<compile_context>
chip_gen: v5e
topology: v5e:2x2
jax: 0.10.0
libtpu: 0.0.40
codegen_flags: <defaults>
</compile_context>

<pallas_src>
import functools
import math

import jax
import jax.numpy as jnp
from jax.experimental import pallas as pl
from jax.experimental.pallas import tpu as pltpu

ACT_DTYPE = jnp.bfloat16        # storage dtype for weights/activations
LN_EPS = 1e-12                  # BertLayerNorm eps
_VMEM_LIMIT = 32 * 1024 * 1024  # explicit scoped-VMEM limit (>= v5e's 16 MiB default)
_MM_VMEM_BUDGET = 24 * 1024 * 1024  # tile-selection budget (headroom under the limit)


# ----------------------------- tiling helpers -----------------------------

def _pick_tile(dim, preferred, quantum):
    """Largest tile <= preferred that divides `dim` and is a multiple of `quantum`,
    falling back to the full dim (a block equal to the full dim is always legal)."""
    if dim <= preferred:
        return dim
    t = (min(preferred, dim) // quantum) * quantum
    while t >= quantum:
        if dim % t == 0:
            return t
        t -= quantum
    return dim


def _matmul_tiles(M, K, N, elem_bytes=2):
    """(tm, tn, tk) for X(M,K) @ W(K,N). Prefer the full output width: X's block
    index is independent of the N grid axis, so tn < N re-streams the activation
    tile N/tn times from HBM. tm prefers 512 (≈85% of HBM roofline) with a 16-row
    quantum (bf16 (16,128) native tile)."""
    tm = _pick_tile(M, 512, 16)
    tk = _pick_tile(K, 512, 128)

    def footprint(tn_):
        # double-buffered x / w / out (bf16) + f32 accumulator + bias
        return ((2 * tm * tk + 2 * tk * tn_ + 2 * tm * tn_ + 2 * tn_) * elem_bytes
                + tm * tn_ * 4)

    tn = N
    if footprint(tn) > _MM_VMEM_BUDGET:
        for cand in (2048, 1024, 512, 256, 128):
            if cand < N and N % cand == 0 and footprint(cand) <= _MM_VMEM_BUDGET:
                tn = cand
                break
        else:
            tn = _pick_tile(N, 512, 128)
    return tm, tn, tk


def _pick_batch_block(B, per_row_bytes, budget=8 * 1024 * 1024):
    """Largest divisor of B (<= 8 rows per grid step) that fits a per-step VMEM
    budget. Batching several rows per step amortizes the ~0.35 us per-step
    pipeline overhead at LXMERT's short sequence lengths."""
    bb = 1
    for cand in range(2, min(B, 8) + 1):
        if B % cand == 0 and cand * per_row_bytes <= budget:
            bb = cand
    return bb


# ----------------------------- Pallas kernels -----------------------------

def _linear_kernel(x_ref, w_ref, b_ref, o_ref, acc_ref):
    """Tiled X @ W + b with an f32 accumulator over the K grid axis."""
    @pl.when(pl.program_id(2) == 0)
    def _init():
        acc_ref[...] = jnp.zeros_like(acc_ref)

    acc_ref[...] += jnp.dot(x_ref[...], w_ref[...],
                            preferred_element_type=jnp.float32)

    @pl.when(pl.program_id(2) == pl.num_programs(2) - 1)
    def _finalize():
        y = acc_ref[...] + b_ref[...].astype(jnp.float32)
        o_ref[...] = y.astype(o_ref.dtype)


def _proj_add_ln_kernel(x_ref, w_ref, b_ref, r_ref, g_ref, bb_ref, o_ref, acc_ref):
    """Output projection fused with residual-add + LayerNorm (BertSelfOutput)."""
    @pl.when(pl.program_id(1) == 0)
    def _init():
        acc_ref[...] = jnp.zeros_like(acc_ref)

    acc_ref[...] += jnp.dot(x_ref[...], w_ref[...],
                            preferred_element_type=jnp.float32)

    @pl.when(pl.program_id(1) == pl.num_programs(1) - 1)
    def _finalize():
        y = (acc_ref[...] + b_ref[...].astype(jnp.float32)
             + r_ref[...].astype(jnp.float32))
        mean = jnp.mean(y, axis=-1, keepdims=True)
        var = jnp.mean(jnp.square(y - mean), axis=-1, keepdims=True)
        yn = (y - mean) * jax.lax.rsqrt(var + LN_EPS)
        o_ref[...] = (yn * g_ref[...].astype(jnp.float32)
                      + bb_ref[...].astype(jnp.float32)).astype(o_ref.dtype)


def _ffn_kernel(x_ref, w1_ref, b1_ref, w2_ref, b2_ref, g_ref, bb_ref, o_ref, acc_ref):
    """Fused FFN: gelu(X @ W1 + b1) @ W2 + b2, + residual + LayerNorm.
    Grid axis 1 tiles the intermediate dim (K of the second matmul), so the
    4H-wide intermediate never leaves VMEM."""
    @pl.when(pl.program_id(1) == 0)
    def _init():
        acc_ref[...] = jnp.zeros_like(acc_ref)

    h = jnp.dot(x_ref[...], w1_ref[...], preferred_element_type=jnp.float32)
    h = h + b1_ref[...].astype(jnp.float32)
    # tanh-approximate gelu: the transcendental goes to the EUP slot instead of a
    # long VALU erf polynomial (deviates from exact-erf BERT gelu by ~1e-3 rel).
    h = jax.nn.gelu(h, approximate=True)
    acc_ref[...] += jnp.dot(h.astype(w2_ref.dtype), w2_ref[...],
                            preferred_element_type=jnp.float32)

    @pl.when(pl.program_id(1) == pl.num_programs(1) - 1)
    def _finalize():
        y = (acc_ref[...] + b2_ref[...].astype(jnp.float32)
             + x_ref[...].astype(jnp.float32))
        mean = jnp.mean(y, axis=-1, keepdims=True)
        var = jnp.mean(jnp.square(y - mean), axis=-1, keepdims=True)
        yn = (y - mean) * jax.lax.rsqrt(var + LN_EPS)
        o_ref[...] = (yn * g_ref[...].astype(jnp.float32)
                      + bb_ref[...].astype(jnp.float32)).astype(o_ref.dtype)


def _mha_kernel(q_ref, kv_ref, m_ref, o_ref, *, num_heads, head_dim, scale):
    """Multi-head attention for one (batch-block, Sq-tile) step, all heads.
    q_ref: (Bb, tq, H); kv_ref: (Bb, Sk, 2H) laid out [K | V]; m_ref: (Bb, 1, Sk)
    additive mask; o_ref: (Bb, tq, H).

    Heads are sliced directly from the refs (static offsets) and each head's
    context is written straight into its o_ref column slice, so per-head live
    ranges never exceed one head and there is no trailing concatenate."""
    H = num_heads * head_dim
    mask = m_ref[...].astype(jnp.float32)                         # (Bb, 1, Sk)
    # NOTE: per-head matmuls only fill head_dim lanes of the MXU; head_dim is a
    # model constant, so the per-head loop is kept simple and the softmax work
    # hides under the next head's MXU pushes.
    for h in range(num_heads):                                    # static unroll
        lo = h * head_dim
        q = q_ref[:, :, lo:lo + head_dim]                         # (Bb, tq, hd)
        k = kv_ref[:, :, lo:lo + head_dim]                        # (Bb, Sk, hd)
        v = kv_ref[:, :, H + lo:H + lo + head_dim]                # (Bb, Sk, hd)
        # batched q @ k^T without an explicit transpose (contract the hd axes)
        s = jax.lax.dot_general(q, k, (((2,), (2,)), ((0,), (0,))),
                                preferred_element_type=jnp.float32) * scale
        s = s + mask
        s = s - jnp.max(s, axis=-1, keepdims=True)
        p = jnp.exp(s)
        p = p * pl.reciprocal(jnp.sum(p, axis=-1, keepdims=True), approx=True)
        ctx = jax.lax.dot_general(p.astype(v.dtype), v,
                                  (((2,), (1,)), ((0,), (0,))),
                                  preferred_element_type=jnp.float32)
        o_ref[:, :, lo:lo + head_dim] = ctx.astype(o_ref.dtype)


# ----------------------------- kernel wrappers -----------------------------

def pallas_linear(x2d, w, b):
    M, K = x2d.shape
    N = w.shape[1]
    tm, tn, tk = _matmul_tiles(M, K, N)
    return pl.pallas_call(
        _linear_kernel,
        out_shape=jax.ShapeDtypeStruct((M, N), x2d.dtype),
        grid=(M // tm, N // tn, K // tk),
        in_specs=[
            pl.BlockSpec((tm, tk), lambda i, j, k: (i, k)),
            pl.BlockSpec((tk, tn), lambda i, j, k: (k, j)),
            pl.BlockSpec((1, tn), lambda i, j, k: (0, j)),
        ],
        out_specs=pl.BlockSpec((tm, tn), lambda i, j, k: (i, j)),
        scratch_shapes=[pltpu.VMEM((tm, tn), jnp.float32)],
        compiler_params=pltpu.CompilerParams(
            dimension_semantics=("parallel", "parallel", "arbitrary"),
            vmem_limit_bytes=_VMEM_LIMIT),
    )(x2d, w, b.reshape(1, N))


def pallas_proj_add_ln(x2d, res2d, w, b, gamma, beta):
    M, K = x2d.shape
    H = w.shape[1]
    tm = _pick_tile(M, 512, 16)
    tk = _pick_tile(K, 512, 128)
    return pl.pallas_call(
        _proj_add_ln_kernel,
        out_shape=jax.ShapeDtypeStruct((M, H), x2d.dtype),
        grid=(M // tm, K // tk),
        in_specs=[
            pl.BlockSpec((tm, tk), lambda i, k: (i, k)),
            pl.BlockSpec((tk, H), lambda i, k: (k, 0)),
            pl.BlockSpec((1, H), lambda i, k: (0, 0)),
            pl.BlockSpec((tm, H), lambda i, k: (i, 0)),        # residual
            pl.BlockSpec((1, H), lambda i, k: (0, 0)),
            pl.BlockSpec((1, H), lambda i, k: (0, 0)),
        ],
        out_specs=pl.BlockSpec((tm, H), lambda i, k: (i, 0)),
        scratch_shapes=[pltpu.VMEM((tm, H), jnp.float32)],
        compiler_params=pltpu.CompilerParams(
            dimension_semantics=("parallel", "arbitrary"),
            vmem_limit_bytes=_VMEM_LIMIT),
    )(x2d, w, b.reshape(1, H), res2d, gamma.reshape(1, H), beta.reshape(1, H))


def pallas_ffn(x2d, w1, b1, w2, b2, gamma, beta):
    M, H = x2d.shape
    inter = w1.shape[1]
    tm = _pick_tile(M, 512, 16)
    ti = _pick_tile(inter, 512, 128)
    return pl.pallas_call(
        _ffn_kernel,
        out_shape=jax.ShapeDtypeStruct((M, H), x2d.dtype),
        grid=(M // tm, inter // ti),
        in_specs=[
            pl.BlockSpec((tm, H), lambda i, j: (i, 0)),        # x (also residual)
            pl.BlockSpec((H, ti), lambda i, j: (0, j)),        # w1
            pl.BlockSpec((1, ti), lambda i, j: (0, j)),        # b1
            pl.BlockSpec((ti, H), lambda i, j: (j, 0)),        # w2
            pl.BlockSpec((1, H), lambda i, j: (0, 0)),         # b2
            pl.BlockSpec((1, H), lambda i, j: (0, 0)),         # gamma
            pl.BlockSpec((1, H), lambda i, j: (0, 0)),         # beta
        ],
        out_specs=pl.BlockSpec((tm, H), lambda i, j: (i, 0)),
        scratch_shapes=[pltpu.VMEM((tm, H), jnp.float32)],
        compiler_params=pltpu.CompilerParams(
            dimension_semantics=("parallel", "arbitrary"),
            vmem_limit_bytes=_VMEM_LIMIT),
    )(x2d, w1, b1.reshape(1, inter), w2, b2.reshape(1, H),
      gamma.reshape(1, H), beta.reshape(1, H))


def pallas_mha(q_src, q_blk, kv_src, kv_blk, mask, num_heads, hidden_size):
    """q_src: (B, Sq, *) with Q in the H-wide column block `q_blk`;
    kv_src: (B, Sk, *) with [K | V] in the 2H-wide column block `kv_blk`;
    mask: (B, 1, 1, Sk) additive. Returns (B, Sq, H)."""
    B, Sq, _ = q_src.shape
    Sk = kv_src.shape[1]
    H = hidden_size
    hd = H // num_heads
    tq = _pick_tile(Sq, 512, 16)
    # batch several rows per grid step (amortizes per-step pipeline overhead at
    # LXMERT's short sequence lengths), bounded by a per-step VMEM estimate
    per_row = ((2 * Sk * 2 * H + 4 * tq * H) * 2      # dbl-buffered KV + Q + out (bf16)
               + tq * Sk * 4 + tq * H * 4)            # f32 score / ctx temps
    Bb = _pick_batch_block(B, per_row)
    scale = 1.0 / math.sqrt(hd)
    kern = functools.partial(_mha_kernel, num_heads=num_heads, head_dim=hd,
                             scale=scale)
    # TODO(synk): for very long contexts add flash-style Sk tiling with an online
    # softmax; here the full (Bb, Sk, 2H) K/V block is held in VMEM per grid step.
    return pl.pallas_call(
        kern,
        out_shape=jax.ShapeDtypeStruct((B, Sq, H), q_src.dtype),
        grid=(B // Bb, Sq // tq),
        in_specs=[
            pl.BlockSpec((Bb, tq, H), lambda b, i, c=q_blk: (b, i, c)),
            pl.BlockSpec((Bb, Sk, 2 * H), lambda b, i, c=kv_blk: (b, 0, c)),
            pl.BlockSpec((Bb, None, 1, Sk), lambda b, i: (b, 0, 0, 0)),
        ],
        out_specs=pl.BlockSpec((Bb, tq, H), lambda b, i: (b, i, 0)),
        compiler_params=pltpu.CompilerParams(
            dimension_semantics=("parallel", "parallel"),
            vmem_limit_bytes=_VMEM_LIMIT),
    )(q_src, kv_src, mask)


# ----------------------------- module glue (plain JAX reshapes only) -----------------------------

def _linear3d(x, w, b):
    B, S, _ = x.shape
    y = pallas_linear(x.reshape(B * S, x.shape[-1]), w, b)
    return y.reshape(B, S, w.shape[1])


def _proj_add_ln3d(x, residual, w, b, gamma, beta):
    B, S, H = residual.shape
    y = pallas_proj_add_ln(x.reshape(B * S, x.shape[-1]),
                           residual.reshape(B * S, H), w, b, gamma, beta)
    return y.reshape(B, S, H)


def self_attention_block(p, x, mask, num_heads):
    """BertSelfAttention + BertSelfOutput with a fused [H, 3H] projection laid out
    [K | V | Q] so the MHA kernel can take K|V as one 2H block and Q as one H block."""
    H = x.shape[-1]
    qkv = _linear3d(x, p["qkv_w"], p["qkv_b"])                  # (B, S, 3H) = [K|V|Q]
    ctx = pallas_mha(qkv, 2, qkv, 0, mask, num_heads, H)        # Q at col-block 2, K|V at 0
    return _proj_add_ln3d(ctx, x, p["o_w"], p["o_b"], p["ln_g"], p["ln_b"])


def cross_attention_pair(p, lang, visn, lang_mask, visn_mask, num_heads):
    """Both directions of BertXAttention (shared visual_attention weights).
    Because the Q/K/V and output-projection weights are identical for the two
    directions, the lang and visn token streams are concatenated along M so the
    fused [K|V|Q] projection and the fused output-proj+LN each run once."""
    # TODO(synk): assumes ctx_dim == hidden_size (the LXMERT default); a distinct
    # ctx_dim would need a separate K/V projection per stream.
    B, Sl, H = lang.shape
    Sv = visn.shape[1]
    Ml, Mv = B * Sl, B * Sv
    x_cat = jnp.concatenate([lang.reshape(Ml, H), visn.reshape(Mv, H)], axis=0)
    qkv_cat = pallas_linear(x_cat, p["qkv_w"], p["qkv_b"])      # (Ml+Mv, 3H) = [K|V|Q]
    qkv_lang = qkv_cat[:Ml].reshape(B, Sl, 3 * H)
    qkv_visn = qkv_cat[Ml:].reshape(B, Sv, 3 * H)
    # lang queries attend to visn K/V (masked by visn_mask), and vice versa
    ctx_lang = pallas_mha(qkv_lang, 2, qkv_visn, 0, visn_mask, num_heads, H)
    ctx_visn = pallas_mha(qkv_visn, 2, qkv_lang, 0, lang_mask, num_heads, H)
    ctx_cat = jnp.concatenate([ctx_lang.reshape(Ml, H), ctx_visn.reshape(Mv, H)],
                              axis=0)
    out_cat = pallas_proj_add_ln(ctx_cat, x_cat, p["o_w"], p["o_b"],
                                 p["ln_g"], p["ln_b"])
    return out_cat[:Ml].reshape(B, Sl, H), out_cat[Ml:].reshape(B, Sv, H)


def ffn_block(p, x):
    """BertIntermediate + BertOutput fully fused (gelu intermediate stays in VMEM)."""
    B, S, H = x.shape
    y = pallas_ffn(x.reshape(B * S, H), p["w1"], p["b1"], p["w2"], p["b2"],
                   p["ln_g"], p["ln_b"])
    return y.reshape(B, S, H)


def bert_x_layer(params, lang_feats, lang_mask, visn_feats, visn_mask, num_heads):
    lang = lang_feats.astype(ACT_DTYPE)
    visn = visn_feats.astype(ACT_DTYPE)
    # cross attention -- SAME visual_attention params for both directions (LXMERT),
    # both directions batched through shared-weight projections
    lang_att, visn_att = cross_attention_pair(params["x_att"], lang, visn,
                                              lang_mask, visn_mask, num_heads)
    # self attention
    lang_att = self_attention_block(params["lang_self"], lang_att, lang_mask, num_heads)
    visn_att = self_attention_block(params["visn_self"], visn_att, visn_mask, num_heads)
    # feed-forward
    lang_out = ffn_block(params["lang_ffn"], lang_att)
    visn_out = ffn_block(params["visn_ffn"], visn_att)
    return lang_out, visn_out


# ----------------------------- parameter init -----------------------------

def _init_linear(key, d_in, d_out, scale=0.02):
    kw, kb = jax.random.split(key)
    w = (scale * jax.random.normal(kw, (d_in, d_out), jnp.float32)).astype(ACT_DTYPE)
    b = (scale * jax.random.normal(kb, (d_out,), jnp.float32)).astype(ACT_DTYPE)
    return w, b


def _init_attention(key, hidden):
    """Shared structure for self- and cross-attention: fused [K|V|Q] projection,
    output projection, LayerNorm."""
    ks = jax.random.split(key, 2)
    qkv_w, qkv_b = _init_linear(ks[0], hidden, 3 * hidden)     # [K | V | Q]
    o_w, o_b = _init_linear(ks[1], hidden, hidden)
    return dict(qkv_w=qkv_w, qkv_b=qkv_b, o_w=o_w, o_b=o_b,
                ln_g=jnp.ones((hidden,), ACT_DTYPE),
                ln_b=jnp.zeros((hidden,), ACT_DTYPE))


def _init_ffn(key, hidden, inter):
    k1, k2 = jax.random.split(key)
    w1, b1 = _init_linear(k1, hidden, inter)
    w2, b2 = _init_linear(k2, inter, hidden)
    return dict(w1=w1, b1=b1, w2=w2, b2=b2,
                ln_g=jnp.ones((hidden,), ACT_DTYPE),
                ln_b=jnp.zeros((hidden,), ACT_DTYPE))


def init_bert_x_layer_params(key, hidden, inter):
    ks = jax.random.split(key, 5)
    return {
        "x_att": _init_attention(ks[0], hidden),                  # visual_attention
        "lang_self": _init_attention(ks[1], hidden),              # lang_self_att
        "visn_self": _init_attention(ks[2], hidden),              # visn_self_att
        "lang_ffn": _init_ffn(ks[3], hidden, inter),              # lang_inter + lang_output
        "visn_ffn": _init_ffn(ks[4], hidden, inter),              # visn_inter + visn_output
    }


# ----------------------------- main -----------------------------

if __name__ == "__main__":
    HIDDEN = 128
    NUM_HEADS = 4
    INTER = 256
    B = 2
    S_LANG = 8
    S_VISN = 16

    root = jax.random.PRNGKey(0)
    k_params, k_lang, k_visn = jax.random.split(root, 3)

    params = init_bert_x_layer_params(k_params, HIDDEN, INTER)

    lang_feats = jax.random.normal(k_lang, (B, S_LANG, HIDDEN), jnp.float32)
    visn_feats = jax.random.normal(k_visn, (B, S_VISN, HIDDEN), jnp.float32)

    # additive extended attention masks (0 = keep, -10000 = masked)
    lang_mask = jnp.zeros((B, 1, 1, S_LANG), jnp.float32)
    lang_mask = lang_mask.at[1, :, :, -2:].set(-10000.0)
    visn_mask = jnp.zeros((B, 1, 1, S_VISN), jnp.float32)
    visn_mask = visn_mask.at[0, :, :, -4:].set(-10000.0)

    # TODO(synk): nn.Dropout layers are treated as eval-mode identity (no RNG).
    fwd = jax.jit(functools.partial(bert_x_layer, num_heads=NUM_HEADS))
    lang_out, visn_out = fwd(params, lang_feats, lang_mask, visn_feats, visn_mask)
    jax.block_until_ready((lang_out, visn_out))

    assert lang_out.shape == (B, S_LANG, HIDDEN)
    assert visn_out.shape == (B, S_VISN, HIDDEN)
    assert bool(jnp.all(jnp.isfinite(lang_out.astype(jnp.float32))))
    assert bool(jnp.all(jnp.isfinite(visn_out.astype(jnp.float32))))
    print("KERNEL_OK")
</pallas_src>

<mosaic_0001>
module attributes {stable_mosaic.version = 11 : i64} {
  func.func @_mha_kernel(%arg0: i32, %arg1: i32, %arg2: memref<2x8x128xbf16, #tpu.memory_space<vmem>>, %arg3: memref<2x16x256xbf16, #tpu.memory_space<vmem>>, %arg4: memref<2x1x1x16xf32, #tpu.memory_space<vmem>>, %arg5: memref<2x8x128xbf16, #tpu.memory_space<vmem>>) attributes {dimension_semantics = [#tpu.dimension_semantics<parallel>, #tpu.dimension_semantics<parallel>], iteration_bounds = array<i64: 1, 1>, scalar_prefetch = 0 : i64, scratch_operands = 0 : i64, tpu.core_type = #tpu.core_type<tc>, window_params = [{transform_indices = @transform_0, window_bounds = array<i64: 2, 8, 128>}, {transform_indices = @transform_1, window_bounds = array<i64: 2, 16, 256>}, {transform_indices = @transform_2, window_bounds = array<i64: 2, 1, 1, 16>}, {transform_indices = @transform_3, window_bounds = array<i64: 2, 8, 128>}]} {
    %c0 = arith.constant 0 : index
    %c0_0 = arith.constant 0 : index
    %c0_1 = arith.constant 0 : index
    %c0_2 = arith.constant 0 : index
    %0 = vector.load %arg4[%c0, %c0_0, %c0_1, %c0_2] : memref<2x1x1x16xf32, #tpu.memory_space<vmem>>, vector<2x1x1x16xf32>
    %1 = vector.shape_cast %0 : vector<2x1x1x16xf32> to vector<2x1x16xf32>
    %c0_3 = arith.constant 0 : index
    %c0_4 = arith.constant 0 : index
    %c0_5 = arith.constant 0 : index
    %2 = vector.load %arg2[%c0_3, %c0_4, %c0_5] : memref<2x8x128xbf16, #tpu.memory_space<vmem>>, vector<2x8x32xbf16>
    %c0_6 = arith.constant 0 : index
    %c0_7 = arith.constant 0 : index
    %c0_8 = arith.constant 0 : index
    %3 = vector.load %arg3[%c0_6, %c0_7, %c0_8] : memref<2x16x256xbf16, #tpu.memory_space<vmem>>, vector<2x16x32xbf16>
    %c0_9 = arith.constant 0 : index
    %c0_10 = arith.constant 0 : index
    %c128 = arith.constant 128 : index
    %4 = vector.load %arg3[%c0_9, %c0_10, %c128] : memref<2x16x256xbf16, #tpu.memory_space<vmem>>, vector<2x16x32xbf16>
    %cst = arith.constant dense<0.000000e+00> : vector<2x8x16xf32>
    %5 = tpu.matmul %2, %3, %cst {dimension_numbers = #tpu.dot_dimension_numbers<[2], [2], [1], [1], [0, 0, 0, 1, 1, 1], [0], [0]>} : vector<2x8x32xbf16>, vector<2x16x32xbf16>, vector<2x8x16xf32> -> vector<2x8x16xf32>
    %cst_11 = arith.constant 0.176776692 : f32
    %6 = vector.broadcast %cst_11 : f32 to vector<2x8x16xf32>
    %7 = arith.mulf %5, %6 : vector<2x8x16xf32>
    %8 = vector.broadcast %1 : vector<2x1x16xf32> to vector<2x8x16xf32>
    %9 = arith.addf %7, %8 : vector<2x8x16xf32>
    %cst_12 = arith.constant dense<0xFF800000> : vector<2x8xf32>
    %10 = vector.multi_reduction <maximumf>, %9, %cst_12 [2] : vector<2x8x16xf32> to vector<2x8xf32>
    %11 = vector.shape_cast %10 : vector<2x8xf32> to vector<2x8x1xf32>
    %12 = vector.broadcast %11 : vector<2x8x1xf32> to vector<2x8x16xf32>
    %13 = arith.subf %9, %12 : vector<2x8x16xf32>
    %14 = math.exp %13 : vector<2x8x16xf32>
    %cst_13 = arith.constant dense<0.000000e+00> : vector<2x8xf32>
    %15 = vector.multi_reduction <add>, %14, %cst_13 [2] : vector<2x8x16xf32> to vector<2x8xf32>
    %16 = vector.shape_cast %15 : vector<2x8xf32> to vector<2x8x1xf32>
    %17 = tpu.reciprocal %16 {approx = true} : vector<2x8x1xf32> -> vector<2x8x1xf32>
    %18 = vector.broadcast %17 : vector<2x8x1xf32> to vector<2x8x16xf32>
    %19 = arith.mulf %14, %18 : vector<2x8x16xf32>
    %20 = arith.truncf %19 : vector<2x8x16xf32> to vector<2x8x16xbf16>
    %cst_14 = arith.constant dense<0.000000e+00> : vector<2x8x32xf32>
    %21 = tpu.matmul %20, %4, %cst_14 {dimension_numbers = #tpu.dot_dimension_numbers<[2], [1], [1], [2], [0, 0, 0, 1, 1, 2], [0], [0]>} : vector<2x8x16xbf16>, vector<2x16x32xbf16>, vector<2x8x32xf32> -> vector<2x8x32xf32>
    %22 = arith.truncf %21 : vector<2x8x32xf32> to vector<2x8x32xbf16>
    %c0_15 = arith.constant 0 : index
    %c0_16 = arith.constant 0 : index
    %c0_17 = arith.constant 0 : index
    %23 = vector.load %arg5[%c0_15, %c0_16, %c0_17] : memref<2x8x128xbf16, #tpu.memory_space<vmem>>, vector<2x8x32xbf16>
    tpu.vector_store %arg5[%c0_15, %c0_16, %c0_17], %22 {strides = array<i32>} : memref<2x8x128xbf16, #tpu.memory_space<vmem>>, vector<2x8x32xbf16>,
    %c0_18 = arith.constant 0 : index
    %c0_19 = arith.constant 0 : index
    %c32 = arith.constant 32 : index
    %24 = vector.load %arg2[%c0_18, %c0_19, %c32] : memref<2x8x128xbf16, #tpu.memory_space<vmem>>, vector<2x8x32xbf16>
    %c0_20 = arith.constant 0 : index
    %c0_21 = arith.constant 0 : index
    %c32_22 = arith.constant 32 : index
    %25 = vector.load %arg3[%c0_20, %c0_21, %c32_22] : memref<2x16x256xbf16, #tpu.memory_space<vmem>>, vector<2x16x32xbf16>
    %c0_23 = arith.constant 0 : index
    %c0_24 = arith.constant 0 : index
    %c160 = arith.constant 160 : index
    %26 = vector.load %arg3[%c0_23, %c0_24, %c160] : memref<2x16x256xbf16, #tpu.memory_space<vmem>>, vector<2x16x32xbf16>
    %cst_25 = arith.constant dense<0.000000e+00> : vector<2x8x16xf32>
    %27 = tpu.matmul %24, %25, %cst_25 {dimension_numbers = #tpu.dot_dimension_numbers<[2], [2], [1], [1], [0, 0, 0, 1, 1, 1], [0], [0]>} : vector<2x8x32xbf16>, vector<2x16x32xbf16>, vector<2x8x16xf32> -> vector<2x8x16xf32>
    %cst_26 = arith.constant 0.176776692 : f32
    %28 = vector.broadcast %cst_26 : f32 to vector<2x8x16xf32>
    %29 = arith.mulf %27, %28 : vector<2x8x16xf32>
    %30 = vector.broadcast %1 : vector<2x1x16xf32> to vector<2x8x16xf32>
    %31 = arith.addf %29, %30 : vector<2x8x16xf32>
    %cst_27 = arith.constant dense<0xFF800000> : vector<2x8xf32>
    %32 = vector.multi_reduction <maximumf>, %31, %cst_27 [2] : vector<2x8x16xf32> to vector<2x8xf32>
    %33 = vector.shape_cast %32 : vector<2x8xf32> to vector<2x8x1xf32>
    %34 = vector.broadcast %33 : vector<2x8x1xf32> to vector<2x8x16xf32>
    %35 = arith.subf %31, %34 : vector<2x8x16xf32>
    %36 = math.exp %35 : vector<2x8x16xf32>
    %cst_28 = arith.constant dense<0.000000e+00> : vector<2x8xf32>
    %37 = vector.multi_reduction <add>, %36, %cst_28 [2] : vector<2x8x16xf32> to vector<2x8xf32>
    %38 = vector.shape_cast %37 : vector<2x8xf32> to vector<2x8x1xf32>
    %39 = tpu.reciprocal %38 {approx = true} : vector<2x8x1xf32> -> vector<2x8x1xf32>
    %40 = vector.broadcast %39 : vector<2x8x1xf32> to vector<2x8x16xf32>
    %41 = arith.mulf %36, %40 : vector<2x8x16xf32>
    %42 = arith.truncf %41 : vector<2x8x16xf32> to vector<2x8x16xbf16>
    %cst_29 = arith.constant dense<0.000000e+00> : vector<2x8x32xf32>
    %43 = tpu.matmul %42, %26, %cst_29 {dimension_numbers = #tpu.dot_dimension_numbers<[2], [1], [1], [2], [0, 0, 0, 1, 1, 2], [0], [0]>} : vector<2x8x16xbf16>, vector<2x16x32xbf16>, vector<2x8x32xf32> -> vector<2x8x32xf32>
    %44 = arith.truncf %43 : vector<2x8x32xf32> to vector<2x8x32xbf16>
    %c0_30 = arith.constant 0 : index
    %c0_31 = arith.constant 0 : index
    %c32_32 = arith.constant 32 : index
    %45 = vector.load %arg5[%c0_30, %c0_31, %c32_32] : memref<2x8x128xbf16, #tpu.memory_space<vmem>>, vector<2x8x32xbf16>
    tpu.vector_store %arg5[%c0_30, %c0_31, %c32_32], %44 {strides = array<i32>} : memref<2x8x128xbf16, #tpu.memory_space<vmem>>, vector<2x8x32xbf16>,
    %c0_33 = arith.constant 0 : index
    %c0_34 = arith.constant 0 : index
    %c64 = arith.constant 64 : index
    %46 = vector.load %arg2[%c0_33, %c0_34, %c64] : memref<2x8x128xbf16, #tpu.memory_space<vmem>>, vector<2x8x32xbf16>
    %c0_35 = arith.constant 0 : index
    %c0_36 = arith.constant 0 : index
    %c64_37 = arith.constant 64 : index
    %47 = vector.load %arg3[%c0_35, %c0_36, %c64_37] : memref<2x16x256xbf16, #tpu.memory_space<vmem>>, vector<2x16x32xbf16>
    %c0_38 = arith.constant 0 : index
    %c0_39 = arith.constant 0 : index
    %c192 = arith.constant 192 : index
    %48 = vector.load %arg3[%c0_38, %c0_39, %c192] : memref<2x16x256xbf16, #tpu.memory_space<vmem>>, vector<2x16x32xbf16>
    %cst_40 = arith.constant dense<0.000000e+00> : vector<2x8x16xf32>
    %49 = tpu.matmul %46, %47, %cst_40 {dimension_numbers = #tpu.dot_dimension_numbers<[2], [2], [1], [1], [0, 0, 0, 1, 1, 1], [0], [0]>} : vector<2x8x32xbf16>, vector<2x16x32xbf16>, vector<2x8x16xf32> -> vector<2x8x16xf32>
    %cst_41 = arith.constant 0.176776692 : f32
    %50 = vector.broadcast %cst_41 : f32 to vector<2x8x16xf32>
    %51 = arith.mulf %49, %50 : vector<2x8x16xf32>
    %52 = vector.broadcast %1 : vector<2x1x16xf32> to vector<2x8x16xf32>
    %53 = arith.addf %51, %52 : vector<2x8x16xf32>
    %cst_42 = arith.constant dense<0xFF800000> : vector<2x8xf32>
    %54 = vector.multi_reduction <maximumf>, %53, %cst_42 [2] : vector<2x8x16xf32> to vector<2x8xf32>
    %55 = vector.shape_cast %54 : vector<2x8xf32> to vector<2x8x1xf32>
    %56 = vector.broadcast %55 : vector<2x8x1xf32> to vector<2x8x16xf32>
    %57 = arith.subf %53, %56 : vector<2x8x16xf32>
    %58 = math.exp %57 : vector<2x8x16xf32>
    %cst_43 = arith.constant dense<0.000000e+00> : vector<2x8xf32>
    %59 = vector.multi_reduction <add>, %58, %cst_43 [2] : vector<2x8x16xf32> to vector<2x8xf32>
    %60 = vector.shape_cast %59 : vector<2x8xf32> to vector<2x8x1xf32>
    %61 = tpu.reciprocal %60 {approx = true} : vector<2x8x1xf32> -> vector<2x8x1xf32>
    %62 = vector.broadcast %61 : vector<2x8x1xf32> to vector<2x8x16xf32>
    %63 = arith.mulf %58, %62 : vector<2x8x16xf32>
    %64 = arith.truncf %63 : vector<2x8x16xf32> to vector<2x8x16xbf16>
    %cst_44 = arith.constant dense<0.000000e+00> : vector<2x8x32xf32>
    %65 = tpu.matmul %64, %48, %cst_44 {dimension_numbers = #tpu.dot_dimension_numbers<[2], [1], [1], [2], [0, 0, 0, 1, 1, 2], [0], [0]>} : vector<2x8x16xbf16>, vector<2x16x32xbf16>, vector<2x8x32xf32> -> vector<2x8x32xf32>
    %66 = arith.truncf %65 : vector<2x8x32xf32> to vector<2x8x32xbf16>
    %c0_45 = arith.constant 0 : index
    %c0_46 = arith.constant 0 : index
    %c64_47 = arith.constant 64 : index
    %67 = vector.load %arg5[%c0_45, %c0_46, %c64_47] : memref<2x8x128xbf16, #tpu.memory_space<vmem>>, vector<2x8x32xbf16>
    tpu.vector_store %arg5[%c0_45, %c0_46, %c64_47], %66 {strides = array<i32>} : memref<2x8x128xbf16, #tpu.memory_space<vmem>>, vector<2x8x32xbf16>,
    %c0_48 = arith.constant 0 : index
    %c0_49 = arith.constant 0 : index
    %c96 = arith.constant 96 : index
    %68 = vector.load %arg2[%c0_48, %c0_49, %c96] : memref<2x8x128xbf16, #tpu.memory_space<vmem>>, vector<2x8x32xbf16>
    %c0_50 = arith.constant 0 : index
    %c0_51 = arith.constant 0 : index
    %c96_52 = arith.constant 96 : index
    %69 = vector.load %arg3[%c0_50, %c0_51, %c96_52] : memref<2x16x256xbf16, #tpu.memory_space<vmem>>, vector<2x16x32xbf16>
    %c0_53 = arith.constant 0 : index
    %c0_54 = arith.constant 0 : index
    %c224 = arith.constant 224 : index
    %70 = vector.load %arg3[%c0_53, %c0_54, %c224] : memref<2x16x256xbf16, #tpu.memory_space<vmem>>, vector<2x16x32xbf16>
    %cst_55 = arith.constant dense<0.000000e+00> : vector<2x8x16xf32>
    %71 = tpu.matmul %68, %69, %cst_55 {dimension_numbers = #tpu.dot_dimension_numbers<[2], [2], [1], [1], [0, 0, 0, 1, 1, 1], [0], [0]>} : vector<2x8x32xbf16>, vector<2x16x32xbf16>, vector<2x8x16xf32> -> vector<2x8x16xf32>
    %cst_56 = arith.constant 0.176776692 : f32
    %72 = vector.broadcast %cst_56 : f32 to vector<2x8x16xf32>
    %73 = arith.mulf %71, %72 : vector<2x8x16xf32>
    %74 = vector.broadcast %1 : vector<2x1x16xf32> to vector<2x8x16xf32>
    %75 = arith.addf %73, %74 : vector<2x8x16xf32>
    %cst_57 = arith.constant dense<0xFF800000> : vector<2x8xf32>
    %76 = vector.multi_reduction <maximumf>, %75, %cst_57 [2] : vector<2x8x16xf32> to vector<2x8xf32>
    %77 = vector.shape_cast %76 : vector<2x8xf32> to vector<2x8x1xf32>
    %78 = vector.broadcast %77 : vector<2x8x1xf32> to vector<2x8x16xf32>
    %79 = arith.subf %75, %78 : vector<2x8x16xf32>
    %80 = math.exp %79 : vector<2x8x16xf32>
    %cst_58 = arith.constant dense<0.000000e+00> : vector<2x8xf32>
    %81 = vector.multi_reduction <add>, %80, %cst_58 [2] : vector<2x8x16xf32> to vector<2x8xf32>
    %82 = vector.shape_cast %81 : vector<2x8xf32> to vector<2x8x1xf32>
    %83 = tpu.reciprocal %82 {approx = true} : vector<2x8x1xf32> -> vector<2x8x1xf32>
    %84 = vector.broadcast %83 : vector<2x8x1xf32> to vector<2x8x16xf32>
    %85 = arith.mulf %80, %84 : vector<2x8x16xf32>
    %86 = arith.truncf %85 : vector<2x8x16xf32> to vector<2x8x16xbf16>
    %cst_59 = arith.constant dense<0.000000e+00> : vector<2x8x32xf32>
    %87 = tpu.matmul %86, %70, %cst_59 {dimension_numbers = #tpu.dot_dimension_numbers<[2], [1], [1], [2], [0, 0, 0, 1, 1, 2], [0], [0]>} : vector<2x8x16xbf16>, vector<2x16x32xbf16>, vector<2x8x32xf32> -> vector<2x8x32xf32>
    %88 = arith.truncf %87 : vector<2x8x32xf32> to vector<2x8x32xbf16>
    %c0_60 = arith.constant 0 : index
    %c0_61 = arith.constant 0 : index
    %c96_62 = arith.constant 96 : index
    %89 = vector.load %arg5[%c0_60, %c0_61, %c96_62] : memref<2x8x128xbf16, #tpu.memory_space<vmem>>, vector<2x8x32xbf16>
    tpu.vector_store %arg5[%c0_60, %c0_61, %c96_62], %88 {strides = array<i32>} : memref<2x8x128xbf16, #tpu.memory_space<vmem>>, vector<2x8x32xbf16>,
    return
  }
  func.func @transform_0(%arg0: i32, %arg1: i32) -> (i32, i32, i32) {
    %c2_i32 = arith.constant 2 : i32
    %c0_i32 = arith.constant 0 : i32
    return %arg0, %arg1, %c2_i32 : i32, i32, i32
  }
  func.func @transform_1(%arg0: i32, %arg1: i32) -> (i32, i32, i32) {
    %c0_i32 = arith.constant 0 : i32
    %c0_i32_0 = arith.constant 0 : i32
    %c0_i32_1 = arith.constant 0 : i32
    return %arg0, %c0_i32, %c0_i32_0 : i32, i32, i32
  }
  func.func @transform_2(%arg0: i32, %arg1: i32) -> (i32, i32, i32, i32) {
    %c0_i32 = arith.constant 0 : i32
    %c0_i32_0 = arith.constant 0 : i32
    %c0_i32_1 = arith.constant 0 : i32
    %c0_i32_2 = arith.constant 0 : i32
    return %arg0, %c0_i32, %c0_i32_0, %c0_i32_1 : i32, i32, i32, i32
  }
  func.func @transform_3(%arg0: i32, %arg1: i32) -> (i32, i32, i32) {
    %c0_i32 = arith.constant 0 : i32
    %c0_i32_0 = arith.constant 0 : i32
    return %arg0, %arg1, %c0_i32 : i32, i32, i32
  }
}

module attributes {stable_mosaic.version = 11 : i64} {
  func.func @_linear_kernel(%arg0: i32, %arg1: i32, %arg2: i32, %arg3: memref<48x128xbf16, #tpu.memory_space<vmem>>, %arg4: memref<128x384xbf16, #tpu.memory_space<vmem>>, %arg5: memref<1x384xbf16, #tpu.memory_space<vmem>>, %arg6: memref<48x384xbf16, #tpu.memory_space<vmem>>, %arg7: memref<48x384xf32, #tpu.memory_space<vmem>>) attributes {dimension_semantics = [#tpu.dimension_semantics<parallel>, #tpu.dimension_semantics<parallel>, #tpu.dimension_semantics<arbitrary>], iteration_bounds = array<i64: 1, 1, 1>, scalar_prefetch = 0 : i64, scratch_operands = 1 : i64, tpu.core_type = #tpu.core_type<tc>, window_params = [{transform_indices = @transform_0, window_bounds = array<i64: 48, 128>}, {transform_indices = @transform_1, window_bounds = array<i64: 128, 384>}, {transform_indices = @transform_2, window_bounds = array<i64: 1, 384>}, {transform_indices = @transform_3, window_bounds = array<i64: 48, 384>}]} {
    %c0_i32 = arith.constant 0 : i32
    %0 = arith.cmpi eq, %arg2, %c0_i32 : i32
    %1 = arith.extui %0 : i1 to i32
    %c0_i32_0 = arith.constant 0 : i32
    %2 = arith.cmpi ne, %1, %c0_i32_0 : i32
    scf.if %2 {
      %cst_10 = arith.constant 0.000000e+00 : f32
      %12 = vector.broadcast %cst_10 : f32 to vector<48x384xf32>
      %c0_11 = arith.constant 0 : index
      %c0_12 = arith.constant 0 : index
      %13 = vector.load %arg7[%c0_11, %c0_12] : memref<48x384xf32, #tpu.memory_space<vmem>>, vector<48x384xf32>
      tpu.vector_store %arg7[%c0_11, %c0_12], %12 {strides = array<i32>} : memref<48x384xf32, #tpu.memory_space<vmem>>, vector<48x384xf32>,
    } else {
    }
    %c0 = arith.constant 0 : index
    %c0_1 = arith.constant 0 : index
    %3 = vector.load %arg7[%c0, %c0_1] : memref<48x384xf32, #tpu.memory_space<vmem>>, vector<48x384xf32>
    %c0_2 = arith.constant 0 : index
    %c0_3 = arith.constant 0 : index
    %4 = vector.load %arg3[%c0_2, %c0_3] : memref<48x128xbf16, #tpu.memory_space<vmem>>, vector<48x128xbf16>
    %c0_4 = arith.constant 0 : index
    %c0_5 = arith.constant 0 : index
    %5 = vector.load %arg4[%c0_4, %c0_5] : memref<128x384xbf16, #tpu.memory_space<vmem>>, vector<128x384xbf16>
    %cst = arith.constant dense<0.000000e+00> : vector<48x384xf32>
    %6 = tpu.matmul %4, %5, %cst {dimension_numbers = #tpu.dot_dimension_numbers<[1], [0], [0], [1], [0, 0, 1, 1], [], []>} : vector<48x128xbf16>, vector<128x384xbf16>, vector<48x384xf32> -> vector<48x384xf32>
    %7 = arith.addf %3, %6 : vector<48x384xf32>
    %c0_6 = arith.constant 0 : index
    %c0_7 = arith.constant 0 : index
    %8 = vector.load %arg7[%c0_6, %c0_7] : memref<48x384xf32, #tpu.memory_space<vmem>>, vector<48x384xf32>
    tpu.vector_store %arg7[%c0_6, %c0_7], %7 {strides = array<i32>} : memref<48x384xf32, #tpu.memory_space<vmem>>, vector<48x384xf32>,
    %c0_i32_8 = arith.constant 0 : i32
    %9 = arith.cmpi eq, %arg2, %c0_i32_8 : i32
    %10 = arith.extui %9 : i1 to i32
    %c0_i32_9 = arith.constant 0 : i32
    %11 = arith.cmpi ne, %10, %c0_i32_9 : i32
    scf.if %11 {
      %c0_10 = arith.constant 0 : index
      %c0_11 = arith.constant 0 : index
      %12 = vector.load %arg7[%c0_10, %c0_11] : memref<48x384xf32, #tpu.memory_space<vmem>>, vector<48x384xf32>
      %c0_12 = arith.constant 0 : index
      %c0_13 = arith.constant 0 : index
      %13 = vector.load %arg5[%c0_12, %c0_13] : memref<1x384xbf16, #tpu.memory_space<vmem>>, vector<1x384xbf16>
      %14 = arith.extf %13 : vector<1x384xbf16> to vector<1x384xf32>
      %15 = vector.broadcast %14 : vector<1x384xf32> to vector<48x384xf32>
      %16 = arith.addf %12, %15 : vector<48x384xf32>
      %17 = arith.truncf %16 : vector<48x384xf32> to vector<48x384xbf16>
      %c0_14 = arith.constant 0 : index
      %c0_15 = arith.constant 0 : index
      %18 = vector.load %arg6[%c0_14, %c0_15] : memref<48x384xbf16, #tpu.memory_space<vmem>>, vector<48x384xbf16>
      tpu.vector_store %arg6[%c0_14, %c0_15], %17 {strides = array<i32>} : memref<48x384xbf16, #tpu.memory_space<vmem>>, vector<48x384xbf16>,
    } else {
    }
    return
  }
  func.func @transform_0(%arg0: i32, %arg1: i32, %arg2: i32) -> (i32, i32) {
    %c0_i32 = arith.constant 0 : i32
    return %arg0, %arg2 : i32, i32
  }
  func.func @transform_1(%arg0: i32, %arg1: i32, %arg2: i32) -> (i32, i32) {
    %c0_i32 = arith.constant 0 : i32
    return %arg2, %arg1 : i32, i32
  }
  func.func @transform_2(%arg0: i32, %arg1: i32, %arg2: i32) -> (i32, i32) {
    %c0_i32 = arith.constant 0 : i32
    %c0_i32_0 = arith.constant 0 : i32
    return %c0_i32, %arg1 : i32, i32
  }
  func.func @transform_3(%arg0: i32, %arg1: i32, %arg2: i32) -> (i32, i32) {
    %c0_i32 = arith.constant 0 : i32
    return %arg0, %arg1 : i32, i32
  }
}

module attributes {stable_mosaic.version = 11 : i64} {
  func.func @_proj_add_ln_kernel(%arg0: i32, %arg1: i32, %arg2: memref<48x128xbf16, #tpu.memory_space<vmem>>, %arg3: memref<128x128xbf16, #tpu.memory_space<vmem>>, %arg4: memref<1x128xbf16, #tpu.memory_space<vmem>>, %arg5: memref<48x128xbf16, #tpu.memory_space<vmem>>, %arg6: memref<1x128xbf16, #tpu.memory_space<vmem>>, %arg7: memref<1x128xbf16, #tpu.memory_space<vmem>>, %arg8: memref<48x128xbf16, #tpu.memory_space<vmem>>, %arg9: memref<48x128xf32, #tpu.memory_space<vmem>>) attributes {dimension_semantics = [#tpu.dimension_semantics<parallel>, #tpu.dimension_semantics<arbitrary>], iteration_bounds = array<i64: 1, 1>, scalar_prefetch = 0 : i64, scratch_operands = 1 : i64, tpu.core_type = #tpu.core_type<tc>, window_params = [{transform_indices = @transform_0, window_bounds = array<i64: 48, 128>}, {transform_indices = @transform_1, window_bounds = array<i64: 128, 128>}, {pipeline_mode = #tpu.pipeline_mode<synchronous>, transform_indices = @transform_2, window_bounds = array<i64: 1, 128>}, {transform_indices = @transform_3, window_bounds = array<i64: 48, 128>}, {pipeline_mode = #tpu.pipeline_mode<synchronous>, transform_indices = @transform_4, window_bounds = array<i64: 1, 128>}, {pipeline_mode = #tpu.pipeline_mode<synchronous>, transform_indices = @transform_5, window_bounds = array<i64: 1, 128>}, {transform_indices = @transform_6, window_bounds = array<i64: 48, 128>}]} {
    %c0_i32 = arith.constant 0 : i32
    %0 = arith.cmpi eq, %arg1, %c0_i32 : i32
    %1 = arith.extui %0 : i1 to i32
    %c0_i32_0 = arith.constant 0 : i32
    %2 = arith.cmpi ne, %1, %c0_i32_0 : i32
    scf.if %2 {
      %cst_10 = arith.constant 0.000000e+00 : f32
      %12 = vector.broadcast %cst_10 : f32 to vector<48x128xf32>
      %c0_11 = arith.constant 0 : index
      %c0_12 = arith.constant 0 : index
      %13 = vector.load %arg9[%c0_11, %c0_12] : memref<48x128xf32, #tpu.memory_space<vmem>>, vector<48x128xf32>
      tpu.vector_store %arg9[%c0_11, %c0_12], %12 {strides = array<i32>} : memref<48x128xf32, #tpu.memory_space<vmem>>, vector<48x128xf32>,
    } else {
    }
    %c0 = arith.constant 0 : index
    %c0_1 = arith.constant 0 : index
    %3 = vector.load %arg9[%c0, %c0_1] : memref<48x128xf32, #tpu.memory_space<vmem>>, vector<48x128xf32>
    %c0_2 = arith.constant 0 : index
    %c0_3 = arith.constant 0 : index
    %4 = vector.load %arg2[%c0_2, %c0_3] : memref<48x128xbf16, #tpu.memory_space<vmem>>, vector<48x128xbf16>
    %c0_4 = arith.constant 0 : index
    %c0_5 = arith.constant 0 : index
    %5 = vector.load %arg3[%c0_4, %c0_5] : memref<128x128xbf16, #tpu.memory_space<vmem>>, vector<128x128xbf16>
    %cst = arith.constant dense<0.000000e+00> : vector<48x128xf32>
    %6 = tpu.matmul %4, %5, %cst {dimension_numbers = #tpu.dot_dimension_numbers<[1], [0], [0], [1], [0, 0, 1, 1], [], []>} : vector<48x128xbf16>, vector<128x128xbf16>, vector<48x128xf32> -> vector<48x128xf32>
    %7 = arith.addf %3, %6 : vector<48x128xf32>
    %c0_6 = arith.constant 0 : index
    %c0_7 = arith.constant 0 : index
    %8 = vector.load %arg9[%c0_6, %c0_7] : memref<48x128xf32, #tpu.memory_space<vmem>>, vector<48x128xf32>
    tpu.vector_store %arg9[%c0_6, %c0_7], %7 {strides = array<i32>} : memref<48x128xf32, #tpu.memory_space<vmem>>, vector<48x128xf32>,
    %c0_i32_8 = arith.constant 0 : i32
    %9 = arith.cmpi eq, %arg1, %c0_i32_8 : i32
    %10 = arith.extui %9 : i1 to i32
    %c0_i32_9 = arith.constant 0 : i32
    %11 = arith.cmpi ne, %10, %c0_i32_9 : i32
    scf.if %11 {
      %c0_10 = arith.constant 0 : index
      %c0_11 = arith.constant 0 : index
      %12 = vector.load %arg9[%c0_10, %c0_11] : memref<48x128xf32, #tpu.memory_space<vmem>>, vector<48x128xf32>
      %c0_12 = arith.constant 0 : index
      %c0_13 = arith.constant 0 : index
      %13 = vector.load %arg4[%c0_12, %c0_13] : memref<1x128xbf16, #tpu.memory_space<vmem>>, vector<1x128xbf16>
      %14 = arith.extf %13 : vector<1x128xbf16> to vector<1x128xf32>
      %15 = vector.broadcast %14 : vector<1x128xf32> to vector<48x128xf32>
      %16 = arith.addf %12, %15 : vector<48x128xf32>
      %c0_14 = arith.constant 0 : index
      %c0_15 = arith.constant 0 : index
      %17 = vector.load %arg5[%c0_14, %c0_15] : memref<48x128xbf16, #tpu.memory_space<vmem>>, vector<48x128xbf16>
      %18 = arith.extf %17 : vector<48x128xbf16> to vector<48x128xf32>
      %19 = arith.addf %16, %18 : vector<48x128xf32>
      %cst_16 = arith.constant dense<0.000000e+00> : vector<48xf32>
      %20 = vector.multi_reduction <add>, %19, %cst_16 [1] : vector<48x128xf32> to vector<48xf32>
      %21 = vector.shape_cast %20 : vector<48xf32> to vector<48x1xf32>
      %cst_17 = arith.constant 1.280000e+02 : f32
      %22 = vector.broadcast %cst_17 : f32 to vector<48x1xf32>
      %23 = arith.divf %21, %22 : vector<48x1xf32>
      %24 = vector.broadcast %23 : vector<48x1xf32> to vector<48x128xf32>
      %25 = arith.subf %19, %24 : vector<48x128xf32>
      %26 = arith.mulf %25, %25 : vector<48x128xf32>
      %cst_18 = arith.constant dense<0.000000e+00> : vector<48xf32>
      %27 = vector.multi_reduction <add>, %26, %cst_18 [1] : vector<48x128xf32> to vector<48xf32>
      %28 = vector.shape_cast %27 : vector<48xf32> to vector<48x1xf32>
      %cst_19 = arith.constant 1.280000e+02 : f32
      %29 = vector.broadcast %cst_19 : f32 to vector<48x1xf32>
      %30 = arith.divf %28, %29 : vector<48x1xf32>
      %31 = vector.broadcast %23 : vector<48x1xf32> to vector<48x128xf32>
      %32 = arith.subf %19, %31 : vector<48x128xf32>
      %cst_20 = arith.constant 9.99999996E-13 : f32
      %33 = vector.broadcast %cst_20 : f32 to vector<48x1xf32>
      %34 = arith.addf %30, %33 : vector<48x1xf32>
      %35 = math.rsqrt %34 : vector<48x1xf32>
      %36 = vector.broadcast %35 : vector<48x1xf32> to vector<48x128xf32>
      %37 = arith.mulf %32, %36 : vector<48x128xf32>
      %c0_21 = arith.constant 0 : index
      %c0_22 = arith.constant 0 : index
      %38 = vector.load %arg6[%c0_21, %c0_22] : memref<1x128xbf16, #tpu.memory_space<vmem>>, vector<1x128xbf16>
      %39 = arith.extf %38 : vector<1x128xbf16> to vector<1x128xf32>
      %40 = vector.broadcast %39 : vector<1x128xf32> to vector<48x128xf32>
      %41 = arith.mulf %37, %40 : vector<48x128xf32>
      %c0_23 = arith.constant 0 : index
      %c0_24 = arith.constant 0 : index
      %42 = vector.load %arg7[%c0_23, %c0_24] : memref<1x128xbf16, #tpu.memory_space<vmem>>, vector<1x128xbf16>
      %43 = arith.extf %42 : vector<1x128xbf16> to vector<1x128xf32>
      %44 = vector.broadcast %43 : vector<1x128xf32> to vector<48x128xf32>
      %45 = arith.addf %41, %44 : vector<48x128xf32>
      %46 = arith.truncf %45 : vector<48x128xf32> to vector<48x128xbf16>
      %c0_25 = arith.constant 0 : index
      %c0_26 = arith.constant 0 : index
      %47 = vector.load %arg8[%c0_25, %c0_26] : memref<48x128xbf16, #tpu.memory_space<vmem>>, vector<48x128xbf16>
      tpu.vector_store %arg8[%c0_25, %c0_26], %46 {strides = array<i32>} : memref<48x128xbf16, #tpu.memory_space<vmem>>, vector<48x128xbf16>,
    } else {
    }
    return
  }
  func.func @transform_0(%arg0: i32, %arg1: i32) -> (i32, i32) {
    %c0_i32 = arith.constant 0 : i32
    return %arg0, %arg1 : i32, i32
  }
  func.func @transform_1(%arg0: i32, %arg1: i32) -> (i32, i32) {
    %c0_i32 = arith.constant 0 : i32
    %c0_i32_0 = arith.constant 0 : i32
    return %arg1, %c0_i32 : i32, i32
  }
  func.func @transform_2(%arg0: i32, %arg1: i32) -> (i32, i32) {
    %c0_i32 = arith.constant 0 : i32
    %c0_i32_0 = arith.constant 0 : i32
    %c0_i32_1 = arith.constant 0 : i32
    return %c0_i32, %c0_i32_0 : i32, i32
  }
  func.func @transform_3(%arg0: i32, %arg1: i32) -> (i32, i32) {
    %c0_i32 = arith.constant 0 : i32
    %c0_i32_0 = arith.constant 0 : i32
    return %arg0, %c0_i32 : i32, i32
  }
  func.func @transform_4(%arg0: i32, %arg1: i32) -> (i32, i32) {
    %c0_i32 = arith.constant 0 : i32
    %c0_i32_0 = arith.constant 0 : i32
    %c0_i32_1 = arith.constant 0 : i32
    return %c0_i32, %c0_i32_0 : i32, i32
  }
  func.func @transform_5(%arg0: i32, %arg1: i32) -> (i32, i32) {
    %c0_i32 = arith.constant 0 : i32
    %c0_i32_0 = arith.constant 0 : i32
    %c0_i32_1 = arith.constant 0 : i32
    return %c0_i32, %c0_i32_0 : i32, i32
  }
  func.func @transform_6(%arg0: i32, %arg1: i32) -> (i32, i32) {
    %c0_i32 = arith.constant 0 : i32
    %c0_i32_0 = arith.constant 0 : i32
    return %arg0, %c0_i32 : i32, i32
  }
}

module attributes {stable_mosaic.version = 11 : i64} {
  func.func @_mha_kernel(%arg0: i32, %arg1: i32, %arg2: memref<2x16x128xbf16, #tpu.memory_space<vmem>>, %arg3: memref<2x8x256xbf16, #tpu.memory_space<vmem>>, %arg4: memref<2x1x1x8xf32, #tpu.memory_space<vmem>>, %arg5: memref<2x16x128xbf16, #tpu.memory_space<vmem>>) attributes {dimension_semantics = [#tpu.dimension_semantics<parallel>, #tpu.dimension_semantics<parallel>], iteration_bounds = array<i64: 1, 1>, scalar_prefetch = 0 : i64, scratch_operands = 0 : i64, tpu.core_type = #tpu.core_type<tc>, window_params = [{transform_indices = @transform_0, window_bounds = array<i64: 2, 16, 128>}, {transform_indices = @transform_1, window_bounds = array<i64: 2, 8, 256>}, {transform_indices = @transform_2, window_bounds = array<i64: 2, 1, 1, 8>}, {transform_indices = @transform_3, window_bounds = array<i64: 2, 16, 128>}]} {
    %c0 = arith.constant 0 : index
    %c0_0 = arith.constant 0 : index
    %c0_1 = arith.constant 0 : index
    %c0_2 = arith.constant 0 : index
    %0 = vector.load %arg4[%c0, %c0_0, %c0_1, %c0_2] : memref<2x1x1x8xf32, #tpu.memory_space<vmem>>, vector<2x1x1x8xf32>
    %1 = vector.shape_cast %0 : vector<2x1x1x8xf32> to vector<2x1x8xf32>
    %c0_3 = arith.constant 0 : index
    %c0_4 = arith.constant 0 : index
    %c0_5 = arith.constant 0 : index
    %2 = vector.load %arg2[%c0_3, %c0_4, %c0_5] : memref<2x16x128xbf16, #tpu.memory_space<vmem>>, vector<2x16x32xbf16>
    %c0_6 = arith.constant 0 : index
    %c0_7 = arith.constant 0 : index
    %c0_8 = arith.constant 0 : index
    %3 = vector.load %arg3[%c0_6, %c0_7, %c0_8] : memref<2x8x256xbf16, #tpu.memory_space<vmem>>, vector<2x8x32xbf16>
    %c0_9 = arith.constant 0 : index
    %c0_10 = arith.constant 0 : index
    %c128 = arith.constant 128 : index
    %4 = vector.load %arg3[%c0_9, %c0_10, %c128] : memref<2x8x256xbf16, #tpu.memory_space<vmem>>, vector<2x8x32xbf16>
    %cst = arith.constant dense<0.000000e+00> : vector<2x16x8xf32>
    %5 = tpu.matmul %2, %3, %cst {dimension_numbers = #tpu.dot_dimension_numbers<[2], [2], [1], [1], [0, 0, 0, 1, 1, 1], [0], [0]>} : vector<2x16x32xbf16>, vector<2x8x32xbf16>, vector<2x16x8xf32> -> vector<2x16x8xf32>
    %cst_11 = arith.constant 0.176776692 : f32
    %6 = vector.broadcast %cst_11 : f32 to vector<2x16x8xf32>
    %7 = arith.mulf %5, %6 : vector<2x16x8xf32>
    %8 = vector.broadcast %1 : vector<2x1x8xf32> to vector<2x16x8xf32>
    %9 = arith.addf %7, %8 : vector<2x16x8xf32>
    %cst_12 = arith.constant dense<0xFF800000> : vector<2x16xf32>
    %10 = vector.multi_reduction <maximumf>, %9, %cst_12 [2] : vector<2x16x8xf32> to vector<2x16xf32>
    %11 = vector.shape_cast %10 : vector<2x16xf32> to vector<2x16x1xf32>
    %12 = vector.broadcast %11 : vector<2x16x1xf32> to vector<2x16x8xf32>
    %13 = arith.subf %9, %12 : vector<2x16x8xf32>
    %14 = math.exp %13 : vector<2x16x8xf32>
    %cst_13 = arith.constant dense<0.000000e+00> : vector<2x16xf32>
    %15 = vector.multi_reduction <add>, %14, %cst_13 [2] : vector<2x16x8xf32> to vector<2x16xf32>
    %16 = vector.shape_cast %15 : vector<2x16xf32> to vector<2x16x1xf32>
    %17 = tpu.reciprocal %16 {approx = true} : vector<2x16x1xf32> -> vector<2x16x1xf32>
    %18 = vector.broadcast %17 : vector<2x16x1xf32> to vector<2x16x8xf32>
    %19 = arith.mulf %14, %18 : vector<2x16x8xf32>
    %20 = arith.truncf %19 : vector<2x16x8xf32> to vector<2x16x8xbf16>
    %cst_14 = arith.constant dense<0.000000e+00> : vector<2x16x32xf32>
    %21 = tpu.matmul %20, %4, %cst_14 {dimension_numbers = #tpu.dot_dimension_numbers<[2], [1], [1], [2], [0, 0, 0, 1, 1, 2], [0], [0]>} : vector<2x16x8xbf16>, vector<2x8x32xbf16>, vector<2x16x32xf32> -> vector<2x16x32xf32>
    %22 = arith.truncf %21 : vector<2x16x32xf32> to vector<2x16x32xbf16>
    %c0_15 = arith.constant 0 : index
    %c0_16 = arith.constant 0 : index
    %c0_17 = arith.constant 0 : index
    %23 = vector.load %arg5[%c0_15, %c0_16, %c0_17] : memref<2x16x128xbf16, #tpu.memory_space<vmem>>, vector<2x16x32xbf16>
    tpu.vector_store %arg5[%c0_15, %c0_16, %c0_17], %22 {strides = array<i32>} : memref<2x16x128xbf16, #tpu.memory_space<vmem>>, vector<2x16x32xbf16>,
    %c0_18 = arith.constant 0 : index
    %c0_19 = arith.constant 0 : index
    %c32 = arith.constant 32 : index
    %24 = vector.load %arg2[%c0_18, %c0_19, %c32] : memref<2x16x128xbf16, #tpu.memory_space<vmem>>, vector<2x16x32xbf16>
    %c0_20 = arith.constant 0 : index
    %c0_21 = arith.constant 0 : index
    %c32_22 = arith.constant 32 : index
    %25 = vector.load %arg3[%c0_20, %c0_21, %c32_22] : memref<2x8x256xbf16, #tpu.memory_space<vmem>>, vector<2x8x32xbf16>
    %c0_23 = arith.constant 0 : index
    %c0_24 = arith.constant 0 : index
    %c160 = arith.constant 160 : index
    %26 = vector.load %arg3[%c0_23, %c0_24, %c160] : memref<2x8x256xbf16, #tpu.memory_space<vmem>>, vector<2x8x32xbf16>
    %cst_25 = arith.constant dense<0.000000e+00> : vector<2x16x8xf32>
    %27 = tpu.matmul %24, %25, %cst_25 {dimension_numbers = #tpu.dot_dimension_numbers<[2], [2], [1], [1], [0, 0, 0, 1, 1, 1], [0], [0]>} : vector<2x16x32xbf16>, vector<2x8x32xbf16>, vector<2x16x8xf32> -> vector<2x16x8xf32>
    %cst_26 = arith.constant 0.176776692 : f32
    %28 = vector.broadcast %cst_26 : f32 to vector<2x16x8xf32>
    %29 = arith.mulf %27, %28 : vector<2x16x8xf32>
    %30 = vector.broadcast %1 : vector<2x1x8xf32> to vector<2x16x8xf32>
    %31 = arith.addf %29, %30 : vector<2x16x8xf32>
    %cst_27 = arith.constant dense<0xFF800000> : vector<2x16xf32>
    %32 = vector.multi_reduction <maximumf>, %31, %cst_27 [2] : vector<2x16x8xf32> to vector<2x16xf32>
    %33 = vector.shape_cast %32 : vector<2x16xf32> to vector<2x16x1xf32>
    %34 = vector.broadcast %33 : vector<2x16x1xf32> to vector<2x16x8xf32>
    %35 = arith.subf %31, %34 : vector<2x16x8xf32>
    %36 = math.exp %35 : vector<2x16x8xf32>
    %cst_28 = arith.constant dense<0.000000e+00> : vector<2x16xf32>
    %37 = vector.multi_reduction <add>, %36, %cst_28 [2] : vector<2x16x8xf32> to vector<2x16xf32>
    %38 = vector.shape_cast %37 : vector<2x16xf32> to vector<2x16x1xf32>
    %39 = tpu.reciprocal %38 {approx = true} : vector<2x16x1xf32> -> vector<2x16x1xf32>
    %40 = vector.broadcast %39 : vector<2x16x1xf32> to vector<2x16x8xf32>
    %41 = arith.mulf %36, %40 : vector<2x16x8xf32>
    %42 = arith.truncf %41 : vector<2x16x8xf32> to vector<2x16x8xbf16>
    %cst_29 = arith.constant dense<0.000000e+00> : vector<2x16x32xf32>
    %43 = tpu.matmul %42, %26, %cst_29 {dimension_numbers = #tpu.dot_dimension_numbers<[2], [1], [1], [2], [0, 0, 0, 1, 1, 2], [0], [0]>} : vector<2x16x8xbf16>, vector<2x8x32xbf16>, vector<2x16x32xf32> -> vector<2x16x32xf32>
    %44 = arith.truncf %43 : vector<2x16x32xf32> to vector<2x16x32xbf16>
    %c0_30 = arith.constant 0 : index
    %c0_31 = arith.constant 0 : index
    %c32_32 = arith.constant 32 : index
    %45 = vector.load %arg5[%c0_30, %c0_31, %c32_32] : memref<2x16x128xbf16, #tpu.memory_space<vmem>>, vector<2x16x32xbf16>
    tpu.vector_store %arg5[%c0_30, %c0_31, %c32_32], %44 {strides = array<i32>} : memref<2x16x128xbf16, #tpu.memory_space<vmem>>, vector<2x16x32xbf16>,
    %c0_33 = arith.constant 0 : index
    %c0_34 = arith.constant 0 : index
    %c64 = arith.constant 64 : index
    %46 = vector.load %arg2[%c0_33, %c0_34, %c64] : memref<2x16x128xbf16, #tpu.memory_space<vmem>>, vector<2x16x32xbf16>
    %c0_35 = arith.constant 0 : index
    %c0_36 = arith.constant 0 : index
    %c64_37 = arith.constant 64 : index
    %47 = vector.load %arg3[%c0_35, %c0_36, %c64_37] : memref<2x8x256xbf16, #tpu.memory_space<vmem>>, vector<2x8x32xbf16>
    %c0_38 = arith.constant 0 : index
    %c0_39 = arith.constant 0 : index
    %c192 = arith.constant 192 : index
    %48 = vector.load %arg3[%c0_38, %c0_39, %c192] : memref<2x8x256xbf16, #tpu.memory_space<vmem>>, vector<2x8x32xbf16>
    %cst_40 = arith.constant dense<0.000000e+00> : vector<2x16x8xf32>
    %49 = tpu.matmul %46, %47, %cst_40 {dimension_numbers = #tpu.dot_dimension_numbers<[2], [2], [1], [1], [0, 0, 0, 1, 1, 1], [0], [0]>} : vector<2x16x32xbf16>, vector<2x8x32xbf16>, vector<2x16x8xf32> -> vector<2x16x8xf32>
    %cst_41 = arith.constant 0.176776692 : f32
    %50 = vector.broadcast %cst_41 : f32 to vector<2x16x8xf32>
    %51 = arith.mulf %49, %50 : vector<2x16x8xf32>
    %52 = vector.broadcast %1 : vector<2x1x8xf32> to vector<2x16x8xf32>
    %53 = arith.addf %51, %52 : vector<2x16x8xf32>
    %cst_42 = arith.constant dense<0xFF800000> : vector<2x16xf32>
    %54 = vector.multi_reduction <maximumf>, %53, %cst_42 [2] : vector<2x16x8xf32> to vector<2x16xf32>
    %55 = vector.shape_cast %54 : vector<2x16xf32> to vector<2x16x1xf32>
    %56 = vector.broadcast %55 : vector<2x16x1xf32> to vector<2x16x8xf32>
    %57 = arith.subf %53, %56 : vector<2x16x8xf32>
    %58 = math.exp %57 : vector<2x16x8xf32>
    %cst_43 = arith.constant dense<0.000000e+00> : vector<2x16xf32>
    %59 = vector.multi_reduction <add>, %58, %cst_43 [2] : vector<2x16x8xf32> to vector<2x16xf32>
    %60 = vector.shape_cast %59 : vector<2x16xf32> to vector<2x16x1xf32>
    %61 = tpu.reciprocal %60 {approx = true} : vector<2x16x1xf32> -> vector<2x16x1xf32>
    %62 = vector.broadcast %61 : vector<2x16x1xf32> to vector<2x16x8xf32>
    %63 = arith.mulf %58, %62 : vector<2x16x8xf32>
    %64 = arith.truncf %63 : vector<2x16x8xf32> to vector<2x16x8xbf16>
    %cst_44 = arith.constant dense<0.000000e+00> : vector<2x16x32xf32>
    %65 = tpu.matmul %64, %48, %cst_44 {dimension_numbers = #tpu.dot_dimension_numbers<[2], [1], [1], [2], [0, 0, 0, 1, 1, 2], [0], [0]>} : vector<2x16x8xbf16>, vector<2x8x32xbf16>, vector<2x16x32xf32> -> vector<2x16x32xf32>
    %66 = arith.truncf %65 : vector<2x16x32xf32> to vector<2x16x32xbf16>
    %c0_45 = arith.constant 0 : index
    %c0_46 = arith.constant 0 : index
    %c64_47 = arith.constant 64 : index
    %67 = vector.load %arg5[%c0_45, %c0_46, %c64_47] : memref<2x16x128xbf16, #tpu.memory_space<vmem>>, vector<2x16x32xbf16>
    tpu.vector_store %arg5[%c0_45, %c0_46, %c64_47], %66 {strides = array<i32>} : memref<2x16x128xbf16, #tpu.memory_space<vmem>>, vector<2x16x32xbf16>,
    %c0_48 = arith.constant 0 : index
    %c0_49 = arith.constant 0 : index
    %c96 = arith.constant 96 : index
    %68 = vector.load %arg2[%c0_48, %c0_49, %c96] : memref<2x16x128xbf16, #tpu.memory_space<vmem>>, vector<2x16x32xbf16>
    %c0_50 = arith.constant 0 : index
    %c0_51 = arith.constant 0 : index
    %c96_52 = arith.constant 96 : index
    %69 = vector.load %arg3[%c0_50, %c0_51, %c96_52] : memref<2x8x256xbf16, #tpu.memory_space<vmem>>, vector<2x8x32xbf16>
    %c0_53 = arith.constant 0 : index
    %c0_54 = arith.constant 0 : index
    %c224 = arith.constant 224 : index
    %70 = vector.load %arg3[%c0_53, %c0_54, %c224] : memref<2x8x256xbf16, #tpu.memory_space<vmem>>, vector<2x8x32xbf16>
    %cst_55 = arith.constant dense<0.000000e+00> : vector<2x16x8xf32>
    %71 = tpu.matmul %68, %69, %cst_55 {dimension_numbers = #tpu.dot_dimension_numbers<[2], [2], [1], [1], [0, 0, 0, 1, 1, 1], [0], [0]>} : vector<2x16x32xbf16>, vector<2x8x32xbf16>, vector<2x16x8xf32> -> vector<2x16x8xf32>
    %cst_56 = arith.constant 0.176776692 : f32
    %72 = vector.broadcast %cst_56 : f32 to vector<2x16x8xf32>
    %73 = arith.mulf %71, %72 : vector<2x16x8xf32>
    %74 = vector.broadcast %1 : vector<2x1x8xf32> to vector<2x16x8xf32>
    %75 = arith.addf %73, %74 : vector<2x16x8xf32>
    %cst_57 = arith.constant dense<0xFF800000> : vector<2x16xf32>
    %76 = vector.multi_reduction <maximumf>, %75, %cst_57 [2] : vector<2x16x8xf32> to vector<2x16xf32>
    %77 = vector.shape_cast %76 : vector<2x16xf32> to vector<2x16x1xf32>
    %78 = vector.broadcast %77 : vector<2x16x1xf32> to vector<2x16x8xf32>
    %79 = arith.subf %75, %78 : vector<2x16x8xf32>
    %80 = math.exp %79 : vector<2x16x8xf32>
    %cst_58 = arith.constant dense<0.000000e+00> : vector<2x16xf32>
    %81 = vector.multi_reduction <add>, %80, %cst_58 [2] : vector<2x16x8xf32> to vector<2x16xf32>
    %82 = vector.shape_cast %81 : vector<2x16xf32> to vector<2x16x1xf32>
    %83 = tpu.reciprocal %82 {approx = true} : vector<2x16x1xf32> -> vector<2x16x1xf32>
    %84 = vector.broadcast %83 : vector<2x16x1xf32> to vector<2x16x8xf32>
    %85 = arith.mulf %80, %84 : vector<2x16x8xf32>
    %86 = arith.truncf %85 : vector<2x16x8xf32> to vector<2x16x8xbf16>
    %cst_59 = arith.constant dense<0.000000e+00> : vector<2x16x32xf32>
    %87 = tpu.matmul %86, %70, %cst_59 {dimension_numbers = #tpu.dot_dimension_numbers<[2], [1], [1], [2], [0, 0, 0, 1, 1, 2], [0], [0]>} : vector<2x16x8xbf16>, vector<2x8x32xbf16>, vector<2x16x32xf32> -> vector<2x16x32xf32>
    %88 = arith.truncf %87 : vector<2x16x32xf32> to vector<2x16x32xbf16>
    %c0_60 = arith.constant 0 : index
    %c0_61 = arith.constant 0 : index
    %c96_62 = arith.constant 96 : index
    %89 = vector.load %arg5[%c0_60, %c0_61, %c96_62] : memref<2x16x128xbf16, #tpu.memory_space<vmem>>, vector<2x16x32xbf16>
    tpu.vector_store %arg5[%c0_60, %c0_61, %c96_62], %88 {strides = array<i32>} : memref<2x16x128xbf16, #tpu.memory_space<vmem>>, vector<2x16x32xbf16>,
    return
  }
  func.func @transform_0(%arg0: i32, %arg1: i32) -> (i32, i32, i32) {
    %c2_i32 = arith.constant 2 : i32
    %c0_i32 = arith.constant 0 : i32
    return %arg0, %arg1, %c2_i32 : i32, i32, i32
  }
  func.func @transform_1(%arg0: i32, %arg1: i32) -> (i32, i32, i32) {
    %c0_i32 = arith.constant 0 : i32
    %c0_i32_0 = arith.constant 0 : i32
    %c0_i32_1 = arith.constant 0 : i32
    return %arg0, %c0_i32, %c0_i32_0 : i32, i32, i32
  }
  func.func @transform_2(%arg0: i32, %arg1: i32) -> (i32, i32, i32, i32) {
    %c0_i32 = arith.constant 0 : i32
    %c0_i32_0 = arith.constant 0 : i32
    %c0_i32_1 = arith.constant 0 : i32
    %c0_i32_2 = arith.constant 0 : i32
    return %arg0, %c0_i32, %c0_i32_0, %c0_i32_1 : i32, i32, i32, i32
  }
  func.func @transform_3(%arg0: i32, %arg1: i32) -> (i32, i32, i32) {
    %c0_i32 = arith.constant 0 : i32
    %c0_i32_0 = arith.constant 0 : i32
    return %arg0, %arg1, %c0_i32 : i32, i32, i32
  }
}

module attributes {stable_mosaic.version = 11 : i64} {
  func.func @_linear_kernel(%arg0: i32, %arg1: i32, %arg2: i32, %arg3: memref<32x128xbf16, #tpu.memory_space<vmem>>, %arg4: memref<128x384xbf16, #tpu.memory_space<vmem>>, %arg5: memref<1x384xbf16, #tpu.memory_space<vmem>>, %arg6: memref<32x384xbf16, #tpu.memory_space<vmem>>, %arg7: memref<32x384xf32, #tpu.memory_space<vmem>>) attributes {dimension_semantics = [#tpu.dimension_semantics<parallel>, #tpu.dimension_semantics<parallel>, #tpu.dimension_semantics<arbitrary>], iteration_bounds = array<i64: 1, 1, 1>, scalar_prefetch = 0 : i64, scratch_operands = 1 : i64, tpu.core_type = #tpu.core_type<tc>, window_params = [{transform_indices = @transform_0, window_bounds = array<i64: 32, 128>}, {transform_indices = @transform_1, window_bounds = array<i64: 128, 384>}, {transform_indices = @transform_2, window_bounds = array<i64: 1, 384>}, {transform_indices = @transform_3, window_bounds = array<i64: 32, 384>}]} {
    %c0_i32 = arith.constant 0 : i32
    %0 = arith.cmpi eq, %arg2, %c0_i32 : i32
    %1 = arith.extui %0 : i1 to i32
    %c0_i32_0 = arith.constant 0 : i32
    %2 = arith.cmpi ne, %1, %c0_i32_0 : i32
    scf.if %2 {
      %cst_10 = arith.constant 0.000000e+00 : f32
      %12 = vector.broadcast %cst_10 : f32 to vector<32x384xf32>
      %c0_11 = arith.constant 0 : index
      %c0_12 = arith.constant 0 : index
      %13 = vector.load %arg7[%c0_11, %c0_12] : memref<32x384xf32, #tpu.memory_space<vmem>>, vector<32x384xf32>
      tpu.vector_store %arg7[%c0_11, %c0_12], %12 {strides = array<i32>} : memref<32x384xf32, #tpu.memory_space<vmem>>, vector<32x384xf32>,
    } else {
    }
    %c0 = arith.constant 0 : index
    %c0_1 = arith.constant 0 : index
    %3 = vector.load %arg7[%c0, %c0_1] : memref<32x384xf32, #tpu.memory_space<vmem>>, vector<32x384xf32>
    %c0_2 = arith.constant 0 : index
    %c0_3 = arith.constant 0 : index
    %4 = vector.load %arg3[%c0_2, %c0_3] : memref<32x128xbf16, #tpu.memory_space<vmem>>, vector<32x128xbf16>
    %c0_4 = arith.constant 0 : index
    %c0_5 = arith.constant 0 : index
    %5 = vector.load %arg4[%c0_4, %c0_5] : memref<128x384xbf16, #tpu.memory_space<vmem>>, vector<128x384xbf16>
    %cst = arith.constant dense<0.000000e+00> : vector<32x384xf32>
    %6 = tpu.matmul %4, %5, %cst {dimension_numbers = #tpu.dot_dimension_numbers<[1], [0], [0], [1], [0, 0, 1, 1], [], []>} : vector<32x128xbf16>, vector<128x384xbf16>, vector<32x384xf32> -> vector<32x384xf32>
    %7 = arith.addf %3, %6 : vector<32x384xf32>
    %c0_6 = arith.constant 0 : index
    %c0_7 = arith.constant 0 : index
    %8 = vector.load %arg7[%c0_6, %c0_7] : memref<32x384xf32, #tpu.memory_space<vmem>>, vector<32x384xf32>
    tpu.vector_store %arg7[%c0_6, %c0_7], %7 {strides = array<i32>} : memref<32x384xf32, #tpu.memory_space<vmem>>, vector<32x384xf32>,
    %c0_i32_8 = arith.constant 0 : i32
    %9 = arith.cmpi eq, %arg2, %c0_i32_8 : i32
    %10 = arith.extui %9 : i1 to i32
    %c0_i32_9 = arith.constant 0 : i32
    %11 = arith.cmpi ne, %10, %c0_i32_9 : i32
    scf.if %11 {
      %c0_10 = arith.constant 0 : index
      %c0_11 = arith.constant 0 : index
      %12 = vector.load %arg7[%c0_10, %c0_11] : memref<32x384xf32, #tpu.memory_space<vmem>>, vector<32x384xf32>
      %c0_12 = arith.constant 0 : index
      %c0_13 = arith.constant 0 : index
      %13 = vector.load %arg5[%c0_12, %c0_13] : memref<1x384xbf16, #tpu.memory_space<vmem>>, vector<1x384xbf16>
      %14 = arith.extf %13 : vector<1x384xbf16> to vector<1x384xf32>
      %15 = vector.broadcast %14 : vector<1x384xf32> to vector<32x384xf32>
      %16 = arith.addf %12, %15 : vector<32x384xf32>
      %17 = arith.truncf %16 : vector<32x384xf32> to vector<32x384xbf16>
      %c0_14 = arith.constant 0 : index
      %c0_15 = arith.constant 0 : index
      %18 = vector.load %arg6[%c0_14, %c0_15] : memref<32x384xbf16, #tpu.memory_space<vmem>>, vector<32x384xbf16>
      tpu.vector_store %arg6[%c0_14, %c0_15], %17 {strides = array<i32>} : memref<32x384xbf16, #tpu.memory_space<vmem>>, vector<32x384xbf16>,
    } else {
    }
    return
  }
  func.func @transform_0(%arg0: i32, %arg1: i32, %arg2: i32) -> (i32, i32) {
    %c0_i32 = arith.constant 0 : i32
    return %arg0, %arg2 : i32, i32
  }
  func.func @transform_1(%arg0: i32, %arg1: i32, %arg2: i32) -> (i32, i32) {
    %c0_i32 = arith.constant 0 : i32
    return %arg2, %arg1 : i32, i32
  }
  func.func @transform_2(%arg0: i32, %arg1: i32, %arg2: i32) -> (i32, i32) {
    %c0_i32 = arith.constant 0 : i32
    %c0_i32_0 = arith.constant 0 : i32
    return %c0_i32, %arg1 : i32, i32
  }
  func.func @transform_3(%arg0: i32, %arg1: i32, %arg2: i32) -> (i32, i32) {
    %c0_i32 = arith.constant 0 : i32
    return %arg0, %arg1 : i32, i32
  }
}

module attributes {stable_mosaic.version = 11 : i64} {
  func.func @_mha_kernel(%arg0: i32, %arg1: i32, %arg2: memref<2x16x128xbf16, #tpu.memory_space<vmem>>, %arg3: memref<2x16x256xbf16, #tpu.memory_space<vmem>>, %arg4: memref<2x1x1x16xf32, #tpu.memory_space<vmem>>, %arg5: memref<2x16x128xbf16, #tpu.memory_space<vmem>>) attributes {dimension_semantics = [#tpu.dimension_semantics<parallel>, #tpu.dimension_semantics<parallel>], iteration_bounds = array<i64: 1, 1>, scalar_prefetch = 0 : i64, scratch_operands = 0 : i64, tpu.core_type = #tpu.core_type<tc>, window_params = [{transform_indices = @transform_0, window_bounds = array<i64: 2, 16, 128>}, {transform_indices = @transform_1, window_bounds = array<i64: 2, 16, 256>}, {transform_indices = @transform_2, window_bounds = array<i64: 2, 1, 1, 16>}, {transform_indices = @transform_3, window_bounds = array<i64: 2, 16, 128>}]} {
    %c0 = arith.constant 0 : index
    %c0_0 = arith.constant 0 : index
    %c0_1 = arith.constant 0 : index
    %c0_2 = arith.constant 0 : index
    %0 = vector.load %arg4[%c0, %c0_0, %c0_1, %c0_2] : memref<2x1x1x16xf32, #tpu.memory_space<vmem>>, vector<2x1x1x16xf32>
    %1 = vector.shape_cast %0 : vector<2x1x1x16xf32> to vector<2x1x16xf32>
    %c0_3 = arith.constant 0 : index
    %c0_4 = arith.constant 0 : index
    %c0_5 = arith.constant 0 : index
    %2 = vector.load %arg2[%c0_3, %c0_4, %c0_5] : memref<2x16x128xbf16, #tpu.memory_space<vmem>>, vector<2x16x32xbf16>
    %c0_6 = arith.constant 0 : index
    %c0_7 = arith.constant 0 : index
    %c0_8 = arith.constant 0 : index
    %3 = vector.load %arg3[%c0_6, %c0_7, %c0_8] : memref<2x16x256xbf16, #tpu.memory_space<vmem>>, vector<2x16x32xbf16>
    %c0_9 = arith.constant 0 : index
    %c0_10 = arith.constant 0 : index
    %c128 = arith.constant 128 : index
    %4 = vector.load %arg3[%c0_9, %c0_10, %c128] : memref<2x16x256xbf16, #tpu.memory_space<vmem>>, vector<2x16x32xbf16>
    %cst = arith.constant dense<0.000000e+00> : vector<2x16x16xf32>
    %5 = tpu.matmul %2, %3, %cst {dimension_numbers = #tpu.dot_dimension_numbers<[2], [2], [1], [1], [0, 0, 0, 1, 1, 1], [0], [0]>} : vector<2x16x32xbf16>, vector<2x16x32xbf16>, vector<2x16x16xf32> -> vector<2x16x16xf32>
    %cst_11 = arith.constant 0.176776692 : f32
    %6 = vector.broadcast %cst_11 : f32 to vector<2x16x16xf32>
    %7 = arith.mulf %5, %6 : vector<2x16x16xf32>
    %8 = vector.broadcast %1 : vector<2x1x16xf32> to vector<2x16x16xf32>
    %9 = arith.addf %7, %8 : vector<2x16x16xf32>
    %cst_12 = arith.constant dense<0xFF800000> : vector<2x16xf32>
    %10 = vector.multi_reduction <maximumf>, %9, %cst_12 [2] : vector<2x16x16xf32> to vector<2x16xf32>
    %11 = vector.shape_cast %10 : vector<2x16xf32> to vector<2x16x1xf32>
    %12 = vector.broadcast %11 : vector<2x16x1xf32> to vector<2x16x16xf32>
    %13 = arith.subf %9, %12 : vector<2x16x16xf32>
    %14 = math.exp %13 : vector<2x16x16xf32>
    %cst_13 = arith.constant dense<0.000000e+00> : vector<2x16xf32>
    %15 = vector.multi_reduction <add>, %14, %cst_13 [2] : vector<2x16x16xf32> to vector<2x16xf32>
    %16 = vector.shape_cast %15 : vector<2x16xf32> to vector<2x16x1xf32>
    %17 = tpu.reciprocal %16 {approx = true} : vector<2x16x1xf32> -> vector<2x16x1xf32>
    %18 = vector.broadcast %17 : vector<2x16x1xf32> to vector<2x16x16xf32>
    %19 = arith.mulf %14, %18 : vector<2x16x16xf32>
    %20 = arith.truncf %19 : vector<2x16x16xf32> to vector<2x16x16xbf16>
    %cst_14 = arith.constant dense<0.000000e+00> : vector<2x16x32xf32>
    %21 = tpu.matmul %20, %4, %cst_14 {dimension_numbers = #tpu.dot_dimension_numbers<[2], [1], [1], [2], [0, 0, 0, 1, 1, 2], [0], [0]>} : vector<2x16x16xbf16>, vector<2x16x32xbf16>, vector<2x16x32xf32> -> vector<2x16x32xf32>
    %22 = arith.truncf %21 : vector<2x16x32xf32> to vector<2x16x32xbf16>
    %c0_15 = arith.constant 0 : index
    %c0_16 = arith.constant 0 : index
    %c0_17 = arith.constant 0 : index
    %23 = vector.load %arg5[%c0_15, %c0_16, %c0_17] : memref<2x16x128xbf16, #tpu.memory_space<vmem>>, vector<2x16x32xbf16>
    tpu.vector_store %arg5[%c0_15, %c0_16, %c0_17], %22 {strides = array<i32>} : memref<2x16x128xbf16, #tpu.memory_space<vmem>>, vector<2x16x32xbf16>,
    %c0_18 = arith.constant 0 : index
    %c0_19 = arith.constant 0 : index
    %c32 = arith.constant 32 : index
    %24 = vector.load %arg2[%c0_18, %c0_19, %c32] : memref<2x16x128xbf16, #tpu.memory_space<vmem>>, vector<2x16x32xbf16>
    %c0_20 = arith.constant 0 : index
    %c0_21 = arith.constant 0 : index
    %c32_22 = arith.constant 32 : index
    %25 = vector.load %arg3[%c0_20, %c0_21, %c32_22] : memref<2x16x256xbf16, #tpu.memory_space<vmem>>, vector<2x16x32xbf16>
    %c0_23 = arith.constant 0 : index
    %c0_24 = arith.constant 0 : index
    %c160 = arith.constant 160 : index
    %26 = vector.load %arg3[%c0_23, %c0_24, %c160] : memref<2x16x256xbf16, #tpu.memory_space<vmem>>, vector<2x16x32xbf16>
    %cst_25 = arith.constant dense<0.000000e+00> : vector<2x16x16xf32>
    %27 = tpu.matmul %24, %25, %cst_25 {dimension_numbers = #tpu.dot_dimension_numbers<[2], [2], [1], [1], [0, 0, 0, 1, 1, 1], [0], [0]>} : vector<2x16x32xbf16>, vector<2x16x32xbf16>, vector<2x16x16xf32> -> vector<2x16x16xf32>
    %cst_26 = arith.constant 0.176776692 : f32
    %28 = vector.broadcast %cst_26 : f32 to vector<2x16x16xf32>
    %29 = arith.mulf %27, %28 : vector<2x16x16xf32>
    %30 = vector.broadcast %1 : vector<2x1x16xf32> to vector<2x16x16xf32>
    %31 = arith.addf %29, %30 : vector<2x16x16xf32>
    %cst_27 = arith.constant dense<0xFF800000> : vector<2x16xf32>
    %32 = vector.multi_reduction <maximumf>, %31, %cst_27 [2] : vector<2x16x16xf32> to vector<2x16xf32>
    %33 = vector.shape_cast %32 : vector<2x16xf32> to vector<2x16x1xf32>
    %34 = vector.broadcast %33 : vector<2x16x1xf32> to vector<2x16x16xf32>
    %35 = arith.subf %31, %34 : vector<2x16x16xf32>
    %36 = math.exp %35 : vector<2x16x16xf32>
    %cst_28 = arith.constant dense<0.000000e+00> : vector<2x16xf32>
    %37 = vector.multi_reduction <add>, %36, %cst_28 [2] : vector<2x16x16xf32> to vector<2x16xf32>
    %38 = vector.shape_cast %37 : vector<2x16xf32> to vector<2x16x1xf32>
    %39 = tpu.reciprocal %38 {approx = true} : vector<2x16x1xf32> -> vector<2x16x1xf32>
    %40 = vector.broadcast %39 : vector<2x16x1xf32> to vector<2x16x16xf32>
    %41 = arith.mulf %36, %40 : vector<2x16x16xf32>
    %42 = arith.truncf %41 : vector<2x16x16xf32> to vector<2x16x16xbf16>
    %cst_29 = arith.constant dense<0.000000e+00> : vector<2x16x32xf32>
    %43 = tpu.matmul %42, %26, %cst_29 {dimension_numbers = #tpu.dot_dimension_numbers<[2], [1], [1], [2], [0, 0, 0, 1, 1, 2], [0], [0]>} : vector<2x16x16xbf16>, vector<2x16x32xbf16>, vector<2x16x32xf32> -> vector<2x16x32xf32>
    %44 = arith.truncf %43 : vector<2x16x32xf32> to vector<2x16x32xbf16>
    %c0_30 = arith.constant 0 : index
    %c0_31 = arith.constant 0 : index
    %c32_32 = arith.constant 32 : index
    %45 = vector.load %arg5[%c0_30, %c0_31, %c32_32] : memref<2x16x128xbf16, #tpu.memory_space<vmem>>, vector<2x16x32xbf16>
    tpu.vector_store %arg5[%c0_30, %c0_31, %c32_32], %44 {strides = array<i32>} : memref<2x16x128xbf16, #tpu.memory_space<vmem>>, vector<2x16x32xbf16>,
    %c0_33 = arith.constant 0 : index
    %c0_34 = arith.constant 0 : index
    %c64 = arith.constant 64 : index
    %46 = vector.load %arg2[%c0_33, %c0_34, %c64] : memref<2x16x128xbf16, #tpu.memory_space<vmem>>, vector<2x16x32xbf16>
    %c0_35 = arith.constant 0 : index
    %c0_36 = arith.constant 0 : index
    %c64_37 = arith.constant 64 : index
    %47 = vector.load %arg3[%c0_35, %c0_36, %c64_37] : memref<2x16x256xbf16, #tpu.memory_space<vmem>>, vector<2x16x32xbf16>
    %c0_38 = arith.constant 0 : index
    %c0_39 = arith.constant 0 : index
    %c192 = arith.constant 192 : index
    %48 = vector.load %arg3[%c0_38, %c0_39, %c192] : memref<2x16x256xbf16, #tpu.memory_space<vmem>>, vector<2x16x32xbf16>
    %cst_40 = arith.constant dense<0.000000e+00> : vector<2x16x16xf32>
    %49 = tpu.matmul %46, %47, %cst_40 {dimension_numbers = #tpu.dot_dimension_numbers<[2], [2], [1], [1], [0, 0, 0, 1, 1, 1], [0], [0]>} : vector<2x16x32xbf16>, vector<2x16x32xbf16>, vector<2x16x16xf32> -> vector<2x16x16xf32>
    %cst_41 = arith.constant 0.176776692 : f32
    %50 = vector.broadcast %cst_41 : f32 to vector<2x16x16xf32>
    %51 = arith.mulf %49, %50 : vector<2x16x16xf32>
    %52 = vector.broadcast %1 : vector<2x1x16xf32> to vector<2x16x16xf32>
    %53 = arith.addf %51, %52 : vector<2x16x16xf32>
    %cst_42 = arith.constant dense<0xFF800000> : vector<2x16xf32>
    %54 = vector.multi_reduction <maximumf>, %53, %cst_42 [2] : vector<2x16x16xf32> to vector<2x16xf32>
    %55 = vector.shape_cast %54 : vector<2x16xf32> to vector<2x16x1xf32>
    %56 = vector.broadcast %55 : vector<2x16x1xf32> to vector<2x16x16xf32>
    %57 = arith.subf %53, %56 : vector<2x16x16xf32>
    %58 = math.exp %57 : vector<2x16x16xf32>
    %cst_43 = arith.constant dense<0.000000e+00> : vector<2x16xf32>
    %59 = vector.multi_reduction <add>, %58, %cst_43 [2] : vector<2x16x16xf32> to vector<2x16xf32>
    %60 = vector.shape_cast %59 : vector<2x16xf32> to vector<2x16x1xf32>
    %61 = tpu.reciprocal %60 {approx = true} : vector<2x16x1xf32> -> vector<2x16x1xf32>
    %62 = vector.broadcast %61 : vector<2x16x1xf32> to vector<2x16x16xf32>
    %63 = arith.mulf %58, %62 : vector<2x16x16xf32>
    %64 = arith.truncf %63 : vector<2x16x16xf32> to vector<2x16x16xbf16>
    %cst_44 = arith.constant dense<0.000000e+00> : vector<2x16x32xf32>
    %65 = tpu.matmul %64, %48, %cst_44 {dimension_numbers = #tpu.dot_dimension_numbers<[2], [1], [1], [2], [0, 0, 0, 1, 1, 2], [0], [0]>} : vector<2x16x16xbf16>, vector<2x16x32xbf16>, vector<2x16x32xf32> -> vector<2x16x32xf32>
    %66 = arith.truncf %65 : vector<2x16x32xf32> to vector<2x16x32xbf16>
    %c0_45 = arith.constant 0 : index
    %c0_46 = arith.constant 0 : index
    %c64_47 = arith.constant 64 : index
    %67 = vector.load %arg5[%c0_45, %c0_46, %c64_47] : memref<2x16x128xbf16, #tpu.memory_space<vmem>>, vector<2x16x32xbf16>
    tpu.vector_store %arg5[%c0_45, %c0_46, %c64_47], %66 {strides = array<i32>} : memref<2x16x128xbf16, #tpu.memory_space<vmem>>, vector<2x16x32xbf16>,
    %c0_48 = arith.constant 0 : index
    %c0_49 = arith.constant 0 : index
    %c96 = arith.constant 96 : index
    %68 = vector.load %arg2[%c0_48, %c0_49, %c96] : memref<2x16x128xbf16, #tpu.memory_space<vmem>>, vector<2x16x32xbf16>
    %c0_50 = arith.constant 0 : index
    %c0_51 = arith.constant 0 : index
    %c96_52 = arith.constant 96 : index
    %69 = vector.load %arg3[%c0_50, %c0_51, %c96_52] : memref<2x16x256xbf16, #tpu.memory_space<vmem>>, vector<2x16x32xbf16>
    %c0_53 = arith.constant 0 : index
    %c0_54 = arith.constant 0 : index
    %c224 = arith.constant 224 : index
    %70 = vector.load %arg3[%c0_53, %c0_54, %c224] : memref<2x16x256xbf16, #tpu.memory_space<vmem>>, vector<2x16x32xbf16>
    %cst_55 = arith.constant dense<0.000000e+00> : vector<2x16x16xf32>
    %71 = tpu.matmul %68, %69, %cst_55 {dimension_numbers = #tpu.dot_dimension_numbers<[2], [2], [1], [1], [0, 0, 0, 1, 1, 1], [0], [0]>} : vector<2x16x32xbf16>, vector<2x16x32xbf16>, vector<2x16x16xf32> -> vector<2x16x16xf32>
    %cst_56 = arith.constant 0.176776692 : f32
    %72 = vector.broadcast %cst_56 : f32 to vector<2x16x16xf32>
    %73 = arith.mulf %71, %72 : vector<2x16x16xf32>
    %74 = vector.broadcast %1 : vector<2x1x16xf32> to vector<2x16x16xf32>
    %75 = arith.addf %73, %74 : vector<2x16x16xf32>
    %cst_57 = arith.constant dense<0xFF800000> : vector<2x16xf32>
    %76 = vector.multi_reduction <maximumf>, %75, %cst_57 [2] : vector<2x16x16xf32> to vector<2x16xf32>
    %77 = vector.shape_cast %76 : vector<2x16xf32> to vector<2x16x1xf32>
    %78 = vector.broadcast %77 : vector<2x16x1xf32> to vector<2x16x16xf32>
    %79 = arith.subf %75, %78 : vector<2x16x16xf32>
    %80 = math.exp %79 : vector<2x16x16xf32>
    %cst_58 = arith.constant dense<0.000000e+00> : vector<2x16xf32>
    %81 = vector.multi_reduction <add>, %80, %cst_58 [2] : vector<2x16x16xf32> to vector<2x16xf32>
    %82 = vector.shape_cast %81 : vector<2x16xf32> to vector<2x16x1xf32>
    %83 = tpu.reciprocal %82 {approx = true} : vector<2x16x1xf32> -> vector<2x16x1xf32>
    %84 = vector.broadcast %83 : vector<2x16x1xf32> to vector<2x16x16xf32>
    %85 = arith.mulf %80, %84 : vector<2x16x16xf32>
    %86 = arith.truncf %85 : vector<2x16x16xf32> to vector<2x16x16xbf16>
    %cst_59 = arith.constant dense<0.000000e+00> : vector<2x16x32xf32>
    %87 = tpu.matmul %86, %70, %cst_59 {dimension_numbers = #tpu.dot_dimension_numbers<[2], [1], [1], [2], [0, 0, 0, 1, 1, 2], [0], [0]>} : vector<2x16x16xbf16>, vector<2x16x32xbf16>, vector<2x16x32xf32> -> vector<2x16x32xf32>
    %88 = arith.truncf %87 : vector<2x16x32xf32> to vector<2x16x32xbf16>
    %c0_60 = arith.constant 0 : index
    %c0_61 = arith.constant 0 : index
    %c96_62 = arith.constant 96 : index
    %89 = vector.load %arg5[%c0_60, %c0_61, %c96_62] : memref<2x16x128xbf16, #tpu.memory_space<vmem>>, vector<2x16x32xbf16>
    tpu.vector_store %arg5[%c0_60, %c0_61, %c96_62], %88 {strides = array<i32>} : memref<2x16x128xbf16, #tpu.memory_space<vmem>>, vector<2x16x32xbf16>,
    return
  }
  func.func @transform_0(%arg0: i32, %arg1: i32) -> (i32, i32, i32) {
    %c2_i32 = arith.constant 2 : i32
    %c0_i32 = arith.constant 0 : i32
    return %arg0, %arg1, %c2_i32 : i32, i32, i32
  }
  func.func @transform_1(%arg0: i32, %arg1: i32) -> (i32, i32, i32) {
    %c0_i32 = arith.constant 0 : i32
    %c0_i32_0 = arith.constant 0 : i32
    %c0_i32_1 = arith.constant 0 : i32
    return %arg0, %c0_i32, %c0_i32_0 : i32, i32, i32
  }
  func.func @transform_2(%arg0: i32, %arg1: i32) -> (i32, i32, i32, i32) {
    %c0_i32 = arith.constant 0 : i32
    %c0_i32_0 = arith.constant 0 : i32
    %c0_i32_1 = arith.constant 0 : i32
    %c0_i32_2 = arith.constant 0 : i32
    return %arg0, %c0_i32, %c0_i32_0, %c0_i32_1 : i32, i32, i32, i32
  }
  func.func @transform_3(%arg0: i32, %arg1: i32) -> (i32, i32, i32) {
    %c0_i32 = arith.constant 0 : i32
    %c0_i32_0 = arith.constant 0 : i32
    return %arg0, %arg1, %c0_i32 : i32, i32, i32
  }
}

module attributes {stable_mosaic.version = 11 : i64} {
  func.func @_proj_add_ln_kernel(%arg0: i32, %arg1: i32, %arg2: memref<32x128xbf16, #tpu.memory_space<vmem>>, %arg3: memref<128x128xbf16, #tpu.memory_space<vmem>>, %arg4: memref<1x128xbf16, #tpu.memory_space<vmem>>, %arg5: memref<32x128xbf16, #tpu.memory_space<vmem>>, %arg6: memref<1x128xbf16, #tpu.memory_space<vmem>>, %arg7: memref<1x128xbf16, #tpu.memory_space<vmem>>, %arg8: memref<32x128xbf16, #tpu.memory_space<vmem>>, %arg9: memref<32x128xf32, #tpu.memory_space<vmem>>) attributes {dimension_semantics = [#tpu.dimension_semantics<parallel>, #tpu.dimension_semantics<arbitrary>], iteration_bounds = array<i64: 1, 1>, scalar_prefetch = 0 : i64, scratch_operands = 1 : i64, tpu.core_type = #tpu.core_type<tc>, window_params = [{transform_indices = @transform_0, window_bounds = array<i64: 32, 128>}, {transform_indices = @transform_1, window_bounds = array<i64: 128, 128>}, {pipeline_mode = #tpu.pipeline_mode<synchronous>, transform_indices = @transform_2, window_bounds = array<i64: 1, 128>}, {transform_indices = @transform_3, window_bounds = array<i64: 32, 128>}, {pipeline_mode = #tpu.pipeline_mode<synchronous>, transform_indices = @transform_4, window_bounds = array<i64: 1, 128>}, {pipeline_mode = #tpu.pipeline_mode<synchronous>, transform_indices = @transform_5, window_bounds = array<i64: 1, 128>}, {transform_indices = @transform_6, window_bounds = array<i64: 32, 128>}]} {
    %c0_i32 = arith.constant 0 : i32
    %0 = arith.cmpi eq, %arg1, %c0_i32 : i32
    %1 = arith.extui %0 : i1 to i32
    %c0_i32_0 = arith.constant 0 : i32
    %2 = arith.cmpi ne, %1, %c0_i32_0 : i32
    scf.if %2 {
      %cst_10 = arith.constant 0.000000e+00 : f32
      %12 = vector.broadcast %cst_10 : f32 to vector<32x128xf32>
      %c0_11 = arith.constant 0 : index
      %c0_12 = arith.constant 0 : index
      %13 = vector.load %arg9[%c0_11, %c0_12] : memref<32x128xf32, #tpu.memory_space<vmem>>, vector<32x128xf32>
      tpu.vector_store %arg9[%c0_11, %c0_12], %12 {strides = array<i32>} : memref<32x128xf32, #tpu.memory_space<vmem>>, vector<32x128xf32>,
    } else {
    }
    %c0 = arith.constant 0 : index
    %c0_1 = arith.constant 0 : index
    %3 = vector.load %arg9[%c0, %c0_1] : memref<32x128xf32, #tpu.memory_space<vmem>>, vector<32x128xf32>
    %c0_2 = arith.constant 0 : index
    %c0_3 = arith.constant 0 : index
    %4 = vector.load %arg2[%c0_2, %c0_3] : memref<32x128xbf16, #tpu.memory_space<vmem>>, vector<32x128xbf16>
    %c0_4 = arith.constant 0 : index
    %c0_5 = arith.constant 0 : index
    %5 = vector.load %arg3[%c0_4, %c0_5] : memref<128x128xbf16, #tpu.memory_space<vmem>>, vector<128x128xbf16>
    %cst = arith.constant dense<0.000000e+00> : vector<32x128xf32>
    %6 = tpu.matmul %4, %5, %cst {dimension_numbers = #tpu.dot_dimension_numbers<[1], [0], [0], [1], [0, 0, 1, 1], [], []>} : vector<32x128xbf16>, vector<128x128xbf16>, vector<32x128xf32> -> vector<32x128xf32>
    %7 = arith.addf %3, %6 : vector<32x128xf32>
    %c0_6 = arith.constant 0 : index
    %c0_7 = arith.constant 0 : index
    %8 = vector.load %arg9[%c0_6, %c0_7] : memref<32x128xf32, #tpu.memory_space<vmem>>, vector<32x128xf32>
    tpu.vector_store %arg9[%c0_6, %c0_7], %7 {strides = array<i32>} : memref<32x128xf32, #tpu.memory_space<vmem>>, vector<32x128xf32>,
    %c0_i32_8 = arith.constant 0 : i32
    %9 = arith.cmpi eq, %arg1, %c0_i32_8 : i32
    %10 = arith.extui %9 : i1 to i32
    %c0_i32_9 = arith.constant 0 : i32
    %11 = arith.cmpi ne, %10, %c0_i32_9 : i32
    scf.if %11 {
      %c0_10 = arith.constant 0 : index
      %c0_11 = arith.constant 0 : index
      %12 = vector.load %arg9[%c0_10, %c0_11] : memref<32x128xf32, #tpu.memory_space<vmem>>, vector<32x128xf32>
      %c0_12 = arith.constant 0 : index
      %c0_13 = arith.constant 0 : index
      %13 = vector.load %arg4[%c0_12, %c0_13] : memref<1x128xbf16, #tpu.memory_space<vmem>>, vector<1x128xbf16>
      %14 = arith.extf %13 : vector<1x128xbf16> to vector<1x128xf32>
      %15 = vector.broadcast %14 : vector<1x128xf32> to vector<32x128xf32>
      %16 = arith.addf %12, %15 : vector<32x128xf32>
      %c0_14 = arith.constant 0 : index
      %c0_15 = arith.constant 0 : index
      %17 = vector.load %arg5[%c0_14, %c0_15] : memref<32x128xbf16, #tpu.memory_space<vmem>>, vector<32x128xbf16>
      %18 = arith.extf %17 : vector<32x128xbf16> to vector<32x128xf32>
      %19 = arith.addf %16, %18 : vector<32x128xf32>
      %cst_16 = arith.constant dense<0.000000e+00> : vector<32xf32>
      %20 = vector.multi_reduction <add>, %19, %cst_16 [1] : vector<32x128xf32> to vector<32xf32>
      %21 = vector.shape_cast %20 : vector<32xf32> to vector<32x1xf32>
      %cst_17 = arith.constant 1.280000e+02 : f32
      %22 = vector.broadcast %cst_17 : f32 to vector<32x1xf32>
      %23 = arith.divf %21, %22 : vector<32x1xf32>
      %24 = vector.broadcast %23 : vector<32x1xf32> to vector<32x128xf32>
      %25 = arith.subf %19, %24 : vector<32x128xf32>
      %26 = arith.mulf %25, %25 : vector<32x128xf32>
      %cst_18 = arith.constant dense<0.000000e+00> : vector<32xf32>
      %27 = vector.multi_reduction <add>, %26, %cst_18 [1] : vector<32x128xf32> to vector<32xf32>
      %28 = vector.shape_cast %27 : vector<32xf32> to vector<32x1xf32>
      %cst_19 = arith.constant 1.280000e+02 : f32
      %29 = vector.broadcast %cst_19 : f32 to vector<32x1xf32>
      %30 = arith.divf %28, %29 : vector<32x1xf32>
      %31 = vector.broadcast %23 : vector<32x1xf32> to vector<32x128xf32>
      %32 = arith.subf %19, %31 : vector<32x128xf32>
      %cst_20 = arith.constant 9.99999996E-13 : f32
      %33 = vector.broadcast %cst_20 : f32 to vector<32x1xf32>
      %34 = arith.addf %30, %33 : vector<32x1xf32>
      %35 = math.rsqrt %34 : vector<32x1xf32>
      %36 = vector.broadcast %35 : vector<32x1xf32> to vector<32x128xf32>
      %37 = arith.mulf %32, %36 : vector<32x128xf32>
      %c0_21 = arith.constant 0 : index
      %c0_22 = arith.constant 0 : index
      %38 = vector.load %arg6[%c0_21, %c0_22] : memref<1x128xbf16, #tpu.memory_space<vmem>>, vector<1x128xbf16>
      %39 = arith.extf %38 : vector<1x128xbf16> to vector<1x128xf32>
      %40 = vector.broadcast %39 : vector<1x128xf32> to vector<32x128xf32>
      %41 = arith.mulf %37, %40 : vector<32x128xf32>
      %c0_23 = arith.constant 0 : index
      %c0_24 = arith.constant 0 : index
      %42 = vector.load %arg7[%c0_23, %c0_24] : memref<1x128xbf16, #tpu.memory_space<vmem>>, vector<1x128xbf16>
      %43 = arith.extf %42 : vector<1x128xbf16> to vector<1x128xf32>
      %44 = vector.broadcast %43 : vector<1x128xf32> to vector<32x128xf32>
      %45 = arith.addf %41, %44 : vector<32x128xf32>
      %46 = arith.truncf %45 : vector<32x128xf32> to vector<32x128xbf16>
      %c0_25 = arith.constant 0 : index
      %c0_26 = arith.constant 0 : index
      %47 = vector.load %arg8[%c0_25, %c0_26] : memref<32x128xbf16, #tpu.memory_space<vmem>>, vector<32x128xbf16>
      tpu.vector_store %arg8[%c0_25, %c0_26], %46 {strides = array<i32>} : memref<32x128xbf16, #tpu.memory_space<vmem>>, vector<32x128xbf16>,
    } else {
    }
    return
  }
  func.func @transform_0(%arg0: i32, %arg1: i32) -> (i32, i32) {
    %c0_i32 = arith.constant 0 : i32
    return %arg0, %arg1 : i32, i32
  }
  func.func @transform_1(%arg0: i32, %arg1: i32) -> (i32, i32) {
    %c0_i32 = arith.constant 0 : i32
    %c0_i32_0 = arith.constant 0 : i32
    return %arg1, %c0_i32 : i32, i32
  }
  func.func @transform_2(%arg0: i32, %arg1: i32) -> (i32, i32) {
    %c0_i32 = arith.constant 0 : i32
    %c0_i32_0 = arith.constant 0 : i32
    %c0_i32_1 = arith.constant 0 : i32
    return %c0_i32, %c0_i32_0 : i32, i32
  }
  func.func @transform_3(%arg0: i32, %arg1: i32) -> (i32, i32) {
    %c0_i32 = arith.constant 0 : i32
    %c0_i32_0 = arith.constant 0 : i32
    return %arg0, %c0_i32 : i32, i32
  }
  func.func @transform_4(%arg0: i32, %arg1: i32) -> (i32, i32) {
    %c0_i32 = arith.constant 0 : i32
    %c0_i32_0 = arith.constant 0 : i32
    %c0_i32_1 = arith.constant 0 : i32
    return %c0_i32, %c0_i32_0 : i32, i32
  }
  func.func @transform_5(%arg0: i32, %arg1: i32) -> (i32, i32) {
    %c0_i32 = arith.constant 0 : i32
    %c0_i32_0 = arith.constant 0 : i32
    %c0_i32_1 = arith.constant 0 : i32
    return %c0_i32, %c0_i32_0 : i32, i32
  }
  func.func @transform_6(%arg0: i32, %arg1: i32) -> (i32, i32) {
    %c0_i32 = arith.constant 0 : i32
    %c0_i32_0 = arith.constant 0 : i32
    return %arg0, %c0_i32 : i32, i32
  }
}

module attributes {stable_mosaic.version = 11 : i64} {
  func.func @_ffn_kernel(%arg0: i32, %arg1: i32, %arg2: memref<32x128xbf16, #tpu.memory_space<vmem>>, %arg3: memref<128x256xbf16, #tpu.memory_space<vmem>>, %arg4: memref<1x256xbf16, #tpu.memory_space<vmem>>, %arg5: memref<256x128xbf16, #tpu.memory_space<vmem>>, %arg6: memref<1x128xbf16, #tpu.memory_space<vmem>>, %arg7: memref<1x128xbf16, #tpu.memory_space<vmem>>, %arg8: memref<1x128xbf16, #tpu.memory_space<vmem>>, %arg9: memref<32x128xbf16, #tpu.memory_space<vmem>>, %arg10: memref<32x128xf32, #tpu.memory_space<vmem>>) attributes {dimension_semantics = [#tpu.dimension_semantics<parallel>, #tpu.dimension_semantics<arbitrary>], iteration_bounds = array<i64: 1, 1>, scalar_prefetch = 0 : i64, scratch_operands = 1 : i64, tpu.core_type = #tpu.core_type<tc>, window_params = [{transform_indices = @transform_0, window_bounds = array<i64: 32, 128>}, {transform_indices = @transform_1, window_bounds = array<i64: 128, 256>}, {transform_indices = @transform_2, window_bounds = array<i64: 1, 256>}, {transform_indices = @transform_3, window_bounds = array<i64: 256, 128>}, {pipeline_mode = #tpu.pipeline_mode<synchronous>, transform_indices = @transform_4, window_bounds = array<i64: 1, 128>}, {pipeline_mode = #tpu.pipeline_mode<synchronous>, transform_indices = @transform_5, window_bounds = array<i64: 1, 128>}, {pipeline_mode = #tpu.pipeline_mode<synchronous>, transform_indices = @transform_6, window_bounds = array<i64: 1, 128>}, {transform_indices = @transform_7, window_bounds = array<i64: 32, 128>}]} {
    %c0_i32 = arith.constant 0 : i32
    %0 = arith.cmpi eq, %arg1, %c0_i32 : i32
    %1 = arith.extui %0 : i1 to i32
    %c0_i32_0 = arith.constant 0 : i32
    %2 = arith.cmpi ne, %1, %c0_i32_0 : i32
    scf.if %2 {
      %cst_19 = arith.constant 0.000000e+00 : f32
      %32 = vector.broadcast %cst_19 : f32 to vector<32x128xf32>
      %c0_20 = arith.constant 0 : index
      %c0_21 = arith.constant 0 : index
      %33 = vector.load %arg10[%c0_20, %c0_21] : memref<32x128xf32, #tpu.memory_space<vmem>>, vector<32x128xf32>
      tpu.vector_store %arg10[%c0_20, %c0_21], %32 {strides = array<i32>} : memref<32x128xf32, #tpu.memory_space<vmem>>, vector<32x128xf32>,
    } else {
    }
    %c0 = arith.constant 0 : index
    %c0_1 = arith.constant 0 : index
    %3 = vector.load %arg2[%c0, %c0_1] : memref<32x128xbf16, #tpu.memory_space<vmem>>, vector<32x128xbf16>
    %c0_2 = arith.constant 0 : index
    %c0_3 = arith.constant 0 : index
    %4 = vector.load %arg3[%c0_2, %c0_3] : memref<128x256xbf16, #tpu.memory_space<vmem>>, vector<128x256xbf16>
    %cst = arith.constant dense<0.000000e+00> : vector<32x256xf32>
    %5 = tpu.matmul %3, %4, %cst {dimension_numbers = #tpu.dot_dimension_numbers<[1], [0], [0], [1], [0, 0, 1, 1], [], []>} : vector<32x128xbf16>, vector<128x256xbf16>, vector<32x256xf32> -> vector<32x256xf32>
    %c0_4 = arith.constant 0 : index
    %c0_5 = arith.constant 0 : index
    %6 = vector.load %arg4[%c0_4, %c0_5] : memref<1x256xbf16, #tpu.memory_space<vmem>>, vector<1x256xbf16>
    %7 = arith.extf %6 : vector<1x256xbf16> to vector<1x256xf32>
    %8 = vector.broadcast %7 : vector<1x256xf32> to vector<32x256xf32>
    %9 = arith.addf %5, %8 : vector<32x256xf32>
    %10 = arith.mulf %9, %9 : vector<32x256xf32>
    %11 = arith.mulf %9, %10 : vector<32x256xf32>
    %cst_6 = arith.constant 4.471500e-02 : f32
    %12 = vector.broadcast %cst_6 : f32 to vector<32x256xf32>
    %13 = arith.mulf %12, %11 : vector<32x256xf32>
    %14 = arith.addf %9, %13 : vector<32x256xf32>
    %cst_7 = arith.constant 0.797884583 : f32
    %15 = vector.broadcast %cst_7 : f32 to vector<32x256xf32>
    %16 = arith.mulf %15, %14 : vector<32x256xf32>
    %17 = math.tanh %16 : vector<32x256xf32>
    %cst_8 = arith.constant 1.000000e+00 : f32
    %18 = vector.broadcast %cst_8 : f32 to vector<32x256xf32>
    %19 = arith.addf %18, %17 : vector<32x256xf32>
    %cst_9 = arith.constant 5.000000e-01 : f32
    %20 = vector.broadcast %cst_9 : f32 to vector<32x256xf32>
    %21 = arith.mulf %20, %19 : vector<32x256xf32>
    %22 = arith.mulf %9, %21 : vector<32x256xf32>
    %c0_10 = arith.constant 0 : index
    %c0_11 = arith.constant 0 : index
    %23 = vector.load %arg10[%c0_10, %c0_11] : memref<32x128xf32, #tpu.memory_space<vmem>>, vector<32x128xf32>
    %24 = arith.truncf %22 : vector<32x256xf32> to vector<32x256xbf16>
    %c0_12 = arith.constant 0 : index
    %c0_13 = arith.constant 0 : index
    %25 = vector.load %arg5[%c0_12, %c0_13] : memref<256x128xbf16, #tpu.memory_space<vmem>>, vector<256x128xbf16>
    %cst_14 = arith.constant dense<0.000000e+00> : vector<32x128xf32>
    %26 = tpu.matmul %24, %25, %cst_14 {dimension_numbers = #tpu.dot_dimension_numbers<[1], [0], [0], [1], [0, 0, 1, 1], [], []>} : vector<32x256xbf16>, vector<256x128xbf16>, vector<32x128xf32> -> vector<32x128xf32>
    %27 = arith.addf %23, %26 : vector<32x128xf32>
    %c0_15 = arith.constant 0 : index
    %c0_16 = arith.constant 0 : index
    %28 = vector.load %arg10[%c0_15, %c0_16] : memref<32x128xf32, #tpu.memory_space<vmem>>, vector<32x128xf32>
    tpu.vector_store %arg10[%c0_15, %c0_16], %27 {strides = array<i32>} : memref<32x128xf32, #tpu.memory_space<vmem>>, vector<32x128xf32>,
    %c0_i32_17 = arith.constant 0 : i32
    %29 = arith.cmpi eq, %arg1, %c0_i32_17 : i32
    %30 = arith.extui %29 : i1 to i32
    %c0_i32_18 = arith.constant 0 : i32
    %31 = arith.cmpi ne, %30, %c0_i32_18 : i32
    scf.if %31 {
      %c0_19 = arith.constant 0 : index
      %c0_20 = arith.constant 0 : index
      %32 = vector.load %arg10[%c0_19, %c0_20] : memref<32x128xf32, #tpu.memory_space<vmem>>, vector<32x128xf32>
      %c0_21 = arith.constant 0 : index
      %c0_22 = arith.constant 0 : index
      %33 = vector.load %arg6[%c0_21, %c0_22] : memref<1x128xbf16, #tpu.memory_space<vmem>>, vector<1x128xbf16>
      %34 = arith.extf %33 : vector<1x128xbf16> to vector<1x128xf32>
      %35 = vector.broadcast %34 : vector<1x128xf32> to vector<32x128xf32>
      %36 = arith.addf %32, %35 : vector<32x128xf32>
      %c0_23 = arith.constant 0 : index
      %c0_24 = arith.constant 0 : index
      %37 = vector.load %arg2[%c0_23, %c0_24] : memref<32x128xbf16, #tpu.memory_space<vmem>>, vector<32x128xbf16>
      %38 = arith.extf %37 : vector<32x128xbf16> to vector<32x128xf32>
      %39 = arith.addf %36, %38 : vector<32x128xf32>
      %cst_25 = arith.constant dense<0.000000e+00> : vector<32xf32>
      %40 = vector.multi_reduction <add>, %39, %cst_25 [1] : vector<32x128xf32> to vector<32xf32>
      %41 = vector.shape_cast %40 : vector<32xf32> to vector<32x1xf32>
      %cst_26 = arith.constant 1.280000e+02 : f32
      %42 = vector.broadcast %cst_26 : f32 to vector<32x1xf32>
      %43 = arith.divf %41, %42 : vector<32x1xf32>
      %44 = vector.broadcast %43 : vector<32x1xf32> to vector<32x128xf32>
      %45 = arith.subf %39, %44 : vector<32x128xf32>
      %46 = arith.mulf %45, %45 : vector<32x128xf32>
      %cst_27 = arith.constant dense<0.000000e+00> : vector<32xf32>
      %47 = vector.multi_reduction <add>, %46, %cst_27 [1] : vector<32x128xf32> to vector<32xf32>
      %48 = vector.shape_cast %47 : vector<32xf32> to vector<32x1xf32>
      %cst_28 = arith.constant 1.280000e+02 : f32
      %49 = vector.broadcast %cst_28 : f32 to vector<32x1xf32>
      %50 = arith.divf %48, %49 : vector<32x1xf32>
      %51 = vector.broadcast %43 : vector<32x1xf32> to vector<32x128xf32>
      %52 = arith.subf %39, %51 : vector<32x128xf32>
      %cst_29 = arith.constant 9.99999996E-13 : f32
      %53 = vector.broadcast %cst_29 : f32 to vector<32x1xf32>
      %54 = arith.addf %50, %53 : vector<32x1xf32>
      %55 = math.rsqrt %54 : vector<32x1xf32>
      %56 = vector.broadcast %55 : vector<32x1xf32> to vector<32x128xf32>
      %57 = arith.mulf %52, %56 : vector<32x128xf32>
      %c0_30 = arith.constant 0 : index
      %c0_31 = arith.constant 0 : index
      %58 = vector.load %arg7[%c0_30, %c0_31] : memref<1x128xbf16, #tpu.memory_space<vmem>>, vector<1x128xbf16>
      %59 = arith.extf %58 : vector<1x128xbf16> to vector<1x128xf32>
      %60 = vector.broadcast %59 : vector<1x128xf32> to vector<32x128xf32>
      %61 = arith.mulf %57, %60 : vector<32x128xf32>
      %c0_32 = arith.constant 0 : index
      %c0_33 = arith.constant 0 : index
      %62 = vector.load %arg8[%c0_32, %c0_33] : memref<1x128xbf16, #tpu.memory_space<vmem>>, vector<1x128xbf16>
      %63 = arith.extf %62 : vector<1x128xbf16> to vector<1x128xf32>
      %64 = vector.broadcast %63 : vector<1x128xf32> to vector<32x128xf32>
      %65 = arith.addf %61, %64 : vector<32x128xf32>
      %66 = arith.truncf %65 : vector<32x128xf32> to vector<32x128xbf16>
      %c0_34 = arith.constant 0 : index
      %c0_35 = arith.constant 0 : index
      %67 = vector.load %arg9[%c0_34, %c0_35] : memref<32x128xbf16, #tpu.memory_space<vmem>>, vector<32x128xbf16>
      tpu.vector_store %arg9[%c0_34, %c0_35], %66 {strides = array<i32>} : memref<32x128xbf16, #tpu.memory_space<vmem>>, vector<32x128xbf16>,
    } else {
    }
    return
  }
  func.func @transform_0(%arg0: i32, %arg1: i32) -> (i32, i32) {
    %c0_i32 = arith.constant 0 : i32
    %c0_i32_0 = arith.constant 0 : i32
    return %arg0, %c0_i32 : i32, i32
  }
  func.func @transform_1(%arg0: i32, %arg1: i32) -> (i32, i32) {
    %c0_i32 = arith.constant 0 : i32
    %c0_i32_0 = arith.constant 0 : i32
    return %c0_i32, %arg1 : i32, i32
  }
  func.func @transform_2(%arg0: i32, %arg1: i32) -> (i32, i32) {
    %c0_i32 = arith.constant 0 : i32
    %c0_i32_0 = arith.constant 0 : i32
    return %c0_i32, %arg1 : i32, i32
  }
  func.func @transform_3(%arg0: i32, %arg1: i32) -> (i32, i32) {
    %c0_i32 = arith.constant 0 : i32
    %c0_i32_0 = arith.constant 0 : i32
    return %arg1, %c0_i32 : i32, i32
  }
  func.func @transform_4(%arg0: i32, %arg1: i32) -> (i32, i32) {
    %c0_i32 = arith.constant 0 : i32
    %c0_i32_0 = arith.constant 0 : i32
    %c0_i32_1 = arith.constant 0 : i32
    return %c0_i32, %c0_i32_0 : i32, i32
  }
  func.func @transform_5(%arg0: i32, %arg1: i32) -> (i32, i32) {
    %c0_i32 = arith.constant 0 : i32
    %c0_i32_0 = arith.constant 0 : i32
    %c0_i32_1 = arith.constant 0 : i32
    return %c0_i32, %c0_i32_0 : i32, i32
  }
  func.func @transform_6(%arg0: i32, %arg1: i32) -> (i32, i32) {
    %c0_i32 = arith.constant 0 : i32
    %c0_i32_0 = arith.constant 0 : i32
    %c0_i32_1 = arith.constant 0 : i32
    return %c0_i32, %c0_i32_0 : i32, i32
  }
  func.func @transform_7(%arg0: i32, %arg1: i32) -> (i32, i32) {
    %c0_i32 = arith.constant 0 : i32
    %c0_i32_0 = arith.constant 0 : i32
    return %arg0, %c0_i32 : i32, i32
  }
}

module attributes {stable_mosaic.version = 11 : i64} {
  func.func @_linear_kernel(%arg0: i32, %arg1: i32, %arg2: i32, %arg3: memref<16x128xbf16, #tpu.memory_space<vmem>>, %arg4: memref<128x384xbf16, #tpu.memory_space<vmem>>, %arg5: memref<1x384xbf16, #tpu.memory_space<vmem>>, %arg6: memref<16x384xbf16, #tpu.memory_space<vmem>>, %arg7: memref<16x384xf32, #tpu.memory_space<vmem>>) attributes {dimension_semantics = [#tpu.dimension_semantics<parallel>, #tpu.dimension_semantics<parallel>, #tpu.dimension_semantics<arbitrary>], iteration_bounds = array<i64: 1, 1, 1>, scalar_prefetch = 0 : i64, scratch_operands = 1 : i64, tpu.core_type = #tpu.core_type<tc>, window_params = [{transform_indices = @transform_0, window_bounds = array<i64: 16, 128>}, {transform_indices = @transform_1, window_bounds = array<i64: 128, 384>}, {transform_indices = @transform_2, window_bounds = array<i64: 1, 384>}, {transform_indices = @transform_3, window_bounds = array<i64: 16, 384>}]} {
    %c0_i32 = arith.constant 0 : i32
    %0 = arith.cmpi eq, %arg2, %c0_i32 : i32
    %1 = arith.extui %0 : i1 to i32
    %c0_i32_0 = arith.constant 0 : i32
    %2 = arith.cmpi ne, %1, %c0_i32_0 : i32
    scf.if %2 {
      %cst_10 = arith.constant 0.000000e+00 : f32
      %12 = vector.broadcast %cst_10 : f32 to vector<16x384xf32>
      %c0_11 = arith.constant 0 : index
      %c0_12 = arith.constant 0 : index
      %13 = vector.load %arg7[%c0_11, %c0_12] : memref<16x384xf32, #tpu.memory_space<vmem>>, vector<16x384xf32>
      tpu.vector_store %arg7[%c0_11, %c0_12], %12 {strides = array<i32>} : memref<16x384xf32, #tpu.memory_space<vmem>>, vector<16x384xf32>,
    } else {
    }
    %c0 = arith.constant 0 : index
    %c0_1 = arith.constant 0 : index
    %3 = vector.load %arg7[%c0, %c0_1] : memref<16x384xf32, #tpu.memory_space<vmem>>, vector<16x384xf32>
    %c0_2 = arith.constant 0 : index
    %c0_3 = arith.constant 0 : index
    %4 = vector.load %arg3[%c0_2, %c0_3] : memref<16x128xbf16, #tpu.memory_space<vmem>>, vector<16x128xbf16>
    %c0_4 = arith.constant 0 : index
    %c0_5 = arith.constant 0 : index
    %5 = vector.load %arg4[%c0_4, %c0_5] : memref<128x384xbf16, #tpu.memory_space<vmem>>, vector<128x384xbf16>
    %cst = arith.constant dense<0.000000e+00> : vector<16x384xf32>
    %6 = tpu.matmul %4, %5, %cst {dimension_numbers = #tpu.dot_dimension_numbers<[1], [0], [0], [1], [0, 0, 1, 1], [], []>} : vector<16x128xbf16>, vector<128x384xbf16>, vector<16x384xf32> -> vector<16x384xf32>
    %7 = arith.addf %3, %6 : vector<16x384xf32>
    %c0_6 = arith.constant 0 : index
    %c0_7 = arith.constant 0 : index
    %8 = vector.load %arg7[%c0_6, %c0_7] : memref<16x384xf32, #tpu.memory_space<vmem>>, vector<16x384xf32>
    tpu.vector_store %arg7[%c0_6, %c0_7], %7 {strides = array<i32>} : memref<16x384xf32, #tpu.memory_space<vmem>>, vector<16x384xf32>,
    %c0_i32_8 = arith.constant 0 : i32
    %9 = arith.cmpi eq, %arg2, %c0_i32_8 : i32
    %10 = arith.extui %9 : i1 to i32
    %c0_i32_9 = arith.constant 0 : i32
    %11 = arith.cmpi ne, %10, %c0_i32_9 : i32
    scf.if %11 {
      %c0_10 = arith.constant 0 : index
      %c0_11 = arith.constant 0 : index
      %12 = vector.load %arg7[%c0_10, %c0_11] : memref<16x384xf32, #tpu.memory_space<vmem>>, vector<16x384xf32>
      %c0_12 = arith.constant 0 : index
      %c0_13 = arith.constant 0 : index
      %13 = vector.load %arg5[%c0_12, %c0_13] : memref<1x384xbf16, #tpu.memory_space<vmem>>, vector<1x384xbf16>
      %14 = arith.extf %13 : vector<1x384xbf16> to vector<1x384xf32>
      %15 = vector.broadcast %14 : vector<1x384xf32> to vector<16x384xf32>
      %16 = arith.addf %12, %15 : vector<16x384xf32>
      %17 = arith.truncf %16 : vector<16x384xf32> to vector<16x384xbf16>
      %c0_14 = arith.constant 0 : index
      %c0_15 = arith.constant 0 : index
      %18 = vector.load %arg6[%c0_14, %c0_15] : memref<16x384xbf16, #tpu.memory_space<vmem>>, vector<16x384xbf16>
      tpu.vector_store %arg6[%c0_14, %c0_15], %17 {strides = array<i32>} : memref<16x384xbf16, #tpu.memory_space<vmem>>, vector<16x384xbf16>,
    } else {
    }
    return
  }
  func.func @transform_0(%arg0: i32, %arg1: i32, %arg2: i32) -> (i32, i32) {
    %c0_i32 = arith.constant 0 : i32
    return %arg0, %arg2 : i32, i32
  }
  func.func @transform_1(%arg0: i32, %arg1: i32, %arg2: i32) -> (i32, i32) {
    %c0_i32 = arith.constant 0 : i32
    return %arg2, %arg1 : i32, i32
  }
  func.func @transform_2(%arg0: i32, %arg1: i32, %arg2: i32) -> (i32, i32) {
    %c0_i32 = arith.constant 0 : i32
    %c0_i32_0 = arith.constant 0 : i32
    return %c0_i32, %arg1 : i32, i32
  }
  func.func @transform_3(%arg0: i32, %arg1: i32, %arg2: i32) -> (i32, i32) {
    %c0_i32 = arith.constant 0 : i32
    return %arg0, %arg1 : i32, i32
  }
}

module attributes {stable_mosaic.version = 11 : i64} {
  func.func @_mha_kernel(%arg0: i32, %arg1: i32, %arg2: memref<2x8x128xbf16, #tpu.memory_space<vmem>>, %arg3: memref<2x8x256xbf16, #tpu.memory_space<vmem>>, %arg4: memref<2x1x1x8xf32, #tpu.memory_space<vmem>>, %arg5: memref<2x8x128xbf16, #tpu.memory_space<vmem>>) attributes {dimension_semantics = [#tpu.dimension_semantics<parallel>, #tpu.dimension_semantics<parallel>], iteration_bounds = array<i64: 1, 1>, scalar_prefetch = 0 : i64, scratch_operands = 0 : i64, tpu.core_type = #tpu.core_type<tc>, window_params = [{transform_indices = @transform_0, window_bounds = array<i64: 2, 8, 128>}, {transform_indices = @transform_1, window_bounds = array<i64: 2, 8, 256>}, {transform_indices = @transform_2, window_bounds = array<i64: 2, 1, 1, 8>}, {transform_indices = @transform_3, window_bounds = array<i64: 2, 8, 128>}]} {
    %c0 = arith.constant 0 : index
    %c0_0 = arith.constant 0 : index
    %c0_1 = arith.constant 0 : index
    %c0_2 = arith.constant 0 : index
    %0 = vector.load %arg4[%c0, %c0_0, %c0_1, %c0_2] : memref<2x1x1x8xf32, #tpu.memory_space<vmem>>, vector<2x1x1x8xf32>
    %1 = vector.shape_cast %0 : vector<2x1x1x8xf32> to vector<2x1x8xf32>
    %c0_3 = arith.constant 0 : index
    %c0_4 = arith.constant 0 : index
    %c0_5 = arith.constant 0 : index
    %2 = vector.load %arg2[%c0_3, %c0_4, %c0_5] : memref<2x8x128xbf16, #tpu.memory_space<vmem>>, vector<2x8x32xbf16>
    %c0_6 = arith.constant 0 : index
    %c0_7 = arith.constant 0 : index
    %c0_8 = arith.constant 0 : index
    %3 = vector.load %arg3[%c0_6, %c0_7, %c0_8] : memref<2x8x256xbf16, #tpu.memory_space<vmem>>, vector<2x8x32xbf16>
    %c0_9 = arith.constant 0 : index
    %c0_10 = arith.constant 0 : index
    %c128 = arith.constant 128 : index
    %4 = vector.load %arg3[%c0_9, %c0_10, %c128] : memref<2x8x256xbf16, #tpu.memory_space<vmem>>, vector<2x8x32xbf16>
    %cst = arith.constant dense<0.000000e+00> : vector<2x8x8xf32>
    %5 = tpu.matmul %2, %3, %cst {dimension_numbers = #tpu.dot_dimension_numbers<[2], [2], [1], [1], [0, 0, 0, 1, 1, 1], [0], [0]>} : vector<2x8x32xbf16>, vector<2x8x32xbf16>, vector<2x8x8xf32> -> vector<2x8x8xf32>
    %cst_11 = arith.constant 0.176776692 : f32
    %6 = vector.broadcast %cst_11 : f32 to vector<2x8x8xf32>
    %7 = arith.mulf %5, %6 : vector<2x8x8xf32>
    %8 = vector.broadcast %1 : vector<2x1x8xf32> to vector<2x8x8xf32>
    %9 = arith.addf %7, %8 : vector<2x8x8xf32>
    %cst_12 = arith.constant dense<0xFF800000> : vector<2x8xf32>
    %10 = vector.multi_reduction <maximumf>, %9, %cst_12 [2] : vector<2x8x8xf32> to vector<2x8xf32>
    %11 = vector.shape_cast %10 : vector<2x8xf32> to vector<2x8x1xf32>
    %12 = vector.broadcast %11 : vector<2x8x1xf32> to vector<2x8x8xf32>
    %13 = arith.subf %9, %12 : vector<2x8x8xf32>
    %14 = math.exp %13 : vector<2x8x8xf32>
    %cst_13 = arith.constant dense<0.000000e+00> : vector<2x8xf32>
    %15 = vector.multi_reduction <add>, %14, %cst_13 [2] : vector<2x8x8xf32> to vector<2x8xf32>
    %16 = vector.shape_cast %15 : vector<2x8xf32> to vector<2x8x1xf32>
    %17 = tpu.reciprocal %16 {approx = true} : vector<2x8x1xf32> -> vector<2x8x1xf32>
    %18 = vector.broadcast %17 : vector<2x8x1xf32> to vector<2x8x8xf32>
    %19 = arith.mulf %14, %18 : vector<2x8x8xf32>
    %20 = arith.truncf %19 : vector<2x8x8xf32> to vector<2x8x8xbf16>
    %cst_14 = arith.constant dense<0.000000e+00> : vector<2x8x32xf32>
    %21 = tpu.matmul %20, %4, %cst_14 {dimension_numbers = #tpu.dot_dimension_numbers<[2], [1], [1], [2], [0, 0, 0, 1, 1, 2], [0], [0]>} : vector<2x8x8xbf16>, vector<2x8x32xbf16>, vector<2x8x32xf32> -> vector<2x8x32xf32>
    %22 = arith.truncf %21 : vector<2x8x32xf32> to vector<2x8x32xbf16>
    %c0_15 = arith.constant 0 : index
    %c0_16 = arith.constant 0 : index
    %c0_17 = arith.constant 0 : index
    %23 = vector.load %arg5[%c0_15, %c0_16, %c0_17] : memref<2x8x128xbf16, #tpu.memory_space<vmem>>, vector<2x8x32xbf16>
    tpu.vector_store %arg5[%c0_15, %c0_16, %c0_17], %22 {strides = array<i32>} : memref<2x8x128xbf16, #tpu.memory_space<vmem>>, vector<2x8x32xbf16>,
    %c0_18 = arith.constant 0 : index
    %c0_19 = arith.constant 0 : index
    %c32 = arith.constant 32 : index
    %24 = vector.load %arg2[%c0_18, %c0_19, %c32] : memref<2x8x128xbf16, #tpu.memory_space<vmem>>, vector<2x8x32xbf16>
    %c0_20 = arith.constant 0 : index
    %c0_21 = arith.constant 0 : index
    %c32_22 = arith.constant 32 : index
    %25 = vector.load %arg3[%c0_20, %c0_21, %c32_22] : memref<2x8x256xbf16, #tpu.memory_space<vmem>>, vector<2x8x32xbf16>
    %c0_23 = arith.constant 0 : index
    %c0_24 = arith.constant 0 : index
    %c160 = arith.constant 160 : index
    %26 = vector.load %arg3[%c0_23, %c0_24, %c160] : memref<2x8x256xbf16, #tpu.memory_space<vmem>>, vector<2x8x32xbf16>
    %cst_25 = arith.constant dense<0.000000e+00> : vector<2x8x8xf32>
    %27 = tpu.matmul %24, %25, %cst_25 {dimension_numbers = #tpu.dot_dimension_numbers<[2], [2], [1], [1], [0, 0, 0, 1, 1, 1], [0], [0]>} : vector<2x8x32xbf16>, vector<2x8x32xbf16>, vector<2x8x8xf32> -> vector<2x8x8xf32>
    %cst_26 = arith.constant 0.176776692 : f32
    %28 = vector.broadcast %cst_26 : f32 to vector<2x8x8xf32>
    %29 = arith.mulf %27, %28 : vector<2x8x8xf32>
    %30 = vector.broadcast %1 : vector<2x1x8xf32> to vector<2x8x8xf32>
    %31 = arith.addf %29, %30 : vector<2x8x8xf32>
    %cst_27 = arith.constant dense<0xFF800000> : vector<2x8xf32>
    %32 = vector.multi_reduction <maximumf>, %31, %cst_27 [2] : vector<2x8x8xf32> to vector<2x8xf32>
    %33 = vector.shape_cast %32 : vector<2x8xf32> to vector<2x8x1xf32>
    %34 = vector.broadcast %33 : vector<2x8x1xf32> to vector<2x8x8xf32>
    %35 = arith.subf %31, %34 : vector<2x8x8xf32>
    %36 = math.exp %35 : vector<2x8x8xf32>
    %cst_28 = arith.constant dense<0.000000e+00> : vector<2x8xf32>
    %37 = vector.multi_reduction <add>, %36, %cst_28 [2] : vector<2x8x8xf32> to vector<2x8xf32>
    %38 = vector.shape_cast %37 : vector<2x8xf32> to vector<2x8x1xf32>
    %39 = tpu.reciprocal %38 {approx = true} : vector<2x8x1xf32> -> vector<2x8x1xf32>
    %40 = vector.broadcast %39 : vector<2x8x1xf32> to vector<2x8x8xf32>
    %41 = arith.mulf %36, %40 : vector<2x8x8xf32>
    %42 = arith.truncf %41 : vector<2x8x8xf32> to vector<2x8x8xbf16>
    %cst_29 = arith.constant dense<0.000000e+00> : vector<2x8x32xf32>
    %43 = tpu.matmul %42, %26, %cst_29 {dimension_numbers = #tpu.dot_dimension_numbers<[2], [1], [1], [2], [0, 0, 0, 1, 1, 2], [0], [0]>} : vector<2x8x8xbf16>, vector<2x8x32xbf16>, vector<2x8x32xf32> -> vector<2x8x32xf32>
    %44 = arith.truncf %43 : vector<2x8x32xf32> to vector<2x8x32xbf16>
    %c0_30 = arith.constant 0 : index
    %c0_31 = arith.constant 0 : index
    %c32_32 = arith.constant 32 : index
    %45 = vector.load %arg5[%c0_30, %c0_31, %c32_32] : memref<2x8x128xbf16, #tpu.memory_space<vmem>>, vector<2x8x32xbf16>
    tpu.vector_store %arg5[%c0_30, %c0_31, %c32_32], %44 {strides = array<i32>} : memref<2x8x128xbf16, #tpu.memory_space<vmem>>, vector<2x8x32xbf16>,
    %c0_33 = arith.constant 0 : index
    %c0_34 = arith.constant 0 : index
    %c64 = arith.constant 64 : index
    %46 = vector.load %arg2[%c0_33, %c0_34, %c64] : memref<2x8x128xbf16, #tpu.memory_space<vmem>>, vector<2x8x32xbf16>
    %c0_35 = arith.constant 0 : index
    %c0_36 = arith.constant 0 : index
    %c64_37 = arith.constant 64 : index
    %47 = vector.load %arg3[%c0_35, %c0_36, %c64_37] : memref<2x8x256xbf16, #tpu.memory_space<vmem>>, vector<2x8x32xbf16>
    %c0_38 = arith.constant 0 : index
    %c0_39 = arith.constant 0 : index
    %c192 = arith.constant 192 : index
    %48 = vector.load %arg3[%c0_38, %c0_39, %c192] : memref<2x8x256xbf16, #tpu.memory_space<vmem>>, vector<2x8x32xbf16>
    %cst_40 = arith.constant dense<0.000000e+00> : vector<2x8x8xf32>
    %49 = tpu.matmul %46, %47, %cst_40 {dimension_numbers = #tpu.dot_dimension_numbers<[2], [2], [1], [1], [0, 0, 0, 1, 1, 1], [0], [0]>} : vector<2x8x32xbf16>, vector<2x8x32xbf16>, vector<2x8x8xf32> -> vector<2x8x8xf32>
    %cst_41 = arith.constant 0.176776692 : f32
    %50 = vector.broadcast %cst_41 : f32 to vector<2x8x8xf32>
    %51 = arith.mulf %49, %50 : vector<2x8x8xf32>
    %52 = vector.broadcast %1 : vector<2x1x8xf32> to vector<2x8x8xf32>
    %53 = arith.addf %51, %52 : vector<2x8x8xf32>
    %cst_42 = arith.constant dense<0xFF800000> : vector<2x8xf32>
    %54 = vector.multi_reduction <maximumf>, %53, %cst_42 [2] : vector<2x8x8xf32> to vector<2x8xf32>
    %55 = vector.shape_cast %54 : vector<2x8xf32> to vector<2x8x1xf32>
    %56 = vector.broadcast %55 : vector<2x8x1xf32> to vector<2x8x8xf32>
    %57 = arith.subf %53, %56 : vector<2x8x8xf32>
    %58 = math.exp %57 : vector<2x8x8xf32>
    %cst_43 = arith.constant dense<0.000000e+00> : vector<2x8xf32>
    %59 = vector.multi_reduction <add>, %58, %cst_43 [2] : vector<2x8x8xf32> to vector<2x8xf32>
    %60 = vector.shape_cast %59 : vector<2x8xf32> to vector<2x8x1xf32>
    %61 = tpu.reciprocal %60 {approx = true} : vector<2x8x1xf32> -> vector<2x8x1xf32>
    %62 = vector.broadcast %61 : vector<2x8x1xf32> to vector<2x8x8xf32>
    %63 = arith.mulf %58, %62 : vector<2x8x8xf32>
    %64 = arith.truncf %63 : vector<2x8x8xf32> to vector<2x8x8xbf16>
    %cst_44 = arith.constant dense<0.000000e+00> : vector<2x8x32xf32>
    %65 = tpu.matmul %64, %48, %cst_44 {dimension_numbers = #tpu.dot_dimension_numbers<[2], [1], [1], [2], [0, 0, 0, 1, 1, 2], [0], [0]>} : vector<2x8x8xbf16>, vector<2x8x32xbf16>, vector<2x8x32xf32> -> vector<2x8x32xf32>
    %66 = arith.truncf %65 : vector<2x8x32xf32> to vector<2x8x32xbf16>
    %c0_45 = arith.constant 0 : index
    %c0_46 = arith.constant 0 : index
    %c64_47 = arith.constant 64 : index
    %67 = vector.load %arg5[%c0_45, %c0_46, %c64_47] : memref<2x8x128xbf16, #tpu.memory_space<vmem>>, vector<2x8x32xbf16>
    tpu.vector_store %arg5[%c0_45, %c0_46, %c64_47], %66 {strides = array<i32>} : memref<2x8x128xbf16, #tpu.memory_space<vmem>>, vector<2x8x32xbf16>,
    %c0_48 = arith.constant 0 : index
    %c0_49 = arith.constant 0 : index
    %c96 = arith.constant 96 : index
    %68 = vector.load %arg2[%c0_48, %c0_49, %c96] : memref<2x8x128xbf16, #tpu.memory_space<vmem>>, vector<2x8x32xbf16>
    %c0_50 = arith.constant 0 : index
    %c0_51 = arith.constant 0 : index
    %c96_52 = arith.constant 96 : index
    %69 = vector.load %arg3[%c0_50, %c0_51, %c96_52] : memref<2x8x256xbf16, #tpu.memory_space<vmem>>, vector<2x8x32xbf16>
    %c0_53 = arith.constant 0 : index
    %c0_54 = arith.constant 0 : index
    %c224 = arith.constant 224 : index
    %70 = vector.load %arg3[%c0_53, %c0_54, %c224] : memref<2x8x256xbf16, #tpu.memory_space<vmem>>, vector<2x8x32xbf16>
    %cst_55 = arith.constant dense<0.000000e+00> : vector<2x8x8xf32>
    %71 = tpu.matmul %68, %69, %cst_55 {dimension_numbers = #tpu.dot_dimension_numbers<[2], [2], [1], [1], [0, 0, 0, 1, 1, 1], [0], [0]>} : vector<2x8x32xbf16>, vector<2x8x32xbf16>, vector<2x8x8xf32> -> vector<2x8x8xf32>
    %cst_56 = arith.constant 0.176776692 : f32
    %72 = vector.broadcast %cst_56 : f32 to vector<2x8x8xf32>
    %73 = arith.mulf %71, %72 : vector<2x8x8xf32>
    %74 = vector.broadcast %1 : vector<2x1x8xf32> to vector<2x8x8xf32>
    %75 = arith.addf %73, %74 : vector<2x8x8xf32>
    %cst_57 = arith.constant dense<0xFF800000> : vector<2x8xf32>
    %76 = vector.multi_reduction <maximumf>, %75, %cst_57 [2] : vector<2x8x8xf32> to vector<2x8xf32>
    %77 = vector.shape_cast %76 : vector<2x8xf32> to vector<2x8x1xf32>
    %78 = vector.broadcast %77 : vector<2x8x1xf32> to vector<2x8x8xf32>
    %79 = arith.subf %75, %78 : vector<2x8x8xf32>
    %80 = math.exp %79 : vector<2x8x8xf32>
    %cst_58 = arith.constant dense<0.000000e+00> : vector<2x8xf32>
    %81 = vector.multi_reduction <add>, %80, %cst_58 [2] : vector<2x8x8xf32> to vector<2x8xf32>
    %82 = vector.shape_cast %81 : vector<2x8xf32> to vector<2x8x1xf32>
    %83 = tpu.reciprocal %82 {approx = true} : vector<2x8x1xf32> -> vector<2x8x1xf32>
    %84 = vector.broadcast %83 : vector<2x8x1xf32> to vector<2x8x8xf32>
    %85 = arith.mulf %80, %84 : vector<2x8x8xf32>
    %86 = arith.truncf %85 : vector<2x8x8xf32> to vector<2x8x8xbf16>
    %cst_59 = arith.constant dense<0.000000e+00> : vector<2x8x32xf32>
    %87 = tpu.matmul %86, %70, %cst_59 {dimension_numbers = #tpu.dot_dimension_numbers<[2], [1], [1], [2], [0, 0, 0, 1, 1, 2], [0], [0]>} : vector<2x8x8xbf16>, vector<2x8x32xbf16>, vector<2x8x32xf32> -> vector<2x8x32xf32>
    %88 = arith.truncf %87 : vector<2x8x32xf32> to vector<2x8x32xbf16>
    %c0_60 = arith.constant 0 : index
    %c0_61 = arith.constant 0 : index
    %c96_62 = arith.constant 96 : index
    %89 = vector.load %arg5[%c0_60, %c0_61, %c96_62] : memref<2x8x128xbf16, #tpu.memory_space<vmem>>, vector<2x8x32xbf16>
    tpu.vector_store %arg5[%c0_60, %c0_61, %c96_62], %88 {strides = array<i32>} : memref<2x8x128xbf16, #tpu.memory_space<vmem>>, vector<2x8x32xbf16>,
    return
  }
  func.func @transform_0(%arg0: i32, %arg1: i32) -> (i32, i32, i32) {
    %c2_i32 = arith.constant 2 : i32
    %c0_i32 = arith.constant 0 : i32
    return %arg0, %arg1, %c2_i32 : i32, i32, i32
  }
  func.func @transform_1(%arg0: i32, %arg1: i32) -> (i32, i32, i32) {
    %c0_i32 = arith.constant 0 : i32
    %c0_i32_0 = arith.constant 0 : i32
    %c0_i32_1 = arith.constant 0 : i32
    return %arg0, %c0_i32, %c0_i32_0 : i32, i32, i32
  }
  func.func @transform_2(%arg0: i32, %arg1: i32) -> (i32, i32, i32, i32) {
    %c0_i32 = arith.constant 0 : i32
    %c0_i32_0 = arith.constant 0 : i32
    %c0_i32_1 = arith.constant 0 : i32
    %c0_i32_2 = arith.constant 0 : i32
    return %arg0, %c0_i32, %c0_i32_0, %c0_i32_1 : i32, i32, i32, i32
  }
  func.func @transform_3(%arg0: i32, %arg1: i32) -> (i32, i32, i32) {
    %c0_i32 = arith.constant 0 : i32
    %c0_i32_0 = arith.constant 0 : i32
    return %arg0, %arg1, %c0_i32 : i32, i32, i32
  }
}

module attributes {stable_mosaic.version = 11 : i64} {
  func.func @_proj_add_ln_kernel(%arg0: i32, %arg1: i32, %arg2: memref<16x128xbf16, #tpu.memory_space<vmem>>, %arg3: memref<128x128xbf16, #tpu.memory_space<vmem>>, %arg4: memref<1x128xbf16, #tpu.memory_space<vmem>>, %arg5: memref<16x128xbf16, #tpu.memory_space<vmem>>, %arg6: memref<1x128xbf16, #tpu.memory_space<vmem>>, %arg7: memref<1x128xbf16, #tpu.memory_space<vmem>>, %arg8: memref<16x128xbf16, #tpu.memory_space<vmem>>, %arg9: memref<16x128xf32, #tpu.memory_space<vmem>>) attributes {dimension_semantics = [#tpu.dimension_semantics<parallel>, #tpu.dimension_semantics<arbitrary>], iteration_bounds = array<i64: 1, 1>, scalar_prefetch = 0 : i64, scratch_operands = 1 : i64, tpu.core_type = #tpu.core_type<tc>, window_params = [{transform_indices = @transform_0, window_bounds = array<i64: 16, 128>}, {transform_indices = @transform_1, window_bounds = array<i64: 128, 128>}, {pipeline_mode = #tpu.pipeline_mode<synchronous>, transform_indices = @transform_2, window_bounds = array<i64: 1, 128>}, {transform_indices = @transform_3, window_bounds = array<i64: 16, 128>}, {pipeline_mode = #tpu.pipeline_mode<synchronous>, transform_indices = @transform_4, window_bounds = array<i64: 1, 128>}, {pipeline_mode = #tpu.pipeline_mode<synchronous>, transform_indices = @transform_5, window_bounds = array<i64: 1, 128>}, {transform_indices = @transform_6, window_bounds = array<i64: 16, 128>}]} {
    %c0_i32 = arith.constant 0 : i32
    %0 = arith.cmpi eq, %arg1, %c0_i32 : i32
    %1 = arith.extui %0 : i1 to i32
    %c0_i32_0 = arith.constant 0 : i32
    %2 = arith.cmpi ne, %1, %c0_i32_0 : i32
    scf.if %2 {
      %cst_10 = arith.constant 0.000000e+00 : f32
      %12 = vector.broadcast %cst_10 : f32 to vector<16x128xf32>
      %c0_11 = arith.constant 0 : index
      %c0_12 = arith.constant 0 : index
      %13 = vector.load %arg9[%c0_11, %c0_12] : memref<16x128xf32, #tpu.memory_space<vmem>>, vector<16x128xf32>
      tpu.vector_store %arg9[%c0_11, %c0_12], %12 {strides = array<i32>} : memref<16x128xf32, #tpu.memory_space<vmem>>, vector<16x128xf32>,
    } else {
    }
    %c0 = arith.constant 0 : index
    %c0_1 = arith.constant 0 : index
    %3 = vector.load %arg9[%c0, %c0_1] : memref<16x128xf32, #tpu.memory_space<vmem>>, vector<16x128xf32>
    %c0_2 = arith.constant 0 : index
    %c0_3 = arith.constant 0 : index
    %4 = vector.load %arg2[%c0_2, %c0_3] : memref<16x128xbf16, #tpu.memory_space<vmem>>, vector<16x128xbf16>
    %c0_4 = arith.constant 0 : index
    %c0_5 = arith.constant 0 : index
    %5 = vector.load %arg3[%c0_4, %c0_5] : memref<128x128xbf16, #tpu.memory_space<vmem>>, vector<128x128xbf16>
    %cst = arith.constant dense<0.000000e+00> : vector<16x128xf32>
    %6 = tpu.matmul %4, %5, %cst {dimension_numbers = #tpu.dot_dimension_numbers<[1], [0], [0], [1], [0, 0, 1, 1], [], []>} : vector<16x128xbf16>, vector<128x128xbf16>, vector<16x128xf32> -> vector<16x128xf32>
    %7 = arith.addf %3, %6 : vector<16x128xf32>
    %c0_6 = arith.constant 0 : index
    %c0_7 = arith.constant 0 : index
    %8 = vector.load %arg9[%c0_6, %c0_7] : memref<16x128xf32, #tpu.memory_space<vmem>>, vector<16x128xf32>
    tpu.vector_store %arg9[%c0_6, %c0_7], %7 {strides = array<i32>} : memref<16x128xf32, #tpu.memory_space<vmem>>, vector<16x128xf32>,
    %c0_i32_8 = arith.constant 0 : i32
    %9 = arith.cmpi eq, %arg1, %c0_i32_8 : i32
    %10 = arith.extui %9 : i1 to i32
    %c0_i32_9 = arith.constant 0 : i32
    %11 = arith.cmpi ne, %10, %c0_i32_9 : i32
    scf.if %11 {
      %c0_10 = arith.constant 0 : index
      %c0_11 = arith.constant 0 : index
      %12 = vector.load %arg9[%c0_10, %c0_11] : memref<16x128xf32, #tpu.memory_space<vmem>>, vector<16x128xf32>
      %c0_12 = arith.constant 0 : index
      %c0_13 = arith.constant 0 : index
      %13 = vector.load %arg4[%c0_12, %c0_13] : memref<1x128xbf16, #tpu.memory_space<vmem>>, vector<1x128xbf16>
      %14 = arith.extf %13 : vector<1x128xbf16> to vector<1x128xf32>
      %15 = vector.broadcast %14 : vector<1x128xf32> to vector<16x128xf32>
      %16 = arith.addf %12, %15 : vector<16x128xf32>
      %c0_14 = arith.constant 0 : index
      %c0_15 = arith.constant 0 : index
      %17 = vector.load %arg5[%c0_14, %c0_15] : memref<16x128xbf16, #tpu.memory_space<vmem>>, vector<16x128xbf16>
      %18 = arith.extf %17 : vector<16x128xbf16> to vector<16x128xf32>
      %19 = arith.addf %16, %18 : vector<16x128xf32>
      %cst_16 = arith.constant dense<0.000000e+00> : vector<16xf32>
      %20 = vector.multi_reduction <add>, %19, %cst_16 [1] : vector<16x128xf32> to vector<16xf32>
      %21 = vector.shape_cast %20 : vector<16xf32> to vector<16x1xf32>
      %cst_17 = arith.constant 1.280000e+02 : f32
      %22 = vector.broadcast %cst_17 : f32 to vector<16x1xf32>
      %23 = arith.divf %21, %22 : vector<16x1xf32>
      %24 = vector.broadcast %23 : vector<16x1xf32> to vector<16x128xf32>
      %25 = arith.subf %19, %24 : vector<16x128xf32>
      %26 = arith.mulf %25, %25 : vector<16x128xf32>
      %cst_18 = arith.constant dense<0.000000e+00> : vector<16xf32>
      %27 = vector.multi_reduction <add>, %26, %cst_18 [1] : vector<16x128xf32> to vector<16xf32>
      %28 = vector.shape_cast %27 : vector<16xf32> to vector<16x1xf32>
      %cst_19 = arith.constant 1.280000e+02 : f32
      %29 = vector.broadcast %cst_19 : f32 to vector<16x1xf32>
      %30 = arith.divf %28, %29 : vector<16x1xf32>
      %31 = vector.broadcast %23 : vector<16x1xf32> to vector<16x128xf32>
      %32 = arith.subf %19, %31 : vector<16x128xf32>
      %cst_20 = arith.constant 9.99999996E-13 : f32
      %33 = vector.broadcast %cst_20 : f32 to vector<16x1xf32>
      %34 = arith.addf %30, %33 : vector<16x1xf32>
      %35 = math.rsqrt %34 : vector<16x1xf32>
      %36 = vector.broadcast %35 : vector<16x1xf32> to vector<16x128xf32>
      %37 = arith.mulf %32, %36 : vector<16x128xf32>
      %c0_21 = arith.constant 0 : index
      %c0_22 = arith.constant 0 : index
      %38 = vector.load %arg6[%c0_21, %c0_22] : memref<1x128xbf16, #tpu.memory_space<vmem>>, vector<1x128xbf16>
      %39 = arith.extf %38 : vector<1x128xbf16> to vector<1x128xf32>
      %40 = vector.broadcast %39 : vector<1x128xf32> to vector<16x128xf32>
      %41 = arith.mulf %37, %40 : vector<16x128xf32>
      %c0_23 = arith.constant 0 : index
      %c0_24 = arith.constant 0 : index
      %42 = vector.load %arg7[%c0_23, %c0_24] : memref<1x128xbf16, #tpu.memory_space<vmem>>, vector<1x128xbf16>
      %43 = arith.extf %42 : vector<1x128xbf16> to vector<1x128xf32>
      %44 = vector.broadcast %43 : vector<1x128xf32> to vector<16x128xf32>
      %45 = arith.addf %41, %44 : vector<16x128xf32>
      %46 = arith.truncf %45 : vector<16x128xf32> to vector<16x128xbf16>
      %c0_25 = arith.constant 0 : index
      %c0_26 = arith.constant 0 : index
      %47 = vector.load %arg8[%c0_25, %c0_26] : memref<16x128xbf16, #tpu.memory_space<vmem>>, vector<16x128xbf16>
      tpu.vector_store %arg8[%c0_25, %c0_26], %46 {strides = array<i32>} : memref<16x128xbf16, #tpu.memory_space<vmem>>, vector<16x128xbf16>,
    } else {
    }
    return
  }
  func.func @transform_0(%arg0: i32, %arg1: i32) -> (i32, i32) {
    %c0_i32 = arith.constant 0 : i32
    return %arg0, %arg1 : i32, i32
  }
  func.func @transform_1(%arg0: i32, %arg1: i32) -> (i32, i32) {
    %c0_i32 = arith.constant 0 : i32
    %c0_i32_0 = arith.constant 0 : i32
    return %arg1, %c0_i32 : i32, i32
  }
  func.func @transform_2(%arg0: i32, %arg1: i32) -> (i32, i32) {
    %c0_i32 = arith.constant 0 : i32
    %c0_i32_0 = arith.constant 0 : i32
    %c0_i32_1 = arith.constant 0 : i32
    return %c0_i32, %c0_i32_0 : i32, i32
  }
  func.func @transform_3(%arg0: i32, %arg1: i32) -> (i32, i32) {
    %c0_i32 = arith.constant 0 : i32
    %c0_i32_0 = arith.constant 0 : i32
    return %arg0, %c0_i32 : i32, i32
  }
  func.func @transform_4(%arg0: i32, %arg1: i32) -> (i32, i32) {
    %c0_i32 = arith.constant 0 : i32
    %c0_i32_0 = arith.constant 0 : i32
    %c0_i32_1 = arith.constant 0 : i32
    return %c0_i32, %c0_i32_0 : i32, i32
  }
  func.func @transform_5(%arg0: i32, %arg1: i32) -> (i32, i32) {
    %c0_i32 = arith.constant 0 : i32
    %c0_i32_0 = arith.constant 0 : i32
    %c0_i32_1 = arith.constant 0 : i32
    return %c0_i32, %c0_i32_0 : i32, i32
  }
  func.func @transform_6(%arg0: i32, %arg1: i32) -> (i32, i32) {
    %c0_i32 = arith.constant 0 : i32
    %c0_i32_0 = arith.constant 0 : i32
    return %arg0, %c0_i32 : i32, i32
  }
}

module attributes {stable_mosaic.version = 11 : i64} {
  func.func @_ffn_kernel(%arg0: i32, %arg1: i32, %arg2: memref<16x128xbf16, #tpu.memory_space<vmem>>, %arg3: memref<128x256xbf16, #tpu.memory_space<vmem>>, %arg4: memref<1x256xbf16, #tpu.memory_space<vmem>>, %arg5: memref<256x128xbf16, #tpu.memory_space<vmem>>, %arg6: memref<1x128xbf16, #tpu.memory_space<vmem>>, %arg7: memref<1x128xbf16, #tpu.memory_space<vmem>>, %arg8: memref<1x128xbf16, #tpu.memory_space<vmem>>, %arg9: memref<16x128xbf16, #tpu.memory_space<vmem>>, %arg10: memref<16x128xf32, #tpu.memory_space<vmem>>) attributes {dimension_semantics = [#tpu.dimension_semantics<parallel>, #tpu.dimension_semantics<arbitrary>], iteration_bounds = array<i64: 1, 1>, scalar_prefetch = 0 : i64, scratch_operands = 1 : i64, tpu.core_type = #tpu.core_type<tc>, window_params = [{transform_indices = @transform_0, window_bounds = array<i64: 16, 128>}, {transform_indices = @transform_1, window_bounds = array<i64: 128, 256>}, {transform_indices = @transform_2, window_bounds = array<i64: 1, 256>}, {transform_indices = @transform_3, window_bounds = array<i64: 256, 128>}, {pipeline_mode = #tpu.pipeline_mode<synchronous>, transform_indices = @transform_4, window_bounds = array<i64: 1, 128>}, {pipeline_mode = #tpu.pipeline_mode<synchronous>, transform_indices = @transform_5, window_bounds = array<i64: 1, 128>}, {pipeline_mode = #tpu.pipeline_mode<synchronous>, transform_indices = @transform_6, window_bounds = array<i64: 1, 128>}, {transform_indices = @transform_7, window_bounds = array<i64: 16, 128>}]} {
    %c0_i32 = arith.constant 0 : i32
    %0 = arith.cmpi eq, %arg1, %c0_i32 : i32
    %1 = arith.extui %0 : i1 to i32
    %c0_i32_0 = arith.constant 0 : i32
    %2 = arith.cmpi ne, %1, %c0_i32_0 : i32
    scf.if %2 {
      %cst_19 = arith.constant 0.000000e+00 : f32
      %32 = vector.broadcast %cst_19 : f32 to vector<16x128xf32>
      %c0_20 = arith.constant 0 : index
      %c0_21 = arith.constant 0 : index
      %33 = vector.load %arg10[%c0_20, %c0_21] : memref<16x128xf32, #tpu.memory_space<vmem>>, vector<16x128xf32>
      tpu.vector_store %arg10[%c0_20, %c0_21], %32 {strides = array<i32>} : memref<16x128xf32, #tpu.memory_space<vmem>>, vector<16x128xf32>,
    } else {
    }
    %c0 = arith.constant 0 : index
    %c0_1 = arith.constant 0 : index
    %3 = vector.load %arg2[%c0, %c0_1] : memref<16x128xbf16, #tpu.memory_space<vmem>>, vector<16x128xbf16>
    %c0_2 = arith.constant 0 : index
    %c0_3 = arith.constant 0 : index
    %4 = vector.load %arg3[%c0_2, %c0_3] : memref<128x256xbf16, #tpu.memory_space<vmem>>, vector<128x256xbf16>
    %cst = arith.constant dense<0.000000e+00> : vector<16x256xf32>
    %5 = tpu.matmul %3, %4, %cst {dimension_numbers = #tpu.dot_dimension_numbers<[1], [0], [0], [1], [0, 0, 1, 1], [], []>} : vector<16x128xbf16>, vector<128x256xbf16>, vector<16x256xf32> -> vector<16x256xf32>
    %c0_4 = arith.constant 0 : index
    %c0_5 = arith.constant 0 : index
    %6 = vector.load %arg4[%c0_4, %c0_5] : memref<1x256xbf16, #tpu.memory_space<vmem>>, vector<1x256xbf16>
    %7 = arith.extf %6 : vector<1x256xbf16> to vector<1x256xf32>
    %8 = vector.broadcast %7 : vector<1x256xf32> to vector<16x256xf32>
    %9 = arith.addf %5, %8 : vector<16x256xf32>
    %10 = arith.mulf %9, %9 : vector<16x256xf32>
    %11 = arith.mulf %9, %10 : vector<16x256xf32>
    %cst_6 = arith.constant 4.471500e-02 : f32
    %12 = vector.broadcast %cst_6 : f32 to vector<16x256xf32>
    %13 = arith.mulf %12, %11 : vector<16x256xf32>
    %14 = arith.addf %9, %13 : vector<16x256xf32>
    %cst_7 = arith.constant 0.797884583 : f32
    %15 = vector.broadcast %cst_7 : f32 to vector<16x256xf32>
    %16 = arith.mulf %15, %14 : vector<16x256xf32>
    %17 = math.tanh %16 : vector<16x256xf32>
    %cst_8 = arith.constant 1.000000e+00 : f32
    %18 = vector.broadcast %cst_8 : f32 to vector<16x256xf32>
    %19 = arith.addf %18, %17 : vector<16x256xf32>
    %cst_9 = arith.constant 5.000000e-01 : f32
    %20 = vector.broadcast %cst_9 : f32 to vector<16x256xf32>
    %21 = arith.mulf %20, %19 : vector<16x256xf32>
    %22 = arith.mulf %9, %21 : vector<16x256xf32>
    %c0_10 = arith.constant 0 : index
    %c0_11 = arith.constant 0 : index
    %23 = vector.load %arg10[%c0_10, %c0_11] : memref<16x128xf32, #tpu.memory_space<vmem>>, vector<16x128xf32>
    %24 = arith.truncf %22 : vector<16x256xf32> to vector<16x256xbf16>
    %c0_12 = arith.constant 0 : index
    %c0_13 = arith.constant 0 : index
    %25 = vector.load %arg5[%c0_12, %c0_13] : memref<256x128xbf16, #tpu.memory_space<vmem>>, vector<256x128xbf16>
    %cst_14 = arith.constant dense<0.000000e+00> : vector<16x128xf32>
    %26 = tpu.matmul %24, %25, %cst_14 {dimension_numbers = #tpu.dot_dimension_numbers<[1], [0], [0], [1], [0, 0, 1, 1], [], []>} : vector<16x256xbf16>, vector<256x128xbf16>, vector<16x128xf32> -> vector<16x128xf32>
    %27 = arith.addf %23, %26 : vector<16x128xf32>
    %c0_15 = arith.constant 0 : index
    %c0_16 = arith.constant 0 : index
    %28 = vector.load %arg10[%c0_15, %c0_16] : memref<16x128xf32, #tpu.memory_space<vmem>>, vector<16x128xf32>
    tpu.vector_store %arg10[%c0_15, %c0_16], %27 {strides = array<i32>} : memref<16x128xf32, #tpu.memory_space<vmem>>, vector<16x128xf32>,
    %c0_i32_17 = arith.constant 0 : i32
    %29 = arith.cmpi eq, %arg1, %c0_i32_17 : i32
    %30 = arith.extui %29 : i1 to i32
    %c0_i32_18 = arith.constant 0 : i32
    %31 = arith.cmpi ne, %30, %c0_i32_18 : i32
    scf.if %31 {
      %c0_19 = arith.constant 0 : index
      %c0_20 = arith.constant 0 : index
      %32 = vector.load %arg10[%c0_19, %c0_20] : memref<16x128xf32, #tpu.memory_space<vmem>>, vector<16x128xf32>
      %c0_21 = arith.constant 0 : index
      %c0_22 = arith.constant 0 : index
      %33 = vector.load %arg6[%c0_21, %c0_22] : memref<1x128xbf16, #tpu.memory_space<vmem>>, vector<1x128xbf16>
      %34 = arith.extf %33 : vector<1x128xbf16> to vector<1x128xf32>
      %35 = vector.broadcast %34 : vector<1x128xf32> to vector<16x128xf32>
      %36 = arith.addf %32, %35 : vector<16x128xf32>
      %c0_23 = arith.constant 0 : index
      %c0_24 = arith.constant 0 : index
      %37 = vector.load %arg2[%c0_23, %c0_24] : memref<16x128xbf16, #tpu.memory_space<vmem>>, vector<16x128xbf16>
      %38 = arith.extf %37 : vector<16x128xbf16> to vector<16x128xf32>
      %39 = arith.addf %36, %38 : vector<16x128xf32>
      %cst_25 = arith.constant dense<0.000000e+00> : vector<16xf32>
      %40 = vector.multi_reduction <add>, %39, %cst_25 [1] : vector<16x128xf32> to vector<16xf32>
      %41 = vector.shape_cast %40 : vector<16xf32> to vector<16x1xf32>
      %cst_26 = arith.constant 1.280000e+02 : f32
      %42 = vector.broadcast %cst_26 : f32 to vector<16x1xf32>
      %43 = arith.divf %41, %42 : vector<16x1xf32>
      %44 = vector.broadcast %43 : vector<16x1xf32> to vector<16x128xf32>
      %45 = arith.subf %39, %44 : vector<16x128xf32>
      %46 = arith.mulf %45, %45 : vector<16x128xf32>
      %cst_27 = arith.constant dense<0.000000e+00> : vector<16xf32>
      %47 = vector.multi_reduction <add>, %46, %cst_27 [1] : vector<16x128xf32> to vector<16xf32>
      %48 = vector.shape_cast %47 : vector<16xf32> to vector<16x1xf32>
      %cst_28 = arith.constant 1.280000e+02 : f32
      %49 = vector.broadcast %cst_28 : f32 to vector<16x1xf32>
      %50 = arith.divf %48, %49 : vector<16x1xf32>
      %51 = vector.broadcast %43 : vector<16x1xf32> to vector<16x128xf32>
      %52 = arith.subf %39, %51 : vector<16x128xf32>
      %cst_29 = arith.constant 9.99999996E-13 : f32
      %53 = vector.broadcast %cst_29 : f32 to vector<16x1xf32>
      %54 = arith.addf %50, %53 : vector<16x1xf32>
      %55 = math.rsqrt %54 : vector<16x1xf32>
      %56 = vector.broadcast %55 : vector<16x1xf32> to vector<16x128xf32>
      %57 = arith.mulf %52, %56 : vector<16x128xf32>
      %c0_30 = arith.constant 0 : index
      %c0_31 = arith.constant 0 : index
      %58 = vector.load %arg7[%c0_30, %c0_31] : memref<1x128xbf16, #tpu.memory_space<vmem>>, vector<1x128xbf16>
      %59 = arith.extf %58 : vector<1x128xbf16> to vector<1x128xf32>
      %60 = vector.broadcast %59 : vector<1x128xf32> to vector<16x128xf32>
      %61 = arith.mulf %57, %60 : vector<16x128xf32>
      %c0_32 = arith.constant 0 : index
      %c0_33 = arith.constant 0 : index
      %62 = vector.load %arg8[%c0_32, %c0_33] : memref<1x128xbf16, #tpu.memory_space<vmem>>, vector<1x128xbf16>
      %63 = arith.extf %62 : vector<1x128xbf16> to vector<1x128xf32>
      %64 = vector.broadcast %63 : vector<1x128xf32> to vector<16x128xf32>
      %65 = arith.addf %61, %64 : vector<16x128xf32>
      %66 = arith.truncf %65 : vector<16x128xf32> to vector<16x128xbf16>
      %c0_34 = arith.constant 0 : index
      %c0_35 = arith.constant 0 : index
      %67 = vector.load %arg9[%c0_34, %c0_35] : memref<16x128xbf16, #tpu.memory_space<vmem>>, vector<16x128xbf16>
      tpu.vector_store %arg9[%c0_34, %c0_35], %66 {strides = array<i32>} : memref<16x128xbf16, #tpu.memory_space<vmem>>, vector<16x128xbf16>,
    } else {
    }
    return
  }
  func.func @transform_0(%arg0: i32, %arg1: i32) -> (i32, i32) {
    %c0_i32 = arith.constant 0 : i32
    %c0_i32_0 = arith.constant 0 : i32
    return %arg0, %c0_i32 : i32, i32
  }
  func.func @transform_1(%arg0: i32, %arg1: i32) -> (i32, i32) {
    %c0_i32 = arith.constant 0 : i32
    %c0_i32_0 = arith.constant 0 : i32
    return %c0_i32, %arg1 : i32, i32
  }
  func.func @transform_2(%arg0: i32, %arg1: i32) -> (i32, i32) {
    %c0_i32 = arith.constant 0 : i32
    %c0_i32_0 = arith.constant 0 : i32
    return %c0_i32, %arg1 : i32, i32
  }
  func.func @transform_3(%arg0: i32, %arg1: i32) -> (i32, i32) {
    %c0_i32 = arith.constant 0 : i32
    %c0_i32_0 = arith.constant 0 : i32
    return %arg1, %c0_i32 : i32, i32
  }
  func.func @transform_4(%arg0: i32, %arg1: i32) -> (i32, i32) {
    %c0_i32 = arith.constant 0 : i32
    %c0_i32_0 = arith.constant 0 : i32
    %c0_i32_1 = arith.constant 0 : i32
    return %c0_i32, %c0_i32_0 : i32, i32
  }
  func.func @transform_5(%arg0: i32, %arg1: i32) -> (i32, i32) {
    %c0_i32 = arith.constant 0 : i32
    %c0_i32_0 = arith.constant 0 : i32
    %c0_i32_1 = arith.constant 0 : i32
    return %c0_i32, %c0_i32_0 : i32, i32
  }
  func.func @transform_6(%arg0: i32, %arg1: i32) -> (i32, i32) {
    %c0_i32 = arith.constant 0 : i32
    %c0_i32_0 = arith.constant 0 : i32
    %c0_i32_1 = arith.constant 0 : i32
    return %c0_i32, %c0_i32_0 : i32, i32
  }
  func.func @transform_7(%arg0: i32, %arg1: i32) -> (i32, i32) {
    %c0_i32 = arith.constant 0 : i32
    %c0_i32_0 = arith.constant 0 : i32
    return %arg0, %c0_i32 : i32, i32
  }
}

</mosaic_0001>

<bundles_post_ra>
// kernel: bert_x_layer.15
= control target key start
LH: loop header
LB: loop body
LE: loop exit
PB: predicated region body
PF: predicated region fallthrough
CT: control target
= control target key end

     0   :  { %v477_v41 = vmov 128.0   ;;  %s618_s1 = inlined_call_operand.vmem [shape: bf16[128,128], index: 1, kind: input, shape index: {}]   ;;  %s619_s0 = inlined_call_operand.vmem [shape: bf16[48,128], index: 0, kind: input, shape index: {}]   ;;  %s620_s2 = inlined_call_operand.vmem [shape: bf16[1,128], index: 2, kind: input, shape index: {}]   ;;  %s621_s3 = inlined_call_operand.vmem [shape: bf16[48,128], index: 3, kind: input, shape index: {}]   ;;  %s622_s4 = inlined_call_operand.vmem [shape: bf16[1,128], index: 4, kind: input, shape index: {}]   ;;  %s623_s5 = inlined_call_operand.vmem [shape: bf16[1,128], index: 5, kind: input, shape index: {}]   ;;  %s624_s6 = inlined_call_operand.vmem [shape: bf16[48,128], index: 6, kind: output, shape index: {}]  }
   0x1   :  { %v414_v0 = vld [vmem:[%s618_s1 + $0x38] sm:$0xff]  ;;  %v413_v1 = vld [vmem:[%s618_s1 + $0x30] sm:$0xff]  ;;  %v412_v2 = vld [vmem:[%s618_s1 + $0x28] sm:$0xff]  ;;  %463 = vrcp.f32 %v477_v41 }
   0x2   :  { %127 = vmatpush.bf16.msra.mxu0 %v414_v0  ;;  %446 = vmatpush.bf16.msra.mxu1 %v414_v0  ;;  %v411_v3 = vld [vmem:[%s618_s1 + $0x20] sm:$0xff]  ;;  %v410_v4 = vld [vmem:[%s618_s1 + $0x18] sm:$0xff]  ;;  %v409_v5 = vld [vmem:[%s618_s1 + $0x10] sm:$0xff] }
   0x3   :  { %447 = vmatpush.bf16.msra.mxu2 %v414_v0  ;;  %v408_v6 = vld [vmem:[%s618_s1 + $0x8] sm:$0xff]  ;;  %v407_v7 = vld [vmem:[%s618_s1] sm:$0xff]  ;;  %v406_v10 = vld [vmem:[%s619_s0 + $0x10] sm:$0xff] }
   0x4   :  { %v404_v8 = vld [vmem:[%s619_s0] sm:$0xff]  ;;  %v405_v9 = vld [vmem:[%s619_s0 + $0x8] sm:$0xff]  ;;  %v443_v24 = vld [vmem:[%s621_s3 + $0x10] sm:$0xff]  }
   0x5   :  { %v172_v11 = vld [vmem:[%s620_s2] sm:$0x1]  ;;  %v442_v13 = vld [vmem:[%s621_s3 + $0x8] sm:$0xff]   ;;  %v425_v25 = vunpack.c.l.bf16 %v443_v24  ;;  %v426_v37 = vunpack.c.h.bf16 %v443_v24 }
   0x6   :  { %128 = vmatpush.bf16.msra.mxu0 %v413_v1  ;;  %448 = vmatpush.bf16.msra.mxu1 %v413_v1  ;;  %v173_v12 = vunpack.c.l.bf16 %v172_v11  ;;  %v416_v14 = vld [vmem:[%s621_s3] sm:$0xff]   ;;  %v421_v16 = vunpack.c.l.bf16 %v442_v13  ;;  %v422_v27 = vunpack.c.h.bf16 %v442_v13 }
   0x7   :  { %449 = vmatpush.bf16.msra.mxu2 %v413_v1  ;;  %v417_v17 = vunpack.c.l.bf16 %v416_v14  ;;  %v418_v28 = vunpack.c.h.bf16 %v416_v14  ;;  %v464_v42 = vpop.eup %463 }
   0x8   :  { %v174_v15 = vperm.slane %v173_v12, 0  ;;  %v212_v43 = vmul.f32 128.0, %v464_v42  ;;  %vm216_vm0 = vweird.f32 %v464_v42 }
   0xa   :  { %129 = vmatpush.bf16.msra.mxu0 %v412_v2  ;;  %450 = vmatpush.bf16.msra.mxu1 %v412_v2  ;;  %v213_v44 = vsub.f32 1.0, %v212_v43 }
   0xb   :  { %451 = vmatpush.bf16.msra.mxu2 %v412_v2 }
   0xc   :  { %v214_v45 = vmul.f32 %v464_v42, %v213_v44  ;;  %v335_v44 = vld [vmem:[%s623_s5] sm:$0x1] }
   0xe   :  { %130 = vmatpush.bf16.msra.mxu0 %v411_v3  ;;  %452 = vmatpush.bf16.msra.mxu1 %v411_v3  ;;  %v215_v46 = vadd.f32 %v464_v42, %v214_v45 }
   0xf   :  { %453 = vmatpush.bf16.msra.mxu2 %v411_v3 }
  0x10   :  { %v217_v47 = vsel %vm216_vm0, %v464_v42, %v215_v46 }
  0x12   :  { %131 = vmatpush.bf16.msra.mxu0 %v410_v4  ;;  %454 = vmatpush.bf16.msra.mxu1 %v410_v4 }
  0x13   :  { %455 = vmatpush.bf16.msra.mxu2 %v410_v4 }
  0x16   :  { %132 = vmatpush.bf16.msra.mxu0 %v409_v5  ;;  %456 = vmatpush.bf16.msra.mxu1 %v409_v5 }
  0x17   :  { %457 = vmatpush.bf16.msra.mxu2 %v409_v5 }
  0x1a   :  { %133 = vmatpush.bf16.msra.mxu0 %v408_v6  ;;  %458 = vmatpush.bf16.msra.mxu1 %v408_v6 }
  0x1b   :  { %459 = vmatpush.bf16.msra.mxu2 %v408_v6 }
  0x1e   :  { %134 = vmatpush.bf16.msra.mxu0 %v407_v7  ;;  %460 = vmatpush.bf16.msra.mxu1 %v407_v7 }
  0x1f   :  { %461 = vmatpush.bf16.msra.mxu2 %v407_v7 }
  0x21   :  { %135 = vmatmul.bf16.vlgmr.msra.gmra.mxu0 %v404_v8  ;;  %140 = vmatmul.bf16.vlgmr.msra.gmra.mxu1 %v405_v9 }
  0x22   :  { %145 = vmatmul.bf16.vlgmr.msra.gmra.mxu2 %v406_v10 }
  0x9e   :  { %v136_v18 = vpop.f32.mrf.mxu0  ;;  %v141_v19 = vpop.f32.mrf.mxu1 }
  0x9f   :  { %v175_v20 = vadd.f32 %v174_v15, %v136_v18  ;;  %v177_v21 = vadd.f32 %v174_v15, %v141_v19 }
  0xa1   :  { %v195_v22 = vadd.f32 %v421_v16, %v177_v21  ;;  %v193_v23 = vadd.f32 %v417_v17, %v175_v20 }
  0xa3   :  { %203 = vadd.xlane.f32.xlu1 %v195_v22  ;;  %199 = vadd.xlane.f32.xlu0 %v193_v23 }
  0xa5   :  { %v146_v26 = vpop.f32.mrf.mxu2 }
  0xa6   :  { %v179_v29 = vadd.f32 %v174_v15, %v146_v26  ;;  %v138_v30 = vpop.f32.mrf.mxu0  ;;  %v143_v31 = vpop.f32.mrf.mxu1 }
  0xa7   :  { %v176_v32 = vadd.f32 %v174_v15, %v138_v30  ;;  %v178_v33 = vadd.f32 %v174_v15, %v143_v31 }
  0xa8   :  { %v197_v34 = vadd.f32 %v425_v25, %v179_v29 }
  0xa9   :  { %v196_v35 = vadd.f32 %v422_v27, %v178_v33  ;;  %v194_v36 = vadd.f32 %v418_v28, %v176_v32 }
  0xaa   :  { %207 = vadd.xlane.f32.xlu2 %v197_v34 }
  0xab   :  { %205 = vadd.xlane.f32.xlu1 %v196_v35  ;;  %201 = vadd.xlane.f32.xlu0 %v194_v36 }
  0xad   :  { %v148_v38 = vpop.f32.mrf.mxu2 }
  0xae   :  { %v180_v39 = vadd.f32 %v174_v15, %v148_v38 }
  0xb0   :  { %v198_v40 = vadd.f32 %v426_v37, %v180_v39 }
  0xb2   :  { %209 = vadd.xlane.f32.xlu2 %v198_v40 }
 0x116   :  { %v204_v48 = vpop.xlane.xlu1 %203  ;;  %v200_v49 = vpop.xlane.xlu0 %199 }
 0x117   :  { %v220_v50 = vmul.f32 %v217_v47, %v204_v48  ;;  %v218_v51 = vmul.f32 %v217_v47, %v200_v49  ;;  %v336_v49 = vunpack.c.l.bf16 %v335_v44 }
 0x119   :  { %v558_v52 = vsub.f32 %v195_v22, %v220_v50  ;;  %v560_v53 = vsub.f32 %v193_v23, %v218_v51 }
 0x11b   :  { %v232_v54 = vmul.f32 %v558_v52, %v558_v52  ;;  %v230_v55 = vmul.f32 %v560_v53, %v560_v53 }
 0x11d   :  { %v208_v56 = vpop.xlane.xlu2 %207  ;;  %240 = vadd.xlane.f32.xlu2 %v232_v54  ;;  %236 = vadd.xlane.f32.xlu0 %v230_v55 }
 0x11e   :  { %v206_v57 = vpop.xlane.xlu1 %205  ;;  %v202_v58 = vpop.xlane.xlu0 %201  ;;  %v222_v63 = vmul.f32 %v217_v47, %v208_v56 }
 0x11f   :  { %v221_v59 = vmul.f32 %v217_v47, %v206_v57  ;;  %v219_v60 = vmul.f32 %v217_v47, %v202_v58 }
 0x120   :  { %v574_v4 = vsub.f32 %v197_v34, %v222_v63 }
 0x121   :  { %v566_v61 = vsub.f32 %v196_v35, %v221_v59  ;;  %v568_v62 = vsub.f32 %v194_v36, %v219_v60  ;;  %v326_v35 = vld [vmem:[%s622_s4] sm:$0x1] }
 0x122   :  { %v234_v7 = vmul.f32 %v574_v4, %v574_v4  ;;  %v327_v43 = vunpack.c.l.bf16 %v326_v35 }
 0x123   :  { %v233_v0 = vmul.f32 %v566_v61, %v566_v61  ;;  %v231_v1 = vmul.f32 %v568_v62, %v568_v62 }
 0x124   :  { %v328_v55 = vperm.slane %v327_v43, 0 }
 0x125   :  { %v210_v2 = vpop.xlane.xlu2 %209  ;;  %242 = vadd.xlane.f32.xlu0 %v233_v0  ;;  %238 = vadd.xlane.f32.xlu1 %v231_v1 }
 0x126   :  { %v223_v3 = vmul.f32 %v217_v47, %v210_v2 }
 0x128   :  { %v576_v5 = vsub.f32 %v198_v40, %v223_v3 }
 0x12a   :  { %v235_v6 = vmul.f32 %v576_v5, %v576_v5 }
 0x12c   :  { %246 = vadd.xlane.f32.xlu2 %v235_v6  ;;  %v337_v6 = vperm.slane %v336_v49, 0 }
 0x12d   :  { %244 = vadd.xlane.f32.xlu1 %v234_v7 }
 0x190   :  { %v241_v8 = vpop.xlane.xlu2 %240  ;;  %v237_v9 = vpop.xlane.xlu0 %236 }
 0x191   :  { %v250_v10 = vmul.f32 %v241_v8, %v217_v47  ;;  %v248_v11 = vmul.f32 %v237_v9, %v217_v47 }
 0x193   :  { %v256_v12 = vadd.f32 1e-12, %v250_v10  ;;  %v254_v13 = vadd.f32 1e-12, %v248_v11 }
 0x195   :  { %465 = vrsqrt.f32 %v256_v12  ;;  %vm266_vm2 = vweird.f32 %v254_v13  ;;  %vm286_vm5 = vweird.f32 %v256_v12 }
 0x196   :  { %467 = vrsqrt.f32 %v254_v13 }
 0x198   :  { %v239_v14 = vpop.xlane.xlu1 %238  ;;  %v243_v15 = vpop.xlane.xlu0 %242 }
 0x199   :  { %v249_v16 = vmul.f32 %v239_v14, %v217_v47  ;;  %v251_v17 = vmul.f32 %v243_v15, %v217_v47 }
 0x19b   :  { %v466_v18 = vpop.eup %465  ;;  %v255_v19 = vadd.f32 1e-12, %v249_v16  ;;  %v582_v20 = vadd.f32 1e-12, %v251_v17 }
 0x19c   :  { %v468_v21 = vpop.eup %467  ;;  %v281_v22 = vmul.f32 %v466_v18, %v256_v12  ;;  %vm287_vm3 = vweird.f32 %v466_v18 }
 0x19d   :  { %v261_v23 = vmul.f32 %v468_v21, %v254_v13  ;;  %469 = vrsqrt.f32 %v255_v19  ;;  %vm267_vm1 = vweird.f32 %v468_v21  ;;  %vm288_vm6 = vmor %vm286_vm5, %vm287_vm3  ;;  %vm276_vm9 = vweird.f32 %v255_v19 }
 0x19e   :  { %v282_v24 = vmul.f32 %v466_v18, %v281_v22  ;;  %471 = vrsqrt.f32 %v582_v20  ;;  %vm268_vm4 = vmor %vm266_vm2, %vm267_vm1  ;;  %vm296_vm11 = vweird.f32 %v582_v20 }
 0x19f   :  { %v262_v25 = vmul.f32 %v468_v21, %v261_v23  ;;  %v247_v26 = vpop.xlane.xlu2 %246 }
 0x1a0   :  { %v283_v27 = vmul.f32 0.5, %v282_v24  ;;  %v253_v28 = vmul.f32 %v247_v26, %v217_v47  ;;  %v245_v29 = vpop.xlane.xlu1 %244 }
 0x1a1   :  { %v263_v30 = vmul.f32 0.5, %v262_v25  ;;  %v252_v31 = vmul.f32 %v245_v29, %v217_v47 }
 0x1a2   :  { %v284_v32 = vsub.f32 1.5, %v283_v27  ;;  %v585_v33 = vadd.f32 1e-12, %v253_v28 }
 0x1a3   :  { %v470_v34 = vpop.eup %469  ;;  %v264_v36 = vsub.f32 1.5, %v263_v30  ;;  %v590_v37 = vadd.f32 1e-12, %v252_v31 }
 0x1a4   :  { %v472_v38 = vpop.eup %471  ;;  %v271_v39 = vmul.f32 %v470_v34, %v255_v19  ;;  %473 = vrsqrt.f32 %v585_v33  ;;  %v285_v40 = vmul.f32 %v466_v18, %v284_v32  ;;  %vm277_vm7 = vweird.f32 %v470_v34 }
 0x1a5   :  { %v265_v41 = vmul.f32 %v468_v21, %v264_v36  ;;  %v291_v42 = vmul.f32 %v472_v38, %v582_v20  ;;  %475 = vrsqrt.f32 %v590_v37  ;;  %vm297_vm8 = vweird.f32 %v472_v38  ;;  %vm278_vm10 = vmor %vm276_vm9, %vm277_vm7 }
 0x1a6   :  { %v272_v45 = vmul.f32 %v470_v34, %v271_v39  ;;  %v289_v50 = vsel %vm288_vm6, %v466_v18, %v285_v40  ;;  %vm298_vm12 = vmor %vm296_vm11, %vm297_vm8  ;;  %vm316_vm14 = vweird.f32 %v585_v33  ;;  %vm306_vm1 = vweird.f32 %v590_v37 }
 0x1a7   :  { %v269_v46 = vsel %vm268_vm4, %v468_v21, %v265_v41  ;;  %v292_v47 = vmul.f32 %v472_v38, %v291_v42  ;;  %v322_v63 = vmul.f32 %v289_v50, %v558_v52 }
 0x1a8   :  { %v273_v48 = vmul.f32 0.5, %v272_v45  ;;  %v320_v56 = vmul.f32 %v269_v46, %v560_v53 }
 0x1a9   :  { %v293_v51 = vmul.f32 0.5, %v292_v47  ;;  %v331_v12 = vmul.f32 %v328_v55, %v322_v63 }
 0x1aa   :  { %v474_v54 = vpop.eup %473  ;;  %v274_v57 = vsub.f32 1.5, %v273_v48  ;;  %v329_v53 = vmul.f32 %v328_v55, %v320_v56 }
 0x1ab   :  { %v294_v58 = vsub.f32 1.5, %v293_v51  ;;  %v311_v59 = vmul.f32 %v474_v54, %v585_v33  ;;  %v476_v60 = vpop.eup %475  ;;  %vm317_vm13 = vweird.f32 %v474_v54  ;;  %v340_v21 = vadd.f32 %v337_v6, %v331_v12 }
 0x1ac   :  { %v275_v0 = vmul.f32 %v470_v34, %v274_v57  ;;  %v301_v3 = vmul.f32 %v476_v60, %v590_v37  ;;  %v338_v16 = vadd.f32 %v337_v6, %v329_v53  ;;  %vm307_vm15 = vweird.f32 %v476_v60  ;;  %vm318_vm0 = vmor %vm316_vm14, %vm317_vm13 }
 0x1ad   :  { %v295_v1 = vmul.f32 %v472_v38, %v294_v58  ;;  %v312_v2 = vmul.f32 %v474_v54, %v311_v59  ;;  %vm308_vm2 = vmor %vm306_vm1, %vm307_vm15 }
 0x1ae   :  { %v279_v7 = vsel %vm278_vm10, %v470_v34, %v275_v0  ;;  %v302_v11 = vmul.f32 %v476_v60, %v301_v3 }
 0x1af   :  { %v321_v8 = vmul.f32 %v279_v7, %v568_v62  ;;  %v299_v9 = vsel %vm298_vm12, %v472_v38, %v295_v1  ;;  %v313_v10 = vmul.f32 0.5, %v312_v2 }
 0x1b0   :  { %v323_v52 = vmul.f32 %v299_v9, %v566_v61  ;;  %v303_v15 = vmul.f32 0.5, %v302_v11 }
 0x1b1   :  { %v330_v13 = vmul.f32 %v328_v55, %v321_v8  ;;  %v314_v14 = vsub.f32 1.5, %v313_v10 }
 0x1b2   :  { %v332_v17 = vmul.f32 %v328_v55, %v323_v52  ;;  %v304_v20 = vsub.f32 1.5, %v303_v15 }
 0x1b3   :  { %v339_v18 = vadd.f32 %v337_v6, %v330_v13  ;;  %v315_v19 = vmul.f32 %v474_v54, %v314_v14 }
 0x1b4   :  { %v341_v62 = vadd.f32 %v337_v6, %v332_v17  ;;  %v305_v24 = vmul.f32 %v476_v60, %v304_v20 }
 0x1b5   :  { %v430_v22 = vpack.c.bf16 %v339_v18, %v338_v16  ;;  %v319_v23 = vsel %vm318_vm0, %v474_v54, %v315_v19 }
 0x1b6   :  { %v435_v61 = vpack.c.bf16 %v341_v62, %v340_v21  ;;  %v325_v25 = vmul.f32 %v319_v23, %v576_v5  ;;  %v309_v26 = vsel %vm308_vm2, %v476_v60, %v305_v24 }
 0x1b7   :  { %431 = vst [vmem:[%s624_s6] sm:$0xff] %v430_v22   ;;  %v324_v28 = vmul.f32 %v309_v26, %v574_v4 }
 0x1b8   :  { %444 = vst [vmem:[%s624_s6 + $0x8] sm:$0xff] %v435_v61   ;;  %v334_v27 = vmul.f32 %v328_v55, %v325_v25 }
 0x1b9   :  { %v333_v29 = vmul.f32 %v328_v55, %v324_v28 }
 0x1ba   :  { %v343_v30 = vadd.f32 %v337_v6, %v334_v27 }
 0x1bb   :  { %v342_v31 = vadd.f32 %v337_v6, %v333_v29 }
 0x1bd   :  { %v440_v32 = vpack.c.bf16 %v343_v30, %v342_v31 }
 0x1bf   :  { %445 = vst [vmem:[%s624_s6 + $0x10] sm:$0xff] %v440_v32  }

// kernel: bert_x_layer.12
= control target key start
LH: loop header
LB: loop body
LE: loop exit
PB: predicated region body
PF: predicated region fallthrough
CT: control target
= control target key end

     0   :  { %8 = vsyncpa [#allocation4], 0  ;;  %s614_s15 = smov [#allocation3]   ;;  %s615_s17 = smov 192   ;;  %s688_s0 = inlined_call_operand.vmem [shape: bf16[48,128], index: 0, kind: input, shape index: {}]   ;;  %s689_s1 = inlined_call_operand.hbm [shape: bf16[128,384], index: 1, kind: input, shape index: {}]   ;;  %s690_s2 = inlined_call_operand.vmem [shape: bf16[1,384], index: 2, kind: input, shape index: {}]   ;;  %s691_s3 = inlined_call_operand.vmem [shape: bf16[48,384], index: 3, kind: output, shape index: {}]  }
   0x1   :  { %s15_s14 = sshll.u32 %s689_s1, 4  ;;  %s17_s16 = sshll.u32 %s614_s15, 4  ;;  %s16_s14 = int_to_ptr.hbm [resolvable:$true] %s15_s14  ;;  %s18_s16 = int_to_ptr.vmem [resolvable:$true] %s17_s16 }
   0x2   :  { %s616_s18 = smov 12  }
   0x3   :  { %23 = dma.hbm_to_vmem [thread:$0]  %s16_s14, 3072, %s18_s16, [#allocation4], %s615_s17, %s615_s17, %s616_s18  }
   0x4   :  { %612 = dma.done.wait [#allocation4], 3072  }
   0x5   :  { %613 = vsyncadd [#allocation4], 4294964224  ;;  %v540_v0 = vld [vmem:[#allocation3 + $0xa8] sm:$0xf]  ;;  %v575_v1 = vld [vmem:[#allocation3 + $0xb0] sm:$0xf0] }
   0x6   :  { %v574_v2 = vld [vmem:[#allocation3 + $0xac] sm:$0xf]  ;;  %v541_v3 = vor.u32 %v575_v1, %v540_v0  ;;  %v542_v4 = vld [vmem:[#allocation3 + $0xb4] sm:$0xf0]  ;;  %v548_v5 = vld [vmem:[#allocation3 + $0xb0] sm:$0xf] }
   0x7   :  { %v576_v6 = vld [vmem:[#allocation3 + $0xb8] sm:$0xf0]  ;;  %v545_v7 = vor.u32 %v574_v2, %v542_v4  ;;  %v528_v9 = vld [vmem:[#allocation3 + $0x90] sm:$0xf]  ;;  %v571_v11 = vld [vmem:[#allocation3 + $0x94] sm:$0xf] }
   0x8   :  { %v549_v8 = vor.u32 %v576_v6, %v548_v5  ;;  %v572_v10 = vld [vmem:[#allocation3 + $0x98] sm:$0xf0]  ;;  %254 = vmatpush.bf16.msra.mxu0 %v541_v3  ;;  %v530_v13 = vld [vmem:[#allocation3 + $0x9c] sm:$0xf0]  ;;  %v536_v14 = vld [vmem:[#allocation3 + $0x98] sm:$0xf]  ;;  %577 = vmatpush.bf16.msra.mxu3 %v541_v3 }
   0x9   :  { %v529_v12 = vor.u32 %v572_v10, %v528_v9  ;;  %v573_v15 = vld [vmem:[#allocation3 + $0xa0] sm:$0xf0]  ;;  %278 = vmatpush.bf16.msra.mxu1 %v545_v7  ;;  %v533_v16 = vor.u32 %v571_v11, %v530_v13  ;;  %v516_v18 = vld [vmem:[#allocation3 + $0x78] sm:$0xf]  ;;  %v568_v20 = vld [vmem:[#allocation3 + $0x7c] sm:$0xf] }
   0xa   :  { %302 = vmatpush.bf16.msra.mxu2 %v549_v8  ;;  %v537_v17 = vor.u32 %v573_v15, %v536_v14  ;;  %v569_v19 = vld [vmem:[#allocation3 + $0x80] sm:$0xf0]  ;;  %v518_v21 = vld [vmem:[#allocation3 + $0x84] sm:$0xf0]  ;;  %v524_v22 = vld [vmem:[#allocation3 + $0x80] sm:$0xf] }
   0xb   :  { %v570_v23 = vld [vmem:[#allocation3 + $0x88] sm:$0xf0]  ;;  %v517_v24 = vor.u32 %v569_v19, %v516_v18  ;;  %v521_v25 = vor.u32 %v568_v20, %v518_v21  ;;  %v504_v27 = vld [vmem:[#allocation3 + $0x60] sm:$0xf]  ;;  %v565_v29 = vld [vmem:[#allocation3 + $0x64] sm:$0xf] }
   0xc   :  { %255 = vmatpush.bf16.msra.mxu0 %v529_v12  ;;  %578 = vmatpush.bf16.msra.mxu3 %v529_v12  ;;  %v525_v26 = vor.u32 %v570_v23, %v524_v22  ;;  %v566_v28 = vld [vmem:[#allocation3 + $0x68] sm:$0xf0]  ;;  %v506_v30 = vld [vmem:[#allocation3 + $0x6c] sm:$0xf0]  ;;  %v512_v31 = vld [vmem:[#allocation3 + $0x68] sm:$0xf] }
   0xd   :  { %279 = vmatpush.bf16.msra.mxu1 %v533_v16  ;;  %v567_v32 = vld [vmem:[#allocation3 + $0x70] sm:$0xf0]  ;;  %v505_v33 = vor.u32 %v566_v28, %v504_v27  ;;  %v509_v34 = vor.u32 %v565_v29, %v506_v30  ;;  %v492_v36 = vld [vmem:[#allocation3 + $0x48] sm:$0xf]  ;;  %v562_v38 = vld [vmem:[#allocation3 + $0x4c] sm:$0xf] }
   0xe   :  { %303 = vmatpush.bf16.msra.mxu2 %v537_v17  ;;  %v513_v35 = vor.u32 %v567_v32, %v512_v31  ;;  %v563_v37 = vld [vmem:[#allocation3 + $0x50] sm:$0xf0]  ;;  %v494_v39 = vld [vmem:[#allocation3 + $0x54] sm:$0xf0]  ;;  %v500_v40 = vld [vmem:[#allocation3 + $0x50] sm:$0xf] }
   0xf   :  { %v564_v41 = vld [vmem:[#allocation3 + $0x58] sm:$0xf0]  ;;  %v493_v42 = vor.u32 %v563_v37, %v492_v36  ;;  %v497_v43 = vor.u32 %v562_v38, %v494_v39  ;;  %v480_v45 = vld [vmem:[#allocation3 + $0x30] sm:$0xf]  ;;  %v559_v47 = vld [vmem:[#allocation3 + $0x34] sm:$0xf] }
  0x10   :  { %256 = vmatpush.bf16.msra.mxu0 %v517_v24  ;;  %579 = vmatpush.bf16.msra.mxu3 %v517_v24  ;;  %v501_v44 = vor.u32 %v564_v41, %v500_v40  ;;  %v560_v46 = vld [vmem:[#allocation3 + $0x38] sm:$0xf0]  ;;  %v482_v48 = vld [vmem:[#allocation3 + $0x3c] sm:$0xf0]  ;;  %v488_v49 = vld [vmem:[#allocation3 + $0x38] sm:$0xf] }
  0x11   :  { %280 = vmatpush.bf16.msra.mxu1 %v521_v25  ;;  %v561_v50 = vld [vmem:[#allocation3 + $0x40] sm:$0xf0]  ;;  %v481_v51 = vor.u32 %v560_v46, %v480_v45  ;;  %v485_v52 = vor.u32 %v559_v47, %v482_v48  ;;  %v468_v54 = vld [vmem:[#allocation3 + $0x18] sm:$0xf]  ;;  %v556_v56 = vld [vmem:[#allocation3 + $0x1c] sm:$0xf] }
  0x12   :  { %304 = vmatpush.bf16.msra.mxu2 %v525_v26  ;;  %v489_v53 = vor.u32 %v561_v50, %v488_v49  ;;  %v557_v55 = vld [vmem:[#allocation3 + $0x20] sm:$0xf0]  ;;  %v470_v57 = vld [vmem:[#allocation3 + $0x24] sm:$0xf0]  ;;  %v476_v58 = vld [vmem:[#allocation3 + $0x20] sm:$0xf] }
  0x13   :  { %v558_v59 = vld [vmem:[#allocation3 + $0x28] sm:$0xf0]  ;;  %v469_v60 = vor.u32 %v557_v55, %v468_v54  ;;  %v473_v61 = vor.u32 %v556_v56, %v470_v57  ;;  %v456_v63 = vld [vmem:[#allocation3] sm:$0xf]  ;;  %v553_v1 = vld [vmem:[#allocation3 + $0x4] sm:$0xf] }
  0x14   :  { %257 = vmatpush.bf16.msra.mxu0 %v505_v33  ;;  %580 = vmatpush.bf16.msra.mxu3 %v505_v33  ;;  %v477_v62 = vor.u32 %v558_v59, %v476_v58  ;;  %v554_v0 = vld [vmem:[#allocation3 + $0x8] sm:$0xf0]  ;;  %v458_v2 = vld [vmem:[#allocation3 + $0xc] sm:$0xf0]  ;;  %v464_v3 = vld [vmem:[#allocation3 + $0x8] sm:$0xf] }
  0x15   :  { %281 = vmatpush.bf16.msra.mxu1 %v509_v34  ;;  %v555_v4 = vld [vmem:[#allocation3 + $0x10] sm:$0xf0]  ;;  %v457_v5 = vor.u32 %v554_v0, %v456_v63  ;;  %v461_v6 = vor.u32 %v553_v1, %v458_v2  ;;  %v550_v8 = vld [vmem:[%s688_s0] sm:$0xff]  ;;  %v551_v9 = vld [vmem:[%s688_s0 + $0x8] sm:$0xff] }
  0x16   :  { %305 = vmatpush.bf16.msra.mxu2 %v513_v35  ;;  %v465_v7 = vor.u32 %v555_v4, %v464_v3  ;;  %v552_v10 = vld [vmem:[%s688_s0 + $0x10] sm:$0xff]  ;;  %v383_v11 = vld [vmem:[%s690_s2] sm:$0x7] }
  0x17   :  { %v384_v12 = vunpack.c.l.bf16 %v383_v11 }
  0x18   :  { %258 = vmatpush.bf16.msra.mxu0 %v493_v42  ;;  %581 = vmatpush.bf16.msra.mxu3 %v493_v42 }
  0x19   :  { %282 = vmatpush.bf16.msra.mxu1 %v497_v43  ;;  %v386_v13 = vperm.slane %v384_v12, 0  ;;  %v387_v14 = vperm.slane %v384_v12, 2  ;;  %v388_v18 = vperm.slane %v384_v12, 4 }
  0x1a   :  { %306 = vmatpush.bf16.msra.mxu2 %v501_v44 }
  0x1b   :  { %v392_v15 = vperm.slane %v386_v13, 0  ;;  %v393_v16 = vperm.slane %v387_v14, 0  ;;  %v394_v23 = vperm.slane %v388_v18, 0 }
  0x1c   :  { %259 = vmatpush.bf16.msra.mxu0 %v481_v51  ;;  %582 = vmatpush.bf16.msra.mxu3 %v481_v51 }
  0x1d   :  { %283 = vmatpush.bf16.msra.mxu1 %v485_v52 }
  0x1e   :  { %307 = vmatpush.bf16.msra.mxu2 %v489_v53 }
  0x20   :  { %260 = vmatpush.bf16.msra.mxu0 %v469_v60  ;;  %583 = vmatpush.bf16.msra.mxu3 %v469_v60 }
  0x21   :  { %284 = vmatpush.bf16.msra.mxu1 %v473_v61 }
  0x22   :  { %308 = vmatpush.bf16.msra.mxu2 %v477_v62 }
  0x24   :  { %261 = vmatpush.bf16.msra.mxu0 %v457_v5  ;;  %584 = vmatpush.bf16.msra.mxu3 %v457_v5 }
  0x25   :  { %285 = vmatpush.bf16.msra.mxu1 %v461_v6 }
  0x26   :  { %309 = vmatpush.bf16.msra.mxu2 %v465_v7 }
  0x27   :  { %262 = vmatmul.bf16.vlgmr.msra.gmra.mxu0 %v550_v8  ;;  %267 = vmatmul.bf16.vlgmr.msra.gmra.mxu3 %v551_v9 }
  0x28   :  { %286 = vmatmul.bf16.vlgmr.msra.gmra.mxu1 %v550_v8 }
  0x29   :  { %310 = vmatmul.bf16.vlgmr.msra.gmra.mxu2 %v550_v8 }
  0x37   :  { %272 = vmatmul.bf16.gmra.mxu3 %v552_v10 }
  0x38   :  { %291 = vmatmul.bf16.gmra.mxu1 %v551_v9 }
  0x39   :  { %315 = vmatmul.bf16.gmra.mxu2 %v551_v9 }
  0x48   :  { %296 = vmatmul.bf16.gmra.mxu1 %v552_v10 }
  0x49   :  { %320 = vmatmul.bf16.gmra.mxu2 %v552_v10 }
  0xa4   :  { %v263_v17 = vpop.f32.mrf.mxu0 }
  0xa5   :  { %v395_v19 = vadd.f32 %v392_v15, %v263_v17  ;;  %v287_v20 = vpop.f32.mrf.mxu1 }
  0xa6   :  { %v396_v21 = vadd.f32 %v393_v16, %v287_v20 }
  0xa8   :  { %v413_v22 = vpack.c.bf16 %v396_v21, %v395_v19 }
  0xaa   :  { %425 = vst [vmem:[%s691_s3] sm:$0xff] %v413_v22  ;;  %v268_v29 = vpop.f32.mrf.mxu3 }
  0xab   :  { %v401_v34 = vadd.f32 %v392_v15, %v268_v29 }
  0xac   :  { %v311_v24 = vpop.f32.mrf.mxu2  ;;  %v265_v26 = vpop.f32.mrf.mxu0 }
  0xad   :  { %v397_v25 = vadd.f32 %v394_v23, %v311_v24  ;;  %v398_v27 = vadd.f32 %v392_v15, %v265_v26  ;;  %v289_v28 = vpop.f32.mrf.mxu1 }
  0xae   :  { %v399_v31 = vadd.f32 %v393_v16, %v289_v28 }
  0xaf   :  { %v414_v30 = vpack.c.bf16 %v397_v25, %v397_v25 }
  0xb0   :  { %v415_v32 = vpack.c.bf16 %v399_v31, %v398_v27 }
  0xb1   :  { %426 = vst [vmem:[%s691_s3 + $0x8] sm:$0xf] %v414_v30 }
  0xb2   :  { %427 = vst [vmem:[%s691_s3 + $0xc] sm:$0xff] %v415_v32  ;;  %v270_v39 = vpop.f32.mrf.mxu3 }
  0xb3   :  { %v404_v44 = vadd.f32 %v392_v15, %v270_v39 }
  0xb4   :  { %v313_v33 = vpop.f32.mrf.mxu2 }
  0xb5   :  { %v400_v35 = vadd.f32 %v394_v23, %v313_v33  ;;  %v292_v36 = vpop.f32.mrf.mxu1 }
  0xb6   :  { %v402_v38 = vadd.f32 %v393_v16, %v292_v36 }
  0xb7   :  { %v416_v37 = vpack.c.bf16 %v400_v35, %v400_v35 }
  0xb8   :  { %v417_v40 = vpack.c.bf16 %v402_v38, %v401_v34 }
  0xb9   :  { %428 = vst [vmem:[%s691_s3 + $0x14] sm:$0xf] %v416_v37 }
  0xba   :  { %429 = vst [vmem:[%s691_s3 + $0x18] sm:$0xff] %v417_v40  ;;  %v273_v48 = vpop.f32.mrf.mxu3 }
  0xbb   :  { %v407_v50 = vadd.f32 %v392_v15, %v273_v48 }
  0xbc   :  { %v316_v41 = vpop.f32.mrf.mxu2 }
  0xbd   :  { %v403_v42 = vadd.f32 %v394_v23, %v316_v41  ;;  %v294_v43 = vpop.f32.mrf.mxu1 }
  0xbe   :  { %v405_v46 = vadd.f32 %v393_v16, %v294_v43 }
  0xbf   :  { %v418_v45 = vpack.c.bf16 %v403_v42, %v403_v42 }
  0xc0   :  { %v419_v47 = vpack.c.bf16 %v405_v46, %v404_v44 }
  0xc1   :  { %430 = vst [vmem:[%s691_s3 + $0x20] sm:$0xf] %v418_v45 }
  0xc2   :  { %431 = vst [vmem:[%s691_s3 + $0x24] sm:$0xff] %v419_v47  ;;  %v275_v56 = vpop.f32.mrf.mxu3 }
  0xc3   :  { %v410_v60 = vadd.f32 %v392_v15, %v275_v56 }
  0xc4   :  { %v318_v49 = vpop.f32.mrf.mxu2 }
  0xc5   :  { %v406_v51 = vadd.f32 %v394_v23, %v318_v49  ;;  %v297_v52 = vpop.f32.mrf.mxu1 }
  0xc6   :  { %v408_v54 = vadd.f32 %v393_v16, %v297_v52 }
  0xc7   :  { %v420_v53 = vpack.c.bf16 %v406_v51, %v406_v51 }
  0xc8   :  { %v421_v55 = vpack.c.bf16 %v408_v54, %v407_v50 }
  0xc9   :  { %432 = vst [vmem:[%s691_s3 + $0x2c] sm:$0xf] %v420_v53 }
  0xca   :  { %433 = vst [vmem:[%s691_s3 + $0x30] sm:$0xff] %v421_v55 }
  0xcc   :  { %v321_v57 = vpop.f32.mrf.mxu2 }
  0xcd   :  { %v409_v58 = vadd.f32 %v394_v23, %v321_v57  ;;  %v299_v59 = vpop.f32.mrf.mxu1 }
  0xce   :  { %v411_v62 = vadd.f32 %v393_v16, %v299_v59 }
  0xcf   :  { %v422_v61 = vpack.c.bf16 %v409_v58, %v409_v58 }
  0xd0   :  { %v423_v63 = vpack.c.bf16 %v411_v62, %v410_v60 }
  0xd1   :  { %434 = vst [vmem:[%s691_s3 + $0x38] sm:$0xf] %v422_v61 }
  0xd2   :  { %435 = vst [vmem:[%s691_s3 + $0x3c] sm:$0xff] %v423_v63 }
  0xd4   :  { %v323_v0 = vpop.f32.mrf.mxu2 }
  0xd5   :  { %v412_v1 = vadd.f32 %v394_v23, %v323_v0 }
  0xd7   :  { %v424_v2 = vpack.c.bf16 %v412_v1, %v412_v1 }
  0xd9   :  { %436 = vst [vmem:[%s691_s3 + $0x44] sm:$0xf] %v424_v2 }
  0xda   :  { %441 = vsyncpa [#allocation4], 1 }

// kernel: bert_x_layer.13
= control target key start
LH: loop header
LB: loop body
LE: loop exit
PB: predicated region body
PF: predicated region fallthrough
CT: control target
= control target key end

     0   :  { %vm127_vm0 = vcmask 261120   ;;  %vm181_vm1 = vcmask 130048   ;;  %s897_s26 = smov 96   ;;  %s899_s27 = smov 32   ;;  %vm252_vm2 = vcmask 257024   ;;  %vm413_vm3 = vcmask 519424   ;;  %s1048_s0 = inlined_call_operand.vmem [shape: bf16[2,8,384], index: 0, kind: input, shape index: {}]   ;;  %s1049_s1 = inlined_call_operand.vmem [shape: bf16[2,16,384], index: 1, kind: input, shape index: {}]   ;;  %s1050_s2 = inlined_call_operand.vmem [shape: f32[2,1,1,16], index: 2, kind: input, shape index: {}]   ;;  %s1051_s3 = inlined_call_operand.vmem [shape: bf16[2,8,128], index: 3, kind: output, shape index: {}]  }
   0x1   :  { %v92_v0 = vld [vmem:[%s1049_s1] sm:$0xff]  ;;  %v94_v1 = vld [vmem:[%s1049_s1 + $0xc] sm:$0xff]  ;;  %v96_v2 = vld [vmem:[%s1049_s1 + $0x18] sm:$0xff]  ;;  %vm574_vm4 = vcmask 781824   ;;  %vm735_vm5 = vcmask 1044224  }
   0x2   :  { %93 = vst [vmem:[#allocation3] sm:$0xff] %v92_v0  ;;  %v98_v3 = vld [vmem:[%s1049_s1 + $0x24] sm:$0xff]  ;;  %v751_v5 = vld [vmem:[%s1048_s0 + $0x14] sm:$0xf]  ;;  %v945_v16 = vld [vmem:[%s1050_s2] ss:$0 sm:$0xff] }
   0x3   :  { %v750_v4 = vld [vmem:[%s1048_s0 + $0x8] sm:$0xf]  ;;  %95 = vst [vmem:[#allocation3 + $0x8] sm:$0xff] %v94_v1  ;;  %v951_v22 = vld [vmem:[%s1050_s2 + $0x1] ss:$0 sm:$0xff]  ;;  %s898_s2 = smov 64  }
   0x4   :  { %97 = vst [vmem:[#allocation3 + $0x10] sm:$0xff] %v96_v2 }
   0x5   :  { %99 = vst [vmem:[#allocation3 + $0x18] sm:$0xff] %v98_v3 }
   0x6   :  { %28 = vst [vmem:[#allocation2] sm:$0xf] %v750_v4 }
   0x7   :  { %30 = vst [vmem:[#allocation2 + $0x4] sm:$0xf] %v751_v5 }
   0x9   :  { %v754_v6 = vld [vmem:[#allocation3] sm:$0xf]  ;;  %v764_v61 = vld [vmem:[#allocation3 + $0x4] sm:$0xf] }
   0xa   :  { %v832_v7 = vld [vmem:[#allocation3 + $0x4] sm:$0xf0]  ;;  %v774_v29 = vld [vmem:[#allocation3] sm:$0xf]  ;;  %v834_v62 = vld [vmem:[#allocation3 + $0x8] sm:$0xf0] }
   0xb   :  { %v755_v8 = vor.u32 %v832_v7, %v754_v6  ;;  %v759_v9 = vld [vmem:[#allocation3 + $0x10] sm:$0xf]  ;;  %v836_v30 = vld [vmem:[#allocation3 + $0x4] sm:$0xf0]  ;;  %v794_v47 = vld [vmem:[#allocation3] sm:$0xf]  ;;  %v765_v63 = vor.u32 %v834_v62, %v764_v61 }
   0xc   :  { %v833_v10 = vld [vmem:[#allocation3 + $0x14] sm:$0xf0]  ;;  %v775_v32 = vor.u32 %v836_v30, %v774_v29  ;;  %v779_v44 = vld [vmem:[#allocation3 + $0x10] sm:$0xf]  ;;  %v840_v48 = vld [vmem:[#allocation3 + $0x4] sm:$0xf0] }
   0xd   :  { %v132_v11 = vsel %vm127_vm0, %v755_v8, 0  ;;  %v760_v12 = vor.u32 %v833_v10, %v759_v9  ;;  %v112_v14 = vld [vmem:[#allocation2] sm:$0xf]  ;;  %v795_v51 = vor.u32 %v840_v48, %v794_v47  ;;  %v799_v52 = vld [vmem:[#allocation3 + $0x10] sm:$0xf]  ;;  %222 = vmatpush.bf16.msra.mxu2 %v765_v63 }
   0xe   :  { %141 = vmatpush.bf16.xpose.msra.mxu0 %v132_v11  ;;  %v113_v15 = vld [vmem:[#allocation2 + $0x4] sm:$0xf]  ;;  %275 = vrot.lane.b32.xlu2 %v775_v32, %s897_s26  ;;  %v837_v45 = vld [vmem:[#allocation3 + $0x14] sm:$0xf0]  ;;  %v814_v55 = vld [vmem:[#allocation3] sm:$0xf] }
   0xf   :  { %v156_v13 = vsel %vm127_vm0, %v760_v12, 0  ;;  %v849_v28 = vld [vmem:[#allocation2] sm:$0xff]   ;;  %v780_v46 = vor.u32 %v837_v45, %v779_v44  ;;  %v844_v56 = vld [vmem:[#allocation3 + $0x4] sm:$0xf0]  ;;  %v819_v58 = vld [vmem:[#allocation3 + $0x10] sm:$0xf] }
  0x10   :  { %165 = vmatpush.bf16.xpose.msra.mxu1 %v156_v13  ;;  %v850_v31 = vunpack.c.l.b16 %v849_v28  ;;  %v851_v34 = vunpack.c.h.b16 %v849_v28  ;;  %v841_v53 = vld [vmem:[#allocation3 + $0x14] sm:$0xf0]  ;;  %v815_v57 = vor.u32 %v844_v56, %v814_v55  ;;  %v769_v1 = vld [vmem:[#allocation3 + $0x14] sm:$0xf]  ;;  %v835_v2 = vld [vmem:[#allocation3 + $0x18] sm:$0xf0] }
  0x11   :  { %v800_v54 = vor.u32 %v841_v53, %v799_v52  ;;  %v845_v59 = vld [vmem:[#allocation3 + $0x14] sm:$0xf0]  ;;  %v770_v4 = vor.u32 %v835_v2, %v769_v1 }
  0x12   :  { %v267_v33 = vpack.c.b16 %v850_v31, %v850_v31  ;;  %v298_v36 = vpack.c.b16 %v851_v34, %v851_v34  ;;  %v820_v60 = vor.u32 %v845_v59, %v819_v58 }
  0x13   :  { %244 = vmatpush.bf16.msra.mxu3 %v770_v4 }
  0x15   :  { %756 = vmatmul.msk.bf16.vlgmr.msra.gmra.mxu0 %vm127_vm0, %v112_v14 }
  0x16   :  { %306 = vrot.lane.b32.xlu2 %v780_v46, %s897_s26 }
  0x17   :  { %761 = vmatmul.msk.bf16.vlgmr.msra.gmra.mxu1 %vm127_vm0, %v113_v15 }
  0x1e   :  { %436 = vrot.lane.b32.xlu2 %v795_v51, %s898_s2 }
  0x26   :  { %467 = vrot.lane.b32.xlu2 %v800_v54, %s898_s2 }
  0x2e   :  { %429 = vrot.lane.b32.xlu2 %v267_v33, %s898_s2 }
  0x36   :  { %597 = vrot.lane.b32.xlu2 %v815_v57, %s899_s27 }
  0x3e   :  { %621 = vrot.lane.b32.xlu2 %v298_v36, %s899_s27 }
  0x68   :  { %v276_v0 = vpop.permute.xlu2 %275 }
  0x69   :  { %v281_v3 = vsel %vm127_vm0, %v276_v0, 0 }
  0x6a   :  { %290 = vmatpush.bf16.xpose.msrb.mxu2 %v281_v3 }
  0x70   :  { %v307_v5 = vpop.permute.xlu2 %306 }
  0x71   :  { %v312_v6 = vsel %vm127_vm0, %v307_v5, 0 }
  0x72   :  { %321 = vmatpush.bf16.xpose.msrb.mxu3 %v312_v6 }
  0x78   :  { %v437_v7 = vpop.permute.xlu2 %436 }
  0x79   :  { %v442_v14 = vsel %vm127_vm0, %v437_v7, 0  ;;  %v804_v7 = vld [vmem:[#allocation3 + $0x4] sm:$0xf] }
  0x80   :  { %v468_v9 = vpop.permute.xlu2 %467 }
  0x88   :  { %v430_v15 = vpop.permute.xlu2 %429 }
  0x92   :  { %v143_v17 = vpop.f32.mrf.mxu0 }
  0x93   :  { %v171_v18 = vmul.f32 0.17677669, %v143_v17 }
  0x94   :  { %v167_v19 = vpop.f32.mrf.mxu1 }
  0x95   :  { %v172_v20 = vmul.f32 0.17677669, %v167_v19  ;;  %v179_v21 = vadd.f32 %v945_v16, %v171_v18 }
  0x97   :  { %v182_v23 = vsel %vm181_vm1, %v179_v21, -inf  ;;  %v180_v24 = vadd.f32 %v951_v22, %v172_v20  ;;  %v473_v20 = vsel %vm127_vm0, %v468_v9, 0 }
  0x98   :  { %183 = vmax.xlane.f32.xlu0 %v182_v23 }
  0x99   :  { %v185_v27 = vsel %vm181_vm1, %v180_v24, -inf }
  0x9a   :  { %v145_v25 = vpop.f32.mrf.mxu0 }
  0x9c   :  { %v169_v26 = vpop.f32.mrf.mxu1 }
  0x9d   :  { %v784_v26 = vld [vmem:[#allocation3 + $0x4] sm:$0xf] }
  0xa0   :  { %186 = vmax.xlane.f32.xlu0 %v185_v27  ;;  %v838_v27 = vld [vmem:[#allocation3 + $0x8] sm:$0xf0] }
  0xa1   :  { %v785_v28 = vor.u32 %v838_v27, %v784_v26 }
  0xa3   :  { %360 = vrot.lane.b32.xlu2 %v785_v28, %s897_s26 }
  0xb4   :  { %268 = vrot.lane.b32.xlu0 %v267_v33, %s897_s26 }
  0xbc   :  { %460 = vrot.lane.b32.xlu0 %v298_v36, %s898_s2 }
  0xc4   :  { %590 = vrot.lane.b32.xlu0 %v267_v33, %s899_s27 }
 0x10b   :  { %v184_v35 = vpop.xlane.xlu0 %183 }
 0x10c   :  { %v188_v37 = vsub.f32 %v179_v21, %v184_v35  ;;  %v598_v21 = vpop.permute.xlu2 %597 }
 0x10e   :  { %v190_v38 = vmul.f32 1.442695, %v188_v37 }
 0x110   :  { %865 = vpow2.f32 %v190_v38 }
 0x113   :  { %v187_v39 = vpop.xlane.xlu0 %186 }
 0x114   :  { %v189_v40 = vsub.f32 %v180_v24, %v187_v39  ;;  %v603_v24 = vsel %vm127_vm0, %v598_v21, 0  ;;  %v622_v33 = vpop.permute.xlu2 %621 }
 0x116   :  { %v866_v41 = vpop.eup %865  ;;  %v192_v42 = vmul.f32 1.442695, %v189_v40 }
 0x117   :  { %v194_v43 = vsel %vm181_vm1, %v866_v41, 0.0 }
 0x118   :  { %867 = vpow2.f32 %v192_v42  ;;  %195 = vadd.xlane.f32.xlu1 %v194_v43 }
 0x11c   :  { %v361_v52 = vpop.permute.xlu2 %360 }
 0x11d   :  { %373 = vmatpush.bf16.msrb.mxu0 %v361_v52 }
 0x11e   :  { %v868_v49 = vpop.eup %867 }
 0x11f   :  { %v197_v50 = vsel %vm181_vm1, %v868_v49, 0.0 }
 0x120   :  { %198 = vadd.xlane.f32.xlu1 %v197_v50 }
 0x126   :  { %v269_v23 = vpop.permute.xlu0 %268 }
 0x12e   :  { %v461_v31 = vpop.permute.xlu0 %460 }
 0x136   :  { %v591_v32 = vpop.permute.xlu0 %590 }
 0x139   :  { %299 = vrot.lane.b32.xlu1 %v298_v36, %s897_s26 }
 0x141   :  { %628 = vrot.lane.b32.xlu1 %v820_v60, %s899_s27 }
 0x18b   :  { %v196_v8 = vpop.xlane.xlu1 %195 }
 0x18c   :  { %869 = vrcp.f32 %v196_v8  ;;  %v842_v8 = vld [vmem:[#allocation3 + $0x8] sm:$0xf0] }
 0x18d   :  { %v805_v9 = vor.u32 %v842_v8, %v804_v7 }
 0x192   :  { %v870_v10 = vpop.eup %869 }
 0x193   :  { %v199_v11 = vpop.xlane.xlu1 %198  ;;  %v202_v12 = vmul.f32 %v870_v10, %v866_v41  ;;  %v843_v10 = vld [vmem:[#allocation3 + $0x18] sm:$0xf0] }
 0x194   :  { %871 = vrcp.f32 %v199_v11 }
 0x195   :  { %v204_v13 = vpack.c.bf16 %v202_v12, %v202_v12 }
 0x197   :  { %766 = vmatmul.msk.bf16.vlgmr.msra.gmra.mxu2 %vm181_vm1, %v204_v13 }
 0x198   :  { %451 = vmatpush.bf16.xpose.msra.mxu2 %v442_v14 }
 0x19a   :  { %v872_v17 = vpop.eup %871 }
 0x19b   :  { %v203_v18 = vmul.f32 %v872_v17, %v868_v49 }
 0x19d   :  { %v205_v19 = vpack.c.bf16 %v203_v18, %v203_v18 }
 0x19f   :  { %771 = vmatmul.msk.bf16.vlgmr.msra.gmra.mxu3 %vm181_vm1, %v205_v19 }
 0x1a0   :  { %482 = vmatpush.bf16.xpose.msra.mxu3 %v473_v20 }
 0x1a7   :  { %776 = vmatmul.msk.bf16.vlgmr.msrb.gmra.mxu2 %vm127_vm0, %v269_v23 }
 0x1a8   :  { %612 = vmatpush.bf16.xpose.msrb.mxu2 %v603_v24 }
 0x1ab   :  { %v300_v25 = vpop.permute.xlu1 %299 }
 0x1af   :  { %781 = vmatmul.msk.bf16.vlgmr.msrb.gmra.mxu3 %vm127_vm0, %v300_v25 }
 0x1b3   :  { %v629_v29 = vpop.permute.xlu1 %628 }
 0x1b4   :  { %v634_v30 = vsel %vm127_vm0, %v629_v29, 0 }
 0x1b5   :  { %643 = vmatpush.bf16.xpose.msrb.mxu3 %v634_v30 }
 0x1b7   :  { %796 = vmatmul.msk.bf16.vlgmr.msra.gmra.mxu2 %vm127_vm0, %v430_v15 }
 0x1bf   :  { %801 = vmatmul.msk.bf16.vlgmr.msra.gmra.mxu3 %vm127_vm0, %v461_v31  ;;  %v789_v31 = vld [vmem:[#allocation3 + $0x14] sm:$0xf] }
 0x1c7   :  { %816 = vmatmul.msk.bf16.vlgmr.msrb.gmra.mxu2 %vm127_vm0, %v591_v32  ;;  %v839_v32 = vld [vmem:[#allocation3 + $0x18] sm:$0xf0] }
 0x1cf   :  { %821 = vmatmul.msk.bf16.vlgmr.msrb.gmra.mxu3 %vm127_vm0, %v622_v33  ;;  %v790_v33 = vor.u32 %v839_v32, %v789_v31 }
 0x21a   :  { %v224_v34 = vpop.f32.mrf.mxu2 }
 0x21b   :  { %v250_v35 = vpack.c.bf16 %v224_v34, %v224_v34 }
 0x21d   :  { %253 = vst.msk [vmem:[%s1051_s3] sm:$0xf] %vm252_vm2, %v250_v35 }
 0x222   :  { %v226_v36 = vpop.f32.mrf.mxu2  ;;  %v246_v37 = vpop.f32.mrf.mxu3 }
 0x223   :  { %v251_v38 = vpack.c.bf16 %v246_v37, %v246_v37 }
 0x225   :  { %254 = vst.msk [vmem:[%s1051_s3 + $0x4] sm:$0xf] %vm252_vm2, %v251_v38 }
 0x22a   :  { %v248_v39 = vpop.f32.mrf.mxu3  ;;  %v292_v40 = vpop.f32.mrf.mxu2 }
 0x22b   :  { %v327_v41 = vmul.f32 0.17677669, %v292_v40  ;;  %v824_v40 = vld [vmem:[#allocation3 + $0x4] sm:$0xf] }
 0x22d   :  { %v329_v42 = vadd.f32 %v945_v16, %v327_v41  ;;  %v846_v41 = vld [vmem:[#allocation3 + $0x8] sm:$0xf0] }
 0x22f   :  { %v331_v43 = vsel %vm181_vm1, %v329_v42, -inf }
 0x230   :  { %332 = vmax.xlane.f32.xlu1 %v331_v43 }
 0x232   :  { %v294_v44 = vpop.f32.mrf.mxu2  ;;  %v323_v45 = vpop.f32.mrf.mxu3 }
 0x233   :  { %v328_v46 = vmul.f32 0.17677669, %v323_v45  ;;  %v825_v45 = vor.u32 %v846_v41, %v824_v40 }
 0x235   :  { %v330_v47 = vadd.f32 %v951_v22, %v328_v46  ;;  %v829_v46 = vld [vmem:[#allocation3 + $0x14] sm:$0xf] }
 0x237   :  { %v334_v48 = vsel %vm181_vm1, %v330_v47, -inf }
 0x238   :  { %335 = vmax.xlane.f32.xlu0 %v334_v48 }
 0x23a   :  { %v325_v49 = vpop.f32.mrf.mxu3  ;;  %v453_v50 = vpop.f32.mrf.mxu2 }
 0x23b   :  { %v488_v51 = vmul.f32 0.17677669, %v453_v50 }
 0x23d   :  { %v490_v53 = vadd.f32 %v945_v16, %v488_v51 }
 0x23f   :  { %v492_v54 = vsel %vm181_vm1, %v490_v53, -inf }
 0x240   :  { %493 = vmax.xlane.f32.xlu2 %v492_v54 }
 0x242   :  { %v455_v55 = vpop.f32.mrf.mxu2  ;;  %v484_v56 = vpop.f32.mrf.mxu3 }
 0x243   :  { %v489_v57 = vmul.f32 0.17677669, %v484_v56 }
 0x245   :  { %v491_v58 = vadd.f32 %v951_v22, %v489_v57 }
 0x247   :  { %v495_v59 = vsel %vm181_vm1, %v491_v58, -inf }
 0x248   :  { %496 = vmax.xlane.f32.xlu1 %v495_v59 }
 0x24a   :  { %v486_v60 = vpop.f32.mrf.mxu3  ;;  %v614_v61 = vpop.f32.mrf.mxu2 }
 0x24b   :  { %v649_v62 = vmul.f32 0.17677669, %v614_v61 }
 0x24d   :  { %v1000_v63 = vadd.f32 %v945_v16, %v649_v62  ;;  %v809_v16 = vld [vmem:[#allocation3 + $0x14] sm:$0xf] }
 0x24e   :  { %v810_v11 = vor.u32 %v843_v10, %v809_v16 }
 0x24f   :  { %v653_v0 = vsel %vm181_vm1, %v1000_v63, -inf }
 0x250   :  { %654 = vmax.xlane.f32.xlu0 %v653_v0 }
 0x252   :  { %v645_v1 = vpop.f32.mrf.mxu3  ;;  %v616_v2 = vpop.f32.mrf.mxu2 }
 0x253   :  { %v650_v3 = vmul.f32 0.17677669, %v645_v1 }
 0x255   :  { %v652_v4 = vadd.f32 %v951_v22, %v650_v3 }
 0x257   :  { %v656_v5 = vsel %vm181_vm1, %v652_v4, -inf }
 0x258   :  { %657 = vmax.xlane.f32.xlu2 %v656_v5 }
 0x25a   :  { %v647_v6 = vpop.f32.mrf.mxu3 }
 0x264   :  { %521 = vrot.lane.b32.xlu0 %v805_v9, %s898_s2 }
 0x270   :  { %545 = vrot.lane.b32.xlu2 %v810_v11, %s898_s2 }
 0x2a3   :  { %v333_v12 = vpop.xlane.xlu1 %332 }
 0x2a4   :  { %v337_v13 = vsub.f32 %v329_v42, %v333_v12 }
 0x2a6   :  { %v339_v14 = vmul.f32 1.442695, %v337_v13 }
 0x2a8   :  { %873 = vpow2.f32 %v339_v14 }
 0x2ab   :  { %v336_v15 = vpop.xlane.xlu0 %335 }
 0x2ac   :  { %v338_v22 = vsub.f32 %v330_v47, %v336_v15  ;;  %v847_v47 = vld [vmem:[#allocation3 + $0x18] sm:$0xf0] }
 0x2ad   :  { %v830_v48 = vor.u32 %v847_v47, %v829_v46 }
 0x2ae   :  { %v874_v17 = vpop.eup %873  ;;  %v341_v18 = vmul.f32 1.442695, %v338_v22 }
 0x2af   :  { %v343_v19 = vsel %vm181_vm1, %v874_v17, 0.0 }
 0x2b0   :  { %875 = vpow2.f32 %v341_v18  ;;  %344 = vadd.xlane.f32.xlu1 %v343_v19 }
 0x2b3   :  { %v494_v20 = vpop.xlane.xlu2 %493 }
 0x2b4   :  { %v498_v21 = vsub.f32 %v490_v53, %v494_v20 }
 0x2b6   :  { %v876_v23 = vpop.eup %875  ;;  %v500_v24 = vmul.f32 1.442695, %v498_v21 }
 0x2b7   :  { %v346_v25 = vsel %vm181_vm1, %v876_v23, 0.0 }
 0x2b8   :  { %877 = vpow2.f32 %v500_v24  ;;  %347 = vadd.xlane.f32.xlu0 %v346_v25 }
 0x2bb   :  { %v497_v26 = vpop.xlane.xlu1 %496 }
 0x2bc   :  { %v499_v27 = vsub.f32 %v491_v58, %v497_v26 }
 0x2be   :  { %v878_v28 = vpop.eup %877  ;;  %v502_v29 = vmul.f32 1.442695, %v499_v27 }
 0x2bf   :  { %v504_v30 = vsel %vm181_vm1, %v878_v28, 0.0 }
 0x2c0   :  { %879 = vpow2.f32 %v502_v29  ;;  %505 = vadd.xlane.f32.xlu0 %v504_v30 }
 0x2c3   :  { %v655_v38 = vpop.xlane.xlu0 %654 }
 0x2c4   :  { %v659_v49 = vsub.f32 %v1000_v63, %v655_v38 }
 0x2c6   :  { %v880_v34 = vpop.eup %879  ;;  %v661_v50 = vmul.f32 1.442695, %v659_v49 }
 0x2c7   :  { %v507_v35 = vsel %vm181_vm1, %v880_v34, 0.0 }
 0x2c8   :  { %508 = vadd.xlane.f32.xlu0 %v507_v35 }
 0x2c9   :  { %384 = vrot.lane.b32.xlu1 %v790_v33, %s897_s26 }
 0x2cb   :  { %v658_v36 = vpop.xlane.xlu2 %657 }
 0x2cc   :  { %v660_v37 = vsub.f32 %v652_v4, %v658_v36 }
 0x2ce   :  { %v663_v39 = vmul.f32 1.442695, %v660_v37 }
 0x2d0   :  { %881 = vpow2.f32 %v663_v39 }
 0x2d1   :  { %883 = vpow2.f32 %v661_v50 }
 0x2d3   :  { %v546_v0 = vpop.permute.xlu2 %545 }
 0x2d6   :  { %v882_v42 = vpop.eup %881  ;;  %v522_v43 = vpop.permute.xlu0 %521 }
 0x2d7   :  { %v668_v44 = vsel %vm181_vm1, %v882_v42, 0.0  ;;  %534 = vmatpush.bf16.msra.mxu0 %v522_v43  ;;  %v884_v51 = vpop.eup %883 }
 0x2d8   :  { %669 = vadd.xlane.f32.xlu2 %v668_v44  ;;  %v665_v52 = vsel %vm181_vm1, %v884_v51, 0.0 }
 0x2dc   :  { %682 = vrot.lane.b32.xlu0 %v825_v45, %s899_s27 }
 0x2e4   :  { %706 = vrot.lane.b32.xlu0 %v830_v48, %s899_s27 }
 0x2f3   :  { %666 = vadd.xlane.f32.xlu1 %v665_v52 }
 0x323   :  { %v345_v53 = vpop.xlane.xlu1 %344 }
 0x324   :  { %885 = vrcp.f32 %v345_v53 }
 0x32a   :  { %v886_v54 = vpop.eup %885 }
 0x32b   :  { %v351_v55 = vmul.f32 %v886_v54, %v874_v17  ;;  %v348_v56 = vpop.xlane.xlu0 %347 }
 0x32c   :  { %887 = vrcp.f32 %v348_v56 }
 0x32d   :  { %v353_v57 = vpack.c.bf16 %v351_v55, %v351_v55 }
 0x32f   :  { %786 = vmatmul.msk.bf16.vlgmr.msrb.gmra.mxu0 %vm181_vm1, %v353_v57 }
 0x332   :  { %v888_v59 = vpop.eup %887 }
 0x333   :  { %v506_v58 = vpop.xlane.xlu0 %505  ;;  %v352_v60 = vmul.f32 %v888_v59, %v876_v23 }
 0x334   :  { %889 = vrcp.f32 %v506_v58 }
 0x335   :  { %v354_v3 = vpack.c.bf16 %v352_v60, %v352_v60 }
 0x33a   :  { %v890_v61 = vpop.eup %889 }
 0x33b   :  { %v512_v62 = vmul.f32 %v890_v61, %v878_v28  ;;  %v385_v63 = vpop.permute.xlu1 %384  ;;  %v509_v2 = vpop.xlane.xlu0 %508 }
 0x33c   :  { %397 = vmatpush.bf16.msrb.mxu1 %v385_v63  ;;  %891 = vrcp.f32 %v509_v2 }
 0x33d   :  { %v514_v1 = vpack.c.bf16 %v512_v62, %v512_v62 }
 0x33f   :  { %791 = vmatmul.msk.bf16.vlgmr.msrb.gmra.mxu1 %vm181_vm1, %v354_v3  ;;  %806 = vmatmul.msk.bf16.vlgmr.msra.gmra.mxu0 %vm181_vm1, %v514_v1 }
 0x340   :  { %558 = vmatpush.bf16.msra.mxu1 %v546_v0 }
 0x342   :  { %v892_v4 = vpop.eup %891 }
 0x343   :  { %v513_v5 = vmul.f32 %v892_v4, %v880_v34 }
 0x345   :  { %v515_v6 = vpack.c.bf16 %v513_v5, %v513_v5 }
 0x34b   :  { %v670_v7 = vpop.xlane.xlu2 %669 }
 0x34c   :  { %893 = vrcp.f32 %v670_v7 }
 0x34e   :  { %v683_v8 = vpop.permute.xlu0 %682 }
 0x34f   :  { %811 = vmatmul.msk.bf16.vlgmr.msra.gmra.mxu1 %vm181_vm1, %v515_v6  ;;  %695 = vmatpush.bf16.msrb.mxu0 %v683_v8 }
 0x352   :  { %v894_v9 = vpop.eup %893 }
 0x353   :  { %v674_v10 = vmul.f32 %v894_v9, %v882_v42 }
 0x355   :  { %v676_v11 = vpack.c.bf16 %v674_v10, %v674_v10 }
 0x356   :  { %v707_v16 = vpop.permute.xlu0 %706 }
 0x357   :  { %719 = vmatpush.bf16.msrb.mxu1 %v707_v16 }
 0x35f   :  { %831 = vmatmul.msk.bf16.vlgmr.msrb.gmra.mxu1 %vm181_vm1, %v676_v11 }
 0x366   :  { %v667_v12 = vpop.xlane.xlu1 %666 }
 0x367   :  { %895 = vrcp.f32 %v667_v12 }
 0x36d   :  { %v896_v13 = vpop.eup %895 }
 0x36e   :  { %v673_v14 = vmul.f32 %v896_v13, %v884_v51 }
 0x370   :  { %v675_v15 = vpack.c.bf16 %v673_v14, %v673_v14 }
 0x372   :  { %826 = vmatmul.msk.bf16.vlgmr.msrb.gmra.mxu0 %vm181_vm1, %v675_v15 }
 0x3ac   :  { %v375_v22 = vpop.f32.mrf.mxu0 }
 0x3ad   :  { %v403_v17 = vpack.c.bf16 %v375_v22, %v375_v22 }
 0x3af   :  { %407 = vrot.lane.b32.xlu0 %v403_v17, %s899_s27 }
 0x3b4   :  { %v377_v18 = vpop.f32.mrf.mxu0 }
 0x3bc   :  { %v399_v19 = vpop.f32.mrf.mxu1  ;;  %v536_v20 = vpop.f32.mrf.mxu0 }
 0x3bd   :  { %v404_v21 = vpack.c.bf16 %v399_v19, %v399_v19  ;;  %v564_v23 = vpack.c.bf16 %v536_v20, %v536_v20 }
 0x3bf   :  { %409 = vrot.lane.b32.xlu0 %v404_v21, %s899_s27  ;;  %568 = vrot.lane.b32.xlu1 %v564_v23, %s898_s2 }
 0x3c4   :  { %v401_v24 = vpop.f32.mrf.mxu1  ;;  %v538_v25 = vpop.f32.mrf.mxu0 }
 0x3cc   :  { %v560_v26 = vpop.f32.mrf.mxu1 }
 0x3cd   :  { %v565_v27 = vpack.c.bf16 %v560_v26, %v560_v26 }
 0x3cf   :  { %570 = vrot.lane.b32.xlu0 %v565_v27, %s898_s2 }
 0x3d4   :  { %v562_v28 = vpop.f32.mrf.mxu1 }
 0x3dc   :  { %v721_v29 = vpop.f32.mrf.mxu1 }
 0x3dd   :  { %v726_v30 = vpack.c.bf16 %v721_v29, %v721_v29 }
 0x3df   :  { %731 = vrot.lane.b32.xlu0 %v726_v30, %s897_s26 }
 0x3e4   :  { %v723_v31 = vpop.f32.mrf.mxu1 }
 0x3ef   :  { %v697_v32 = vpop.f32.mrf.mxu0 }
 0x3f0   :  { %v725_v33 = vpack.c.bf16 %v697_v32, %v697_v32 }
 0x3f2   :  { %729 = vrot.lane.b32.xlu2 %v725_v33, %s897_s26 }
 0x3f7   :  { %v699_v34 = vpop.f32.mrf.mxu0 }
 0x421   :  { %v408_v35 = vpop.permute.xlu0 %407 }
 0x422   :  { %414 = vst.msk [vmem:[%s1051_s3] sm:$0xf] %vm413_vm3, %v408_v35 }
 0x431   :  { %v410_v36 = vpop.permute.xlu0 %409  ;;  %v569_v37 = vpop.permute.xlu1 %568 }
 0x432   :  { %415 = vst.msk [vmem:[%s1051_s3 + $0x4] sm:$0xf] %vm413_vm3, %v410_v36 }
 0x433   :  { %575 = vst.msk [vmem:[%s1051_s3] sm:$0xf] %vm574_vm4, %v569_v37 }
 0x441   :  { %v571_v38 = vpop.permute.xlu0 %570 }
 0x442   :  { %576 = vst.msk [vmem:[%s1051_s3 + $0x4] sm:$0xf] %vm574_vm4, %v571_v38 }
 0x44c   :  { %v730_v39 = vpop.permute.xlu2 %729 }
 0x44d   :  { %736 = vst.msk [vmem:[%s1051_s3] sm:$0xf] %vm735_vm5, %v730_v39 }
 0x451   :  { %v732_v40 = vpop.permute.xlu0 %731 }
 0x452   :  { %737 = vst.msk [vmem:[%s1051_s3 + $0x4] sm:$0xf] %vm735_vm5, %v732_v40 }

// kernel: bert_x_layer.14
= control target key start
LH: loop header
LB: loop body
LE: loop exit
PB: predicated region body
PF: predicated region fallthrough
CT: control target
= control target key end

     0   :  { %vm125_vm0 = vcmask 261120   ;;  %vm185_vm1 = vcmask 64512   ;;  %s1101_s26 = smov 96   ;;  %vm242_vm2 = vcmask 1043456   ;;  %s1103_s27 = smov 32   ;;  %vm289_vm3 = vcmask 257024   ;;  %s1435_s0 = inlined_call_operand.vmem [shape: bf16[2,16,384], index: 0, kind: input, shape index: {}]   ;;  %s1436_s1 = inlined_call_operand.vmem [shape: bf16[2,8,384], index: 1, kind: input, shape index: {}]   ;;  %s1437_s2 = inlined_call_operand.vmem [shape: f32[2,1,1,8], index: 2, kind: input, shape index: {}]   ;;  %s1438_s3 = inlined_call_operand.vmem [shape: bf16[2,16,128], index: 3, kind: output, shape index: {}]  }
   0x1   :  { %v1127_v0 = vld [vmem:[%s1436_s1] sm:$0xff]  ;;  %v1132_v1 = vld [vmem:[%s1436_s1 + $0xc] sm:$0xff]  ;;  %v945_v2 = vld [vmem:[%s1435_s0 + $0x8] sm:$0xf]  ;;  %vm502_vm4 = vcmask 519424   ;;  %vm715_vm5 = vcmask 781824  }
   0x2   :  { %97 = vst [vmem:[#allocation3] sm:$0xff] %v1127_v0  ;;  %v946_v3 = vld [vmem:[%s1435_s0 + $0x14] sm:$0xf]  ;;  %v947_v4 = vld [vmem:[%s1435_s0 + $0x20] sm:$0xf]  ;;  %v1007_v18 = vunpack.c.l.b16 %v1127_v0  ;;  %v1011_v32 = vunpack.c.l.b16 %v1132_v1  ;;  %vm928_vm6 = vcmask 1044224  }
   0x3   :  { %99 = vst [vmem:[#allocation3 + $0x8] sm:$0xff] %v1132_v1  ;;  %v948_v5 = vld [vmem:[%s1435_s0 + $0x2c] sm:$0xf]  ;;  %v1155_v12 = vld [vmem:[%s1437_s2] ss:$0 sm:$0xff] }
   0x4   :  { %28 = vst [vmem:[#allocation2] sm:$0xf] %v945_v2  ;;  %v1160_v14 = vld [vmem:[%s1437_s2 + $0x1] ss:$0 sm:$0xff]  ;;  %v1165_v21 = vpack.c.b16 %v1007_v18, %v1007_v18  ;;  %v343_v33 = vpack.c.b16 %v1011_v32, %v1011_v32  ;;  %s1102_s2 = smov 64  }
   0x5   :  { %30 = vst [vmem:[#allocation2 + $0x4] sm:$0xf] %v946_v3 }
   0x6   :  { %32 = vst [vmem:[#allocation2 + $0x8] sm:$0xf] %v947_v4  ;;  %312 = vrot.lane.b32.xlu2 %v1165_v21, %s1101_s26 }
   0x7   :  { %34 = vst [vmem:[#allocation2 + $0xc] sm:$0xf] %v948_v5 }
   0x9   :  { %v116_v6 = vld [vmem:[#allocation3] sm:$0xf]  ;;  %v118_v51 = vld [vmem:[#allocation3 + $0x4] sm:$0xf] }
   0xa   :  { %v130_v7 = vsel %vm125_vm0, %v116_v6, 0  ;;  %v117_v8 = vld [vmem:[#allocation3 + $0x8] sm:$0xf]  ;;  %v244_v52 = vsel %vm242_vm2, %v118_v51, 0  ;;  %v119_v59 = vld [vmem:[#allocation3 + $0xc] sm:$0xf] }
   0xb   :  { %139 = vmatpush.bf16.xpose.msra.mxu0 %v130_v7  ;;  %v155_v9 = vsel %vm125_vm0, %v117_v8, 0  ;;  %253 = vmatpush.bf16.msra.mxu2 %v244_v52  ;;  %v269_v60 = vsel %vm242_vm2, %v119_v59, 0 }
   0xc   :  { %164 = vmatpush.bf16.xpose.msra.mxu1 %v155_v9  ;;  %v997_v10 = vld [vmem:[#allocation2] sm:$0xff]  ;;  %278 = vmatpush.bf16.msra.mxu3 %v269_v60 }
   0xd   :  { %v999_v2 = vld [vmem:[#allocation2] sm:$0xff] }
   0xe   :  { %v998_v11 = vld [vmem:[#allocation2 + $0x8] sm:$0xff]  ;;  %v1003_v3 = vld [vmem:[#allocation2] sm:$0xff] }
   0xf   :  { %v1002_v62 = vld [vmem:[#allocation2 + $0x8] sm:$0xff]  ;;  %v1001_v4 = vld [vmem:[#allocation2] sm:$0xff] }
  0x10   :  { %v1000_v63 = vld [vmem:[#allocation2 + $0x8] sm:$0xff] }
  0x11   :  { %v1004_v5 = vld [vmem:[#allocation2 + $0x8] sm:$0xff] }
  0x12   :  { %953 = vmatmul.msk.bf16.vlgmr.msra.gmra.mxu0 %vm125_vm0, %v997_v10 }
  0x13   :  { %958 = vmatmul.msk.bf16.vlgmr.msra.gmra.mxu1 %vm125_vm0, %v998_v11 }
  0x60   :  { %v313_v50 = vpop.permute.xlu2 %312 }
  0x61   :  { %v318_v53 = vsel %vm125_vm0, %v313_v50, 0 }
  0x62   :  { %327 = vmatpush.bf16.xpose.msrb.mxu2 %v318_v53 }
  0x8f   :  { %v141_v13 = vpop.f32.mrf.mxu0 }
  0x90   :  { %v171_v15 = vmul.f32 0.17677669, %v141_v13  ;;  %v166_v16 = vpop.f32.mrf.mxu1 }
  0x91   :  { %v173_v17 = vmul.f32 0.17677669, %v166_v16 }
  0x92   :  { %v181_v19 = vadd.f32 %v1155_v12, %v171_v15 }
  0x93   :  { %v183_v20 = vadd.f32 %v1160_v14, %v173_v17 }
  0x94   :  { %v186_v22 = vsel %vm185_vm1, %v181_v19, -inf }
  0x95   :  { %v192_v23 = vsel %vm185_vm1, %v183_v20, -inf  ;;  %187 = vmax.xlane.f32.xlu0 %v186_v22 }
  0x96   :  { %193 = vmax.xlane.f32.xlu1 %v192_v23 }
  0x97   :  { %v143_v24 = vpop.f32.mrf.mxu0 }
  0x98   :  { %v172_v25 = vmul.f32 0.17677669, %v143_v24  ;;  %v168_v26 = vpop.f32.mrf.mxu1 }
  0x99   :  { %v174_v27 = vmul.f32 0.17677669, %v168_v26 }
  0x9a   :  { %v182_v28 = vadd.f32 %v1155_v12, %v172_v25 }
  0x9b   :  { %v184_v29 = vadd.f32 %v1160_v14, %v174_v27 }
  0x9c   :  { %v189_v30 = vsel %vm185_vm1, %v182_v28, -inf }
  0x9d   :  { %v195_v31 = vsel %vm185_vm1, %v184_v29, -inf  ;;  %190 = vmax.xlane.f32.xlu0 %v189_v30 }
  0x9e   :  { %196 = vmax.xlane.f32.xlu1 %v195_v31 }
  0xb1   :  { %344 = vrot.lane.b32.xlu0 %v343_v33, %s1101_s26 }
 0x108   :  { %v188_v34 = vpop.xlane.xlu0 %187 }
 0x109   :  { %v194_v35 = vpop.xlane.xlu1 %193  ;;  %v198_v36 = vsub.f32 %v181_v19, %v188_v34 }
 0x10a   :  { %v200_v37 = vsub.f32 %v183_v20, %v194_v35 }
 0x10b   :  { %v202_v38 = vmul.f32 1.442695, %v198_v36 }
 0x10c   :  { %v206_v39 = vmul.f32 1.442695, %v200_v37  ;;  %v1008_v37 = vunpack.c.h.b16 %v1127_v0 }
 0x10d   :  { %1037 = vpow2.f32 %v202_v38 }
 0x10e   :  { %1039 = vpow2.f32 %v206_v39 }
 0x110   :  { %v191_v40 = vpop.xlane.xlu0 %190 }
 0x111   :  { %v197_v41 = vpop.xlane.xlu1 %196  ;;  %v199_v42 = vsub.f32 %v182_v28, %v191_v40  ;;  %v1012_v40 = vunpack.c.h.b16 %v1132_v1 }
 0x112   :  { %v201_v43 = vsub.f32 %v184_v29, %v197_v41  ;;  %v1206_v41 = vpack.c.b16 %v1008_v37, %v1008_v37 }
 0x113   :  { %v1038_v44 = vpop.eup %1037  ;;  %v204_v45 = vmul.f32 1.442695, %v199_v42  ;;  %v1208_v42 = vpack.c.b16 %v1012_v40, %v1012_v40 }
 0x114   :  { %v1040_v46 = vpop.eup %1039  ;;  %v208_v47 = vmul.f32 1.442695, %v201_v43  ;;  %v210_v48 = vsel %vm185_vm1, %v1038_v44, 0.0 }
 0x115   :  { %1041 = vpow2.f32 %v204_v45  ;;  %211 = vadd.xlane.f32.xlu2 %v210_v48  ;;  %v216_v49 = vsel %vm185_vm1, %v1040_v46, 0.0 }
 0x116   :  { %1043 = vpow2.f32 %v208_v47  ;;  %217 = vadd.xlane.f32.xlu0 %v216_v49 }
 0x11b   :  { %v1042_v54 = vpop.eup %1041 }
 0x11c   :  { %v1044_v55 = vpop.eup %1043  ;;  %v213_v56 = vsel %vm185_vm1, %v1042_v54, 0.0 }
 0x11d   :  { %v219_v57 = vsel %vm185_vm1, %v1044_v55, 0.0  ;;  %214 = vadd.xlane.f32.xlu2 %v213_v56 }
 0x11e   :  { %220 = vadd.xlane.f32.xlu1 %v219_v57 }
 0x123   :  { %v345_v58 = vpop.permute.xlu0 %344 }
 0x124   :  { %v350_v61 = vsel %vm125_vm0, %v345_v58, 0 }
 0x125   :  { %359 = vmatpush.bf16.xpose.msrb.mxu3 %v350_v61 }
 0x12a   :  { %525 = vrot.lane.b32.xlu0 %v1165_v21, %s1102_s2 }
 0x132   :  { %552 = vrot.lane.b32.xlu0 %v1002_v62, %s1102_s2 }
 0x135   :  { %339 = vrot.lane.b32.xlu2 %v1000_v63, %s1101_s26 }
 0x137   :  { %307 = vrot.lane.b32.xlu1 %v999_v2, %s1101_s26 }
 0x13a   :  { %733 = vrot.lane.b32.xlu0 %v1003_v3, %s1103_s27 }
 0x13d   :  { %557 = vrot.lane.b32.xlu2 %v343_v33, %s1102_s2 }
 0x13f   :  { %520 = vrot.lane.b32.xlu1 %v1001_v4, %s1102_s2 }
 0x142   :  { %430 = vrot.lane.b32.xlu0 %v1206_v41, %s1101_s26 }
 0x145   :  { %738 = vrot.lane.b32.xlu2 %v1165_v21, %s1103_s27 }
 0x147   :  { %770 = vrot.lane.b32.xlu1 %v343_v33, %s1103_s27 }
 0x14d   :  { %765 = vrot.lane.b32.xlu2 %v1004_v5, %s1103_s27 }
 0x155   :  { %460 = vrot.lane.b32.xlu2 %v1208_v42, %s1101_s26 }
 0x188   :  { %v212_v6 = vpop.xlane.xlu2 %211 }
 0x189   :  { %v218_v7 = vpop.xlane.xlu0 %217  ;;  %1045 = vrcp.f32 %v212_v6 }
 0x18a   :  { %1047 = vrcp.f32 %v218_v7 }
 0x18f   :  { %v1046_v9 = vpop.eup %1045 }
 0x190   :  { %v215_v8 = vpop.xlane.xlu2 %214  ;;  %v1048_v11 = vpop.eup %1047  ;;  %v226_v13 = vmul.f32 %v1046_v9, %v1038_v44 }
 0x191   :  { %v221_v10 = vpop.xlane.xlu1 %220  ;;  %1049 = vrcp.f32 %v215_v8  ;;  %v228_v15 = vmul.f32 %v1048_v11, %v1040_v46 }
 0x192   :  { %1051 = vrcp.f32 %v221_v10  ;;  %v230_v19 = vpack.c.bf16 %v226_v13, %v226_v13 }
 0x193   :  { %v232_v22 = vpack.c.bf16 %v228_v15, %v228_v15 }
 0x194   :  { %v236_v25 = vunpack.c.l.b16 %v230_v19 }
 0x195   :  { %v262_v28 = vunpack.c.l.b16 %v232_v22 }
 0x197   :  { %v1050_v16 = vpop.eup %1049 }
 0x198   :  { %v1052_v17 = vpop.eup %1051  ;;  %v227_v18 = vmul.f32 %v1050_v16, %v1042_v54  ;;  %v340_v20 = vpop.permute.xlu2 %339 }
 0x199   :  { %v229_v21 = vmul.f32 %v1052_v17, %v1044_v55 }
 0x19a   :  { %v231_v23 = vpack.c.bf16 %v227_v18, %v227_v18 }
 0x19b   :  { %v233_v24 = vpack.c.bf16 %v229_v21, %v229_v21 }
 0x19c   :  { %v237_v26 = vunpack.c.l.b16 %v231_v23  ;;  %v526_v27 = vpop.permute.xlu0 %525 }
 0x19d   :  { %v263_v29 = vunpack.c.l.b16 %v233_v24  ;;  %v531_v31 = vsel %vm125_vm0, %v526_v27, 0 }
 0x19e   :  { %v238_v30 = vpack.c.b16 %v237_v26, %v236_v25 }
 0x19f   :  { %v264_v32 = vpack.c.b16 %v263_v29, %v262_v28 }
 0x1a0   :  { %959 = vmatmul.msk.bf16.vlgmr.msra.gmra.mxu2 %vm185_vm1, %v238_v30  ;;  %v558_v33 = vpop.permute.xlu2 %557 }
 0x1a1   :  { %960 = vmatmul.msk.bf16.vlgmr.msra.gmra.mxu3 %vm185_vm1, %v264_v32  ;;  %540 = vmatpush.bf16.xpose.msra.mxu2 %v531_v31  ;;  %v563_v34 = vsel %vm125_vm0, %v558_v33, 0 }
 0x1a2   :  { %572 = vmatpush.bf16.xpose.msra.mxu3 %v563_v34 }
 0x1a4   :  { %v553_v44 = vpop.permute.xlu0 %552 }
 0x1a8   :  { %v739_v36 = vpop.permute.xlu2 %738 }
 0x1a9   :  { %v308_v35 = vpop.permute.xlu1 %307  ;;  %v744_v38 = vsel %vm125_vm0, %v739_v36, 0 }
 0x1ac   :  { %v734_v1 = vpop.permute.xlu0 %733 }
 0x1b0   :  { %965 = vmatmul.msk.bf16.vlgmr.msrb.gmra.mxu2 %vm125_vm0, %v308_v35  ;;  %v766_v45 = vpop.permute.xlu2 %765 }
 0x1b1   :  { %970 = vmatmul.msk.bf16.vlgmr.msrb.gmra.mxu3 %vm125_vm0, %v340_v20  ;;  %v521_v39 = vpop.permute.xlu1 %520  ;;  %753 = vmatpush.bf16.xpose.msrb.mxu2 %v744_v38 }
 0x1b4   :  { %v431_v9 = vpop.permute.xlu0 %430 }
 0x1b5   :  { %v436_v13 = vsel %vm242_vm2, %v431_v9, 0 }
 0x1b6   :  { %445 = vmatpush.bf16.msrb.mxu0 %v436_v13 }
 0x1b8   :  { %v461_v8 = vpop.permute.xlu2 %460 }
 0x1b9   :  { %v771_v0 = vpop.permute.xlu1 %770  ;;  %v466_v11 = vsel %vm242_vm2, %v461_v8, 0 }
 0x1ba   :  { %v776_v43 = vsel %vm125_vm0, %v771_v0, 0  ;;  %475 = vmatpush.bf16.msrb.mxu1 %v466_v11 }
 0x1bb   :  { %785 = vmatpush.bf16.xpose.msrb.mxu3 %v776_v43 }
 0x1c0   :  { %977 = vmatmul.msk.bf16.vlgmr.msra.gmra.mxu2 %vm125_vm0, %v521_v39 }
 0x1c1   :  { %982 = vmatmul.msk.bf16.vlgmr.msra.gmra.mxu3 %vm125_vm0, %v553_v44 }
 0x1d0   :  { %989 = vmatmul.msk.bf16.vlgmr.msrb.gmra.mxu2 %vm125_vm0, %v734_v1 }
 0x1d1   :  { %994 = vmatmul.msk.bf16.vlgmr.msrb.gmra.mxu3 %vm125_vm0, %v766_v45 }
 0x223   :  { %v255_v46 = vpop.f32.mrf.mxu2 }
 0x224   :  { %v285_v47 = vpack.c.bf16 %v255_v46, %v255_v46  ;;  %v280_v48 = vpop.f32.mrf.mxu3 }
 0x225   :  { %v287_v49 = vpack.c.bf16 %v280_v48, %v280_v48 }
 0x226   :  { %290 = vst.msk [vmem:[%s1438_s3] sm:$0xf] %vm289_vm3, %v285_v47 }
 0x227   :  { %292 = vst.msk [vmem:[%s1438_s3 + $0x8] sm:$0xf] %vm289_vm3, %v287_v49 }
 0x22b   :  { %v257_v50 = vpop.f32.mrf.mxu2 }
 0x22c   :  { %v286_v51 = vpack.c.bf16 %v257_v50, %v257_v50  ;;  %v282_v52 = vpop.f32.mrf.mxu3 }
 0x22d   :  { %v288_v53 = vpack.c.bf16 %v282_v52, %v282_v52 }
 0x22e   :  { %291 = vst.msk [vmem:[%s1438_s3 + $0x4] sm:$0xf] %vm289_vm3, %v286_v51 }
 0x22f   :  { %293 = vst.msk [vmem:[%s1438_s3 + $0xc] sm:$0xf] %vm289_vm3, %v288_v53 }
 0x233   :  { %v329_v54 = vpop.f32.mrf.mxu2 }
 0x234   :  { %v366_v55 = vmul.f32 0.17677669, %v329_v54  ;;  %v361_v56 = vpop.f32.mrf.mxu3 }
 0x235   :  { %v368_v57 = vmul.f32 0.17677669, %v361_v56 }
 0x236   :  { %v1232_v58 = vadd.f32 %v1155_v12, %v366_v55 }
 0x237   :  { %v1235_v59 = vadd.f32 %v1160_v14, %v368_v57 }
 0x238   :  { %v374_v60 = vsel %vm185_vm1, %v1232_v58, -inf }
 0x239   :  { %375 = vmax.xlane.f32.xlu1 %v374_v60  ;;  %v380_v61 = vsel %vm185_vm1, %v1235_v59, -inf }
 0x23a   :  { %381 = vmax.xlane.f32.xlu2 %v380_v61 }
 0x23b   :  { %v331_v62 = vpop.f32.mrf.mxu2 }
 0x23c   :  { %v367_v63 = vmul.f32 0.17677669, %v331_v62  ;;  %v363_v2 = vpop.f32.mrf.mxu3 }
 0x23d   :  { %v369_v3 = vmul.f32 0.17677669, %v363_v2 }
 0x23e   :  { %v1242_v4 = vadd.f32 %v1155_v12, %v367_v63 }
 0x23f   :  { %v1245_v5 = vadd.f32 %v1160_v14, %v369_v3 }
 0x240   :  { %v377_v6 = vsel %vm185_vm1, %v1242_v4, -inf }
 0x241   :  { %378 = vmax.xlane.f32.xlu0 %v377_v6  ;;  %v383_v7 = vsel %vm185_vm1, %v1245_v5, -inf }
 0x242   :  { %384 = vmax.xlane.f32.xlu1 %v383_v7 }
 0x243   :  { %v542_v10 = vpop.f32.mrf.mxu2 }
 0x244   :  { %v579_v15 = vmul.f32 0.17677669, %v542_v10  ;;  %v574_v16 = vpop.f32.mrf.mxu3 }
 0x245   :  { %v581_v17 = vmul.f32 0.17677669, %v574_v16 }
 0x246   :  { %v1254_v18 = vadd.f32 %v1155_v12, %v579_v15 }
 0x247   :  { %v1257_v19 = vadd.f32 %v1160_v14, %v581_v17 }
 0x248   :  { %v587_v20 = vsel %vm185_vm1, %v1254_v18, -inf }
 0x249   :  { %588 = vmax.xlane.f32.xlu0 %v587_v20  ;;  %v593_v21 = vsel %vm185_vm1, %v1257_v19, -inf }
 0x24a   :  { %594 = vmax.xlane.f32.xlu1 %v593_v21 }
 0x24b   :  { %v544_v22 = vpop.f32.mrf.mxu2 }
 0x24c   :  { %v580_v23 = vmul.f32 0.17677669, %v544_v22  ;;  %v576_v24 = vpop.f32.mrf.mxu3 }
 0x24d   :  { %v582_v25 = vmul.f32 0.17677669, %v576_v24 }
 0x24e   :  { %v1264_v26 = vadd.f32 %v1155_v12, %v580_v23 }
 0x24f   :  { %v1267_v27 = vadd.f32 %v1160_v14, %v582_v25 }
 0x250   :  { %v590_v28 = vsel %vm185_vm1, %v1264_v26, -inf }
 0x251   :  { %591 = vmax.xlane.f32.xlu2 %v590_v28  ;;  %v596_v29 = vsel %vm185_vm1, %v1267_v27, -inf }
 0x252   :  { %597 = vmax.xlane.f32.xlu0 %v596_v29 }
 0x253   :  { %v755_v30 = vpop.f32.mrf.mxu2 }
 0x254   :  { %v792_v31 = vmul.f32 0.17677669, %v755_v30  ;;  %v787_v32 = vpop.f32.mrf.mxu3 }
 0x255   :  { %v794_v33 = vmul.f32 0.17677669, %v787_v32 }
 0x256   :  { %v1274_v34 = vadd.f32 %v1155_v12, %v792_v31 }
 0x257   :  { %v1277_v35 = vadd.f32 %v1160_v14, %v794_v33 }
 0x258   :  { %v800_v36 = vsel %vm185_vm1, %v1274_v34, -inf }
 0x259   :  { %v806_v37 = vsel %vm185_vm1, %v1277_v35, -inf  ;;  %801 = vmax.xlane.f32.xlu2 %v800_v36 }
 0x25a   :  { %807 = vmax.xlane.f32.xlu0 %v806_v37 }
 0x25b   :  { %v757_v38 = vpop.f32.mrf.mxu2 }
 0x25c   :  { %v793_v39 = vmul.f32 0.17677669, %v757_v38  ;;  %v789_v40 = vpop.f32.mrf.mxu3 }
 0x25d   :  { %v795_v0 = vmul.f32 0.17677669, %v789_v40 }
 0x25e   :  { %v1284_v43 = vadd.f32 %v1155_v12, %v793_v39 }
 0x25f   :  { %v1287_v44 = vadd.f32 %v1160_v14, %v795_v0 }
 0x260   :  { %v803_v1 = vsel %vm185_vm1, %v1284_v43, -inf }
 0x261   :  { %v809_v45 = vsel %vm185_vm1, %v1287_v44, -inf  ;;  %804 = vmax.xlane.f32.xlu1 %v803_v1 }
 0x262   :  { %810 = vmax.xlane.f32.xlu2 %v809_v45 }
 0x27a   :  { %643 = vrot.lane.b32.xlu2 %v1206_v41, %s1102_s2 }
 0x2ac   :  { %v376_v46 = vpop.xlane.xlu1 %375 }
 0x2ad   :  { %v386_v47 = vsub.f32 %v1232_v58, %v376_v46  ;;  %v382_v48 = vpop.xlane.xlu2 %381 }
 0x2ae   :  { %v388_v12 = vsub.f32 %v1235_v59, %v382_v48 }
 0x2af   :  { %v390_v49 = vmul.f32 1.442695, %v386_v47 }
 0x2b0   :  { %v394_v14 = vmul.f32 1.442695, %v388_v12 }
 0x2b1   :  { %1053 = vpow2.f32 %v390_v49 }
 0x2b2   :  { %1055 = vpow2.f32 %v394_v14 }
 0x2b4   :  { %v379_v50 = vpop.xlane.xlu0 %378 }
 0x2b5   :  { %v385_v51 = vpop.xlane.xlu1 %384  ;;  %v387_v52 = vsub.f32 %v1242_v4, %v379_v50 }
 0x2b6   :  { %v389_v53 = vsub.f32 %v1245_v5, %v385_v51 }
 0x2b7   :  { %v1299_v54 = vpop.eup %1053  ;;  %v392_v55 = vmul.f32 1.442695, %v387_v52 }
 0x2b8   :  { %v1301_v56 = vpop.eup %1055  ;;  %v396_v57 = vmul.f32 1.442695, %v389_v53  ;;  %v398_v58 = vsel %vm185_vm1, %v1299_v54, 0.0 }
 0x2b9   :  { %1057 = vpow2.f32 %v392_v55  ;;  %v404_v59 = vsel %vm185_vm1, %v1301_v56, 0.0  ;;  %399 = vadd.xlane.f32.xlu1 %v398_v58 }
 0x2ba   :  { %1059 = vpow2.f32 %v396_v57  ;;  %405 = vadd.xlane.f32.xlu2 %v404_v59 }
 0x2bc   :  { %v589_v60 = vpop.xlane.xlu0 %588 }
 0x2bd   :  { %v595_v61 = vpop.xlane.xlu1 %594  ;;  %v599_v62 = vsub.f32 %v1254_v18, %v589_v60 }
 0x2be   :  { %v601_v63 = vsub.f32 %v1257_v19, %v595_v61 }
 0x2bf   :  { %v1309_v2 = vpop.eup %1057  ;;  %v603_v3 = vmul.f32 1.442695, %v599_v62 }
 0x2c0   :  { %v1311_v4 = vpop.eup %1059  ;;  %v607_v5 = vmul.f32 1.442695, %v601_v63  ;;  %v401_v6 = vsel %vm185_vm1, %v1309_v2, 0.0 }
 0x2c1   :  { %1061 = vpow2.f32 %v603_v3  ;;  %v407_v7 = vsel %vm185_vm1, %v1311_v4, 0.0  ;;  %402 = vadd.xlane.f32.xlu0 %v401_v6 }
 0x2c2   :  { %1063 = vpow2.f32 %v607_v5  ;;  %408 = vadd.xlane.f32.xlu1 %v407_v7 }
 0x2c4   :  { %v592_v8 = vpop.xlane.xlu2 %591 }
 0x2c5   :  { %v600_v9 = vsub.f32 %v1264_v26, %v592_v8  ;;  %v598_v10 = vpop.xlane.xlu0 %597 }
 0x2c6   :  { %v602_v16 = vsub.f32 %v1267_v27, %v598_v10 }
 0x2c7   :  { %v1318_v11 = vpop.eup %1061  ;;  %v605_v13 = vmul.f32 1.442695, %v600_v9 }
 0x2c8   :  { %v1320_v15 = vpop.eup %1063  ;;  %v611_v17 = vsel %vm185_vm1, %v1318_v11, 0.0  ;;  %v609_v19 = vmul.f32 1.442695, %v602_v16 }
 0x2c9   :  { %1065 = vpow2.f32 %v605_v13  ;;  %v617_v18 = vsel %vm185_vm1, %v1320_v15, 0.0 }
 0x2ca   :  { %618 = vadd.xlane.f32.xlu0 %v617_v18  ;;  %612 = vadd.xlane.f32.xlu1 %v611_v17  ;;  %1067 = vpow2.f32 %v609_v19 }
 0x2cc   :  { %v802_v20 = vpop.xlane.xlu2 %801 }
 0x2cd   :  { %v812_v21 = vsub.f32 %v1274_v34, %v802_v20  ;;  %v808_v22 = vpop.xlane.xlu0 %807 }
 0x2ce   :  { %v814_v23 = vsub.f32 %v1277_v35, %v808_v22 }
 0x2cf   :  { %v1329_v24 = vpop.eup %1065  ;;  %v816_v25 = vmul.f32 1.442695, %v812_v21 }
 0x2d0   :  { %v820_v26 = vmul.f32 1.442695, %v814_v23  ;;  %v614_v27 = vsel %vm185_vm1, %v1329_v24, 0.0  ;;  %v1333_v29 = vpop.eup %1067 }
 0x2d1   :  { %1069 = vpow2.f32 %v816_v25  ;;  %v620_v35 = vsel %vm185_vm1, %v1333_v29, 0.0 }
 0x2d2   :  { %1071 = vpow2.f32 %v820_v26  ;;  %615 = vadd.xlane.f32.xlu1 %v614_v27 }
 0x2d4   :  { %v805_v0 = vpop.xlane.xlu1 %804 }
 0x2d5   :  { %v811_v28 = vpop.xlane.xlu2 %810 }
 0x2d6   :  { %v815_v30 = vsub.f32 %v1287_v44, %v811_v28  ;;  %v813_v44 = vsub.f32 %v1284_v43, %v805_v0 }
 0x2d7   :  { %v1336_v31 = vpop.eup %1069 }
 0x2d8   :  { %v1338_v32 = vpop.eup %1071  ;;  %v822_v33 = vmul.f32 1.442695, %v815_v30  ;;  %v824_v34 = vsel %vm185_vm1, %v1336_v31, 0.0  ;;  %v818_v1 = vmul.f32 1.442695, %v813_v44 }
 0x2d9   :  { %825 = vadd.xlane.f32.xlu2 %v824_v34  ;;  %v830_v36 = vsel %vm185_vm1, %v1338_v32, 0.0 }
 0x2da   :  { %1073 = vpow2.f32 %v822_v33  ;;  %621 = vadd.xlane.f32.xlu1 %v620_v35  ;;  %831 = vadd.xlane.f32.xlu0 %v830_v36 }
 0x2db   :  { %1075 = vpow2.f32 %v818_v1 }
 0x2dd   :  { %v644_v39 = vpop.permute.xlu2 %643 }
 0x2de   :  { %v649_v40 = vsel %vm242_vm2, %v644_v39, 0 }
 0x2df   :  { %658 = vmatpush.bf16.msra.mxu0 %v649_v40 }
 0x2e0   :  { %v1346_v37 = vpop.eup %1073 }
 0x2e1   :  { %v833_v38 = vsel %vm185_vm1, %v1346_v37, 0.0  ;;  %v1358_v45 = vpop.eup %1075 }
 0x2e2   :  { %834 = vadd.xlane.f32.xlu0 %v833_v38 }
 0x2f1   :  { %856 = vrot.lane.b32.xlu2 %v1206_v41, %s1103_s27  ;;  %v827_v41 = vsel %vm185_vm1, %v1358_v45, 0.0 }
 0x2f3   :  { %673 = vrot.lane.b32.xlu1 %v1208_v42, %s1102_s2 }
 0x2f6   :  { %886 = vrot.lane.b32.xlu0 %v1208_v42, %s1103_s27 }
 0x31d   :  { %828 = vadd.xlane.f32.xlu1 %v827_v41 }
 0x32c   :  { %v400_v46 = vpop.xlane.xlu1 %399 }
 0x32d   :  { %v406_v47 = vpop.xlane.xlu2 %405  ;;  %1077 = vrcp.f32 %v400_v46 }
 0x32e   :  { %1079 = vrcp.f32 %v406_v47 }
 0x333   :  { %v1078_v48 = vpop.eup %1077 }
 0x334   :  { %v403_v42 = vpop.xlane.xlu0 %402  ;;  %v1080_v49 = vpop.eup %1079  ;;  %v414_v43 = vmul.f32 %v1078_v48, %v1299_v54 }
 0x335   :  { %v409_v12 = vpop.xlane.xlu1 %408  ;;  %1081 = vrcp.f32 %v403_v42  ;;  %v416_v14 = vmul.f32 %v1080_v49, %v1301_v56 }
 0x336   :  { %1083 = vrcp.f32 %v409_v12  ;;  %v418_v52 = vpack.c.bf16 %v414_v43, %v414_v43 }
 0x337   :  { %v420_v55 = vpack.c.bf16 %v416_v14, %v416_v14 }
 0x338   :  { %v424_v61 = vunpack.c.l.b16 %v418_v52 }
 0x339   :  { %v454_v63 = vunpack.c.l.b16 %v420_v55 }
 0x33b   :  { %v1082_v50 = vpop.eup %1081 }
 0x33c   :  { %v1084_v51 = vpop.eup %1083  ;;  %v415_v53 = vmul.f32 %v1082_v50, %v1309_v2 }
 0x33d   :  { %v417_v57 = vmul.f32 %v1084_v51, %v1311_v4  ;;  %v613_v58 = vpop.xlane.xlu1 %612  ;;  %v619_v9 = vpop.xlane.xlu0 %618 }
 0x33e   :  { %v419_v59 = vpack.c.bf16 %v415_v53, %v415_v53  ;;  %1085 = vrcp.f32 %v613_v58 }
 0x33f   :  { %v421_v60 = vpack.c.bf16 %v417_v57, %v417_v57 }
 0x340   :  { %v425_v62 = vunpack.c.l.b16 %v419_v59 }
 0x341   :  { %v455_v3 = vunpack.c.l.b16 %v421_v60 }
 0x342   :  { %v426_v5 = vpack.c.b16 %v425_v62, %v424_v61 }
 0x343   :  { %v456_v54 = vpack.c.b16 %v455_v3, %v454_v63 }
 0x344   :  { %971 = vmatmul.msk.bf16.vlgmr.msrb.gmra.mxu0 %vm185_vm1, %v426_v5  ;;  %v1086_v6 = vpop.eup %1085 }
 0x345   :  { %972 = vmatmul.msk.bf16.vlgmr.msrb.gmra.mxu1 %vm185_vm1, %v456_v54  ;;  %v616_v56 = vpop.xlane.xlu1 %615  ;;  %v627_v2 = vmul.f32 %v1086_v6, %v1318_v11 }
 0x346   :  { %1087 = vrcp.f32 %v616_v56 }
 0x347   :  { %v631_v7 = vpack.c.bf16 %v627_v2, %v627_v2 }
 0x349   :  { %v637_v16 = vunpack.c.l.b16 %v631_v7 }
 0x34c   :  { %v1088_v4 = vpop.eup %1087  ;;  %v826_v18 = vpop.xlane.xlu2 %825 }
 0x34d   :  { %v628_v8 = vmul.f32 %v1088_v4, %v1329_v24  ;;  %v622_v13 = vpop.xlane.xlu1 %621  ;;  %v832_v20 = vpop.xlane.xlu0 %831 }
 0x34e   :  { %1089 = vrcp.f32 %v622_v13 }
 0x34f   :  { %v632_v10 = vpack.c.bf16 %v628_v8, %v628_v8  ;;  %1091 = vrcp.f32 %v619_v9 }
 0x351   :  { %v638_v17 = vunpack.c.l.b16 %v632_v10 }
 0x353   :  { %v639_v19 = vpack.c.b16 %v638_v17, %v637_v16 }
 0x354   :  { %v1090_v21 = vpop.eup %1089  ;;  %v857_v22 = vpop.permute.xlu2 %856 }
 0x355   :  { %983 = vmatmul.msk.bf16.vlgmr.msra.gmra.mxu0 %vm185_vm1, %v639_v19  ;;  %v1092_v23 = vpop.eup %1091  ;;  %v862_v11 = vsel %vm242_vm2, %v857_v22, 0  ;;  %v630_v25 = vmul.f32 %v1090_v21, %v1333_v29  ;;  %v835_v27 = vpop.xlane.xlu0 %834 }
 0x356   :  { %871 = vmatpush.bf16.msrb.mxu0 %v862_v11  ;;  %v629_v24 = vmul.f32 %v1092_v23, %v1320_v15  ;;  %1093 = vrcp.f32 %v835_v27 }
 0x357   :  { %v634_v26 = vpack.c.bf16 %v630_v25, %v630_v25  ;;  %1095 = vrcp.f32 %v832_v20 }
 0x358   :  { %v633_v28 = vpack.c.bf16 %v629_v24, %v629_v24  ;;  %1097 = vrcp.f32 %v826_v18 }
 0x359   :  { %v668_v30 = vunpack.c.l.b16 %v634_v26 }
 0x35a   :  { %v667_v34 = vunpack.c.l.b16 %v633_v28 }
 0x35c   :  { %v669_v36 = vpack.c.b16 %v668_v30, %v667_v34  ;;  %v1094_v39 = vpop.eup %1093 }
 0x35d   :  { %v1096_v29 = vpop.eup %1095  ;;  %v843_v15 = vmul.f32 %v1094_v39, %v1346_v37 }
 0x35e   :  { %v842_v0 = vmul.f32 %v1096_v29, %v1338_v32  ;;  %v1098_v48 = vpop.eup %1097 }
 0x35f   :  { %v847_v44 = vpack.c.bf16 %v843_v15, %v843_v15  ;;  %v840_v12 = vmul.f32 %v1098_v48, %v1336_v31 }
 0x360   :  { %v846_v1 = vpack.c.bf16 %v842_v0, %v842_v0 }
 0x361   :  { %v881_v41 = vunpack.c.l.b16 %v847_v44  ;;  %v844_v43 = vpack.c.bf16 %v840_v12, %v840_v12 }
 0x362   :  { %v880_v46 = vunpack.c.l.b16 %v846_v1 }
 0x363   :  { %v850_v50 = vunpack.c.l.b16 %v844_v43 }
 0x364   :  { %v882_v47 = vpack.c.b16 %v881_v41, %v880_v46 }
 0x365   :  { %v674_v33 = vpop.permute.xlu1 %673 }
 0x366   :  { %v679_v35 = vsel %vm242_vm2, %v674_v33, 0 }
 0x367   :  { %688 = vmatpush.bf16.msra.mxu1 %v679_v35 }
 0x368   :  { %v887_v38 = vpop.permute.xlu0 %886 }
 0x369   :  { %v892_v40 = vsel %vm242_vm2, %v887_v38, 0 }
 0x36a   :  { %984 = vmatmul.msk.bf16.vlgmr.msra.gmra.mxu1 %vm185_vm1, %v669_v36 }
 0x36b   :  { %901 = vmatpush.bf16.msrb.mxu1 %v892_v40 }
 0x37a   :  { %996 = vmatmul.msk.bf16.vlgmr.msrb.gmra.mxu1 %vm185_vm1, %v882_v47 }
 0x390   :  { %v829_v42 = vpop.xlane.xlu1 %828 }
 0x391   :  { %1099 = vrcp.f32 %v829_v42 }
 0x397   :  { %v1100_v49 = vpop.eup %1099 }
 0x398   :  { %v841_v14 = vmul.f32 %v1100_v49, %v1358_v45 }
 0x39a   :  { %v845_v37 = vpack.c.bf16 %v841_v14, %v841_v14 }
 0x39c   :  { %v851_v32 = vunpack.c.l.b16 %v845_v37 }
 0x39e   :  { %v852_v51 = vpack.c.b16 %v851_v32, %v850_v50 }
 0x3a0   :  { %995 = vmatmul.msk.bf16.vlgmr.msrb.gmra.mxu0 %vm185_vm1, %v852_v51 }
 0x3c1   :  { %v447_v52 = vpop.f32.mrf.mxu0 }
 0x3c2   :  { %v482_v53 = vpack.c.bf16 %v447_v52, %v447_v52  ;;  %v477_v55 = vpop.f32.mrf.mxu1 }
 0x3c3   :  { %v484_v57 = vpack.c.bf16 %v477_v55, %v477_v55 }
 0x3c4   :  { %490 = vrot.lane.b32.xlu1 %v482_v53, %s1103_s27 }
 0x3c5   :  { %494 = vrot.lane.b32.xlu2 %v484_v57, %s1103_s27 }
 0x3c9   :  { %v449_v58 = vpop.f32.mrf.mxu0 }
 0x3ca   :  { %v483_v31 = vpack.c.bf16 %v449_v58, %v449_v58  ;;  %v479_v59 = vpop.f32.mrf.mxu1 }
 0x3cb   :  { %v485_v45 = vpack.c.bf16 %v479_v59, %v479_v59 }
 0x3cc   :  { %492 = vrot.lane.b32.xlu0 %v483_v31, %s1103_s27 }
 0x3d2   :  { %v660_v60 = vpop.f32.mrf.mxu0 }
 0x3d3   :  { %v695_v61 = vpack.c.bf16 %v660_v60, %v660_v60 }
 0x3d4   :  { %496 = vrot.lane.b32.xlu0 %v485_v45, %s1103_s27 }
 0x3d5   :  { %703 = vrot.lane.b32.xlu2 %v695_v61, %s1102_s2 }
 0x3da   :  { %v662_v62 = vpop.f32.mrf.mxu0 }
 0x3db   :  { %v696_v63 = vpack.c.bf16 %v662_v62, %v662_v62 }
 0x3dd   :  { %705 = vrot.lane.b32.xlu0 %v696_v63, %s1102_s2 }
 0x3e7   :  { %v690_v3 = vpop.f32.mrf.mxu1 }
 0x3e8   :  { %v697_v5 = vpack.c.bf16 %v690_v3, %v690_v3 }
 0x3ea   :  { %707 = vrot.lane.b32.xlu2 %v697_v5, %s1102_s2 }
 0x3ef   :  { %v692_v54 = vpop.f32.mrf.mxu1 }
 0x3f0   :  { %v698_v56 = vpack.c.bf16 %v692_v54, %v692_v54 }
 0x3f2   :  { %709 = vrot.lane.b32.xlu1 %v698_v56, %s1102_s2 }
 0x3f7   :  { %v903_v6 = vpop.f32.mrf.mxu1 }
 0x3f8   :  { %v910_v2 = vpack.c.bf16 %v903_v6, %v903_v6 }
 0x3fa   :  { %920 = vrot.lane.b32.xlu1 %v910_v2, %s1101_s26 }
 0x3ff   :  { %v905_v9 = vpop.f32.mrf.mxu1 }
 0x400   :  { %v911_v13 = vpack.c.bf16 %v905_v9, %v905_v9 }
 0x41d   :  { %v873_v4 = vpop.f32.mrf.mxu0 }
 0x41e   :  { %v908_v7 = vpack.c.bf16 %v873_v4, %v873_v4 }
 0x41f   :  { %v495_v8 = vpop.permute.xlu2 %494 }
 0x420   :  { %505 = vst.msk [vmem:[%s1438_s3 + $0x8] sm:$0xf] %vm502_vm4, %v495_v8  ;;  %916 = vrot.lane.b32.xlu0 %v908_v7, %s1101_s26 }
 0x425   :  { %v875_v10 = vpop.f32.mrf.mxu0 }
 0x426   :  { %v909_v16 = vpack.c.bf16 %v875_v10, %v875_v10 }
 0x428   :  { %918 = vrot.lane.b32.xlu2 %v909_v16, %s1101_s26  ;;  %922 = vrot.lane.b32.xlu0 %v911_v13, %s1101_s26 }
 0x42f   :  { %v704_v18 = vpop.permute.xlu2 %703 }
 0x436   :  { %v491_v17 = vpop.permute.xlu1 %490 }
 0x437   :  { %503 = vst.msk [vmem:[%s1438_s3] sm:$0xf] %vm502_vm4, %v491_v17 }
 0x438   :  { %716 = vst.msk [vmem:[%s1438_s3] sm:$0xf] %vm715_vm5, %v704_v18 }
 0x43e   :  { %v493_v19 = vpop.permute.xlu0 %492 }
 0x43f   :  { %504 = vst.msk [vmem:[%s1438_s3 + $0x4] sm:$0xf] %vm502_vm4, %v493_v19 }
 0x444   :  { %v708_v20 = vpop.permute.xlu2 %707 }
 0x445   :  { %718 = vst.msk [vmem:[%s1438_s3 + $0x8] sm:$0xf] %vm715_vm5, %v708_v20 }
 0x446   :  { %v497_v21 = vpop.permute.xlu0 %496 }
 0x447   :  { %506 = vst.msk [vmem:[%s1438_s3 + $0xc] sm:$0xf] %vm502_vm4, %v497_v21 }
 0x44f   :  { %v706_v22 = vpop.permute.xlu0 %705 }
 0x450   :  { %717 = vst.msk [vmem:[%s1438_s3 + $0x4] sm:$0xf] %vm715_vm5, %v706_v22 }
 0x464   :  { %v710_v23 = vpop.permute.xlu1 %709 }
 0x465   :  { %719 = vst.msk [vmem:[%s1438_s3 + $0xc] sm:$0xf] %vm715_vm5, %v710_v23 }
 0x46c   :  { %v921_v11 = vpop.permute.xlu1 %920 }
 0x46d   :  { %931 = vst.msk [vmem:[%s1438_s3 + $0x8] sm:$0xf] %vm928_vm6, %v921_v11 }
 0x482   :  { %v919_v25 = vpop.permute.xlu2 %918 }
 0x483   :  { %930 = vst.msk [vmem:[%s1438_s3 + $0x4] sm:$0xf] %vm928_vm6, %v919_v25 }
 0x492   :  { %v917_v24 = vpop.permute.xlu0 %916 }
 0x493   :  { %929 = vst.msk [vmem:[%s1438_s3] sm:$0xf] %vm928_vm6, %v917_v24 }
 0x49a   :  { %v923_v26 = vpop.permute.xlu0 %922 }
 0x49b   :  { %932 = vst.msk [vmem:[%s1438_s3 + $0xc] sm:$0xf] %vm928_vm6, %v923_v26 }

// kernel: bert_x_layer.19
= control target key start
LH: loop header
LB: loop body
LE: loop exit
PB: predicated region body
PF: predicated region fallthrough
CT: control target
= control target key end

     0   :  { %s693_s1 = inlined_call_operand.vmem [shape: bf16[128,384], index: 1, kind: input, shape index: {}]   ;;  %s694_s0 = inlined_call_operand.vmem [shape: bf16[32,128], index: 0, kind: input, shape index: {}]   ;;  %s695_s2 = inlined_call_operand.vmem [shape: bf16[1,384], index: 2, kind: input, shape index: {}]   ;;  %s696_s3 = inlined_call_operand.vmem [shape: bf16[32,384], index: 3, kind: output, shape index: {}]  }
   0x1   :  { %v452_v0 = vld [vmem:[%s693_s1 + $0xa8] sm:$0xf]  ;;  %v486_v1 = vld [vmem:[%s693_s1 + $0xb0] sm:$0xf0]  ;;  %v485_v2 = vld [vmem:[%s693_s1 + $0xac] sm:$0xf] }
   0x2   :  { %v453_v3 = vor.u32 %v486_v1, %v452_v0  ;;  %v454_v4 = vld [vmem:[%s693_s1 + $0xb4] sm:$0xf0]  ;;  %v460_v5 = vld [vmem:[%s693_s1 + $0xb0] sm:$0xf]  ;;  %v487_v6 = vld [vmem:[%s693_s1 + $0xb8] sm:$0xf0] }
   0x3   :  { %v457_v7 = vor.u32 %v485_v2, %v454_v4  ;;  %v461_v8 = vor.u32 %v487_v6, %v460_v5  ;;  %v440_v9 = vld [vmem:[%s693_s1 + $0x90] sm:$0xf]  ;;  %v483_v10 = vld [vmem:[%s693_s1 + $0x98] sm:$0xf0]  ;;  %v482_v11 = vld [vmem:[%s693_s1 + $0x94] sm:$0xf] }
   0x4   :  { %218 = vmatpush.bf16.msra.mxu0 %v453_v3  ;;  %v441_v12 = vor.u32 %v483_v10, %v440_v9  ;;  %v442_v13 = vld [vmem:[%s693_s1 + $0x9c] sm:$0xf0]  ;;  %v448_v14 = vld [vmem:[%s693_s1 + $0x98] sm:$0xf]  ;;  %v484_v15 = vld [vmem:[%s693_s1 + $0xa0] sm:$0xf0]  ;;  %488 = vmatpush.bf16.msra.mxu3 %v453_v3 }
   0x5   :  { %237 = vmatpush.bf16.msra.mxu1 %v457_v7  ;;  %256 = vmatpush.bf16.msra.mxu2 %v461_v8  ;;  %v445_v16 = vor.u32 %v482_v11, %v442_v13  ;;  %v449_v17 = vor.u32 %v484_v15, %v448_v14  ;;  %v428_v18 = vld [vmem:[%s693_s1 + $0x78] sm:$0xf]  ;;  %v480_v19 = vld [vmem:[%s693_s1 + $0x80] sm:$0xf0]  ;;  %v479_v20 = vld [vmem:[%s693_s1 + $0x7c] sm:$0xf] }
   0x6   :  { %v430_v21 = vld [vmem:[%s693_s1 + $0x84] sm:$0xf0]  ;;  %v436_v22 = vld [vmem:[%s693_s1 + $0x80] sm:$0xf]  ;;  %v481_v23 = vld [vmem:[%s693_s1 + $0x88] sm:$0xf0]  ;;  %v429_v24 = vor.u32 %v480_v19, %v428_v18 }
   0x7   :  { %v433_v25 = vor.u32 %v479_v20, %v430_v21  ;;  %v437_v26 = vor.u32 %v481_v23, %v436_v22  ;;  %v416_v27 = vld [vmem:[%s693_s1 + $0x60] sm:$0xf]  ;;  %v477_v28 = vld [vmem:[%s693_s1 + $0x68] sm:$0xf0]  ;;  %v476_v29 = vld [vmem:[%s693_s1 + $0x64] sm:$0xf] }
   0x8   :  { %219 = vmatpush.bf16.msra.mxu0 %v441_v12  ;;  %489 = vmatpush.bf16.msra.mxu3 %v441_v12  ;;  %v418_v30 = vld [vmem:[%s693_s1 + $0x6c] sm:$0xf0]  ;;  %v424_v31 = vld [vmem:[%s693_s1 + $0x68] sm:$0xf]  ;;  %v478_v32 = vld [vmem:[%s693_s1 + $0x70] sm:$0xf0]  ;;  %v417_v33 = vor.u32 %v477_v28, %v416_v27 }
   0x9   :  { %238 = vmatpush.bf16.msra.mxu1 %v445_v16  ;;  %257 = vmatpush.bf16.msra.mxu2 %v449_v17  ;;  %v421_v34 = vor.u32 %v476_v29, %v418_v30  ;;  %v425_v35 = vor.u32 %v478_v32, %v424_v31  ;;  %v404_v36 = vld [vmem:[%s693_s1 + $0x48] sm:$0xf]  ;;  %v474_v37 = vld [vmem:[%s693_s1 + $0x50] sm:$0xf0]  ;;  %v473_v38 = vld [vmem:[%s693_s1 + $0x4c] sm:$0xf] }
   0xa   :  { %v406_v39 = vld [vmem:[%s693_s1 + $0x54] sm:$0xf0]  ;;  %v412_v40 = vld [vmem:[%s693_s1 + $0x50] sm:$0xf]  ;;  %v475_v41 = vld [vmem:[%s693_s1 + $0x58] sm:$0xf0]  ;;  %v405_v42 = vor.u32 %v474_v37, %v404_v36 }
   0xb   :  { %v409_v43 = vor.u32 %v473_v38, %v406_v39  ;;  %v413_v44 = vor.u32 %v475_v41, %v412_v40  ;;  %v392_v45 = vld [vmem:[%s693_s1 + $0x30] sm:$0xf]  ;;  %v471_v46 = vld [vmem:[%s693_s1 + $0x38] sm:$0xf0]  ;;  %v470_v47 = vld [vmem:[%s693_s1 + $0x34] sm:$0xf] }
   0xc   :  { %220 = vmatpush.bf16.msra.mxu0 %v429_v24  ;;  %490 = vmatpush.bf16.msra.mxu3 %v429_v24  ;;  %v394_v48 = vld [vmem:[%s693_s1 + $0x3c] sm:$0xf0]  ;;  %v400_v49 = vld [vmem:[%s693_s1 + $0x38] sm:$0xf]  ;;  %v472_v50 = vld [vmem:[%s693_s1 + $0x40] sm:$0xf0]  ;;  %v393_v51 = vor.u32 %v471_v46, %v392_v45 }
   0xd   :  { %239 = vmatpush.bf16.msra.mxu1 %v433_v25  ;;  %258 = vmatpush.bf16.msra.mxu2 %v437_v26  ;;  %v397_v52 = vor.u32 %v470_v47, %v394_v48  ;;  %v401_v53 = vor.u32 %v472_v50, %v400_v49  ;;  %v380_v54 = vld [vmem:[%s693_s1 + $0x18] sm:$0xf]  ;;  %v468_v55 = vld [vmem:[%s693_s1 + $0x20] sm:$0xf0]  ;;  %v467_v56 = vld [vmem:[%s693_s1 + $0x1c] sm:$0xf] }
   0xe   :  { %v382_v57 = vld [vmem:[%s693_s1 + $0x24] sm:$0xf0]  ;;  %v388_v58 = vld [vmem:[%s693_s1 + $0x20] sm:$0xf]  ;;  %v469_v59 = vld [vmem:[%s693_s1 + $0x28] sm:$0xf0]  ;;  %v381_v60 = vor.u32 %v468_v55, %v380_v54 }
   0xf   :  { %v385_v61 = vor.u32 %v467_v56, %v382_v57  ;;  %v389_v62 = vor.u32 %v469_v59, %v388_v58  ;;  %v368_v63 = vld [vmem:[%s693_s1] sm:$0xf]  ;;  %v465_v0 = vld [vmem:[%s693_s1 + $0x8] sm:$0xf0]  ;;  %v464_v1 = vld [vmem:[%s693_s1 + $0x4] sm:$0xf] }
  0x10   :  { %221 = vmatpush.bf16.msra.mxu0 %v417_v33  ;;  %491 = vmatpush.bf16.msra.mxu3 %v417_v33  ;;  %v370_v2 = vld [vmem:[%s693_s1 + $0xc] sm:$0xf0]  ;;  %v376_v3 = vld [vmem:[%s693_s1 + $0x8] sm:$0xf]  ;;  %v466_v4 = vld [vmem:[%s693_s1 + $0x10] sm:$0xf0]  ;;  %v369_v5 = vor.u32 %v465_v0, %v368_v63 }
  0x11   :  { %240 = vmatpush.bf16.msra.mxu1 %v421_v34  ;;  %259 = vmatpush.bf16.msra.mxu2 %v425_v35  ;;  %v373_v6 = vor.u32 %v464_v1, %v370_v2  ;;  %v377_v7 = vor.u32 %v466_v4, %v376_v3  ;;  %v462_v8 = vld [vmem:[%s694_s0] sm:$0xff]  ;;  %v463_v9 = vld [vmem:[%s694_s0 + $0x8] sm:$0xff] }
  0x12   :  { %v314_v10 = vld [vmem:[%s695_s2] sm:$0x7] }
  0x13   :  { %v315_v11 = vunpack.c.l.bf16 %v314_v10 }
  0x14   :  { %222 = vmatpush.bf16.msra.mxu0 %v405_v42  ;;  %492 = vmatpush.bf16.msra.mxu3 %v405_v42 }
  0x15   :  { %241 = vmatpush.bf16.msra.mxu1 %v409_v43  ;;  %260 = vmatpush.bf16.msra.mxu2 %v413_v44  ;;  %v317_v12 = vperm.slane %v315_v11, 0  ;;  %v318_v13 = vperm.slane %v315_v11, 2  ;;  %v319_v17 = vperm.slane %v315_v11, 4 }
  0x17   :  { %v323_v14 = vperm.slane %v317_v12, 0  ;;  %v324_v15 = vperm.slane %v318_v13, 0  ;;  %v325_v22 = vperm.slane %v319_v17, 0 }
  0x18   :  { %223 = vmatpush.bf16.msra.mxu0 %v393_v51  ;;  %493 = vmatpush.bf16.msra.mxu3 %v393_v51 }
  0x19   :  { %242 = vmatpush.bf16.msra.mxu1 %v397_v52  ;;  %261 = vmatpush.bf16.msra.mxu2 %v401_v53 }
  0x1c   :  { %224 = vmatpush.bf16.msra.mxu0 %v381_v60  ;;  %494 = vmatpush.bf16.msra.mxu3 %v381_v60 }
  0x1d   :  { %243 = vmatpush.bf16.msra.mxu1 %v385_v61  ;;  %262 = vmatpush.bf16.msra.mxu2 %v389_v62 }
  0x20   :  { %225 = vmatpush.bf16.msra.mxu0 %v369_v5  ;;  %495 = vmatpush.bf16.msra.mxu3 %v369_v5 }
  0x21   :  { %244 = vmatpush.bf16.msra.mxu1 %v373_v6  ;;  %263 = vmatpush.bf16.msra.mxu2 %v377_v7 }
  0x23   :  { %226 = vmatmul.bf16.vlgmr.msra.gmra.mxu0 %v462_v8  ;;  %231 = vmatmul.bf16.vlgmr.msra.gmra.mxu3 %v463_v9 }
  0x24   :  { %245 = vmatmul.bf16.vlgmr.msra.gmra.mxu1 %v462_v8  ;;  %264 = vmatmul.bf16.vlgmr.msra.gmra.mxu2 %v462_v8 }
  0x34   :  { %250 = vmatmul.bf16.gmra.mxu1 %v463_v9  ;;  %269 = vmatmul.bf16.gmra.mxu2 %v463_v9 }
  0xa0   :  { %v227_v16 = vpop.f32.mrf.mxu0 }
  0xa1   :  { %v326_v18 = vadd.f32 %v323_v14, %v227_v16  ;;  %v246_v19 = vpop.f32.mrf.mxu1 }
  0xa2   :  { %v327_v20 = vadd.f32 %v324_v15, %v246_v19 }
  0xa4   :  { %v338_v21 = vpack.c.bf16 %v327_v20, %v326_v18 }
  0xa6   :  { %346 = vst [vmem:[%s696_s3] sm:$0xff] %v338_v21  ;;  %v232_v31 = vpop.f32.mrf.mxu3 }
  0xa7   :  { %v265_v23 = vpop.f32.mrf.mxu2  ;;  %v332_v33 = vadd.f32 %v323_v14, %v232_v31 }
  0xa8   :  { %v328_v24 = vadd.f32 %v325_v22, %v265_v23  ;;  %v229_v25 = vpop.f32.mrf.mxu0 }
  0xa9   :  { %v329_v26 = vadd.f32 %v323_v14, %v229_v25  ;;  %v248_v27 = vpop.f32.mrf.mxu1 }
  0xaa   :  { %v339_v28 = vpack.c.bf16 %v328_v24, %v328_v24  ;;  %v330_v29 = vadd.f32 %v324_v15, %v248_v27 }
  0xac   :  { %347 = vst [vmem:[%s696_s3 + $0x8] sm:$0xf] %v339_v28  ;;  %v340_v30 = vpack.c.bf16 %v330_v29, %v329_v26 }
  0xae   :  { %348 = vst [vmem:[%s696_s3 + $0xc] sm:$0xff] %v340_v30  ;;  %v234_v39 = vpop.f32.mrf.mxu3 }
  0xaf   :  { %v267_v32 = vpop.f32.mrf.mxu2  ;;  %v335_v43 = vadd.f32 %v323_v14, %v234_v39 }
  0xb0   :  { %v331_v34 = vadd.f32 %v325_v22, %v267_v32 }
  0xb1   :  { %v251_v35 = vpop.f32.mrf.mxu1 }
  0xb2   :  { %v341_v36 = vpack.c.bf16 %v331_v34, %v331_v34  ;;  %v333_v37 = vadd.f32 %v324_v15, %v251_v35 }
  0xb4   :  { %349 = vst [vmem:[%s696_s3 + $0x14] sm:$0xf] %v341_v36  ;;  %v342_v38 = vpack.c.bf16 %v333_v37, %v332_v33 }
  0xb6   :  { %350 = vst [vmem:[%s696_s3 + $0x18] sm:$0xff] %v342_v38 }
  0xb7   :  { %v270_v40 = vpop.f32.mrf.mxu2 }
  0xb8   :  { %v334_v41 = vadd.f32 %v325_v22, %v270_v40 }
  0xb9   :  { %v253_v42 = vpop.f32.mrf.mxu1 }
  0xba   :  { %v343_v44 = vpack.c.bf16 %v334_v41, %v334_v41  ;;  %v336_v45 = vadd.f32 %v324_v15, %v253_v42 }
  0xbc   :  { %351 = vst [vmem:[%s696_s3 + $0x20] sm:$0xf] %v343_v44  ;;  %v344_v46 = vpack.c.bf16 %v336_v45, %v335_v43 }
  0xbe   :  { %352 = vst [vmem:[%s696_s3 + $0x24] sm:$0xff] %v344_v46 }
  0xbf   :  { %v272_v47 = vpop.f32.mrf.mxu2 }
  0xc0   :  { %v337_v48 = vadd.f32 %v325_v22, %v272_v47 }
  0xc2   :  { %v345_v49 = vpack.c.bf16 %v337_v48, %v337_v48 }
  0xc4   :  { %353 = vst [vmem:[%s696_s3 + $0x2c] sm:$0xf] %v345_v49 }

// kernel: bert_x_layer.21
= control target key start
LH: loop header
LB: loop body
LE: loop exit
PB: predicated region body
PF: predicated region fallthrough
CT: control target
= control target key end

     0   :  { %11 = vsyncpa [#allocation4], 0  ;;  %s416_s24 = smov [#allocation3]   ;;  %s417_s26 = smov 64   ;;  %s505_s0 = inlined_call_operand.vmem [shape: bf16[32,128], index: 0, kind: input, shape index: {}]   ;;  %s506_s1 = inlined_call_operand.hbm [shape: bf16[128,128], index: 1, kind: input, shape index: {}]   ;;  %s507_s2 = inlined_call_operand.vmem [shape: bf16[1,128], index: 2, kind: input, shape index: {}]   ;;  %s508_s3 = inlined_call_operand.vmem [shape: bf16[32,128], index: 3, kind: input, shape index: {}]   ;;  %s509_s4 = inlined_call_operand.vmem [shape: bf16[1,128], index: 4, kind: input, shape index: {}]   ;;  %s510_s5 = inlined_call_operand.vmem [shape: bf16[1,128], index: 5, kind: input, shape index: {}]   ;;  %s511_s6 = inlined_call_operand.vmem [shape: bf16[32,128], index: 6, kind: output, shape index: {}]  }
   0x1   :  { %s18_s23 = sshll.u32 %s506_s1, 4  ;;  %s20_s25 = sshll.u32 %s416_s24, 4  ;;  %s19_s23 = int_to_ptr.hbm [resolvable:$true] %s18_s23  ;;  %s21_s25 = int_to_ptr.vmem [resolvable:$true] %s20_s25 }
   0x2   :  { %s418_s27 = smov 4  }
   0x3   :  { %26 = dma.hbm_to_vmem [thread:$0]  %s19_s23, 1024, %s21_s25, [#allocation4], %s417_s26, %s417_s26, %s418_s27  }
   0x4   :  { %414 = dma.done.wait [#allocation4], 1024  }
   0x5   :  { %415 = vsyncadd [#allocation4], 4294966272  ;;  %v347_v0 = vld [vmem:[#allocation3 + $0x38] sm:$0xff]  ;;  %v346_v1 = vld [vmem:[#allocation3 + $0x30] sm:$0xff]  ;;  %v419_v31 = vmov 128.0  }
   0x6   :  { %131 = vmatpush.bf16.msra.mxu0 %v347_v0  ;;  %368 = vmatpush.bf16.msra.mxu1 %v347_v0  ;;  %v345_v2 = vld [vmem:[#allocation3 + $0x28] sm:$0xff]  ;;  %v344_v3 = vld [vmem:[#allocation3 + $0x20] sm:$0xff]  ;;  %v343_v4 = vld [vmem:[#allocation3 + $0x18] sm:$0xff]  ;;  %380 = vrcp.f32 %v419_v31 }
   0x7   :  { %v342_v5 = vld [vmem:[#allocation3 + $0x10] sm:$0xff]  ;;  %v341_v6 = vld [vmem:[#allocation3 + $0x8] sm:$0xff]  ;;  %v340_v7 = vld [vmem:[#allocation3] sm:$0xff] }
   0x8   :  { %v338_v8 = vld [vmem:[%s505_s0] sm:$0xff]  ;;  %v339_v9 = vld [vmem:[%s505_s0 + $0x8] sm:$0xff] }
   0x9   :  { %v165_v10 = vld [vmem:[%s507_s2] sm:$0x1]  ;;  %v366_v12 = vld [vmem:[%s508_s3 + $0x8] sm:$0xff]  }
   0xa   :  { %132 = vmatpush.bf16.msra.mxu0 %v346_v1  ;;  %369 = vmatpush.bf16.msra.mxu1 %v346_v1  ;;  %v166_v11 = vunpack.c.l.bf16 %v165_v10  ;;  %v349_v13 = vld [vmem:[%s508_s3] sm:$0xff]   ;;  %v354_v15 = vunpack.c.l.bf16 %v366_v12  ;;  %v355_v23 = vunpack.c.h.bf16 %v366_v12 }
   0xb   :  { %v350_v16 = vunpack.c.l.bf16 %v349_v13  ;;  %v351_v24 = vunpack.c.h.bf16 %v349_v13 }
   0xc   :  { %v167_v14 = vperm.slane %v166_v11, 0  ;;  %v381_v32 = vpop.eup %380 }
   0xd   :  { %v193_v33 = vmul.f32 128.0, %v381_v32  ;;  %vm197_vm0 = vweird.f32 %v381_v32 }
   0xe   :  { %133 = vmatpush.bf16.msra.mxu0 %v345_v2  ;;  %370 = vmatpush.bf16.msra.mxu1 %v345_v2 }
   0xf   :  { %v194_v34 = vsub.f32 1.0, %v193_v33 }
  0x11   :  { %v195_v35 = vmul.f32 %v381_v32, %v194_v34 }
  0x12   :  { %134 = vmatpush.bf16.msra.mxu0 %v344_v3  ;;  %371 = vmatpush.bf16.msra.mxu1 %v344_v3 }
  0x13   :  { %v196_v36 = vadd.f32 %v381_v32, %v195_v35 }
  0x15   :  { %v198_v37 = vsel %vm197_vm0, %v381_v32, %v196_v36 }
  0x16   :  { %135 = vmatpush.bf16.msra.mxu0 %v343_v4  ;;  %372 = vmatpush.bf16.msra.mxu1 %v343_v4 }
  0x1a   :  { %136 = vmatpush.bf16.msra.mxu0 %v342_v5  ;;  %373 = vmatpush.bf16.msra.mxu1 %v342_v5 }
  0x1e   :  { %137 = vmatpush.bf16.msra.mxu0 %v341_v6  ;;  %374 = vmatpush.bf16.msra.mxu1 %v341_v6 }
  0x22   :  { %138 = vmatpush.bf16.msra.mxu0 %v340_v7  ;;  %375 = vmatpush.bf16.msra.mxu1 %v340_v7 }
  0x25   :  { %139 = vmatmul.bf16.vlgmr.msra.gmra.mxu0 %v338_v8  ;;  %144 = vmatmul.bf16.vlgmr.msra.gmra.mxu1 %v339_v9 }
  0xa2   :  { %v140_v17 = vpop.f32.mrf.mxu0  ;;  %v145_v18 = vpop.f32.mrf.mxu1 }
  0xa3   :  { %v168_v19 = vadd.f32 %v167_v14, %v140_v17  ;;  %v170_v20 = vadd.f32 %v167_v14, %v145_v18 }
  0xa5   :  { %v182_v21 = vadd.f32 %v354_v15, %v170_v20  ;;  %v180_v22 = vadd.f32 %v350_v16, %v168_v19 }
  0xa7   :  { %188 = vadd.xlane.f32.xlu1 %v182_v21  ;;  %184 = vadd.xlane.f32.xlu0 %v180_v22 }
  0xaa   :  { %v142_v25 = vpop.f32.mrf.mxu0  ;;  %v147_v26 = vpop.f32.mrf.mxu1 }
  0xab   :  { %v169_v27 = vadd.f32 %v167_v14, %v142_v25  ;;  %v171_v28 = vadd.f32 %v167_v14, %v147_v26  ;;  %v271_v14 = vld [vmem:[%s509_s4] sm:$0x1] }
  0xac   :  { %v272_v20 = vunpack.c.l.bf16 %v271_v14 }
  0xad   :  { %v183_v29 = vadd.f32 %v355_v23, %v171_v28  ;;  %v181_v30 = vadd.f32 %v351_v24, %v169_v27 }
  0xaf   :  { %190 = vadd.xlane.f32.xlu1 %v183_v29  ;;  %186 = vadd.xlane.f32.xlu0 %v181_v30 }
 0x11a   :  { %v189_v38 = vpop.xlane.xlu1 %188  ;;  %v185_v39 = vpop.xlane.xlu0 %184 }
 0x11b   :  { %v201_v40 = vmul.f32 %v198_v37, %v189_v38  ;;  %v199_v41 = vmul.f32 %v198_v37, %v185_v39 }
 0x11d   :  { %v473_v42 = vsub.f32 %v182_v21, %v201_v40  ;;  %v475_v43 = vsub.f32 %v180_v22, %v199_v41  ;;  %v278_v21 = vld [vmem:[%s510_s5] sm:$0x1] }
 0x11e   :  { %v279_v27 = vunpack.c.l.bf16 %v278_v21 }
 0x11f   :  { %v207_v44 = vmul.f32 %v475_v43, %v475_v43  ;;  %v209_v45 = vmul.f32 %v473_v42, %v473_v42 }
 0x120   :  { %v280_v36 = vperm.slane %v279_v27, 0 }
 0x121   :  { %211 = vadd.xlane.f32.xlu2 %v207_v44  ;;  %215 = vadd.xlane.f32.xlu0 %v209_v45 }
 0x122   :  { %v191_v46 = vpop.xlane.xlu1 %190  ;;  %v187_v47 = vpop.xlane.xlu0 %186 }
 0x123   :  { %v202_v48 = vmul.f32 %v198_v37, %v191_v46  ;;  %v200_v49 = vmul.f32 %v198_v37, %v187_v47 }
 0x125   :  { %v481_v50 = vsub.f32 %v183_v29, %v202_v48  ;;  %v483_v51 = vsub.f32 %v181_v30, %v200_v49  ;;  %v273_v29 = vperm.slane %v272_v20, 0 }
 0x127   :  { %v210_v52 = vmul.f32 %v481_v50, %v481_v50  ;;  %v208_v53 = vmul.f32 %v483_v51, %v483_v51 }
 0x129   :  { %217 = vadd.xlane.f32.xlu1 %v210_v52  ;;  %213 = vadd.xlane.f32.xlu2 %v208_v53 }
 0x194   :  { %v212_v54 = vpop.xlane.xlu2 %211  ;;  %v216_v55 = vpop.xlane.xlu0 %215 }
 0x195   :  { %v219_v56 = vmul.f32 %v212_v54, %v198_v37  ;;  %v221_v57 = vmul.f32 %v216_v55, %v198_v37 }
 0x197   :  { %v223_v58 = vadd.f32 1e-12, %v219_v56  ;;  %v225_v59 = vadd.f32 1e-12, %v221_v57 }
 0x199   :  { %382 = vrsqrt.f32 %v223_v58  ;;  %vm253_vm3 = vweird.f32 %v225_v59  ;;  %vm233_vm4 = vweird.f32 %v223_v58 }
 0x19a   :  { %384 = vrsqrt.f32 %v225_v59 }
 0x19c   :  { %v218_v60 = vpop.xlane.xlu1 %217  ;;  %v214_v61 = vpop.xlane.xlu2 %213 }
 0x19d   :  { %v222_v62 = vmul.f32 %v218_v60, %v198_v37  ;;  %v220_v63 = vmul.f32 %v214_v61, %v198_v37 }
 0x19f   :  { %v383_v0 = vpop.eup %382  ;;  %v226_v1 = vadd.f32 1e-12, %v222_v62  ;;  %v224_v2 = vadd.f32 1e-12, %v220_v63 }
 0x1a0   :  { %v385_v3 = vpop.eup %384  ;;  %v228_v4 = vmul.f32 %v383_v0, %v223_v58  ;;  %vm234_vm2 = vweird.f32 %v383_v0 }
 0x1a1   :  { %v248_v5 = vmul.f32 %v385_v3, %v225_v59  ;;  %386 = vrsqrt.f32 %v226_v1  ;;  %vm254_vm1 = vweird.f32 %v385_v3  ;;  %vm235_vm6 = vmor %vm233_vm4, %vm234_vm2  ;;  %vm263_vm9 = vweird.f32 %v226_v1 }
 0x1a2   :  { %v229_v6 = vmul.f32 %v383_v0, %v228_v4  ;;  %388 = vrsqrt.f32 %v224_v2  ;;  %vm255_vm5 = vmor %vm253_vm3, %vm254_vm1  ;;  %vm243_vm11 = vweird.f32 %v224_v2 }
 0x1a3   :  { %v249_v7 = vmul.f32 %v385_v3, %v248_v5 }
 0x1a4   :  { %v230_v8 = vmul.f32 0.5, %v229_v6 }
 0x1a5   :  { %v250_v9 = vmul.f32 0.5, %v249_v7 }
 0x1a6   :  { %v231_v10 = vsub.f32 1.5, %v230_v8 }
 0x1a7   :  { %v387_v11 = vpop.eup %386  ;;  %v251_v12 = vsub.f32 1.5, %v250_v9 }
 0x1a8   :  { %v389_v13 = vpop.eup %388  ;;  %v258_v15 = vmul.f32 %v387_v11, %v226_v1  ;;  %v232_v16 = vmul.f32 %v383_v0, %v231_v10  ;;  %vm264_vm7 = vweird.f32 %v387_v11 }
 0x1a9   :  { %v252_v17 = vmul.f32 %v385_v3, %v251_v12  ;;  %v238_v18 = vmul.f32 %v389_v13, %v224_v2  ;;  %vm244_vm8 = vweird.f32 %v389_v13  ;;  %vm265_vm10 = vmor %vm263_vm9, %vm264_vm7 }
 0x1aa   :  { %v259_v19 = vmul.f32 %v387_v11, %v258_v15  ;;  %v236_v25 = vsel %vm235_vm6, %v383_v0, %v232_v16  ;;  %vm245_vm12 = vmor %vm243_vm11, %vm244_vm8 }
 0x1ab   :  { %v239_v22 = vmul.f32 %v389_v13, %v238_v18  ;;  %v256_v23 = vsel %vm255_vm5, %v385_v3, %v252_v17  ;;  %v267_v32 = vmul.f32 %v236_v25, %v475_v43 }
 0x1ac   :  { %v260_v24 = vmul.f32 0.5, %v259_v19  ;;  %v269_v30 = vmul.f32 %v256_v23, %v473_v42 }
 0x1ad   :  { %v240_v26 = vmul.f32 0.5, %v239_v22  ;;  %v274_v40 = vmul.f32 %v273_v29, %v267_v32 }
 0x1ae   :  { %v261_v28 = vsub.f32 1.5, %v260_v24  ;;  %v276_v37 = vmul.f32 %v273_v29, %v269_v30 }
 0x1af   :  { %v241_v31 = vsub.f32 1.5, %v240_v26  ;;  %v281_v43 = vadd.f32 %v280_v36, %v274_v40 }
 0x1b0   :  { %v262_v33 = vmul.f32 %v387_v11, %v261_v28  ;;  %v283_v45 = vadd.f32 %v280_v36, %v276_v37 }
 0x1b1   :  { %v242_v34 = vmul.f32 %v389_v13, %v241_v31 }
 0x1b2   :  { %v266_v35 = vsel %vm265_vm10, %v387_v11, %v262_v33 }
 0x1b3   :  { %v270_v38 = vmul.f32 %v266_v35, %v481_v50  ;;  %v246_v39 = vsel %vm245_vm12, %v389_v13, %v242_v34 }
 0x1b4   :  { %v268_v41 = vmul.f32 %v246_v39, %v483_v51 }
 0x1b5   :  { %v277_v42 = vmul.f32 %v273_v29, %v270_v38 }
 0x1b6   :  { %v275_v44 = vmul.f32 %v273_v29, %v268_v41 }
 0x1b7   :  { %v284_v46 = vadd.f32 %v280_v36, %v277_v42 }
 0x1b8   :  { %v282_v47 = vadd.f32 %v280_v36, %v275_v44 }
 0x1b9   :  { %v364_v48 = vpack.c.bf16 %v284_v46, %v283_v45 }
 0x1ba   :  { %v359_v49 = vpack.c.bf16 %v282_v47, %v281_v43 }
 0x1bb   :  { %367 = vst [vmem:[%s511_s6 + $0x8] sm:$0xff] %v364_v48  }
 0x1bc   :  { %360 = vst [vmem:[%s511_s6] sm:$0xff] %v359_v49  }
 0x1bd   :  { %297 = vsyncpa [#allocation4], 1 }

// kernel: bert_x_layer.20
= control target key start
LH: loop header
LB: loop body
LE: loop exit
PB: predicated region body
PF: predicated region fallthrough
CT: control target
= control target key end

     0   :  { %vm142_vm0 = vcmask 261120   ;;  %vm207_vm1 = vcmask 130048   ;;  %s1205_s30 = smov 96   ;;  %s1207_s4 = smov 32   ;;  %vm316_vm2 = vcmask 257024   ;;  %vm537_vm3 = vcmask 519424   ;;  %s1520_s0 = inlined_call_operand.vmem [shape: bf16[2,16,384], index: 0, kind: input, shape index: {}, may-alias: {0,1}]   ;;  %s1521_s1 = inlined_call_operand.vmem [shape: bf16[2,16,384], index: 1, kind: input, shape index: {}, may-alias: {0,1}]   ;;  %s1522_s2 = inlined_call_operand.vmem [shape: f32[2,1,1,16], index: 2, kind: input, shape index: {}]   ;;  %s1523_s3 = inlined_call_operand.vmem [shape: bf16[2,16,128], index: 3, kind: output, shape index: {}]  }
   0x1   :  { %v100_v0 = vld [vmem:[%s1521_s1] sm:$0xff]  ;;  %v102_v1 = vld [vmem:[%s1521_s1 + $0xc] sm:$0xff]  ;;  %v104_v2 = vld [vmem:[%s1521_s1 + $0x18] sm:$0xff]  ;;  %vm758_vm4 = vcmask 781824   ;;  %vm979_vm5 = vcmask 1044224  }
   0x2   :  { %101 = vst [vmem:[#allocation3] sm:$0xff] %v100_v0  ;;  %v106_v3 = vld [vmem:[%s1521_s1 + $0x24] sm:$0xff]  ;;  %v997_v5 = vld [vmem:[%s1520_s0 + $0x14] sm:$0xf]  ;;  %v998_v6 = vld [vmem:[%s1520_s0 + $0x20] sm:$0xf] }
   0x3   :  { %103 = vst [vmem:[#allocation3 + $0x8] sm:$0xff] %v102_v1  ;;  %v996_v4 = vld [vmem:[%s1520_s0 + $0x8] sm:$0xf]  ;;  %v999_v7 = vld [vmem:[%s1520_s0 + $0x2c] sm:$0xf] }
   0x4   :  { %105 = vst [vmem:[#allocation3 + $0x10] sm:$0xff] %v104_v2  ;;  %v1259_v18 = vld [vmem:[%s1522_s2] ss:$0 sm:$0xff]  ;;  %v1264_v21 = vld [vmem:[%s1522_s2 + $0x1] ss:$0 sm:$0xff]  ;;  %s1206_s2 = smov 64  }
   0x5   :  { %107 = vst [vmem:[#allocation3 + $0x18] sm:$0xff] %v106_v3 }
   0x6   :  { %28 = vst [vmem:[#allocation2] sm:$0xf] %v996_v4 }
   0x7   :  { %30 = vst [vmem:[#allocation2 + $0x4] sm:$0xf] %v997_v5 }
   0x8   :  { %32 = vst [vmem:[#allocation2 + $0x8] sm:$0xf] %v998_v6 }
   0x9   :  { %v1006_v8 = vld [vmem:[#allocation3] sm:$0xf]  ;;  %34 = vst [vmem:[#allocation2 + $0xc] sm:$0xf] %v999_v7  ;;  %v1020_v59 = vld [vmem:[#allocation3 + $0x4] sm:$0xf] }
   0xa   :  { %v1114_v9 = vld [vmem:[#allocation3 + $0x4] sm:$0xf0]  ;;  %v1034_v23 = vld [vmem:[#allocation3] sm:$0xf]  ;;  %v1116_v60 = vld [vmem:[#allocation3 + $0x8] sm:$0xf0] }
   0xb   :  { %v1007_v10 = vor.u32 %v1114_v9, %v1006_v8  ;;  %v1015_v11 = vld [vmem:[#allocation3 + $0x10] sm:$0xf]  ;;  %v1120_v24 = vld [vmem:[#allocation3 + $0x4] sm:$0xf0]  ;;  %v1021_v61 = vor.u32 %v1116_v60, %v1020_v59  ;;  %v1062_v3 = vld [vmem:[#allocation3] sm:$0xf] }
   0xc   :  { %v1115_v12 = vld [vmem:[#allocation3 + $0x14] sm:$0xf0]  ;;  %v1035_v27 = vor.u32 %v1120_v24, %v1034_v23  ;;  %v1043_v39 = vld [vmem:[#allocation3 + $0x10] sm:$0xf]  ;;  %v1126_v4 = vld [vmem:[#allocation3 + $0x4] sm:$0xf0] }
   0xd   :  { %v147_v13 = vsel %vm142_vm0, %v1007_v10, 0  ;;  %v1016_v14 = vor.u32 %v1115_v12, %v1015_v11  ;;  %v1121_v40 = vld [vmem:[#allocation3 + $0x14] sm:$0xf0]  ;;  %277 = vmatpush.bf16.msra.mxu2 %v1021_v61  ;;  %v1063_v5 = vor.u32 %v1126_v4, %v1062_v3  ;;  %v1025_v7 = vld [vmem:[#allocation3 + $0x14] sm:$0xf] }
   0xe   :  { %156 = vmatpush.bf16.xpose.msra.mxu0 %v147_v13  ;;  %v1112_v16 = vld [vmem:[#allocation2] sm:$0xff]  ;;  %345 = vrot.lane.b32.xlu2 %v1035_v27, %s1205_s30  ;;  %v1044_v41 = vor.u32 %v1121_v40, %v1043_v39  ;;  %v1117_v8 = vld [vmem:[#allocation3 + $0x18] sm:$0xf0]  ;;  %v1133_v24 = vld [vmem:[#allocation3 + $0x14] sm:$0xf0] }
   0xf   :  { %v177_v15 = vsel %vm142_vm0, %v1016_v14, 0  ;;  %v1026_v9 = vor.u32 %v1117_v8, %v1025_v7  ;;  %v1118_v13 = vld [vmem:[#allocation2] sm:$0xff]  ;;  %v1123_v60 = vld [vmem:[#allocation3 + $0x18] sm:$0xf0]  ;;  %v1048_v61 = vld [vmem:[#allocation3 + $0x4] sm:$0xf] }
  0x10   :  { %186 = vmatpush.bf16.xpose.msra.mxu1 %v177_v15  ;;  %v1113_v17 = vld [vmem:[#allocation2 + $0x8] sm:$0xff]  ;;  %v1071_v14 = vld [vmem:[#allocation3 + $0x10] sm:$0xf]  ;;  %v1053_v59 = vld [vmem:[#allocation3 + $0x14] sm:$0xf] }
  0x11   :  { %305 = vmatpush.bf16.msra.mxu3 %v1026_v9  ;;  %v1125_v11 = vld [vmem:[#allocation2 + $0x8] sm:$0xff]  ;;  %v1099_v23 = vld [vmem:[#allocation3 + $0x10] sm:$0xf] }
  0x12   :  { %v1119_v12 = vld [vmem:[#allocation2 + $0x8] sm:$0xff] }
  0x13   :  { %v1127_v15 = vld [vmem:[#allocation3 + $0x14] sm:$0xf0] }
  0x14   :  { %v1131_v27 = vld [vmem:[#allocation2 + $0x8] sm:$0xff] }
  0x15   :  { %1008 = vmatmul.msk.bf16.vlgmr.msra.gmra.mxu0 %vm142_vm0, %v1112_v16  ;;  %v1130_v16 = vld [vmem:[#allocation2] sm:$0xff] }
  0x17   :  { %1017 = vmatmul.msk.bf16.vlgmr.msra.gmra.mxu1 %vm142_vm0, %v1113_v17  ;;  %v1072_v17 = vor.u32 %v1127_v15, %v1071_v14 }
  0x68   :  { %v346_v58 = vpop.permute.xlu2 %345 }
  0x69   :  { %v351_v62 = vsel %vm142_vm0, %v346_v58, 0 }
  0x6a   :  { %360 = vmatpush.bf16.xpose.msrb.mxu2 %v351_v62  ;;  %v1054_v62 = vor.u32 %v1123_v60, %v1053_v59 }
  0x92   :  { %v158_v19 = vpop.f32.mrf.mxu0 }
  0x93   :  { %v193_v20 = vmul.f32 0.17677669, %v158_v19  ;;  %v1124_v19 = vld [vmem:[#allocation2] sm:$0xff] }
  0x94   :  { %v188_v22 = vpop.f32.mrf.mxu1 }
  0x95   :  { %v195_v25 = vmul.f32 0.17677669, %v188_v22  ;;  %v203_v26 = vadd.f32 %v1259_v18, %v193_v20  ;;  %v1090_v20 = vld [vmem:[#allocation3] sm:$0xf]  ;;  %v1132_v22 = vld [vmem:[#allocation3 + $0x4] sm:$0xf0] }
  0x97   :  { %v205_v28 = vadd.f32 %v1264_v21, %v195_v25  ;;  %v208_v29 = vsel %vm207_vm1, %v203_v26, -inf  ;;  %v1091_v25 = vor.u32 %v1132_v22, %v1090_v20 }
  0x98   :  { %209 = vmax.xlane.f32.xlu0 %v208_v29 }
  0x99   :  { %v214_v30 = vsel %vm207_vm1, %v205_v28, -inf }
  0x9a   :  { %215 = vmax.xlane.f32.xlu1 %v214_v30  ;;  %v160_v31 = vpop.f32.mrf.mxu0 }
  0x9b   :  { %v194_v32 = vmul.f32 0.17677669, %v160_v31 }
  0x9c   :  { %v190_v33 = vpop.f32.mrf.mxu1 }
  0x9d   :  { %v196_v34 = vmul.f32 0.17677669, %v190_v33  ;;  %v204_v35 = vadd.f32 %v1259_v18, %v194_v32 }
  0x9f   :  { %v206_v36 = vadd.f32 %v1264_v21, %v196_v34  ;;  %v211_v37 = vsel %vm207_vm1, %v204_v35, -inf }
  0xa0   :  { %212 = vmax.xlane.f32.xlu0 %v211_v37 }
  0xa1   :  { %v217_v38 = vsel %vm207_vm1, %v206_v36, -inf }
  0xa2   :  { %218 = vmax.xlane.f32.xlu1 %v217_v38 }
  0xb4   :  { %379 = vrot.lane.b32.xlu0 %v1044_v41, %s1205_s30 }
 0x10b   :  { %v210_v42 = vpop.xlane.xlu0 %209 }
 0x10c   :  { %v220_v43 = vsub.f32 %v203_v26, %v210_v42  ;;  %v1100_v26 = vor.u32 %v1133_v24, %v1099_v23 }
 0x10d   :  { %v216_v44 = vpop.xlane.xlu1 %215 }
 0x10e   :  { %v222_v45 = vsub.f32 %v205_v28, %v216_v44  ;;  %v224_v46 = vmul.f32 1.442695, %v220_v43 }
 0x110   :  { %v228_v47 = vmul.f32 1.442695, %v222_v45  ;;  %1141 = vpow2.f32 %v224_v46 }
 0x112   :  { %1143 = vpow2.f32 %v228_v47 }
 0x113   :  { %v213_v48 = vpop.xlane.xlu0 %212 }
 0x114   :  { %v221_v49 = vsub.f32 %v204_v35, %v213_v48 }
 0x115   :  { %v219_v50 = vpop.xlane.xlu1 %218 }
 0x116   :  { %v1276_v51 = vpop.eup %1141  ;;  %v223_v52 = vsub.f32 %v206_v36, %v219_v50  ;;  %v226_v53 = vmul.f32 1.442695, %v221_v49 }
 0x117   :  { %v232_v54 = vsel %vm207_vm1, %v1276_v51, 0.0 }
 0x118   :  { %v1280_v55 = vpop.eup %1143  ;;  %v230_v56 = vmul.f32 1.442695, %v223_v52  ;;  %1145 = vpow2.f32 %v226_v53  ;;  %233 = vadd.xlane.f32.xlu2 %v232_v54 }
 0x119   :  { %v238_v57 = vsel %vm207_vm1, %v1280_v55, 0.0 }
 0x11a   :  { %1147 = vpow2.f32 %v230_v56  ;;  %239 = vadd.xlane.f32.xlu0 %v238_v57 }
 0x11e   :  { %v1146_v63 = vpop.eup %1145 }
 0x11f   :  { %v235_v0 = vsel %vm207_vm1, %v1146_v63, 0.0 }
 0x120   :  { %v1148_v1 = vpop.eup %1147  ;;  %236 = vadd.xlane.f32.xlu2 %v235_v0 }
 0x121   :  { %v241_v2 = vsel %vm207_vm1, %v1148_v1, 0.0 }
 0x122   :  { %242 = vadd.xlane.f32.xlu1 %v241_v2 }
 0x126   :  { %v380_v6 = vpop.permute.xlu0 %379 }
 0x127   :  { %v385_v10 = vsel %vm142_vm0, %v380_v6, 0 }
 0x128   :  { %394 = vmatpush.bf16.xpose.msrb.mxu3 %v385_v10 }
 0x12e   :  { %566 = vrot.lane.b32.xlu0 %v1063_v5, %s1206_s2 }
 0x136   :  { %593 = vrot.lane.b32.xlu0 %v1125_v11, %s1206_s2 }
 0x138   :  { %372 = vrot.lane.b32.xlu2 %v1119_v12, %s1205_s30 }
 0x13b   :  { %338 = vrot.lane.b32.xlu1 %v1118_v13, %s1205_s30 }
 0x13e   :  { %780 = vrot.lane.b32.xlu0 %v1130_v16, %s1207_s4 }
 0x140   :  { %600 = vrot.lane.b32.xlu2 %v1072_v17, %s1206_s2 }
 0x143   :  { %559 = vrot.lane.b32.xlu1 %v1124_v19, %s1206_s2 }
 0x148   :  { %787 = vrot.lane.b32.xlu2 %v1091_v25, %s1207_s4 }
 0x14b   :  { %821 = vrot.lane.b32.xlu1 %v1100_v26, %s1207_s4 }
 0x150   :  { %814 = vrot.lane.b32.xlu2 %v1131_v27, %s1207_s4 }
 0x158   :  { %497 = vrot.lane.b32.xlu2 %v1054_v62, %s1205_s30 }
 0x18b   :  { %v234_v28 = vpop.xlane.xlu2 %233 }
 0x18c   :  { %1149 = vrcp.f32 %v234_v28 }
 0x18d   :  { %v240_v29 = vpop.xlane.xlu0 %239 }
 0x18e   :  { %1151 = vrcp.f32 %v240_v29 }
 0x192   :  { %v1150_v31 = vpop.eup %1149 }
 0x193   :  { %v237_v30 = vpop.xlane.xlu2 %236  ;;  %v248_v34 = vmul.f32 %v1150_v31, %v1276_v51 }
 0x194   :  { %1153 = vrcp.f32 %v237_v30  ;;  %v1152_v33 = vpop.eup %1151 }
 0x195   :  { %v243_v32 = vpop.xlane.xlu1 %242  ;;  %v250_v35 = vmul.f32 %v1152_v33, %v1280_v55  ;;  %v252_v38 = vpack.c.bf16 %v248_v34, %v248_v34 }
 0x196   :  { %1155 = vrcp.f32 %v243_v32 }
 0x197   :  { %v254_v43 = vpack.c.bf16 %v250_v35, %v250_v35  ;;  %v258_v44 = vunpack.c.l.b16 %v252_v38 }
 0x199   :  { %v286_v49 = vunpack.c.l.b16 %v254_v43 }
 0x19a   :  { %v1154_v36 = vpop.eup %1153 }
 0x19b   :  { %v249_v37 = vmul.f32 %v1154_v36, %v1146_v63  ;;  %v373_v39 = vpop.permute.xlu2 %372  ;;  %v1122_v63 = vld [vmem:[#allocation3 + $0x8] sm:$0xf0] }
 0x19c   :  { %v1156_v40 = vpop.eup %1155  ;;  %v1049_v0 = vor.u32 %v1122_v63, %v1048_v61 }
 0x19d   :  { %v253_v41 = vpack.c.bf16 %v249_v37, %v249_v37  ;;  %v251_v42 = vmul.f32 %v1156_v40, %v1148_v1 }
 0x19e   :  { %467 = vrot.lane.b32.xlu0 %v1049_v0, %s1205_s30 }
 0x19f   :  { %v259_v45 = vunpack.c.l.b16 %v253_v41  ;;  %v255_v46 = vpack.c.bf16 %v251_v42, %v251_v42 }
 0x1a0   :  { %v567_v47 = vpop.permute.xlu0 %566 }
 0x1a1   :  { %v260_v48 = vpack.c.b16 %v259_v45, %v258_v44  ;;  %v287_v50 = vunpack.c.l.b16 %v255_v46  ;;  %v572_v52 = vsel %vm142_vm0, %v567_v47, 0 }
 0x1a3   :  { %1022 = vmatmul.msk.bf16.vlgmr.msra.gmra.mxu2 %vm207_vm1, %v260_v48  ;;  %v288_v51 = vpack.c.b16 %v287_v50, %v286_v49  ;;  %v601_v53 = vpop.permute.xlu2 %600 }
 0x1a4   :  { %581 = vmatpush.bf16.xpose.msra.mxu2 %v572_v52  ;;  %v606_v54 = vsel %vm142_vm0, %v601_v53, 0 }
 0x1a5   :  { %1027 = vmatmul.msk.bf16.vlgmr.msra.gmra.mxu3 %vm207_vm1, %v288_v51 }
 0x1a6   :  { %615 = vmatpush.bf16.xpose.msra.mxu3 %v606_v54 }
 0x1a8   :  { %v594_v3 = vpop.permute.xlu0 %593 }
 0x1ab   :  { %v788_v56 = vpop.permute.xlu2 %787 }
 0x1ac   :  { %v793_v57 = vsel %vm142_vm0, %v788_v56, 0 }
 0x1ad   :  { %v339_v55 = vpop.permute.xlu1 %338 }
 0x1b0   :  { %v781_v4 = vpop.permute.xlu0 %780 }
 0x1b3   :  { %1036 = vmatmul.msk.bf16.vlgmr.msrb.gmra.mxu2 %vm142_vm0, %v339_v55  ;;  %v815_v5 = vpop.permute.xlu2 %814 }
 0x1b4   :  { %802 = vmatpush.bf16.xpose.msrb.mxu2 %v793_v57 }
 0x1b5   :  { %1045 = vmatmul.msk.bf16.vlgmr.msrb.gmra.mxu3 %vm142_vm0, %v373_v39  ;;  %v560_v58 = vpop.permute.xlu1 %559 }
 0x1bb   :  { %v498_v33 = vpop.permute.xlu2 %497 }
 0x1bc   :  { %510 = vmatpush.bf16.msrb.mxu1 %v498_v33 }
 0x1bd   :  { %v822_v1 = vpop.permute.xlu1 %821 }
 0x1be   :  { %v827_v2 = vsel %vm142_vm0, %v822_v1, 0 }
 0x1bf   :  { %836 = vmatpush.bf16.xpose.msrb.mxu3 %v827_v2  ;;  %v1076_v2 = vld [vmem:[#allocation3 + $0x4] sm:$0xf] }
 0x1c3   :  { %1064 = vmatmul.msk.bf16.vlgmr.msra.gmra.mxu2 %vm142_vm0, %v560_v58 }
 0x1c5   :  { %1073 = vmatmul.msk.bf16.vlgmr.msra.gmra.mxu3 %vm142_vm0, %v594_v3  ;;  %v1128_v3 = vld [vmem:[#allocation3 + $0x8] sm:$0xf0] }
 0x1d3   :  { %1092 = vmatmul.msk.bf16.vlgmr.msrb.gmra.mxu2 %vm142_vm0, %v781_v4  ;;  %v1077_v4 = vor.u32 %v1128_v3, %v1076_v2 }
 0x1d5   :  { %1101 = vmatmul.msk.bf16.vlgmr.msrb.gmra.mxu3 %vm142_vm0, %v815_v5 }
 0x210   :  { %v468_v35 = vpop.permute.xlu0 %467 }
 0x211   :  { %480 = vmatpush.bf16.msrb.mxu0 %v468_v35 }
 0x226   :  { %v279_v6 = vpop.f32.mrf.mxu2 }
 0x227   :  { %v312_v7 = vpack.c.bf16 %v279_v6, %v279_v6 }
 0x228   :  { %v307_v8 = vpop.f32.mrf.mxu3 }
 0x229   :  { %317 = vst.msk [vmem:[%s1523_s3] sm:$0xf] %vm316_vm2, %v312_v7  ;;  %v314_v9 = vpack.c.bf16 %v307_v8, %v307_v8 }
 0x22b   :  { %319 = vst.msk [vmem:[%s1523_s3 + $0x8] sm:$0xf] %vm316_vm2, %v314_v9 }
 0x22e   :  { %v281_v10 = vpop.f32.mrf.mxu2 }
 0x22f   :  { %v313_v11 = vpack.c.bf16 %v281_v10, %v281_v10 }
 0x230   :  { %v309_v12 = vpop.f32.mrf.mxu3 }
 0x231   :  { %318 = vst.msk [vmem:[%s1523_s3 + $0x4] sm:$0xf] %vm316_vm2, %v313_v11  ;;  %v315_v13 = vpack.c.bf16 %v309_v12, %v309_v12 }
 0x233   :  { %320 = vst.msk [vmem:[%s1523_s3 + $0xc] sm:$0xf] %vm316_vm2, %v315_v13 }
 0x236   :  { %v362_v14 = vpop.f32.mrf.mxu2 }
 0x237   :  { %v401_v15 = vmul.f32 0.17677669, %v362_v14 }
 0x238   :  { %v396_v16 = vpop.f32.mrf.mxu3 }
 0x239   :  { %v403_v17 = vmul.f32 0.17677669, %v396_v16  ;;  %v1327_v19 = vadd.f32 %v1259_v18, %v401_v15 }
 0x23b   :  { %v409_v20 = vsel %vm207_vm1, %v1327_v19, -inf  ;;  %v1332_v22 = vadd.f32 %v1264_v21, %v403_v17 }
 0x23c   :  { %410 = vmax.xlane.f32.xlu1 %v409_v20 }
 0x23d   :  { %v415_v23 = vsel %vm207_vm1, %v1332_v22, -inf }
 0x23e   :  { %416 = vmax.xlane.f32.xlu2 %v415_v23  ;;  %v364_v24 = vpop.f32.mrf.mxu2 }
 0x23f   :  { %v402_v25 = vmul.f32 0.17677669, %v364_v24 }
 0x240   :  { %v398_v26 = vpop.f32.mrf.mxu3 }
 0x241   :  { %v404_v27 = vmul.f32 0.17677669, %v398_v26  ;;  %v1337_v28 = vadd.f32 %v1259_v18, %v402_v25 }
 0x243   :  { %v412_v29 = vsel %vm207_vm1, %v1337_v28, -inf  ;;  %v1342_v30 = vadd.f32 %v1264_v21, %v404_v27 }
 0x244   :  { %413 = vmax.xlane.f32.xlu0 %v412_v29 }
 0x245   :  { %v418_v31 = vsel %vm207_vm1, %v1342_v30, -inf }
 0x246   :  { %419 = vmax.xlane.f32.xlu1 %v418_v31  ;;  %v583_v32 = vpop.f32.mrf.mxu2 }
 0x247   :  { %v622_v34 = vmul.f32 0.17677669, %v583_v32 }
 0x248   :  { %v617_v36 = vpop.f32.mrf.mxu3 }
 0x249   :  { %v624_v37 = vmul.f32 0.17677669, %v617_v36  ;;  %v1347_v38 = vadd.f32 %v1259_v18, %v622_v34 }
 0x24b   :  { %v630_v39 = vsel %vm207_vm1, %v1347_v38, -inf  ;;  %v1352_v40 = vadd.f32 %v1264_v21, %v624_v37 }
 0x24c   :  { %631 = vmax.xlane.f32.xlu0 %v630_v39 }
 0x24d   :  { %v636_v41 = vsel %vm207_vm1, %v1352_v40, -inf }
 0x24e   :  { %637 = vmax.xlane.f32.xlu1 %v636_v41  ;;  %v585_v42 = vpop.f32.mrf.mxu2 }
 0x24f   :  { %v623_v43 = vmul.f32 0.17677669, %v585_v42 }
 0x250   :  { %v619_v44 = vpop.f32.mrf.mxu3 }
 0x251   :  { %v625_v45 = vmul.f32 0.17677669, %v619_v44  ;;  %v1357_v46 = vadd.f32 %v1259_v18, %v623_v43 }
 0x253   :  { %v633_v47 = vsel %vm207_vm1, %v1357_v46, -inf  ;;  %v1362_v48 = vadd.f32 %v1264_v21, %v625_v45 }
 0x254   :  { %634 = vmax.xlane.f32.xlu2 %v633_v47 }
 0x255   :  { %v639_v49 = vsel %vm207_vm1, %v1362_v48, -inf }
 0x256   :  { %640 = vmax.xlane.f32.xlu0 %v639_v49  ;;  %v804_v50 = vpop.f32.mrf.mxu2 }
 0x257   :  { %v843_v52 = vmul.f32 0.17677669, %v804_v50 }
 0x258   :  { %v838_v51 = vpop.f32.mrf.mxu3 }
 0x259   :  { %v845_v53 = vmul.f32 0.17677669, %v838_v51  ;;  %v1367_v54 = vadd.f32 %v1259_v18, %v843_v52 }
 0x25b   :  { %v1370_v55 = vadd.f32 %v1264_v21, %v845_v53  ;;  %v851_v56 = vsel %vm207_vm1, %v1367_v54, -inf }
 0x25c   :  { %852 = vmax.xlane.f32.xlu2 %v851_v56 }
 0x25d   :  { %v857_v57 = vsel %vm207_vm1, %v1370_v55, -inf }
 0x25e   :  { %858 = vmax.xlane.f32.xlu0 %v857_v57  ;;  %v806_v58 = vpop.f32.mrf.mxu2 }
 0x25f   :  { %v844_v59 = vmul.f32 0.17677669, %v806_v58 }
 0x260   :  { %v840_v60 = vpop.f32.mrf.mxu3 }
 0x261   :  { %v1377_v61 = vadd.f32 %v1259_v18, %v844_v59  ;;  %v846_v62 = vmul.f32 0.17677669, %v840_v60  ;;  %v1081_v60 = vld [vmem:[#allocation3 + $0x14] sm:$0xf] }
 0x263   :  { %v1380_v63 = vadd.f32 %v1264_v21, %v846_v62  ;;  %v854_v0 = vsel %vm207_vm1, %v1377_v61, -inf  ;;  %v1129_v62 = vld [vmem:[#allocation3 + $0x18] sm:$0xf0] }
 0x264   :  { %855 = vmax.xlane.f32.xlu1 %v854_v0  ;;  %v1109_v0 = vld [vmem:[#allocation3 + $0x14] sm:$0xf] }
 0x265   :  { %v860_v1 = vsel %vm207_vm1, %v1380_v63, -inf }
 0x266   :  { %861 = vmax.xlane.f32.xlu2 %v860_v1  ;;  %v1135_v1 = vld [vmem:[#allocation3 + $0x18] sm:$0xf0] }
 0x267   :  { %v1110_v2 = vor.u32 %v1135_v1, %v1109_v0 }
 0x27e   :  { %688 = vrot.lane.b32.xlu2 %v1077_v4, %s1206_s2 }
 0x2af   :  { %v411_v5 = vpop.xlane.xlu1 %410 }
 0x2b0   :  { %v421_v18 = vsub.f32 %v1327_v19, %v411_v5 }
 0x2b1   :  { %v417_v6 = vpop.xlane.xlu2 %416 }
 0x2b2   :  { %v425_v7 = vmul.f32 1.442695, %v421_v18  ;;  %v423_v21 = vsub.f32 %v1332_v22, %v417_v6 }
 0x2b4   :  { %1157 = vpow2.f32 %v425_v7  ;;  %v429_v8 = vmul.f32 1.442695, %v423_v21  ;;  %v1104_v7 = vld [vmem:[#allocation3 + $0x4] sm:$0xf]  ;;  %v1134_v21 = vld [vmem:[#allocation3 + $0x8] sm:$0xf0] }
 0x2b6   :  { %1159 = vpow2.f32 %v429_v8  ;;  %v1105_v8 = vor.u32 %v1134_v21, %v1104_v7 }
 0x2b7   :  { %v414_v9 = vpop.xlane.xlu0 %413 }
 0x2b8   :  { %v422_v10 = vsub.f32 %v1337_v28, %v414_v9 }
 0x2b9   :  { %v420_v11 = vpop.xlane.xlu1 %419 }
 0x2ba   :  { %v1390_v12 = vpop.eup %1157  ;;  %v424_v13 = vsub.f32 %v1342_v30, %v420_v11  ;;  %v427_v14 = vmul.f32 1.442695, %v422_v10 }
 0x2bb   :  { %v433_v15 = vsel %vm207_vm1, %v1390_v12, 0.0 }
 0x2bc   :  { %v1395_v16 = vpop.eup %1159  ;;  %v431_v17 = vmul.f32 1.442695, %v424_v13  ;;  %1161 = vpow2.f32 %v427_v14  ;;  %434 = vadd.xlane.f32.xlu1 %v433_v15 }
 0x2bd   :  { %v439_v19 = vsel %vm207_vm1, %v1395_v16, 0.0 }
 0x2be   :  { %1163 = vpow2.f32 %v431_v17  ;;  %440 = vadd.xlane.f32.xlu2 %v439_v19 }
 0x2bf   :  { %v632_v20 = vpop.xlane.xlu0 %631 }
 0x2c0   :  { %v642_v22 = vsub.f32 %v1347_v38, %v632_v20 }
 0x2c1   :  { %v638_v23 = vpop.xlane.xlu1 %637 }
 0x2c2   :  { %v1400_v24 = vpop.eup %1161  ;;  %v644_v25 = vsub.f32 %v1352_v40, %v638_v23  ;;  %v646_v26 = vmul.f32 1.442695, %v642_v22 }
 0x2c3   :  { %v436_v27 = vsel %vm207_vm1, %v1400_v24, 0.0 }
 0x2c4   :  { %v1405_v28 = vpop.eup %1163  ;;  %v650_v29 = vmul.f32 1.442695, %v644_v25  ;;  %1165 = vpow2.f32 %v646_v26  ;;  %437 = vadd.xlane.f32.xlu0 %v436_v27 }
 0x2c5   :  { %v442_v30 = vsel %vm207_vm1, %v1405_v28, 0.0 }
 0x2c6   :  { %1167 = vpow2.f32 %v650_v29  ;;  %443 = vadd.xlane.f32.xlu1 %v442_v30 }
 0x2c7   :  { %v635_v31 = vpop.xlane.xlu2 %634 }
 0x2c8   :  { %v643_v32 = vsub.f32 %v1357_v46, %v635_v31 }
 0x2c9   :  { %v641_v33 = vpop.xlane.xlu0 %640 }
 0x2ca   :  { %v1410_v34 = vpop.eup %1165  ;;  %v648_v35 = vmul.f32 1.442695, %v643_v32  ;;  %v645_v36 = vsub.f32 %v1362_v48, %v641_v33 }
 0x2cb   :  { %v654_v37 = vsel %vm207_vm1, %v1410_v34, 0.0 }
 0x2cc   :  { %v1415_v38 = vpop.eup %1167  ;;  %1169 = vpow2.f32 %v648_v35  ;;  %v652_v40 = vmul.f32 1.442695, %v645_v36 }
 0x2cd   :  { %v660_v39 = vsel %vm207_vm1, %v1415_v38, 0.0 }
 0x2ce   :  { %661 = vadd.xlane.f32.xlu0 %v660_v39  ;;  %655 = vadd.xlane.f32.xlu1 %v654_v37  ;;  %1171 = vpow2.f32 %v652_v40 }
 0x2cf   :  { %v853_v41 = vpop.xlane.xlu2 %852 }
 0x2d0   :  { %v863_v42 = vsub.f32 %v1367_v54, %v853_v41 }
 0x2d1   :  { %v859_v43 = vpop.xlane.xlu0 %858 }
 0x2d2   :  { %v1420_v44 = vpop.eup %1169  ;;  %v867_v45 = vmul.f32 1.442695, %v863_v42  ;;  %v865_v46 = vsub.f32 %v1370_v55, %v859_v43 }
 0x2d3   :  { %v657_v47 = vsel %vm207_vm1, %v1420_v44, 0.0 }
 0x2d4   :  { %1173 = vpow2.f32 %v867_v45  ;;  %v871_v48 = vmul.f32 1.442695, %v865_v46  ;;  %v1425_v49 = vpop.eup %1171 }
 0x2d5   :  { %v663_v56 = vsel %vm207_vm1, %v1425_v49, 0.0 }
 0x2d6   :  { %1175 = vpow2.f32 %v871_v48  ;;  %658 = vadd.xlane.f32.xlu1 %v657_v47 }
 0x2d7   :  { %v856_v4 = vpop.xlane.xlu1 %855 }
 0x2d8   :  { %v864_v5 = vsub.f32 %v1377_v61, %v856_v4 }
 0x2d9   :  { %v862_v50 = vpop.xlane.xlu2 %861 }
 0x2da   :  { %v1427_v52 = vpop.eup %1173  ;;  %v866_v51 = vsub.f32 %v1380_v63, %v862_v50  ;;  %v1082_v63 = vor.u32 %v1129_v62, %v1081_v60  ;;  %v869_v18 = vmul.f32 1.442695, %v864_v5 }
 0x2db   :  { %v875_v53 = vsel %vm207_vm1, %v1427_v52, 0.0 }
 0x2dc   :  { %v1432_v54 = vpop.eup %1175  ;;  %v873_v55 = vmul.f32 1.442695, %v866_v51  ;;  %876 = vadd.xlane.f32.xlu2 %v875_v53 }
 0x2dd   :  { %v881_v57 = vsel %vm207_vm1, %v1432_v54, 0.0 }
 0x2de   :  { %1177 = vpow2.f32 %v873_v55  ;;  %664 = vadd.xlane.f32.xlu1 %v663_v56  ;;  %882 = vadd.xlane.f32.xlu0 %v881_v57 }
 0x2df   :  { %1179 = vpow2.f32 %v869_v18 }
 0x2e1   :  { %v689_v3 = vpop.permute.xlu2 %688 }
 0x2e2   :  { %701 = vmatpush.bf16.msra.mxu0 %v689_v3 }
 0x2e4   :  { %v1438_v58 = vpop.eup %1177 }
 0x2e5   :  { %v884_v59 = vsel %vm207_vm1, %v1438_v58, 0.0  ;;  %v1445_v6 = vpop.eup %1179 }
 0x2e6   :  { %885 = vadd.xlane.f32.xlu0 %v884_v59  ;;  %v878_v9 = vsel %vm207_vm1, %v1445_v6, 0.0 }
 0x2f4   :  { %909 = vrot.lane.b32.xlu2 %v1105_v8, %s1207_s4 }
 0x2f7   :  { %718 = vrot.lane.b32.xlu1 %v1082_v63, %s1206_s2 }
 0x2fa   :  { %939 = vrot.lane.b32.xlu0 %v1110_v2, %s1207_s4 }
 0x321   :  { %879 = vadd.xlane.f32.xlu1 %v878_v9 }
 0x32f   :  { %v435_v10 = vpop.xlane.xlu1 %434 }
 0x330   :  { %1181 = vrcp.f32 %v435_v10 }
 0x331   :  { %v441_v11 = vpop.xlane.xlu2 %440 }
 0x332   :  { %1183 = vrcp.f32 %v441_v11 }
 0x336   :  { %v1182_v14 = vpop.eup %1181 }
 0x337   :  { %v438_v13 = vpop.xlane.xlu0 %437  ;;  %v449_v17 = vmul.f32 %v1182_v14, %v1390_v12 }
 0x338   :  { %1185 = vrcp.f32 %v438_v13  ;;  %v1184_v15 = vpop.eup %1183 }
 0x339   :  { %v444_v61 = vpop.xlane.xlu1 %443  ;;  %v451_v19 = vmul.f32 %v1184_v15, %v1395_v16  ;;  %v453_v22 = vpack.c.bf16 %v449_v17, %v449_v17 }
 0x33a   :  { %1187 = vrcp.f32 %v444_v61 }
 0x33b   :  { %v455_v26 = vpack.c.bf16 %v451_v19, %v451_v19  ;;  %v459_v31 = vunpack.c.l.b16 %v453_v22 }
 0x33d   :  { %v489_v35 = vunpack.c.l.b16 %v455_v26 }
 0x33e   :  { %v1186_v20 = vpop.eup %1185 }
 0x33f   :  { %v450_v23 = vmul.f32 %v1186_v20, %v1400_v24 }
 0x340   :  { %v1188_v25 = vpop.eup %1187 }
 0x341   :  { %v452_v27 = vmul.f32 %v1188_v25, %v1405_v28  ;;  %v454_v29 = vpack.c.bf16 %v450_v23, %v450_v23  ;;  %v656_v30 = vpop.xlane.xlu1 %655  ;;  %v662_v41 = vpop.xlane.xlu0 %661 }
 0x342   :  { %1189 = vrcp.f32 %v656_v30 }
 0x343   :  { %v456_v32 = vpack.c.bf16 %v452_v27, %v452_v27  ;;  %v460_v33 = vunpack.c.l.b16 %v454_v29 }
 0x345   :  { %v490_v36 = vunpack.c.l.b16 %v456_v32  ;;  %v461_v37 = vpack.c.b16 %v460_v33, %v459_v31 }
 0x347   :  { %v491_v12 = vpack.c.b16 %v490_v36, %v489_v35  ;;  %1050 = vmatmul.msk.bf16.vlgmr.msrb.gmra.mxu0 %vm207_vm1, %v461_v37 }
 0x348   :  { %v1190_v24 = vpop.eup %1189 }
 0x349   :  { %1055 = vmatmul.msk.bf16.vlgmr.msrb.gmra.mxu1 %vm207_vm1, %v491_v12  ;;  %v659_v16 = vpop.xlane.xlu1 %658  ;;  %v670_v39 = vmul.f32 %v1190_v24, %v1410_v34 }
 0x34a   :  { %1191 = vrcp.f32 %v659_v16 }
 0x34b   :  { %v674_v40 = vpack.c.bf16 %v670_v39, %v670_v39 }
 0x34d   :  { %v680_v46 = vunpack.c.l.b16 %v674_v40 }
 0x34f   :  { %v877_v3 = vpop.xlane.xlu2 %876 }
 0x350   :  { %v1192_v28 = vpop.eup %1191 }
 0x351   :  { %v671_v42 = vmul.f32 %v1192_v28, %v1420_v44  ;;  %v665_v45 = vpop.xlane.xlu1 %664  ;;  %v883_v50 = vpop.xlane.xlu0 %882 }
 0x352   :  { %1193 = vrcp.f32 %v665_v45 }
 0x353   :  { %v675_v43 = vpack.c.bf16 %v671_v42, %v671_v42  ;;  %1195 = vrcp.f32 %v662_v41 }
 0x355   :  { %v681_v47 = vunpack.c.l.b16 %v675_v43 }
 0x357   :  { %v682_v48 = vpack.c.b16 %v681_v47, %v680_v46  ;;  %v910_v21 = vpop.permute.xlu2 %909 }
 0x358   :  { %v1194_v51 = vpop.eup %1193  ;;  %922 = vmatpush.bf16.msrb.mxu0 %v910_v21 }
 0x359   :  { %1078 = vmatmul.msk.bf16.vlgmr.msra.gmra.mxu0 %vm207_vm1, %v682_v48  ;;  %v1196_v53 = vpop.eup %1195  ;;  %v673_v55 = vmul.f32 %v1194_v51, %v1425_v49  ;;  %v886_v57 = vpop.xlane.xlu0 %885 }
 0x35a   :  { %v672_v34 = vmul.f32 %v1196_v53, %v1415_v38  ;;  %1197 = vrcp.f32 %v886_v57 }
 0x35b   :  { %v677_v56 = vpack.c.bf16 %v673_v55, %v673_v55  ;;  %1199 = vrcp.f32 %v883_v50 }
 0x35c   :  { %v676_v59 = vpack.c.bf16 %v672_v34, %v672_v34  ;;  %1201 = vrcp.f32 %v877_v3 }
 0x35d   :  { %v711_v44 = vunpack.c.l.b16 %v677_v56 }
 0x35e   :  { %v710_v60 = vunpack.c.l.b16 %v676_v59 }
 0x360   :  { %v712_v63 = vpack.c.b16 %v711_v44, %v710_v60  ;;  %v1198_v0 = vpop.eup %1197 }
 0x361   :  { %v1200_v2 = vpop.eup %1199  ;;  %v894_v49 = vmul.f32 %v1198_v0, %v1438_v58 }
 0x362   :  { %v893_v38 = vmul.f32 %v1200_v2, %v1432_v54  ;;  %v1202_v10 = vpop.eup %1201 }
 0x363   :  { %v898_v4 = vpack.c.bf16 %v894_v49, %v894_v49  ;;  %v891_v11 = vmul.f32 %v1202_v10, %v1427_v52 }
 0x364   :  { %v897_v5 = vpack.c.bf16 %v893_v38, %v893_v38 }
 0x365   :  { %v932_v18 = vunpack.c.l.b16 %v898_v4  ;;  %v895_v58 = vpack.c.bf16 %v891_v11, %v891_v11 }
 0x366   :  { %v931_v7 = vunpack.c.l.b16 %v897_v5 }
 0x367   :  { %v901_v61 = vunpack.c.l.b16 %v895_v58 }
 0x368   :  { %v933_v8 = vpack.c.b16 %v932_v18, %v931_v7 }
 0x369   :  { %v719_v62 = vpop.permute.xlu1 %718 }
 0x36a   :  { %731 = vmatpush.bf16.msra.mxu1 %v719_v62 }
 0x36c   :  { %v940_v1 = vpop.permute.xlu0 %939 }
 0x36d   :  { %1083 = vmatmul.msk.bf16.vlgmr.msra.gmra.mxu1 %vm207_vm1, %v712_v63 }
 0x36e   :  { %952 = vmatpush.bf16.msrb.mxu1 %v940_v1 }
 0x37d   :  { %1111 = vmatmul.msk.bf16.vlgmr.msrb.gmra.mxu1 %vm207_vm1, %v933_v8 }
 0x394   :  { %v880_v9 = vpop.xlane.xlu1 %879 }
 0x395   :  { %1203 = vrcp.f32 %v880_v9 }
 0x39b   :  { %v1204_v13 = vpop.eup %1203 }
 0x39c   :  { %v892_v54 = vmul.f32 %v1204_v13, %v1445_v6 }
 0x39e   :  { %v896_v14 = vpack.c.bf16 %v892_v54, %v892_v54 }
 0x3a0   :  { %v902_v15 = vunpack.c.l.b16 %v896_v14 }
 0x3a2   :  { %v903_v17 = vpack.c.b16 %v902_v15, %v901_v61 }
 0x3a4   :  { %1106 = vmatmul.msk.bf16.vlgmr.msrb.gmra.mxu0 %vm207_vm1, %v903_v17 }
 0x3c4   :  { %v482_v19 = vpop.f32.mrf.mxu0 }
 0x3c5   :  { %v517_v20 = vpack.c.bf16 %v482_v19, %v482_v19 }
 0x3c6   :  { %v512_v22 = vpop.f32.mrf.mxu1 }
 0x3c7   :  { %v519_v23 = vpack.c.bf16 %v512_v22, %v512_v22  ;;  %525 = vrot.lane.b32.xlu1 %v517_v20, %s1207_s4 }
 0x3c9   :  { %529 = vrot.lane.b32.xlu2 %v519_v23, %s1207_s4 }
 0x3cc   :  { %v484_v25 = vpop.f32.mrf.mxu0 }
 0x3cd   :  { %v518_v52 = vpack.c.bf16 %v484_v25, %v484_v25 }
 0x3ce   :  { %v514_v26 = vpop.f32.mrf.mxu1 }
 0x3cf   :  { %527 = vrot.lane.b32.xlu0 %v518_v52, %s1207_s4  ;;  %v520_v6 = vpack.c.bf16 %v514_v26, %v514_v26 }
 0x3d6   :  { %v703_v27 = vpop.f32.mrf.mxu0 }
 0x3d7   :  { %v738_v29 = vpack.c.bf16 %v703_v27, %v703_v27  ;;  %531 = vrot.lane.b32.xlu0 %v520_v6, %s1207_s4 }
 0x3d9   :  { %746 = vrot.lane.b32.xlu2 %v738_v29, %s1206_s2 }
 0x3de   :  { %v705_v30 = vpop.f32.mrf.mxu0 }
 0x3df   :  { %v739_v31 = vpack.c.bf16 %v705_v30, %v705_v30 }
 0x3e1   :  { %748 = vrot.lane.b32.xlu0 %v739_v31, %s1206_s2 }
 0x3ea   :  { %v733_v32 = vpop.f32.mrf.mxu1 }
 0x3eb   :  { %v740_v33 = vpack.c.bf16 %v733_v32, %v733_v32 }
 0x3ed   :  { %750 = vrot.lane.b32.xlu2 %v740_v33, %s1206_s2 }
 0x3f2   :  { %v735_v35 = vpop.f32.mrf.mxu1 }
 0x3f3   :  { %v741_v36 = vpack.c.bf16 %v735_v35, %v735_v35 }
 0x3f5   :  { %752 = vrot.lane.b32.xlu1 %v741_v36, %s1206_s2 }
 0x3fa   :  { %v954_v37 = vpop.f32.mrf.mxu1 }
 0x3fb   :  { %v961_v12 = vpack.c.bf16 %v954_v37, %v954_v37 }
 0x3fd   :  { %971 = vrot.lane.b32.xlu1 %v961_v12, %s1205_s30 }
 0x402   :  { %v956_v28 = vpop.f32.mrf.mxu1 }
 0x403   :  { %v962_v41 = vpack.c.bf16 %v956_v28, %v956_v28 }
 0x421   :  { %v924_v16 = vpop.f32.mrf.mxu0 }
 0x422   :  { %v959_v24 = vpack.c.bf16 %v924_v16, %v924_v16 }
 0x423   :  { %v530_v39 = vpop.permute.xlu2 %529 }
 0x424   :  { %540 = vst.msk [vmem:[%s1523_s3 + $0x8] sm:$0xf] %vm537_vm3, %v530_v39  ;;  %967 = vrot.lane.b32.xlu0 %v959_v24, %s1205_s30 }
 0x429   :  { %v926_v40 = vpop.f32.mrf.mxu0 }
 0x42a   :  { %v960_v42 = vpack.c.bf16 %v926_v40, %v926_v40 }
 0x42c   :  { %969 = vrot.lane.b32.xlu2 %v960_v42, %s1205_s30  ;;  %973 = vrot.lane.b32.xlu0 %v962_v41, %s1205_s30 }
 0x433   :  { %v747_v45 = vpop.permute.xlu2 %746 }
 0x439   :  { %v526_v43 = vpop.permute.xlu1 %525 }
 0x43a   :  { %538 = vst.msk [vmem:[%s1523_s3] sm:$0xf] %vm537_vm3, %v526_v43 }
 0x43b   :  { %759 = vst.msk [vmem:[%s1523_s3] sm:$0xf] %vm758_vm4, %v747_v45 }
 0x441   :  { %v528_v46 = vpop.permute.xlu0 %527 }
 0x442   :  { %539 = vst.msk [vmem:[%s1523_s3 + $0x4] sm:$0xf] %vm537_vm3, %v528_v46 }
 0x447   :  { %v751_v47 = vpop.permute.xlu2 %750 }
 0x448   :  { %761 = vst.msk [vmem:[%s1523_s3 + $0x8] sm:$0xf] %vm758_vm4, %v751_v47 }
 0x449   :  { %v532_v48 = vpop.permute.xlu0 %531 }
 0x44a   :  { %541 = vst.msk [vmem:[%s1523_s3 + $0xc] sm:$0xf] %vm537_vm3, %v532_v48 }
 0x453   :  { %v749_v50 = vpop.permute.xlu0 %748 }
 0x454   :  { %760 = vst.msk [vmem:[%s1523_s3 + $0x4] sm:$0xf] %vm758_vm4, %v749_v50 }
 0x467   :  { %v753_v51 = vpop.permute.xlu1 %752 }
 0x468   :  { %762 = vst.msk [vmem:[%s1523_s3 + $0xc] sm:$0xf] %vm758_vm4, %v753_v51 }
 0x46f   :  { %v972_v53 = vpop.permute.xlu1 %971 }
 0x470   :  { %982 = vst.msk [vmem:[%s1523_s3 + $0x8] sm:$0xf] %vm979_vm5, %v972_v53 }
 0x486   :  { %v970_v55 = vpop.permute.xlu2 %969 }
 0x487   :  { %981 = vst.msk [vmem:[%s1523_s3 + $0x4] sm:$0xf] %vm979_vm5, %v970_v55 }
 0x496   :  { %v968_v34 = vpop.permute.xlu0 %967 }
 0x497   :  { %980 = vst.msk [vmem:[%s1523_s3] sm:$0xf] %vm979_vm5, %v968_v34 }
 0x49e   :  { %v974_v56 = vpop.permute.xlu0 %973 }
 0x49f   :  { %983 = vst.msk [vmem:[%s1523_s3 + $0xc] sm:$0xf] %vm979_vm5, %v974_v56 }

// kernel: bert_x_layer.23
= control target key start
LH: loop header
LB: loop body
LE: loop exit
PB: predicated region body
PF: predicated region fallthrough
CT: control target
= control target key end

     0   :  { %12 = vsyncpa [#allocation4], 0  ;;  %s1062_s0 = inlined_call_operand.vmem [shape: bf16[32,128], index: 0, kind: input, shape index: {}]   ;;  %s1063_s1 = inlined_call_operand.hbm [shape: bf16[128,256], index: 1, kind: input, shape index: {}]   ;;  %s1064_s2 = inlined_call_operand.vmem [shape: bf16[1,256], index: 2, kind: input, shape index: {}]   ;;  %s1065_s3 = inlined_call_operand.hbm [shape: bf16[256,128], index: 3, kind: input, shape index: {}]   ;;  %s1066_s4 = inlined_call_operand.vmem [shape: bf16[1,128], index: 4, kind: input, shape index: {}]   ;;  %s1067_s5 = inlined_call_operand.vmem [shape: bf16[1,128], index: 5, kind: input, shape index: {}]   ;;  %s1068_s6 = inlined_call_operand.vmem [shape: bf16[1,128], index: 6, kind: input, shape index: {}]   ;;  %s1069_s7 = inlined_call_operand.hbm [shape: bf16[32,128], index: 7, kind: output, shape index: {}]  }
   0x1   :  { %13 = vsyncpa [#allocation7], 0 }
   0x2   :  { %14 = vsyncpa [#allocation5], 0  ;;  %s21_s26 = sshll.u32 %s1063_s1, 4  ;;  %s937_s27 = smov [#allocation3]   ;;  %s22_s26 = int_to_ptr.hbm [resolvable:$true] %s21_s26 }
   0x3   :  { %s23_s28 = sshll.u32 %s937_s27, 4  ;;  %s36_s8 = sshll.u32 %s1065_s3, 4  ;;  %s24_s28 = int_to_ptr.vmem [resolvable:$true] %s23_s28  ;;  %s37_s8 = int_to_ptr.hbm [resolvable:$true] %s36_s8 }
   0x4   :  { %s938_s9 = smov 128   ;;  %s939_s10 = smov 8  }
   0x5   :  { %29 = dma.hbm_to_vmem [thread:$0]  %s22_s26, 2048, %s24_s28, [#allocation4], %s938_s9, %s938_s9, %s939_s10  }
   0x6   :  { %s940_s11 = smov [#allocation6]   ;;  %s941_s13 = smov 64  }
   0x7   :  { %s38_s12 = sshll.u32 %s940_s11, 4  ;;  %s942_s14 = smov 4   ;;  %s39_s12 = int_to_ptr.vmem [resolvable:$true] %s38_s12 }
   0x8   :  { %44 = dma.hbm_to_vmem [thread:$0]  %s37_s8, 2048, %s39_s12, [#allocation7], %s941_s13, %s941_s13, %s942_s14  }
   0x9   :  { %931 = dma.done.wait [#allocation4], 2048  }
   0xa   :  { %932 = vsyncadd [#allocation4], 4294965248 }
   0xb   :  { %933 = dma.done.wait [#allocation7], 2048  }
   0xc   :  { %934 = vsyncadd [#allocation7], 4294965248  ;;  %v701_v0 = vld [vmem:[#allocation3 + $0x70] sm:$0xf]  ;;  %v788_v1 = vld [vmem:[#allocation3 + $0x74] sm:$0xf0] }
   0xd   :  { %v787_v2 = vld [vmem:[#allocation3 + $0x74] sm:$0xf]  ;;  %v702_v3 = vor.u32 %v788_v1, %v701_v0  ;;  %v703_v4 = vld [vmem:[#allocation3 + $0x78] sm:$0xf0]  ;;  %v693_v5 = vld [vmem:[#allocation3 + $0x60] sm:$0xf] }
   0xe   :  { %v786_v6 = vld [vmem:[#allocation3 + $0x64] sm:$0xf0]  ;;  %v706_v7 = vor.u32 %v787_v2, %v703_v4  ;;  %v785_v8 = vld [vmem:[#allocation3 + $0x64] sm:$0xf]  ;;  %v695_v9 = vld [vmem:[#allocation3 + $0x68] sm:$0xf0] }
   0xf   :  { %188 = vmatpush.bf16.msra.mxu0 %v702_v3  ;;  %v694_v10 = vor.u32 %v786_v6, %v693_v5  ;;  %v698_v11 = vor.u32 %v785_v8, %v695_v9  ;;  %v685_v12 = vld [vmem:[#allocation3 + $0x50] sm:$0xf]  ;;  %v784_v13 = vld [vmem:[#allocation3 + $0x54] sm:$0xf0]  ;;  %v783_v14 = vld [vmem:[#allocation3 + $0x54] sm:$0xf] }
  0x10   :  { %207 = vmatpush.bf16.msra.mxu1 %v706_v7  ;;  %v687_v15 = vld [vmem:[#allocation3 + $0x58] sm:$0xf0]  ;;  %v686_v16 = vor.u32 %v784_v13, %v685_v12  ;;  %v677_v18 = vld [vmem:[#allocation3 + $0x40] sm:$0xf]  ;;  %v782_v19 = vld [vmem:[#allocation3 + $0x44] sm:$0xf0] }
  0x11   :  { %v690_v17 = vor.u32 %v783_v14, %v687_v15  ;;  %v781_v20 = vld [vmem:[#allocation3 + $0x44] sm:$0xf]  ;;  %v679_v21 = vld [vmem:[#allocation3 + $0x48] sm:$0xf0]  ;;  %v678_v22 = vor.u32 %v782_v19, %v677_v18  ;;  %v669_v24 = vld [vmem:[#allocation3 + $0x30] sm:$0xf] }
  0x12   :  { %v682_v23 = vor.u32 %v781_v20, %v679_v21  ;;  %v780_v25 = vld [vmem:[#allocation3 + $0x34] sm:$0xf0]  ;;  %v779_v26 = vld [vmem:[#allocation3 + $0x34] sm:$0xf]  ;;  %v671_v27 = vld [vmem:[#allocation3 + $0x38] sm:$0xf0] }
  0x13   :  { %189 = vmatpush.bf16.msra.mxu0 %v694_v10  ;;  %v670_v28 = vor.u32 %v780_v25, %v669_v24  ;;  %v674_v29 = vor.u32 %v779_v26, %v671_v27  ;;  %v661_v30 = vld [vmem:[#allocation3 + $0x20] sm:$0xf]  ;;  %v778_v31 = vld [vmem:[#allocation3 + $0x24] sm:$0xf0]  ;;  %v777_v32 = vld [vmem:[#allocation3 + $0x24] sm:$0xf] }
  0x14   :  { %208 = vmatpush.bf16.msra.mxu1 %v698_v11  ;;  %v663_v33 = vld [vmem:[#allocation3 + $0x28] sm:$0xf0]  ;;  %v662_v34 = vor.u32 %v778_v31, %v661_v30  ;;  %v653_v36 = vld [vmem:[#allocation3 + $0x10] sm:$0xf]  ;;  %v776_v37 = vld [vmem:[#allocation3 + $0x14] sm:$0xf0] }
  0x15   :  { %v666_v35 = vor.u32 %v777_v32, %v663_v33  ;;  %v775_v38 = vld [vmem:[#allocation3 + $0x14] sm:$0xf]  ;;  %v655_v39 = vld [vmem:[#allocation3 + $0x18] sm:$0xf0]  ;;  %v654_v40 = vor.u32 %v776_v37, %v653_v36  ;;  %v645_v42 = vld [vmem:[#allocation3] sm:$0xf] }
  0x16   :  { %v658_v41 = vor.u32 %v775_v38, %v655_v39  ;;  %v774_v43 = vld [vmem:[#allocation3 + $0x4] sm:$0xf0]  ;;  %v773_v44 = vld [vmem:[#allocation3 + $0x4] sm:$0xf]  ;;  %v647_v45 = vld [vmem:[#allocation3 + $0x8] sm:$0xf0] }
  0x17   :  { %190 = vmatpush.bf16.msra.mxu0 %v686_v16  ;;  %v646_v46 = vor.u32 %v774_v43, %v645_v42  ;;  %v650_v47 = vor.u32 %v773_v44, %v647_v45  ;;  %v771_v48 = vld [vmem:[%s1062_s0] sm:$0xff]  ;;  %v772_v49 = vld [vmem:[%s1062_s0 + $0x8] sm:$0xff]  ;;  %v796_v50 = vld [vmem:[#allocation6 + $0x38] sm:$0xff]  ;;  %s621_s28 = sshll.u32 %s1069_s7, 4  ;;  %s622_s28 = int_to_ptr.hbm [resolvable:$true] %s621_s28 }
  0x18   :  { %209 = vmatpush.bf16.msra.mxu1 %v690_v17  ;;  %v804_v51 = vld [vmem:[#allocation6 + $0x78] sm:$0xff]  ;;  %434 = vmatpush.bf16.msra.mxu2 %v796_v50  ;;  %v795_v52 = vld [vmem:[#allocation6 + $0x30] sm:$0xff]  ;;  %v794_v54 = vld [vmem:[#allocation6 + $0x28] sm:$0xff] }
  0x19   :  { %453 = vmatpush.bf16.msra.mxu3 %v804_v51  ;;  %v803_v53 = vld [vmem:[#allocation6 + $0x70] sm:$0xff]  ;;  %v802_v55 = vld [vmem:[#allocation6 + $0x68] sm:$0xff]  ;;  %v793_v56 = vld [vmem:[#allocation6 + $0x20] sm:$0xff] }
  0x1a   :  { %v801_v57 = vld [vmem:[#allocation6 + $0x60] sm:$0xff]  ;;  %v792_v59 = vld [vmem:[#allocation6 + $0x18] sm:$0xff]  ;;  %v791_v62 = vld [vmem:[#allocation6 + $0x10] sm:$0xff] }
  0x1b   :  { %191 = vmatpush.bf16.msra.mxu0 %v678_v22  ;;  %v87_v58 = vld [vmem:[%s1064_s2] sm:$0x3]  ;;  %v800_v60 = vld [vmem:[#allocation6 + $0x58] sm:$0xff]  ;;  %v799_v63 = vld [vmem:[#allocation6 + $0x50] sm:$0xff] }
  0x1c   :  { %210 = vmatpush.bf16.msra.mxu1 %v682_v23  ;;  %435 = vmatpush.bf16.msra.mxu2 %v795_v52  ;;  %v88_v61 = vunpack.c.l.bf16 %v87_v58  ;;  %v790_v2 = vld [vmem:[#allocation6 + $0x8] sm:$0xff]  ;;  %v789_v7 = vld [vmem:[#allocation6] sm:$0xff] }
  0x1d   :  { %454 = vmatpush.bf16.msra.mxu3 %v803_v53  ;;  %v798_v3 = vld [vmem:[#allocation6 + $0x48] sm:$0xff]  ;;  %v797_v8 = vld [vmem:[#allocation6 + $0x40] sm:$0xff] }
  0x1e   :  { %v90_v0 = vperm.slane %v88_v61, 0  ;;  %v91_v1 = vperm.slane %v88_v61, 2 }
  0x1f   :  { %192 = vmatpush.bf16.msra.mxu0 %v670_v28 }
  0x20   :  { %211 = vmatpush.bf16.msra.mxu1 %v674_v29  ;;  %436 = vmatpush.bf16.msra.mxu2 %v794_v54  ;;  %v94_v4 = vperm.slane %v90_v0, 0  ;;  %v95_v5 = vperm.slane %v91_v1, 0 }
  0x21   :  { %455 = vmatpush.bf16.msra.mxu3 %v802_v55 }
  0x23   :  { %193 = vmatpush.bf16.msra.mxu0 %v662_v34 }
  0x24   :  { %212 = vmatpush.bf16.msra.mxu1 %v666_v35  ;;  %437 = vmatpush.bf16.msra.mxu2 %v793_v56 }
  0x25   :  { %456 = vmatpush.bf16.msra.mxu3 %v801_v57 }
  0x27   :  { %194 = vmatpush.bf16.msra.mxu0 %v654_v40 }
  0x28   :  { %213 = vmatpush.bf16.msra.mxu1 %v658_v41  ;;  %438 = vmatpush.bf16.msra.mxu2 %v792_v59 }
  0x29   :  { %457 = vmatpush.bf16.msra.mxu3 %v800_v60 }
  0x2b   :  { %195 = vmatpush.bf16.msra.mxu0 %v646_v46 }
  0x2c   :  { %214 = vmatpush.bf16.msra.mxu1 %v650_v47  ;;  %439 = vmatpush.bf16.msra.mxu2 %v791_v62 }
  0x2d   :  { %458 = vmatpush.bf16.msra.mxu3 %v799_v63 }
  0x2e   :  { %196 = vmatmul.bf16.vlgmr.msra.gmra.mxu0 %v771_v48 }
  0x2f   :  { %215 = vmatmul.bf16.vlgmr.msra.gmra.mxu1 %v771_v48 }
  0x30   :  { %440 = vmatpush.bf16.msra.mxu2 %v790_v2 }
  0x31   :  { %459 = vmatpush.bf16.msra.mxu3 %v798_v3 }
  0x34   :  { %441 = vmatpush.bf16.msra.mxu2 %v789_v7 }
  0x35   :  { %460 = vmatpush.bf16.msra.mxu3 %v797_v8 }
  0x3e   :  { %201 = vmatmul.bf16.gmra.mxu0 %v772_v49 }
  0x3f   :  { %220 = vmatmul.bf16.gmra.mxu1 %v772_v49 }
  0xab   :  { %v197_v6 = vpop.f32.mrf.mxu0 }
  0xac   :  { %v1003_v9 = vadd.f32 %v197_v6, %v94_v4  ;;  %v216_v10 = vpop.f32.mrf.mxu1 }
  0xad   :  { %v1005_v11 = vadd.f32 %v216_v10, %v95_v5 }
  0xae   :  { %v226_v12 = vmul.f32 %v1003_v9, %v1003_v9 }
  0xaf   :  { %v227_v13 = vmul.f32 %v1005_v11, %v1005_v11 }
  0xb0   :  { %v234_v14 = vmul.f32 %v226_v12, %v1003_v9 }
  0xb1   :  { %v235_v15 = vmul.f32 %v227_v13, %v1005_v11 }
  0xb2   :  { %v242_v16 = vmul.f32 0.044715, %v234_v14 }
  0xb3   :  { %v243_v17 = vmul.f32 0.044715, %v235_v15  ;;  %v199_v18 = vpop.f32.mrf.mxu0 }
  0xb4   :  { %v250_v19 = vadd.f32 %v242_v16, %v1003_v9  ;;  %v200_v20 = vadd.f32 %v199_v18, %v94_v4  ;;  %v218_v21 = vpop.f32.mrf.mxu1 }
  0xb5   :  { %v251_v22 = vadd.f32 %v243_v17, %v1005_v11  ;;  %v219_v23 = vadd.f32 %v218_v21, %v95_v5 }
  0xb6   :  { %v228_v24 = vmul.f32 %v200_v20, %v200_v20  ;;  %v258_v25 = vmul.f32 0.7978846, %v250_v19 }
  0xb7   :  { %v229_v26 = vmul.f32 %v219_v23, %v219_v23  ;;  %v259_v27 = vmul.f32 0.7978846, %v251_v22 }
  0xb8   :  { %v236_v28 = vmul.f32 %v228_v24, %v200_v20  ;;  %833 = vtanh.f32 %v258_v25 }
  0xb9   :  { %v237_v29 = vmul.f32 %v229_v26, %v219_v23  ;;  %835 = vtanh.f32 %v259_v27 }
  0xba   :  { %v244_v30 = vmul.f32 0.044715, %v236_v28 }
  0xbb   :  { %v245_v31 = vmul.f32 0.044715, %v237_v29  ;;  %v202_v32 = vpop.f32.mrf.mxu0 }
  0xbc   :  { %v252_v33 = vadd.f32 %v244_v30, %v200_v20  ;;  %v1015_v34 = vadd.f32 %v202_v32, %v94_v4  ;;  %v221_v35 = vpop.f32.mrf.mxu1 }
  0xbd   :  { %v253_v36 = vadd.f32 %v245_v31, %v219_v23  ;;  %v1017_v37 = vadd.f32 %v221_v35, %v95_v5 }
  0xbe   :  { %v230_v38 = vmul.f32 %v1015_v34, %v1015_v34  ;;  %v260_v39 = vmul.f32 0.7978846, %v252_v33  ;;  %v834_v42 = vpop.eup %833 }
  0xbf   :  { %v231_v40 = vmul.f32 %v1017_v37, %v1017_v37  ;;  %v261_v41 = vmul.f32 0.7978846, %v253_v36  ;;  %v836_v44 = vpop.eup %835  ;;  %v274_v49 = vadd.f32 1.0, %v834_v42 }
  0xc0   :  { %v238_v43 = vmul.f32 %v230_v38, %v1015_v34  ;;  %837 = vtanh.f32 %v260_v39  ;;  %v275_v53 = vadd.f32 1.0, %v836_v44  ;;  %v487_v38 = vld [vmem:[%s1066_s4] sm:$0x1] }
  0xc1   :  { %v239_v45 = vmul.f32 %v231_v40, %v1017_v37  ;;  %839 = vtanh.f32 %v261_v41  ;;  %v282_v62 = vmul.f32 0.5, %v274_v49  ;;  %v488_v39 = vunpack.c.l.bf16 %v487_v38  ;;  %v806_v40 = vld [vmem:[%s1062_s0] sm:$0xff]  }
  0xc2   :  { %v246_v46 = vmul.f32 0.044715, %v238_v43  ;;  %v283_v2 = vmul.f32 0.5, %v275_v53  ;;  %v807_v44 = vunpack.c.l.bf16 %v806_v40  ;;  %v808_v49 = vunpack.c.h.bf16 %v806_v40 }
  0xc3   :  { %v247_v47 = vmul.f32 0.044715, %v239_v45  ;;  %v204_v48 = vpop.f32.mrf.mxu0  ;;  %v290_v10 = vmul.f32 %v282_v62, %v1003_v9  ;;  %v489_v42 = vperm.slane %v488_v39, 0 }
  0xc4   :  { %v254_v50 = vadd.f32 %v246_v46, %v1015_v34  ;;  %v205_v51 = vadd.f32 %v204_v48, %v94_v4  ;;  %v223_v52 = vpop.f32.mrf.mxu1  ;;  %v291_v13 = vmul.f32 %v283_v2, %v1005_v11 }
  0xc5   :  { %v255_v54 = vadd.f32 %v247_v47, %v1017_v37  ;;  %v224_v55 = vadd.f32 %v223_v52, %v95_v5  ;;  %v823_v52 = vld [vmem:[%s1062_s0 + $0x8] sm:$0xff]  }
  0xc6   :  { %v838_v56 = vpop.eup %837  ;;  %v232_v57 = vmul.f32 %v205_v51, %v205_v51  ;;  %v262_v58 = vmul.f32 0.7978846, %v254_v50  ;;  %v812_v62 = vunpack.c.h.bf16 %v823_v52 }
  0xc7   :  { %v840_v59 = vpop.eup %839  ;;  %v233_v60 = vmul.f32 %v224_v55, %v224_v55  ;;  %v276_v61 = vadd.f32 1.0, %v838_v56  ;;  %v263_v63 = vmul.f32 0.7978846, %v255_v54  ;;  %v811_v56 = vunpack.c.l.bf16 %v823_v52 }
  0xc8   :  { %v240_v0 = vmul.f32 %v232_v57, %v205_v51  ;;  %v277_v1 = vadd.f32 1.0, %v840_v59  ;;  %841 = vtanh.f32 %v262_v58 }
  0xc9   :  { %v241_v3 = vmul.f32 %v233_v60, %v224_v55  ;;  %v284_v6 = vmul.f32 0.5, %v276_v61  ;;  %843 = vtanh.f32 %v263_v63 }
  0xca   :  { %v248_v7 = vmul.f32 0.044715, %v240_v0  ;;  %v285_v4 = vmul.f32 0.5, %v277_v1  ;;  %v943_v1 = vmov 128.0  }
  0xcb   :  { %v249_v8 = vmul.f32 0.044715, %v241_v3  ;;  %v292_v5 = vmul.f32 %v284_v6, %v200_v20 }
  0xcc   :  { %v256_v12 = vadd.f32 %v248_v7, %v205_v51  ;;  %v293_v14 = vmul.f32 %v285_v4, %v219_v23 }
  0xcd   :  { %v257_v15 = vadd.f32 %v249_v8, %v224_v55  ;;  %v302_v16 = vpack.c.bf16 %v292_v5, %v290_v10 }
  0xce   :  { %v303_v17 = vpack.c.bf16 %v293_v14, %v291_v13  ;;  %v264_v18 = vmul.f32 0.7978846, %v256_v12  ;;  %v842_v21 = vpop.eup %841 }
  0xcf   :  { %442 = vmatmul.bf16.vlgmr.msra.gmra.mxu2 %v302_v16  ;;  %v265_v19 = vmul.f32 0.7978846, %v257_v15  ;;  %v844_v22 = vpop.eup %843  ;;  %v278_v24 = vadd.f32 1.0, %v842_v21 }
  0xd0   :  { %461 = vmatmul.bf16.vlgmr.msra.gmra.mxu3 %v303_v17  ;;  %845 = vtanh.f32 %v264_v18  ;;  %v279_v25 = vadd.f32 1.0, %v844_v22 }
  0xd1   :  { %847 = vtanh.f32 %v265_v19  ;;  %v286_v27 = vmul.f32 0.5, %v278_v24 }
  0xd2   :  { %v287_v11 = vmul.f32 0.5, %v279_v25  ;;  %849 = vrcp.f32 %v943_v1 }
  0xd3   :  { %v294_v30 = vmul.f32 %v286_v27, %v1015_v34 }
  0xd4   :  { %v295_v32 = vmul.f32 %v287_v11, %v1017_v37 }
  0xd6   :  { %v846_v9 = vpop.eup %845 }
  0xd7   :  { %v848_v20 = vpop.eup %847  ;;  %v280_v26 = vadd.f32 1.0, %v846_v9 }
  0xd8   :  { %v281_v28 = vadd.f32 1.0, %v848_v20  ;;  %v850_v2 = vpop.eup %849 }
  0xd9   :  { %v288_v23 = vmul.f32 0.5, %v280_v26  ;;  %v515_v3 = vmul.f32 128.0, %v850_v2  ;;  %vm519_vm0 = vweird.f32 %v850_v2 }
  0xda   :  { %v289_v29 = vmul.f32 0.5, %v281_v28 }
  0xdb   :  { %v296_v31 = vmul.f32 %v288_v23, %v205_v51  ;;  %v516_v6 = vsub.f32 1.0, %v515_v3 }
  0xdc   :  { %v297_v33 = vmul.f32 %v289_v29, %v224_v55 }
  0xdd   :  { %v304_v35 = vpack.c.bf16 %v296_v31, %v294_v30  ;;  %v517_v7 = vmul.f32 %v850_v2, %v516_v6 }
  0xde   :  { %v305_v36 = vpack.c.bf16 %v297_v33, %v295_v32 }
  0xdf   :  { %447 = vmatmul.bf16.gmra.mxu2 %v304_v35  ;;  %v518_v4 = vadd.f32 %v850_v2, %v517_v7 }
  0xe0   :  { %466 = vmatmul.bf16.gmra.mxu3 %v305_v36 }
  0xe1   :  { %v520_v8 = vsel %vm519_vm0, %v850_v2, %v518_v4 }
 0x152   :  { %v443_v41 = vpop.f32.mrf.mxu2 }
 0x153   :  { %v462_v34 = vpop.f32.mrf.mxu3 }
 0x154   :  { %v463_v43 = vadd.f32 %v462_v34, %v443_v41  ;;  %v593_v34 = vld [vmem:[%s1067_s5] sm:$0x1]  ;;  %s944_s5 = smov [#allocation8]  }
 0x156   :  { %v490_v37 = vadd.f32 %v489_v42, %v463_v43 }
 0x158   :  { %v502_v45 = vadd.f32 %v807_v44, %v490_v37  ;;  %v594_v44 = vunpack.c.l.bf16 %v593_v34 }
 0x15a   :  { %506 = vadd.xlane.f32.xlu0 %v502_v45  ;;  %v445_v46 = vpop.f32.mrf.mxu2 }
 0x15b   :  { %v464_v47 = vpop.f32.mrf.mxu3 }
 0x15c   :  { %v465_v48 = vadd.f32 %v464_v47, %v445_v46  ;;  %v600_v47 = vld [vmem:[%s1068_s6] sm:$0x1]  ;;  %s619_s6 = sshll.u32 %s944_s5, 4  ;;  %s620_s6 = int_to_ptr.vmem [resolvable:$true] %s619_s6 }
 0x15e   :  { %v491_v50 = vadd.f32 %v489_v42, %v465_v48 }
 0x160   :  { %v503_v51 = vadd.f32 %v808_v49, %v491_v50 }
 0x162   :  { %508 = vadd.xlane.f32.xlu0 %v503_v51  ;;  %v448_v53 = vpop.f32.mrf.mxu2 }
 0x163   :  { %v467_v54 = vpop.f32.mrf.mxu3 }
 0x164   :  { %v468_v55 = vadd.f32 %v467_v54, %v448_v53  ;;  %v595_v53 = vperm.slane %v594_v44, 0  ;;  %v601_v54 = vunpack.c.l.bf16 %v600_v47 }
 0x166   :  { %v492_v57 = vadd.f32 %v489_v42, %v468_v55 }
 0x168   :  { %v504_v58 = vadd.f32 %v811_v56, %v492_v57 }
 0x16a   :  { %510 = vadd.xlane.f32.xlu1 %v504_v58  ;;  %v450_v59 = vpop.f32.mrf.mxu2 }
 0x16b   :  { %v469_v60 = vpop.f32.mrf.mxu3 }
 0x16c   :  { %v470_v61 = vadd.f32 %v469_v60, %v450_v59 }
 0x16e   :  { %v493_v63 = vadd.f32 %v489_v42, %v470_v61  ;;  %v602_v61 = vperm.slane %v601_v54, 0 }
 0x170   :  { %v505_v0 = vadd.f32 %v812_v62, %v493_v63 }
 0x172   :  { %512 = vadd.xlane.f32.xlu1 %v505_v0 }
 0x1cd   :  { %v507_v10 = vpop.xlane.xlu0 %506 }
 0x1ce   :  { %v521_v5 = vmul.f32 %v520_v8, %v507_v10 }
 0x1d0   :  { %v525_v12 = vsub.f32 %v502_v45, %v521_v5 }
 0x1d2   :  { %v529_v13 = vmul.f32 %v525_v12, %v525_v12 }
 0x1d4   :  { %533 = vadd.xlane.f32.xlu2 %v529_v13 }
 0x1d5   :  { %v509_v14 = vpop.xlane.xlu0 %508 }
 0x1d6   :  { %v522_v15 = vmul.f32 %v520_v8, %v509_v14 }
 0x1d8   :  { %v526_v16 = vsub.f32 %v503_v51, %v522_v15 }
 0x1da   :  { %v530_v17 = vmul.f32 %v526_v16, %v526_v16 }
 0x1dc   :  { %535 = vadd.xlane.f32.xlu2 %v530_v17 }
 0x1dd   :  { %v511_v18 = vpop.xlane.xlu1 %510 }
 0x1de   :  { %v523_v19 = vmul.f32 %v520_v8, %v511_v18 }
 0x1e0   :  { %v1040_v21 = vsub.f32 %v504_v58, %v523_v19 }
 0x1e2   :  { %v531_v22 = vmul.f32 %v1040_v21, %v1040_v21 }
 0x1e4   :  { %537 = vadd.xlane.f32.xlu0 %v531_v22 }
 0x1e5   :  { %v513_v24 = vpop.xlane.xlu1 %512 }
 0x1e6   :  { %v524_v25 = vmul.f32 %v520_v8, %v513_v24 }
 0x1e8   :  { %v1044_v9 = vsub.f32 %v505_v0, %v524_v25 }
 0x1ea   :  { %v532_v20 = vmul.f32 %v1044_v9, %v1044_v9 }
 0x1ec   :  { %539 = vadd.xlane.f32.xlu1 %v532_v20 }
 0x247   :  { %v534_v26 = vpop.xlane.xlu2 %533 }
 0x248   :  { %v541_v27 = vmul.f32 %v534_v26, %v520_v8 }
 0x24a   :  { %v545_v28 = vadd.f32 1e-12, %v541_v27 }
 0x24c   :  { %851 = vrsqrt.f32 %v545_v28  ;;  %vm555_vm2 = vweird.f32 %v545_v28 }
 0x24f   :  { %v536_v11 = vpop.xlane.xlu2 %535 }
 0x250   :  { %v542_v23 = vmul.f32 %v536_v11, %v520_v8 }
 0x252   :  { %v852_v29 = vpop.eup %851  ;;  %v546_v30 = vadd.f32 1e-12, %v542_v23 }
 0x253   :  { %v550_v31 = vmul.f32 %v852_v29, %v545_v28  ;;  %vm556_vm1 = vweird.f32 %v852_v29 }
 0x254   :  { %853 = vrsqrt.f32 %v546_v30  ;;  %vm557_vm3 = vmor %vm555_vm2, %vm556_vm1  ;;  %vm565_vm5 = vweird.f32 %v546_v30 }
 0x255   :  { %v551_v32 = vmul.f32 %v852_v29, %v550_v31 }
 0x257   :  { %v552_v33 = vmul.f32 0.5, %v551_v32  ;;  %v538_v35 = vpop.xlane.xlu0 %537 }
 0x258   :  { %v543_v36 = vmul.f32 %v538_v35, %v520_v8 }
 0x259   :  { %v553_v38 = vsub.f32 1.5, %v552_v33 }
 0x25a   :  { %v854_v39 = vpop.eup %853  ;;  %v547_v40 = vadd.f32 1e-12, %v543_v36 }
 0x25b   :  { %v554_v41 = vmul.f32 %v852_v29, %v553_v38  ;;  %v560_v42 = vmul.f32 %v854_v39, %v546_v30  ;;  %vm566_vm4 = vweird.f32 %v854_v39 }
 0x25c   :  { %855 = vrsqrt.f32 %v547_v40  ;;  %vm567_vm6 = vmor %vm565_vm5, %vm566_vm4  ;;  %vm575_vm8 = vweird.f32 %v547_v40 }
 0x25d   :  { %v561_v43 = vmul.f32 %v854_v39, %v560_v42  ;;  %v558_v37 = vsel %vm557_vm3, %v852_v29, %v554_v41 }
 0x25e   :  { %v589_v51 = vmul.f32 %v558_v37, %v525_v12 }
 0x25f   :  { %v562_v45 = vmul.f32 0.5, %v561_v43  ;;  %v540_v46 = vpop.xlane.xlu1 %539 }
 0x260   :  { %v544_v48 = vmul.f32 %v540_v46, %v520_v8  ;;  %v596_v60 = vmul.f32 %v595_v53, %v589_v51 }
 0x261   :  { %v563_v49 = vsub.f32 1.5, %v562_v45 }
 0x262   :  { %v856_v50 = vpop.eup %855  ;;  %v548_v52 = vadd.f32 1e-12, %v544_v48  ;;  %v603_v2 = vadd.f32 %v602_v61, %v596_v60 }
 0x263   :  { %v564_v55 = vmul.f32 %v854_v39, %v563_v49  ;;  %v570_v56 = vmul.f32 %v856_v50, %v547_v40  ;;  %vm576_vm7 = vweird.f32 %v856_v50 }
 0x264   :  { %857 = vrsqrt.f32 %v548_v52  ;;  %vm577_vm9 = vmor %vm575_vm8, %vm576_vm7  ;;  %vm585_vm11 = vweird.f32 %v548_v52 }
 0x265   :  { %v568_v57 = vsel %vm567_vm6, %v854_v39, %v564_v55  ;;  %v571_v58 = vmul.f32 %v856_v50, %v570_v56 }
 0x266   :  { %v590_v59 = vmul.f32 %v568_v57, %v526_v16 }
 0x267   :  { %v572_v62 = vmul.f32 0.5, %v571_v58 }
 0x268   :  { %v597_v63 = vmul.f32 %v595_v53, %v590_v59 }
 0x269   :  { %v573_v0 = vsub.f32 1.5, %v572_v62 }
 0x26a   :  { %v858_v1 = vpop.eup %857  ;;  %v604_v3 = vadd.f32 %v602_v61, %v597_v63 }
 0x26b   :  { %v574_v6 = vmul.f32 %v856_v50, %v573_v0  ;;  %v580_v7 = vmul.f32 %v858_v1, %v548_v52  ;;  %vm586_vm10 = vweird.f32 %v858_v1 }
 0x26c   :  { %v816_v4 = vpack.c.bf16 %v604_v3, %v603_v2  ;;  %vm587_vm12 = vmor %vm585_vm11, %vm586_vm10 }
 0x26d   :  { %v581_v8 = vmul.f32 %v858_v1, %v580_v7  ;;  %v578_v10 = vsel %vm577_vm9, %v856_v50, %v574_v6 }
 0x26e   :  { %817 = vst [vmem:[#allocation8] sm:$0xff] %v816_v4   ;;  %v591_v13 = vmul.f32 %v578_v10, %v1040_v21 }
 0x26f   :  { %v582_v5 = vmul.f32 0.5, %v581_v8 }
 0x270   :  { %v598_v17 = vmul.f32 %v595_v53, %v591_v13 }
 0x271   :  { %v583_v12 = vsub.f32 1.5, %v582_v5 }
 0x272   :  { %v605_v19 = vadd.f32 %v602_v61, %v598_v17 }
 0x273   :  { %v584_v14 = vmul.f32 %v858_v1, %v583_v12 }
 0x275   :  { %v588_v15 = vsel %vm587_vm12, %v858_v1, %v584_v14 }
 0x276   :  { %v592_v16 = vmul.f32 %v588_v15, %v1044_v9 }
 0x278   :  { %v599_v18 = vmul.f32 %v595_v53, %v592_v16 }
 0x27a   :  { %v606_v22 = vadd.f32 %v602_v61, %v599_v18 }
 0x27c   :  { %v821_v24 = vpack.c.bf16 %v606_v22, %v605_v19 }
 0x27e   :  { %824 = vst [vmem:[#allocation8 + $0x8] sm:$0xff] %v821_v24  }
 0x27f   :  { %627 = dma.vmem_to_hbm [thread:$0]  %s620_s6, 256, %s622_s28, [#allocation5], %s941_s13, %s941_s13, %s942_s14  }
 0x280   :  { %935 = dma.done.wait [#allocation5], 256  }
 0x281   :  { %936 = vsyncadd [#allocation5], 4294967040 }
 0x282   :  { %632 = vsyncpa [#allocation4], 1 }
 0x283   :  { %633 = vsyncpa [#allocation7], 1 }
 0x284   :  { %634 = vsyncpa [#allocation5], 1 }

// kernel: bert_x_layer.16
= control target key start
LH: loop header
LB: loop body
LE: loop exit
PB: predicated region body
PF: predicated region fallthrough
CT: control target
= control target key end

     0   :  { %8 = vsyncpa [#allocation4], 0  ;;  %s462_s15 = smov [#allocation3]   ;;  %s463_s17 = smov 192   ;;  %s506_s0 = inlined_call_operand.vmem [shape: bf16[16,128], index: 0, kind: input, shape index: {}]   ;;  %s507_s1 = inlined_call_operand.hbm [shape: bf16[128,384], index: 1, kind: input, shape index: {}]   ;;  %s508_s2 = inlined_call_operand.vmem [shape: bf16[1,384], index: 2, kind: input, shape index: {}]   ;;  %s509_s3 = inlined_call_operand.vmem [shape: bf16[16,384], index: 3, kind: output, shape index: {}]  }
   0x1   :  { %s15_s14 = sshll.u32 %s507_s1, 4  ;;  %s17_s16 = sshll.u32 %s462_s15, 4  ;;  %s16_s14 = int_to_ptr.hbm [resolvable:$true] %s15_s14  ;;  %s18_s16 = int_to_ptr.vmem [resolvable:$true] %s17_s16 }
   0x2   :  { %s464_s18 = smov 12  }
   0x3   :  { %23 = dma.hbm_to_vmem [thread:$0]  %s16_s14, 3072, %s18_s16, [#allocation4], %s463_s17, %s463_s17, %s464_s18  }
   0x4   :  { %460 = dma.done.wait [#allocation4], 3072  }
   0x5   :  { %461 = vsyncadd [#allocation4], 4294964224  ;;  %v398_v0 = vld [vmem:[#allocation3 + $0xa8] sm:$0xf]  ;;  %v431_v1 = vld [vmem:[#allocation3 + $0xb0] sm:$0xf0] }
   0x6   :  { %v430_v2 = vld [vmem:[#allocation3 + $0xac] sm:$0xf]  ;;  %v399_v3 = vor.u32 %v431_v1, %v398_v0  ;;  %v400_v4 = vld [vmem:[#allocation3 + $0xb4] sm:$0xf0]  ;;  %v406_v5 = vld [vmem:[#allocation3 + $0xb0] sm:$0xf] }
   0x7   :  { %v432_v6 = vld [vmem:[#allocation3 + $0xb8] sm:$0xf0]  ;;  %v403_v7 = vor.u32 %v430_v2, %v400_v4  ;;  %v386_v9 = vld [vmem:[#allocation3 + $0x90] sm:$0xf]  ;;  %v427_v11 = vld [vmem:[#allocation3 + $0x94] sm:$0xf] }
   0x8   :  { %v407_v8 = vor.u32 %v432_v6, %v406_v5  ;;  %v428_v10 = vld [vmem:[#allocation3 + $0x98] sm:$0xf0]  ;;  %214 = vmatpush.bf16.msra.mxu0 %v399_v3  ;;  %v388_v13 = vld [vmem:[#allocation3 + $0x9c] sm:$0xf0]  ;;  %v394_v14 = vld [vmem:[#allocation3 + $0x98] sm:$0xf] }
   0x9   :  { %v387_v12 = vor.u32 %v428_v10, %v386_v9  ;;  %v429_v15 = vld [vmem:[#allocation3 + $0xa0] sm:$0xf0]  ;;  %228 = vmatpush.bf16.msra.mxu1 %v403_v7  ;;  %v391_v16 = vor.u32 %v427_v11, %v388_v13  ;;  %v374_v18 = vld [vmem:[#allocation3 + $0x78] sm:$0xf]  ;;  %v424_v20 = vld [vmem:[#allocation3 + $0x7c] sm:$0xf] }
   0xa   :  { %242 = vmatpush.bf16.msra.mxu2 %v407_v8  ;;  %v395_v17 = vor.u32 %v429_v15, %v394_v14  ;;  %v425_v19 = vld [vmem:[#allocation3 + $0x80] sm:$0xf0]  ;;  %v376_v21 = vld [vmem:[#allocation3 + $0x84] sm:$0xf0]  ;;  %v382_v22 = vld [vmem:[#allocation3 + $0x80] sm:$0xf] }
   0xb   :  { %v426_v23 = vld [vmem:[#allocation3 + $0x88] sm:$0xf0]  ;;  %v375_v24 = vor.u32 %v425_v19, %v374_v18  ;;  %v379_v25 = vor.u32 %v424_v20, %v376_v21  ;;  %v362_v27 = vld [vmem:[#allocation3 + $0x60] sm:$0xf]  ;;  %v421_v29 = vld [vmem:[#allocation3 + $0x64] sm:$0xf] }
   0xc   :  { %215 = vmatpush.bf16.msra.mxu0 %v387_v12  ;;  %v383_v26 = vor.u32 %v426_v23, %v382_v22  ;;  %v422_v28 = vld [vmem:[#allocation3 + $0x68] sm:$0xf0]  ;;  %v364_v30 = vld [vmem:[#allocation3 + $0x6c] sm:$0xf0]  ;;  %v370_v31 = vld [vmem:[#allocation3 + $0x68] sm:$0xf] }
   0xd   :  { %229 = vmatpush.bf16.msra.mxu1 %v391_v16  ;;  %v423_v32 = vld [vmem:[#allocation3 + $0x70] sm:$0xf0]  ;;  %v363_v33 = vor.u32 %v422_v28, %v362_v27  ;;  %v367_v34 = vor.u32 %v421_v29, %v364_v30  ;;  %v350_v36 = vld [vmem:[#allocation3 + $0x48] sm:$0xf]  ;;  %v418_v38 = vld [vmem:[#allocation3 + $0x4c] sm:$0xf] }
   0xe   :  { %243 = vmatpush.bf16.msra.mxu2 %v395_v17  ;;  %v371_v35 = vor.u32 %v423_v32, %v370_v31  ;;  %v419_v37 = vld [vmem:[#allocation3 + $0x50] sm:$0xf0]  ;;  %v352_v39 = vld [vmem:[#allocation3 + $0x54] sm:$0xf0]  ;;  %v358_v40 = vld [vmem:[#allocation3 + $0x50] sm:$0xf] }
   0xf   :  { %v420_v41 = vld [vmem:[#allocation3 + $0x58] sm:$0xf0]  ;;  %v351_v42 = vor.u32 %v419_v37, %v350_v36  ;;  %v355_v43 = vor.u32 %v418_v38, %v352_v39  ;;  %v338_v45 = vld [vmem:[#allocation3 + $0x30] sm:$0xf]  ;;  %v415_v47 = vld [vmem:[#allocation3 + $0x34] sm:$0xf] }
  0x10   :  { %216 = vmatpush.bf16.msra.mxu0 %v375_v24  ;;  %v359_v44 = vor.u32 %v420_v41, %v358_v40  ;;  %v416_v46 = vld [vmem:[#allocation3 + $0x38] sm:$0xf0]  ;;  %v340_v48 = vld [vmem:[#allocation3 + $0x3c] sm:$0xf0]  ;;  %v346_v49 = vld [vmem:[#allocation3 + $0x38] sm:$0xf] }
  0x11   :  { %230 = vmatpush.bf16.msra.mxu1 %v379_v25  ;;  %v417_v50 = vld [vmem:[#allocation3 + $0x40] sm:$0xf0]  ;;  %v339_v51 = vor.u32 %v416_v46, %v338_v45  ;;  %v343_v52 = vor.u32 %v415_v47, %v340_v48  ;;  %v326_v54 = vld [vmem:[#allocation3 + $0x18] sm:$0xf]  ;;  %v412_v56 = vld [vmem:[#allocation3 + $0x1c] sm:$0xf] }
  0x12   :  { %244 = vmatpush.bf16.msra.mxu2 %v383_v26  ;;  %v347_v53 = vor.u32 %v417_v50, %v346_v49  ;;  %v413_v55 = vld [vmem:[#allocation3 + $0x20] sm:$0xf0]  ;;  %v328_v57 = vld [vmem:[#allocation3 + $0x24] sm:$0xf0]  ;;  %v334_v58 = vld [vmem:[#allocation3 + $0x20] sm:$0xf] }
  0x13   :  { %v414_v59 = vld [vmem:[#allocation3 + $0x28] sm:$0xf0]  ;;  %v327_v60 = vor.u32 %v413_v55, %v326_v54  ;;  %v331_v61 = vor.u32 %v412_v56, %v328_v57  ;;  %v314_v63 = vld [vmem:[#allocation3] sm:$0xf]  ;;  %v409_v1 = vld [vmem:[#allocation3 + $0x4] sm:$0xf] }
  0x14   :  { %217 = vmatpush.bf16.msra.mxu0 %v363_v33  ;;  %v335_v62 = vor.u32 %v414_v59, %v334_v58  ;;  %v410_v0 = vld [vmem:[#allocation3 + $0x8] sm:$0xf0]  ;;  %v316_v2 = vld [vmem:[#allocation3 + $0xc] sm:$0xf0]  ;;  %v322_v3 = vld [vmem:[#allocation3 + $0x8] sm:$0xf] }
  0x15   :  { %231 = vmatpush.bf16.msra.mxu1 %v367_v34  ;;  %v411_v4 = vld [vmem:[#allocation3 + $0x10] sm:$0xf0]  ;;  %v315_v5 = vor.u32 %v410_v0, %v314_v63  ;;  %v319_v6 = vor.u32 %v409_v1, %v316_v2  ;;  %v408_v8 = vld [vmem:[%s506_s0] sm:$0xff] }
  0x16   :  { %245 = vmatpush.bf16.msra.mxu2 %v371_v35  ;;  %v323_v7 = vor.u32 %v411_v4, %v322_v3  ;;  %v277_v9 = vld [vmem:[%s508_s2] sm:$0x7] }
  0x17   :  { %v278_v10 = vunpack.c.l.bf16 %v277_v9 }
  0x18   :  { %218 = vmatpush.bf16.msra.mxu0 %v351_v42 }
  0x19   :  { %232 = vmatpush.bf16.msra.mxu1 %v355_v43  ;;  %v280_v11 = vperm.slane %v278_v10, 0  ;;  %v281_v12 = vperm.slane %v278_v10, 2  ;;  %v282_v16 = vperm.slane %v278_v10, 4 }
  0x1a   :  { %246 = vmatpush.bf16.msra.mxu2 %v359_v44 }
  0x1b   :  { %v286_v13 = vperm.slane %v280_v11, 0  ;;  %v287_v14 = vperm.slane %v281_v12, 0  ;;  %v288_v21 = vperm.slane %v282_v16, 0 }
  0x1c   :  { %219 = vmatpush.bf16.msra.mxu0 %v339_v51 }
  0x1d   :  { %233 = vmatpush.bf16.msra.mxu1 %v343_v52 }
  0x1e   :  { %247 = vmatpush.bf16.msra.mxu2 %v347_v53 }
  0x20   :  { %220 = vmatpush.bf16.msra.mxu0 %v327_v60 }
  0x21   :  { %234 = vmatpush.bf16.msra.mxu1 %v331_v61 }
  0x22   :  { %248 = vmatpush.bf16.msra.mxu2 %v335_v62 }
  0x24   :  { %221 = vmatpush.bf16.msra.mxu0 %v315_v5 }
  0x25   :  { %235 = vmatpush.bf16.msra.mxu1 %v319_v6 }
  0x26   :  { %249 = vmatpush.bf16.msra.mxu2 %v323_v7 }
  0x27   :  { %222 = vmatmul.bf16.vlgmr.msra.gmra.mxu0 %v408_v8 }
  0x28   :  { %236 = vmatmul.bf16.vlgmr.msra.gmra.mxu1 %v408_v8 }
  0x29   :  { %250 = vmatmul.bf16.vlgmr.msra.gmra.mxu2 %v408_v8 }
  0xa4   :  { %v223_v15 = vpop.f32.mrf.mxu0 }
  0xa5   :  { %v289_v17 = vadd.f32 %v286_v13, %v223_v15  ;;  %v237_v18 = vpop.f32.mrf.mxu1 }
  0xa6   :  { %v290_v19 = vadd.f32 %v287_v14, %v237_v18 }
  0xa8   :  { %v295_v20 = vpack.c.bf16 %v290_v19, %v289_v17 }
  0xaa   :  { %299 = vst [vmem:[%s509_s3] sm:$0xff] %v295_v20 }
  0xac   :  { %v251_v22 = vpop.f32.mrf.mxu2  ;;  %v225_v24 = vpop.f32.mrf.mxu0 }
  0xad   :  { %v291_v23 = vadd.f32 %v288_v21, %v251_v22  ;;  %v292_v25 = vadd.f32 %v286_v13, %v225_v24  ;;  %v239_v26 = vpop.f32.mrf.mxu1 }
  0xae   :  { %v293_v28 = vadd.f32 %v287_v14, %v239_v26 }
  0xaf   :  { %v296_v27 = vpack.c.bf16 %v291_v23, %v291_v23 }
  0xb0   :  { %v297_v29 = vpack.c.bf16 %v293_v28, %v292_v25 }
  0xb1   :  { %300 = vst [vmem:[%s509_s3 + $0x8] sm:$0xf] %v296_v27 }
  0xb2   :  { %301 = vst [vmem:[%s509_s3 + $0xc] sm:$0xff] %v297_v29 }
  0xb4   :  { %v253_v30 = vpop.f32.mrf.mxu2 }
  0xb5   :  { %v294_v31 = vadd.f32 %v288_v21, %v253_v30 }
  0xb7   :  { %v298_v32 = vpack.c.bf16 %v294_v31, %v294_v31 }
  0xb9   :  { %302 = vst [vmem:[%s509_s3 + $0x14] sm:$0xf] %v298_v32 }
  0xba   :  { %307 = vsyncpa [#allocation4], 1 }

// kernel: bert_x_layer.17
= control target key start
LH: loop header
LB: loop body
LE: loop exit
PB: predicated region body
PF: predicated region fallthrough
CT: control target
= control target key end

     0   :  { %vm110_vm0 = vcmask 261120   ;;  %vm159_vm1 = vcmask 64512   ;;  %s793_s22 = smov 96   ;;  %s795_s23 = smov 32   ;;  %vm187_vm2 = vcmask 1043456   ;;  %vm225_vm3 = vcmask 257024   ;;  %s957_s0 = inlined_call_operand.vmem [shape: bf16[2,8,384], index: 0, kind: input, shape index: {}, may-alias: {0,1}]   ;;  %s958_s1 = inlined_call_operand.vmem [shape: bf16[2,8,384], index: 1, kind: input, shape index: {}, may-alias: {0,1}]   ;;  %s959_s2 = inlined_call_operand.vmem [shape: f32[2,1,1,8], index: 2, kind: input, shape index: {}]   ;;  %s960_s3 = inlined_call_operand.vmem [shape: bf16[2,8,128], index: 3, kind: output, shape index: {}]  }
   0x1   :  { %v819_v0 = vld [vmem:[%s958_s1] sm:$0xff]  ;;  %v824_v1 = vld [vmem:[%s958_s1 + $0xc] sm:$0xff]  ;;  %v699_v2 = vld [vmem:[%s957_s0 + $0x8] sm:$0xf]  ;;  %vm378_vm4 = vcmask 519424   ;;  %vm531_vm5 = vcmask 781824  }
   0x2   :  { %89 = vst [vmem:[#allocation3] sm:$0xff] %v819_v0  ;;  %v700_v3 = vld [vmem:[%s957_s0 + $0x14] sm:$0xf]  ;;  %v841_v10 = vld [vmem:[%s959_s2] ss:$0 sm:$0xff]  ;;  %v723_v23 = vunpack.c.l.b16 %v819_v0  ;;  %v727_v37 = vunpack.c.l.b16 %v824_v1  ;;  %vm684_vm6 = vcmask 1044224  }
   0x3   :  { %91 = vst [vmem:[#allocation3 + $0x8] sm:$0xff] %v824_v1  ;;  %v847_v16 = vld [vmem:[%s959_s2 + $0x1] ss:$0 sm:$0xff]  ;;  %s794_s2 = smov 64  }
   0x4   :  { %28 = vst [vmem:[#allocation2] sm:$0xf] %v699_v2  ;;  %v241_v25 = vpack.c.b16 %v723_v23, %v723_v23  ;;  %v270_v38 = vpack.c.b16 %v727_v37, %v727_v37 }
   0x5   :  { %30 = vst [vmem:[#allocation2 + $0x4] sm:$0xf] %v700_v3  ;;  %v724_v3 = vunpack.c.h.b16 %v819_v0 }
   0x6   :  { %242 = vrot.lane.b32.xlu2 %v241_v25, %s793_s22 }
   0x9   :  { %v106_v4 = vld [vmem:[#allocation3] sm:$0xf]  ;;  %v108_v41 = vld [vmem:[#allocation3 + $0x4] sm:$0xf] }
   0xa   :  { %v115_v5 = vsel %vm110_vm0, %v106_v4, 0  ;;  %v107_v6 = vld [vmem:[#allocation3 + $0x8] sm:$0xf]  ;;  %v189_v42 = vsel %vm187_vm2, %v108_v41, 0  ;;  %v109_v44 = vld [vmem:[#allocation3 + $0xc] sm:$0xf] }
   0xb   :  { %124 = vmatpush.bf16.xpose.msra.mxu0 %v115_v5  ;;  %v134_v7 = vsel %vm110_vm0, %v107_v6, 0  ;;  %v104_v8 = vld [vmem:[#allocation2] sm:$0xf]  ;;  %198 = vmatpush.bf16.msra.mxu2 %v189_v42  ;;  %v208_v46 = vsel %vm187_vm2, %v109_v44, 0  ;;  %v880_v5 = vpack.c.b16 %v724_v3, %v724_v3 }
   0xc   :  { %143 = vmatpush.bf16.xpose.msra.mxu1 %v134_v7  ;;  %v105_v9 = vld [vmem:[#allocation2 + $0x4] sm:$0xf]  ;;  %217 = vmatpush.bf16.msra.mxu3 %v208_v46 }
   0xd   :  { %v718_v22 = vld [vmem:[#allocation2] sm:$0xff]  }
   0xe   :  { %v719_v24 = vunpack.c.l.b16 %v718_v22  ;;  %v720_v27 = vunpack.c.h.b16 %v718_v22  ;;  %271 = vrot.lane.b32.xlu2 %v270_v38, %s793_s22 }
  0x10   :  { %v236_v26 = vpack.c.b16 %v719_v24, %v719_v24  ;;  %v265_v29 = vpack.c.b16 %v720_v27, %v720_v27 }
  0x12   :  { %701 = vmatmul.msk.bf16.vlgmr.msra.gmra.mxu0 %vm110_vm0, %v104_v8 }
  0x13   :  { %702 = vmatmul.msk.bf16.vlgmr.msra.gmra.mxu1 %vm110_vm0, %v105_v9 }
  0x16   :  { %395 = vrot.lane.b32.xlu2 %v241_v25, %s794_s2 }
  0x1e   :  { %424 = vrot.lane.b32.xlu2 %v270_v38, %s794_s2 }
  0x26   :  { %390 = vrot.lane.b32.xlu2 %v236_v26, %s794_s2 }
  0x2e   :  { %548 = vrot.lane.b32.xlu2 %v241_v25, %s795_s23 }
  0x36   :  { %572 = vrot.lane.b32.xlu2 %v265_v29, %s795_s23 }
  0x3e   :  { %323 = vrot.lane.b32.xlu2 %v880_v5, %s793_s22 }
  0x60   :  { %v243_v43 = vpop.permute.xlu2 %242 }
  0x61   :  { %v248_v45 = vsel %vm110_vm0, %v243_v43, 0 }
  0x62   :  { %257 = vmatpush.bf16.xpose.msrb.mxu2 %v248_v45 }
  0x68   :  { %v272_v47 = vpop.permute.xlu2 %271 }
  0x69   :  { %v277_v48 = vsel %vm110_vm0, %v272_v47, 0 }
  0x6a   :  { %286 = vmatpush.bf16.xpose.msrb.mxu3 %v277_v48 }
  0x70   :  { %v396_v49 = vpop.permute.xlu2 %395 }
  0x71   :  { %v401_v56 = vsel %vm110_vm0, %v396_v49, 0 }
  0x78   :  { %v425_v51 = vpop.permute.xlu2 %424 }
  0x79   :  { %v430_v61 = vsel %vm110_vm0, %v425_v51, 0 }
  0x80   :  { %v391_v57 = vpop.permute.xlu2 %390 }
  0x88   :  { %v549_v62 = vpop.permute.xlu2 %548 }
  0x89   :  { %v554_v2 = vsel %vm110_vm0, %v549_v62, 0 }
  0x8f   :  { %v126_v11 = vpop.f32.mrf.mxu0 }
  0x90   :  { %v149_v12 = vmul.f32 0.17677669, %v126_v11  ;;  %v145_v13 = vpop.f32.mrf.mxu1  ;;  %v573_v0 = vpop.permute.xlu2 %572 }
  0x91   :  { %v150_v14 = vmul.f32 0.17677669, %v145_v13 }
  0x92   :  { %v157_v15 = vadd.f32 %v841_v10, %v149_v12 }
  0x93   :  { %v158_v18 = vadd.f32 %v847_v16, %v150_v14 }
  0x94   :  { %v160_v17 = vsel %vm159_vm1, %v157_v15, -inf }
  0x95   :  { %161 = vmax.xlane.f32.xlu0 %v160_v17  ;;  %v163_v21 = vsel %vm159_vm1, %v158_v18, -inf }
  0x97   :  { %v128_v19 = vpop.f32.mrf.mxu0 }
  0x98   :  { %v147_v20 = vpop.f32.mrf.mxu1 }
  0x9d   :  { %164 = vmax.xlane.f32.xlu0 %v163_v21 }
  0xb1   :  { %237 = vrot.lane.b32.xlu0 %v236_v26, %s793_s22 }
  0xb9   :  { %419 = vrot.lane.b32.xlu0 %v265_v29, %s794_s2 }
  0xc1   :  { %543 = vrot.lane.b32.xlu0 %v236_v26, %s795_s23 }
 0x108   :  { %v162_v28 = vpop.xlane.xlu0 %161 }
 0x109   :  { %v166_v30 = vsub.f32 %v157_v15, %v162_v28 }
 0x10b   :  { %v168_v31 = vmul.f32 1.442695, %v166_v30  ;;  %v324_v30 = vpop.permute.xlu2 %323 }
 0x10d   :  { %761 = vpow2.f32 %v168_v31  ;;  %v329_v31 = vsel %vm187_vm2, %v324_v30, 0 }
 0x10e   :  { %338 = vmatpush.bf16.msrb.mxu0 %v329_v31 }
 0x110   :  { %v165_v32 = vpop.xlane.xlu0 %164 }
 0x111   :  { %v167_v33 = vsub.f32 %v158_v18, %v165_v32 }
 0x113   :  { %v762_v34 = vpop.eup %761  ;;  %v170_v35 = vmul.f32 1.442695, %v167_v33 }
 0x114   :  { %v172_v36 = vsel %vm159_vm1, %v762_v34, 0.0 }
 0x115   :  { %763 = vpow2.f32 %v170_v35  ;;  %173 = vadd.xlane.f32.xlu1 %v172_v36 }
 0x11b   :  { %v764_v39 = vpop.eup %763 }
 0x11c   :  { %v175_v40 = vsel %vm159_vm1, %v764_v39, 0.0 }
 0x11d   :  { %176 = vadd.xlane.f32.xlu1 %v175_v40 }
 0x123   :  { %v238_v63 = vpop.permute.xlu0 %237 }
 0x12b   :  { %v420_v8 = vpop.permute.xlu0 %419 }
 0x133   :  { %v544_v9 = vpop.permute.xlu0 %543 }
 0x136   :  { %266 = vrot.lane.b32.xlu1 %v265_v29, %s793_s22 }
 0x13e   :  { %577 = vrot.lane.b32.xlu1 %v270_v38, %s795_s23 }
 0x188   :  { %v174_v50 = vpop.xlane.xlu1 %173 }
 0x189   :  { %765 = vrcp.f32 %v174_v50  ;;  %v740_v50 = vunpack.c.h.b16 %v824_v1 }
 0x18b   :  { %v499_v51 = vpack.c.b16 %v740_v50, %v740_v50 }
 0x18f   :  { %v766_v52 = vpop.eup %765 }
 0x190   :  { %v177_v53 = vpop.xlane.xlu1 %176  ;;  %v180_v54 = vmul.f32 %v766_v52, %v762_v34 }
 0x191   :  { %767 = vrcp.f32 %v177_v53 }
 0x192   :  { %v182_v55 = vpack.c.bf16 %v180_v54, %v180_v54 }
 0x194   :  { %703 = vmatmul.msk.bf16.vlgmr.msra.gmra.mxu2 %vm159_vm1, %v182_v55 }
 0x195   :  { %410 = vmatpush.bf16.xpose.msra.mxu2 %v401_v56 }
 0x197   :  { %v768_v58 = vpop.eup %767 }
 0x198   :  { %v181_v59 = vmul.f32 %v768_v58, %v764_v39 }
 0x19a   :  { %v183_v60 = vpack.c.bf16 %v181_v59, %v181_v59 }
 0x19c   :  { %704 = vmatmul.msk.bf16.vlgmr.msra.gmra.mxu3 %vm159_vm1, %v183_v60 }
 0x19d   :  { %439 = vmatpush.bf16.xpose.msra.mxu3 %v430_v61 }
 0x1a4   :  { %705 = vmatmul.msk.bf16.vlgmr.msrb.gmra.mxu2 %vm110_vm0, %v238_v63 }
 0x1a5   :  { %563 = vmatpush.bf16.xpose.msrb.mxu2 %v554_v2 }
 0x1a8   :  { %v267_v4 = vpop.permute.xlu1 %266 }
 0x1ac   :  { %706 = vmatmul.msk.bf16.vlgmr.msrb.gmra.mxu3 %vm110_vm0, %v267_v4 }
 0x1b0   :  { %v578_v6 = vpop.permute.xlu1 %577 }
 0x1b1   :  { %v583_v7 = vsel %vm110_vm0, %v578_v6, 0 }
 0x1b2   :  { %592 = vmatpush.bf16.xpose.msrb.mxu3 %v583_v7 }
 0x1b4   :  { %709 = vmatmul.msk.bf16.vlgmr.msra.gmra.mxu2 %vm110_vm0, %v391_v57 }
 0x1bc   :  { %710 = vmatmul.msk.bf16.vlgmr.msra.gmra.mxu3 %vm110_vm0, %v420_v8 }
 0x1c4   :  { %713 = vmatmul.msk.bf16.vlgmr.msrb.gmra.mxu2 %vm110_vm0, %v544_v9 }
 0x1cc   :  { %714 = vmatmul.msk.bf16.vlgmr.msrb.gmra.mxu3 %vm110_vm0, %v573_v0 }
 0x217   :  { %v200_v11 = vpop.f32.mrf.mxu2 }
 0x218   :  { %v223_v12 = vpack.c.bf16 %v200_v11, %v200_v11 }
 0x21a   :  { %226 = vst.msk [vmem:[%s960_s3] sm:$0xf] %vm225_vm3, %v223_v12 }
 0x21f   :  { %v202_v13 = vpop.f32.mrf.mxu2  ;;  %v219_v14 = vpop.f32.mrf.mxu3 }
 0x220   :  { %v224_v15 = vpack.c.bf16 %v219_v14, %v219_v14 }
 0x222   :  { %227 = vst.msk [vmem:[%s960_s3 + $0x4] sm:$0xf] %vm225_vm3, %v224_v15 }
 0x227   :  { %v221_v17 = vpop.f32.mrf.mxu3  ;;  %v259_v18 = vpop.f32.mrf.mxu2 }
 0x228   :  { %v292_v19 = vmul.f32 0.17677669, %v259_v18 }
 0x22a   :  { %v294_v20 = vadd.f32 %v841_v10, %v292_v19 }
 0x22c   :  { %v296_v21 = vsel %vm159_vm1, %v294_v20, -inf }
 0x22d   :  { %297 = vmax.xlane.f32.xlu1 %v296_v21 }
 0x22f   :  { %v261_v22 = vpop.f32.mrf.mxu2  ;;  %v288_v23 = vpop.f32.mrf.mxu3 }
 0x230   :  { %v293_v24 = vmul.f32 0.17677669, %v288_v23 }
 0x232   :  { %v295_v25 = vadd.f32 %v847_v16, %v293_v24 }
 0x234   :  { %v299_v26 = vsel %vm159_vm1, %v295_v25, -inf }
 0x235   :  { %300 = vmax.xlane.f32.xlu0 %v299_v26 }
 0x237   :  { %v290_v27 = vpop.f32.mrf.mxu3  ;;  %v412_v28 = vpop.f32.mrf.mxu2 }
 0x238   :  { %v445_v29 = vmul.f32 0.17677669, %v412_v28 }
 0x23a   :  { %v447_v32 = vadd.f32 %v841_v10, %v445_v29 }
 0x23c   :  { %v449_v33 = vsel %vm159_vm1, %v447_v32, -inf }
 0x23d   :  { %450 = vmax.xlane.f32.xlu2 %v449_v33 }
 0x23f   :  { %v414_v34 = vpop.f32.mrf.mxu2  ;;  %v441_v35 = vpop.f32.mrf.mxu3 }
 0x240   :  { %v446_v36 = vmul.f32 0.17677669, %v441_v35 }
 0x242   :  { %v448_v37 = vadd.f32 %v847_v16, %v446_v36 }
 0x244   :  { %v452_v38 = vsel %vm159_vm1, %v448_v37, -inf }
 0x245   :  { %453 = vmax.xlane.f32.xlu1 %v452_v38 }
 0x247   :  { %v443_v39 = vpop.f32.mrf.mxu3  ;;  %v565_v40 = vpop.f32.mrf.mxu2 }
 0x248   :  { %v598_v41 = vmul.f32 0.17677669, %v565_v40 }
 0x24a   :  { %v600_v42 = vadd.f32 %v841_v10, %v598_v41 }
 0x24c   :  { %v602_v43 = vsel %vm159_vm1, %v600_v42, -inf }
 0x24d   :  { %603 = vmax.xlane.f32.xlu0 %v602_v43 }
 0x24f   :  { %v594_v44 = vpop.f32.mrf.mxu3  ;;  %v567_v45 = vpop.f32.mrf.mxu2 }
 0x250   :  { %v599_v46 = vmul.f32 0.17677669, %v594_v44 }
 0x252   :  { %v601_v47 = vadd.f32 %v847_v16, %v599_v46 }
 0x254   :  { %v605_v48 = vsel %vm159_vm1, %v601_v47, -inf }
 0x255   :  { %606 = vmax.xlane.f32.xlu2 %v605_v48 }
 0x257   :  { %v596_v49 = vpop.f32.mrf.mxu3 }
 0x261   :  { %476 = vrot.lane.b32.xlu0 %v880_v5, %s794_s2 }
 0x26d   :  { %500 = vrot.lane.b32.xlu2 %v499_v51, %s794_s2 }
 0x2a0   :  { %v298_v10 = vpop.xlane.xlu1 %297 }
 0x2a1   :  { %v302_v52 = vsub.f32 %v294_v20, %v298_v10 }
 0x2a3   :  { %v304_v53 = vmul.f32 1.442695, %v302_v52 }
 0x2a5   :  { %769 = vpow2.f32 %v304_v53 }
 0x2a8   :  { %v301_v54 = vpop.xlane.xlu0 %300 }
 0x2a9   :  { %v303_v55 = vsub.f32 %v295_v25, %v301_v54 }
 0x2ab   :  { %v770_v56 = vpop.eup %769  ;;  %v306_v16 = vmul.f32 1.442695, %v303_v55 }
 0x2ac   :  { %v308_v57 = vsel %vm159_vm1, %v770_v56, 0.0 }
 0x2ad   :  { %771 = vpow2.f32 %v306_v16  ;;  %309 = vadd.xlane.f32.xlu1 %v308_v57 }
 0x2b0   :  { %v451_v58 = vpop.xlane.xlu2 %450 }
 0x2b1   :  { %v455_v59 = vsub.f32 %v447_v32, %v451_v58 }
 0x2b3   :  { %v772_v60 = vpop.eup %771  ;;  %v457_v61 = vmul.f32 1.442695, %v455_v59 }
 0x2b4   :  { %v311_v1 = vsel %vm159_vm1, %v772_v60, 0.0 }
 0x2b5   :  { %773 = vpow2.f32 %v457_v61  ;;  %312 = vadd.xlane.f32.xlu0 %v311_v1 }
 0x2b8   :  { %v454_v62 = vpop.xlane.xlu1 %453 }
 0x2b9   :  { %v456_v63 = vsub.f32 %v448_v37, %v454_v62 }
 0x2bb   :  { %v774_v2 = vpop.eup %773  ;;  %v459_v3 = vmul.f32 1.442695, %v456_v63 }
 0x2bc   :  { %v461_v4 = vsel %vm159_vm1, %v774_v2, 0.0 }
 0x2bd   :  { %775 = vpow2.f32 %v459_v3  ;;  %462 = vadd.xlane.f32.xlu0 %v461_v4 }
 0x2c0   :  { %v604_v0 = vpop.xlane.xlu0 %603 }
 0x2c1   :  { %v608_v17 = vsub.f32 %v600_v42, %v604_v0 }
 0x2c3   :  { %v776_v6 = vpop.eup %775  ;;  %v610_v18 = vmul.f32 1.442695, %v608_v17 }
 0x2c4   :  { %v464_v7 = vsel %vm159_vm1, %v776_v6, 0.0 }
 0x2c5   :  { %465 = vadd.xlane.f32.xlu0 %v464_v7 }
 0x2c6   :  { %347 = vrot.lane.b32.xlu1 %v499_v51, %s793_s22 }
 0x2c8   :  { %v607_v8 = vpop.xlane.xlu2 %606 }
 0x2c9   :  { %v609_v9 = vsub.f32 %v601_v47, %v607_v8 }
 0x2cb   :  { %v612_v11 = vmul.f32 1.442695, %v609_v9 }
 0x2cd   :  { %777 = vpow2.f32 %v612_v11 }
 0x2ce   :  { %779 = vpow2.f32 %v610_v18 }
 0x2d0   :  { %v501_v28 = vpop.permute.xlu2 %500 }
 0x2d1   :  { %v506_v33 = vsel %vm187_vm2, %v501_v28, 0 }
 0x2d3   :  { %v778_v12 = vpop.eup %777  ;;  %v477_v13 = vpop.permute.xlu0 %476 }
 0x2d4   :  { %v617_v14 = vsel %vm159_vm1, %v778_v12, 0.0  ;;  %v482_v15 = vsel %vm187_vm2, %v477_v13, 0  ;;  %v780_v19 = vpop.eup %779 }
 0x2d5   :  { %618 = vadd.xlane.f32.xlu2 %v617_v14  ;;  %491 = vmatpush.bf16.msra.mxu0 %v482_v15  ;;  %v614_v20 = vsel %vm159_vm1, %v780_v19, 0.0 }
 0x2d9   :  { %629 = vrot.lane.b32.xlu0 %v880_v5, %s795_s23 }
 0x2e1   :  { %653 = vrot.lane.b32.xlu0 %v499_v51, %s795_s23 }
 0x2f0   :  { %615 = vadd.xlane.f32.xlu1 %v614_v20 }
 0x320   :  { %v310_v21 = vpop.xlane.xlu1 %309 }
 0x321   :  { %781 = vrcp.f32 %v310_v21 }
 0x327   :  { %v782_v22 = vpop.eup %781 }
 0x328   :  { %v316_v23 = vmul.f32 %v782_v22, %v770_v56  ;;  %v313_v24 = vpop.xlane.xlu0 %312 }
 0x329   :  { %783 = vrcp.f32 %v313_v24 }
 0x32a   :  { %v318_v25 = vpack.c.bf16 %v316_v23, %v316_v23 }
 0x32c   :  { %707 = vmatmul.msk.bf16.vlgmr.msrb.gmra.mxu0 %vm159_vm1, %v318_v25 }
 0x32f   :  { %v784_v5 = vpop.eup %783 }
 0x330   :  { %v463_v26 = vpop.xlane.xlu0 %462  ;;  %v317_v29 = vmul.f32 %v784_v5, %v772_v60 }
 0x331   :  { %785 = vrcp.f32 %v463_v26 }
 0x332   :  { %v319_v36 = vpack.c.bf16 %v317_v29, %v317_v29 }
 0x337   :  { %v786_v27 = vpop.eup %785 }
 0x338   :  { %v469_v30 = vmul.f32 %v786_v27, %v774_v2  ;;  %v348_v31 = vpop.permute.xlu1 %347  ;;  %v466_v35 = vpop.xlane.xlu0 %465 }
 0x339   :  { %v353_v32 = vsel %vm187_vm2, %v348_v31, 0  ;;  %787 = vrcp.f32 %v466_v35 }
 0x33a   :  { %v471_v34 = vpack.c.bf16 %v469_v30, %v469_v30  ;;  %362 = vmatpush.bf16.msrb.mxu1 %v353_v32 }
 0x33c   :  { %711 = vmatmul.msk.bf16.vlgmr.msra.gmra.mxu0 %vm159_vm1, %v471_v34 }
 0x33d   :  { %708 = vmatmul.msk.bf16.vlgmr.msrb.gmra.mxu1 %vm159_vm1, %v319_v36 }
 0x33e   :  { %515 = vmatpush.bf16.msra.mxu1 %v506_v33 }
 0x33f   :  { %v788_v37 = vpop.eup %787 }
 0x340   :  { %v470_v38 = vmul.f32 %v788_v37, %v776_v6 }
 0x342   :  { %v472_v39 = vpack.c.bf16 %v470_v38, %v470_v38 }
 0x348   :  { %v619_v40 = vpop.xlane.xlu2 %618 }
 0x349   :  { %789 = vrcp.f32 %v619_v40 }
 0x34b   :  { %v630_v41 = vpop.permute.xlu0 %629 }
 0x34c   :  { %v635_v42 = vsel %vm187_vm2, %v630_v41, 0 }
 0x34d   :  { %712 = vmatmul.msk.bf16.vlgmr.msra.gmra.mxu1 %vm159_vm1, %v472_v39  ;;  %644 = vmatpush.bf16.msrb.mxu0 %v635_v42 }
 0x34f   :  { %v790_v44 = vpop.eup %789 }
 0x350   :  { %v623_v46 = vmul.f32 %v790_v44, %v778_v12 }
 0x352   :  { %v625_v47 = vpack.c.bf16 %v623_v46, %v623_v46 }
 0x353   :  { %v654_v43 = vpop.permute.xlu0 %653 }
 0x354   :  { %v659_v45 = vsel %vm187_vm2, %v654_v43, 0 }
 0x355   :  { %668 = vmatpush.bf16.msrb.mxu1 %v659_v45 }
 0x35d   :  { %716 = vmatmul.msk.bf16.vlgmr.msrb.gmra.mxu1 %vm159_vm1, %v625_v47 }
 0x363   :  { %v616_v48 = vpop.xlane.xlu1 %615 }
 0x364   :  { %791 = vrcp.f32 %v616_v48 }
 0x36a   :  { %v792_v49 = vpop.eup %791 }
 0x36b   :  { %v622_v50 = vmul.f32 %v792_v49, %v780_v19 }
 0x36d   :  { %v624_v51 = vpack.c.bf16 %v622_v50, %v622_v50 }
 0x36f   :  { %715 = vmatmul.msk.bf16.vlgmr.msrb.gmra.mxu0 %vm159_vm1, %v624_v51 }
 0x3a9   :  { %v340_v10 = vpop.f32.mrf.mxu0 }
 0x3aa   :  { %v368_v52 = vpack.c.bf16 %v340_v10, %v340_v10 }
 0x3ac   :  { %372 = vrot.lane.b32.xlu0 %v368_v52, %s795_s23 }
 0x3b1   :  { %v342_v53 = vpop.f32.mrf.mxu0 }
 0x3b9   :  { %v493_v54 = vpop.f32.mrf.mxu0 }
 0x3ba   :  { %v521_v55 = vpack.c.bf16 %v493_v54, %v493_v54  ;;  %v364_v56 = vpop.f32.mrf.mxu1 }
 0x3bb   :  { %v369_v16 = vpack.c.bf16 %v364_v56, %v364_v56 }
 0x3bc   :  { %525 = vrot.lane.b32.xlu1 %v521_v55, %s794_s2 }
 0x3bd   :  { %374 = vrot.lane.b32.xlu0 %v369_v16, %s795_s23 }
 0x3c1   :  { %v495_v57 = vpop.f32.mrf.mxu0 }
 0x3c2   :  { %v366_v58 = vpop.f32.mrf.mxu1 }
 0x3ca   :  { %v517_v59 = vpop.f32.mrf.mxu1 }
 0x3cb   :  { %v522_v60 = vpack.c.bf16 %v517_v59, %v517_v59 }
 0x3cd   :  { %527 = vrot.lane.b32.xlu0 %v522_v60, %s794_s2 }
 0x3d2   :  { %v519_v61 = vpop.f32.mrf.mxu1 }
 0x3da   :  { %v670_v1 = vpop.f32.mrf.mxu1 }
 0x3db   :  { %v675_v62 = vpack.c.bf16 %v670_v1, %v670_v1 }
 0x3dd   :  { %680 = vrot.lane.b32.xlu0 %v675_v62, %s793_s22 }
 0x3e2   :  { %v672_v63 = vpop.f32.mrf.mxu1 }
 0x3ec   :  { %v646_v2 = vpop.f32.mrf.mxu0 }
 0x3ed   :  { %v674_v3 = vpack.c.bf16 %v646_v2, %v646_v2 }
 0x3ef   :  { %678 = vrot.lane.b32.xlu2 %v674_v3, %s793_s22 }
 0x3f4   :  { %v648_v4 = vpop.f32.mrf.mxu0 }
 0x41e   :  { %v373_v6 = vpop.permute.xlu0 %372 }
 0x41f   :  { %379 = vst.msk [vmem:[%s960_s3] sm:$0xf] %vm378_vm4, %v373_v6 }
 0x42e   :  { %v526_v7 = vpop.permute.xlu1 %525 }
 0x42f   :  { %532 = vst.msk [vmem:[%s960_s3] sm:$0xf] %vm531_vm5, %v526_v7  ;;  %v375_v8 = vpop.permute.xlu0 %374 }
 0x430   :  { %380 = vst.msk [vmem:[%s960_s3 + $0x4] sm:$0xf] %vm378_vm4, %v375_v8 }
 0x43f   :  { %v528_v9 = vpop.permute.xlu0 %527 }
 0x440   :  { %533 = vst.msk [vmem:[%s960_s3 + $0x4] sm:$0xf] %vm531_vm5, %v528_v9 }
 0x449   :  { %v679_v0 = vpop.permute.xlu2 %678 }
 0x44a   :  { %685 = vst.msk [vmem:[%s960_s3] sm:$0xf] %vm684_vm6, %v679_v0 }
 0x44f   :  { %v681_v11 = vpop.permute.xlu0 %680 }
 0x450   :  { %686 = vst.msk [vmem:[%s960_s3 + $0x4] sm:$0xf] %vm684_vm6, %v681_v11 }

// kernel: bert_x_layer.18
= control target key start
LH: loop header
LB: loop body
LE: loop exit
PB: predicated region body
PF: predicated region fallthrough
CT: control target
= control target key end

     0   :  { %11 = vsyncpa [#allocation4], 0  ;;  %s309_s24 = smov [#allocation3]   ;;  %s310_s26 = smov 64   ;;  %s369_s0 = inlined_call_operand.vmem [shape: bf16[16,128], index: 0, kind: input, shape index: {}]   ;;  %s370_s1 = inlined_call_operand.hbm [shape: bf16[128,128], index: 1, kind: input, shape index: {}]   ;;  %s371_s2 = inlined_call_operand.vmem [shape: bf16[1,128], index: 2, kind: input, shape index: {}]   ;;  %s372_s3 = inlined_call_operand.vmem [shape: bf16[16,128], index: 3, kind: input, shape index: {}]   ;;  %s373_s4 = inlined_call_operand.vmem [shape: bf16[1,128], index: 4, kind: input, shape index: {}]   ;;  %s374_s5 = inlined_call_operand.vmem [shape: bf16[1,128], index: 5, kind: input, shape index: {}]   ;;  %s375_s6 = inlined_call_operand.vmem [shape: bf16[16,128], index: 6, kind: output, shape index: {}]  }
   0x1   :  { %s18_s23 = sshll.u32 %s370_s1, 4  ;;  %s20_s25 = sshll.u32 %s309_s24, 4  ;;  %s19_s23 = int_to_ptr.hbm [resolvable:$true] %s18_s23  ;;  %s21_s25 = int_to_ptr.vmem [resolvable:$true] %s20_s25 }
   0x2   :  { %s311_s27 = smov 4  }
   0x3   :  { %26 = dma.hbm_to_vmem [thread:$0]  %s19_s23, 1024, %s21_s25, [#allocation4], %s310_s26, %s310_s26, %s311_s27  }
   0x4   :  { %307 = dma.done.wait [#allocation4], 1024  }
   0x5   :  { %308 = vsyncadd [#allocation4], 4294966272  ;;  %v263_v0 = vld [vmem:[#allocation3 + $0x38] sm:$0xff]  ;;  %v262_v1 = vld [vmem:[#allocation3 + $0x30] sm:$0xff]  ;;  %v312_v21 = vmov 128.0  }
   0x6   :  { %119 = vmatpush.bf16.msra.mxu0 %v263_v0  ;;  %v261_v2 = vld [vmem:[#allocation3 + $0x28] sm:$0xff]  ;;  %v260_v3 = vld [vmem:[#allocation3 + $0x20] sm:$0xff]  ;;  %v259_v4 = vld [vmem:[#allocation3 + $0x18] sm:$0xff]  ;;  %277 = vrcp.f32 %v312_v21 }
   0x7   :  { %v258_v5 = vld [vmem:[#allocation3 + $0x10] sm:$0xff]  ;;  %v257_v6 = vld [vmem:[#allocation3 + $0x8] sm:$0xff]  ;;  %v256_v7 = vld [vmem:[#allocation3] sm:$0xff] }
   0x8   :  { %v255_v8 = vld [vmem:[%s369_s0] sm:$0xff] }
   0x9   :  { %v142_v9 = vld [vmem:[%s371_s2] sm:$0x1] }
   0xa   :  { %120 = vmatpush.bf16.msra.mxu0 %v262_v1  ;;  %v143_v10 = vunpack.c.l.bf16 %v142_v9  ;;  %v265_v11 = vld [vmem:[%s372_s3] sm:$0xff]  }
   0xb   :  { %v266_v13 = vunpack.c.l.bf16 %v265_v11  ;;  %v267_v17 = vunpack.c.h.bf16 %v265_v11  ;;  %v200_v48 = vld [vmem:[%s373_s4] sm:$0x1] }
   0xc   :  { %v144_v12 = vperm.slane %v143_v10, 0  ;;  %v278_v22 = vpop.eup %277  ;;  %v201_v52 = vunpack.c.l.bf16 %v200_v48  ;;  %v205_v53 = vld [vmem:[%s374_s5] sm:$0x1] }
   0xd   :  { %v158_v23 = vmul.f32 128.0, %v278_v22  ;;  %vm162_vm0 = vweird.f32 %v278_v22  ;;  %v206_v58 = vunpack.c.l.bf16 %v205_v53 }
   0xe   :  { %121 = vmatpush.bf16.msra.mxu0 %v261_v2  ;;  %v202_v57 = vperm.slane %v201_v52, 0 }
   0xf   :  { %v159_v24 = vsub.f32 1.0, %v158_v23  ;;  %v207_v62 = vperm.slane %v206_v58, 0 }
  0x11   :  { %v160_v25 = vmul.f32 %v278_v22, %v159_v24 }
  0x12   :  { %122 = vmatpush.bf16.msra.mxu0 %v260_v3 }
  0x13   :  { %v161_v26 = vadd.f32 %v278_v22, %v160_v25 }
  0x15   :  { %v163_v27 = vsel %vm162_vm0, %v278_v22, %v161_v26 }
  0x16   :  { %123 = vmatpush.bf16.msra.mxu0 %v259_v4 }
  0x1a   :  { %124 = vmatpush.bf16.msra.mxu0 %v258_v5 }
  0x1e   :  { %125 = vmatpush.bf16.msra.mxu0 %v257_v6 }
  0x22   :  { %126 = vmatpush.bf16.msra.mxu0 %v256_v7 }
  0x25   :  { %127 = vmatmul.bf16.vlgmr.msra.gmra.mxu0 %v255_v8 }
  0xa2   :  { %v128_v14 = vpop.f32.mrf.mxu0 }
  0xa3   :  { %v145_v15 = vadd.f32 %v144_v12, %v128_v14 }
  0xa5   :  { %v151_v16 = vadd.f32 %v266_v13, %v145_v15 }
  0xa7   :  { %153 = vadd.xlane.f32.xlu0 %v151_v16 }
  0xaa   :  { %v130_v18 = vpop.f32.mrf.mxu0 }
  0xab   :  { %v146_v19 = vadd.f32 %v144_v12, %v130_v18 }
  0xad   :  { %v152_v20 = vadd.f32 %v267_v17, %v146_v19 }
  0xaf   :  { %155 = vadd.xlane.f32.xlu0 %v152_v20 }
 0x11a   :  { %v154_v28 = vpop.xlane.xlu0 %153 }
 0x11b   :  { %v164_v29 = vmul.f32 %v163_v27, %v154_v28 }
 0x11d   :  { %v166_v30 = vsub.f32 %v151_v16, %v164_v29 }
 0x11f   :  { %v168_v31 = vmul.f32 %v166_v30, %v166_v30 }
 0x121   :  { %170 = vadd.xlane.f32.xlu1 %v168_v31 }
 0x122   :  { %v156_v32 = vpop.xlane.xlu0 %155 }
 0x123   :  { %v165_v33 = vmul.f32 %v163_v27, %v156_v32 }
 0x125   :  { %v167_v34 = vsub.f32 %v152_v20, %v165_v33 }
 0x127   :  { %v169_v35 = vmul.f32 %v167_v34, %v167_v34 }
 0x129   :  { %172 = vadd.xlane.f32.xlu1 %v169_v35 }
 0x194   :  { %v171_v36 = vpop.xlane.xlu1 %170 }
 0x195   :  { %v174_v37 = vmul.f32 %v171_v36, %v163_v27 }
 0x197   :  { %v176_v38 = vadd.f32 1e-12, %v174_v37 }
 0x199   :  { %279 = vrsqrt.f32 %v176_v38  ;;  %vm184_vm2 = vweird.f32 %v176_v38 }
 0x19c   :  { %v173_v39 = vpop.xlane.xlu1 %172 }
 0x19d   :  { %v175_v40 = vmul.f32 %v173_v39, %v163_v27 }
 0x19f   :  { %v280_v41 = vpop.eup %279  ;;  %v177_v42 = vadd.f32 1e-12, %v175_v40 }
 0x1a0   :  { %v179_v43 = vmul.f32 %v280_v41, %v176_v38  ;;  %vm185_vm1 = vweird.f32 %v280_v41 }
 0x1a1   :  { %281 = vrsqrt.f32 %v177_v42  ;;  %vm186_vm3 = vmor %vm184_vm2, %vm185_vm1  ;;  %vm194_vm5 = vweird.f32 %v177_v42 }
 0x1a2   :  { %v180_v44 = vmul.f32 %v280_v41, %v179_v43 }
 0x1a4   :  { %v181_v45 = vmul.f32 0.5, %v180_v44 }
 0x1a6   :  { %v182_v46 = vsub.f32 1.5, %v181_v45 }
 0x1a7   :  { %v282_v47 = vpop.eup %281 }
 0x1a8   :  { %v183_v49 = vmul.f32 %v280_v41, %v182_v46  ;;  %v189_v50 = vmul.f32 %v282_v47, %v177_v42  ;;  %vm195_vm4 = vweird.f32 %v282_v47 }
 0x1a9   :  { %vm196_vm6 = vmor %vm194_vm5, %vm195_vm4 }
 0x1aa   :  { %v190_v51 = vmul.f32 %v282_v47, %v189_v50  ;;  %v187_v54 = vsel %vm186_vm3, %v280_v41, %v183_v49 }
 0x1ab   :  { %v198_v59 = vmul.f32 %v187_v54, %v166_v30 }
 0x1ac   :  { %v191_v55 = vmul.f32 0.5, %v190_v51 }
 0x1ad   :  { %v203_v63 = vmul.f32 %v202_v57, %v198_v59 }
 0x1ae   :  { %v192_v56 = vsub.f32 1.5, %v191_v55 }
 0x1af   :  { %v208_v2 = vadd.f32 %v207_v62, %v203_v63 }
 0x1b0   :  { %v193_v60 = vmul.f32 %v282_v47, %v192_v56 }
 0x1b2   :  { %v197_v61 = vsel %vm196_vm6, %v282_v47, %v193_v60 }
 0x1b3   :  { %v199_v0 = vmul.f32 %v197_v61, %v167_v34 }
 0x1b5   :  { %v204_v1 = vmul.f32 %v202_v57, %v199_v0 }
 0x1b7   :  { %v209_v3 = vadd.f32 %v207_v62, %v204_v1 }
 0x1b9   :  { %v271_v4 = vpack.c.bf16 %v209_v3, %v208_v2 }
 0x1bb   :  { %272 = vst [vmem:[%s375_s6] sm:$0xff] %v271_v4  }
 0x1bc   :  { %218 = vsyncpa [#allocation4], 1 }

// kernel: bert_x_layer.22
= control target key start
LH: loop header
LB: loop body
LE: loop exit
PB: predicated region body
PF: predicated region fallthrough
CT: control target
= control target key end

     0   :  { %12 = vsyncpa [#allocation4], 0  ;;  %s858_s0 = inlined_call_operand.vmem [shape: bf16[16,128], index: 0, kind: input, shape index: {}]   ;;  %s859_s1 = inlined_call_operand.hbm [shape: bf16[128,256], index: 1, kind: input, shape index: {}]   ;;  %s860_s2 = inlined_call_operand.vmem [shape: bf16[1,256], index: 2, kind: input, shape index: {}]   ;;  %s861_s3 = inlined_call_operand.hbm [shape: bf16[256,128], index: 3, kind: input, shape index: {}]   ;;  %s862_s4 = inlined_call_operand.vmem [shape: bf16[1,128], index: 4, kind: input, shape index: {}]   ;;  %s863_s5 = inlined_call_operand.vmem [shape: bf16[1,128], index: 5, kind: input, shape index: {}]   ;;  %s864_s6 = inlined_call_operand.vmem [shape: bf16[1,128], index: 6, kind: input, shape index: {}]   ;;  %s865_s7 = inlined_call_operand.hbm [shape: bf16[16,128], index: 7, kind: output, shape index: {}]  }
   0x1   :  { %13 = vsyncpa [#allocation7], 0 }
   0x2   :  { %14 = vsyncpa [#allocation5], 0  ;;  %s21_s26 = sshll.u32 %s859_s1, 4  ;;  %s777_s27 = smov [#allocation3]   ;;  %s22_s26 = int_to_ptr.hbm [resolvable:$true] %s21_s26 }
   0x3   :  { %s23_s28 = sshll.u32 %s777_s27, 4  ;;  %s36_s8 = sshll.u32 %s861_s3, 4  ;;  %s24_s28 = int_to_ptr.vmem [resolvable:$true] %s23_s28  ;;  %s37_s8 = int_to_ptr.hbm [resolvable:$true] %s36_s8 }
   0x4   :  { %s778_s9 = smov 128   ;;  %s779_s10 = smov 8  }
   0x5   :  { %29 = dma.hbm_to_vmem [thread:$0]  %s22_s26, 2048, %s24_s28, [#allocation4], %s778_s9, %s778_s9, %s779_s10  }
   0x6   :  { %s780_s11 = smov [#allocation6]   ;;  %s781_s13 = smov 64  }
   0x7   :  { %s38_s12 = sshll.u32 %s780_s11, 4  ;;  %s782_s14 = smov 4   ;;  %s39_s12 = int_to_ptr.vmem [resolvable:$true] %s38_s12 }
   0x8   :  { %44 = dma.hbm_to_vmem [thread:$0]  %s37_s8, 2048, %s39_s12, [#allocation7], %s781_s13, %s781_s13, %s782_s14  }
   0x9   :  { %771 = dma.done.wait [#allocation4], 2048  }
   0xa   :  { %772 = vsyncadd [#allocation4], 4294965248 }
   0xb   :  { %773 = dma.done.wait [#allocation7], 2048  }
   0xc   :  { %774 = vsyncadd [#allocation7], 4294965248  ;;  %v565_v0 = vld [vmem:[#allocation3 + $0x70] sm:$0xf]  ;;  %v651_v1 = vld [vmem:[#allocation3 + $0x74] sm:$0xf0] }
   0xd   :  { %v650_v2 = vld [vmem:[#allocation3 + $0x74] sm:$0xf]  ;;  %v566_v3 = vor.u32 %v651_v1, %v565_v0  ;;  %v567_v4 = vld [vmem:[#allocation3 + $0x78] sm:$0xf0]  ;;  %v557_v5 = vld [vmem:[#allocation3 + $0x60] sm:$0xf] }
   0xe   :  { %v649_v6 = vld [vmem:[#allocation3 + $0x64] sm:$0xf0]  ;;  %v570_v7 = vor.u32 %v650_v2, %v567_v4  ;;  %v648_v8 = vld [vmem:[#allocation3 + $0x64] sm:$0xf]  ;;  %v559_v9 = vld [vmem:[#allocation3 + $0x68] sm:$0xf0] }
   0xf   :  { %178 = vmatpush.bf16.msra.mxu0 %v566_v3  ;;  %v558_v10 = vor.u32 %v649_v6, %v557_v5  ;;  %v562_v11 = vor.u32 %v648_v8, %v559_v9  ;;  %v549_v12 = vld [vmem:[#allocation3 + $0x50] sm:$0xf]  ;;  %v647_v13 = vld [vmem:[#allocation3 + $0x54] sm:$0xf0]  ;;  %v646_v14 = vld [vmem:[#allocation3 + $0x54] sm:$0xf] }
  0x10   :  { %192 = vmatpush.bf16.msra.mxu1 %v570_v7  ;;  %v551_v15 = vld [vmem:[#allocation3 + $0x58] sm:$0xf0]  ;;  %v550_v16 = vor.u32 %v647_v13, %v549_v12  ;;  %v541_v18 = vld [vmem:[#allocation3 + $0x40] sm:$0xf]  ;;  %v645_v19 = vld [vmem:[#allocation3 + $0x44] sm:$0xf0] }
  0x11   :  { %v554_v17 = vor.u32 %v646_v14, %v551_v15  ;;  %v644_v20 = vld [vmem:[#allocation3 + $0x44] sm:$0xf]  ;;  %v543_v21 = vld [vmem:[#allocation3 + $0x48] sm:$0xf0]  ;;  %v542_v22 = vor.u32 %v645_v19, %v541_v18  ;;  %v533_v24 = vld [vmem:[#allocation3 + $0x30] sm:$0xf] }
  0x12   :  { %v546_v23 = vor.u32 %v644_v20, %v543_v21  ;;  %v643_v25 = vld [vmem:[#allocation3 + $0x34] sm:$0xf0]  ;;  %v642_v26 = vld [vmem:[#allocation3 + $0x34] sm:$0xf]  ;;  %v535_v27 = vld [vmem:[#allocation3 + $0x38] sm:$0xf0] }
  0x13   :  { %179 = vmatpush.bf16.msra.mxu0 %v558_v10  ;;  %v534_v28 = vor.u32 %v643_v25, %v533_v24  ;;  %v538_v29 = vor.u32 %v642_v26, %v535_v27  ;;  %v525_v30 = vld [vmem:[#allocation3 + $0x20] sm:$0xf]  ;;  %v641_v31 = vld [vmem:[#allocation3 + $0x24] sm:$0xf0]  ;;  %v640_v32 = vld [vmem:[#allocation3 + $0x24] sm:$0xf] }
  0x14   :  { %193 = vmatpush.bf16.msra.mxu1 %v562_v11  ;;  %v527_v33 = vld [vmem:[#allocation3 + $0x28] sm:$0xf0]  ;;  %v526_v34 = vor.u32 %v641_v31, %v525_v30  ;;  %v517_v36 = vld [vmem:[#allocation3 + $0x10] sm:$0xf]  ;;  %v639_v37 = vld [vmem:[#allocation3 + $0x14] sm:$0xf0] }
  0x15   :  { %v530_v35 = vor.u32 %v640_v32, %v527_v33  ;;  %v638_v38 = vld [vmem:[#allocation3 + $0x14] sm:$0xf]  ;;  %v519_v39 = vld [vmem:[#allocation3 + $0x18] sm:$0xf0]  ;;  %v518_v40 = vor.u32 %v639_v37, %v517_v36  ;;  %v509_v42 = vld [vmem:[#allocation3] sm:$0xf] }
  0x16   :  { %v522_v41 = vor.u32 %v638_v38, %v519_v39  ;;  %v637_v43 = vld [vmem:[#allocation3 + $0x4] sm:$0xf0]  ;;  %v636_v44 = vld [vmem:[#allocation3 + $0x4] sm:$0xf]  ;;  %v511_v45 = vld [vmem:[#allocation3 + $0x8] sm:$0xf0] }
  0x17   :  { %180 = vmatpush.bf16.msra.mxu0 %v550_v16  ;;  %v510_v46 = vor.u32 %v637_v43, %v509_v42  ;;  %v514_v47 = vor.u32 %v636_v44, %v511_v45  ;;  %v635_v48 = vld [vmem:[%s858_s0] sm:$0xff]  ;;  %v659_v49 = vld [vmem:[#allocation6 + $0x38] sm:$0xff]  ;;  %v658_v51 = vld [vmem:[#allocation6 + $0x30] sm:$0xff]  ;;  %s489_s25 = sshll.u32 %s865_s7, 4  ;;  %s490_s25 = int_to_ptr.hbm [resolvable:$true] %s489_s25 }
  0x18   :  { %194 = vmatpush.bf16.msra.mxu1 %v554_v17  ;;  %v667_v50 = vld [vmem:[#allocation6 + $0x78] sm:$0xff]  ;;  %374 = vmatpush.bf16.msra.mxu2 %v659_v49  ;;  %v666_v52 = vld [vmem:[#allocation6 + $0x70] sm:$0xff]  ;;  %v657_v53 = vld [vmem:[#allocation6 + $0x28] sm:$0xff] }
  0x19   :  { %388 = vmatpush.bf16.msra.mxu3 %v667_v50  ;;  %v665_v54 = vld [vmem:[#allocation6 + $0x68] sm:$0xff]  ;;  %v656_v55 = vld [vmem:[#allocation6 + $0x20] sm:$0xff]  ;;  %v655_v58 = vld [vmem:[#allocation6 + $0x18] sm:$0xff] }
  0x1a   :  { %v664_v56 = vld [vmem:[#allocation6 + $0x60] sm:$0xff]  ;;  %v663_v59 = vld [vmem:[#allocation6 + $0x58] sm:$0xff]  ;;  %v654_v61 = vld [vmem:[#allocation6 + $0x10] sm:$0xff] }
  0x1b   :  { %181 = vmatpush.bf16.msra.mxu0 %v542_v22  ;;  %v83_v57 = vld [vmem:[%s860_s2] sm:$0x3]  ;;  %v662_v62 = vld [vmem:[#allocation6 + $0x50] sm:$0xff]  ;;  %v653_v1 = vld [vmem:[#allocation6 + $0x8] sm:$0xff] }
  0x1c   :  { %195 = vmatpush.bf16.msra.mxu1 %v546_v23  ;;  %375 = vmatpush.bf16.msra.mxu2 %v658_v51  ;;  %v84_v60 = vunpack.c.l.bf16 %v83_v57  ;;  %v661_v2 = vld [vmem:[#allocation6 + $0x48] sm:$0xff]  ;;  %v652_v5 = vld [vmem:[#allocation6] sm:$0xff] }
  0x1d   :  { %389 = vmatpush.bf16.msra.mxu3 %v666_v52  ;;  %v660_v6 = vld [vmem:[#allocation6 + $0x40] sm:$0xff] }
  0x1e   :  { %v86_v63 = vperm.slane %v84_v60, 0  ;;  %v87_v0 = vperm.slane %v84_v60, 2 }
  0x1f   :  { %182 = vmatpush.bf16.msra.mxu0 %v534_v28 }
  0x20   :  { %196 = vmatpush.bf16.msra.mxu1 %v538_v29  ;;  %376 = vmatpush.bf16.msra.mxu2 %v657_v53  ;;  %v90_v3 = vperm.slane %v86_v63, 0  ;;  %v91_v4 = vperm.slane %v87_v0, 0  ;;  %v411_v53 = vld [vmem:[%s862_s4] sm:$0x1] }
  0x21   :  { %390 = vmatpush.bf16.msra.mxu3 %v665_v54  ;;  %v412_v54 = vunpack.c.l.bf16 %v411_v53 }
  0x23   :  { %183 = vmatpush.bf16.msra.mxu0 %v526_v34  ;;  %v413_v57 = vperm.slane %v412_v54, 0 }
  0x24   :  { %197 = vmatpush.bf16.msra.mxu1 %v530_v35  ;;  %377 = vmatpush.bf16.msra.mxu2 %v656_v55  ;;  %v669_v55 = vld [vmem:[%s858_s0] sm:$0xff]  }
  0x25   :  { %391 = vmatpush.bf16.msra.mxu3 %v664_v56  ;;  %v670_v60 = vunpack.c.l.bf16 %v669_v55 }
  0x27   :  { %184 = vmatpush.bf16.msra.mxu0 %v518_v40 }
  0x28   :  { %198 = vmatpush.bf16.msra.mxu1 %v522_v41  ;;  %378 = vmatpush.bf16.msra.mxu2 %v655_v58 }
  0x29   :  { %392 = vmatpush.bf16.msra.mxu3 %v663_v59 }
  0x2b   :  { %185 = vmatpush.bf16.msra.mxu0 %v510_v46 }
  0x2c   :  { %199 = vmatpush.bf16.msra.mxu1 %v514_v47  ;;  %379 = vmatpush.bf16.msra.mxu2 %v654_v61 }
  0x2d   :  { %393 = vmatpush.bf16.msra.mxu3 %v662_v62 }
  0x2e   :  { %186 = vmatmul.bf16.vlgmr.msra.gmra.mxu0 %v635_v48 }
  0x2f   :  { %200 = vmatmul.bf16.vlgmr.msra.gmra.mxu1 %v635_v48 }
  0x30   :  { %380 = vmatpush.bf16.msra.mxu2 %v653_v1 }
  0x31   :  { %394 = vmatpush.bf16.msra.mxu3 %v661_v2  ;;  %v671_v2 = vunpack.c.h.bf16 %v669_v55 }
  0x34   :  { %381 = vmatpush.bf16.msra.mxu2 %v652_v5  ;;  %v783_v5 = vmov 128.0  }
  0x35   :  { %395 = vmatpush.bf16.msra.mxu3 %v660_v6 }
  0xab   :  { %v187_v7 = vpop.f32.mrf.mxu0 }
  0xac   :  { %v188_v8 = vadd.f32 %v187_v7, %v90_v3  ;;  %v201_v9 = vpop.f32.mrf.mxu1 }
  0xad   :  { %v202_v10 = vadd.f32 %v201_v9, %v91_v4 }
  0xae   :  { %v206_v11 = vmul.f32 %v188_v8, %v188_v8 }
  0xaf   :  { %v207_v12 = vmul.f32 %v202_v10, %v202_v10 }
  0xb0   :  { %v210_v13 = vmul.f32 %v206_v11, %v188_v8 }
  0xb1   :  { %v211_v14 = vmul.f32 %v207_v12, %v202_v10 }
  0xb2   :  { %v214_v15 = vmul.f32 0.044715, %v210_v13 }
  0xb3   :  { %v215_v16 = vmul.f32 0.044715, %v211_v14  ;;  %v189_v17 = vpop.f32.mrf.mxu0 }
  0xb4   :  { %v218_v18 = vadd.f32 %v214_v15, %v188_v8  ;;  %v190_v19 = vadd.f32 %v189_v17, %v90_v3  ;;  %v203_v20 = vpop.f32.mrf.mxu1 }
  0xb5   :  { %v219_v21 = vadd.f32 %v215_v16, %v202_v10  ;;  %v204_v22 = vadd.f32 %v203_v20, %v91_v4 }
  0xb6   :  { %v208_v23 = vmul.f32 %v190_v19, %v190_v19  ;;  %v222_v24 = vmul.f32 0.7978846, %v218_v18 }
  0xb7   :  { %v209_v25 = vmul.f32 %v204_v22, %v204_v22  ;;  %v223_v26 = vmul.f32 0.7978846, %v219_v21 }
  0xb8   :  { %v212_v27 = vmul.f32 %v208_v23, %v190_v19  ;;  %685 = vtanh.f32 %v222_v24 }
  0xb9   :  { %v213_v28 = vmul.f32 %v209_v25, %v204_v22  ;;  %687 = vtanh.f32 %v223_v26 }
  0xba   :  { %v216_v29 = vmul.f32 0.044715, %v212_v27 }
  0xbb   :  { %v217_v30 = vmul.f32 0.044715, %v213_v28 }
  0xbc   :  { %v220_v31 = vadd.f32 %v216_v29, %v190_v19 }
  0xbd   :  { %v221_v32 = vadd.f32 %v217_v30, %v204_v22 }
  0xbe   :  { %v224_v33 = vmul.f32 0.7978846, %v220_v31  ;;  %v686_v35 = vpop.eup %685 }
  0xbf   :  { %v225_v34 = vmul.f32 0.7978846, %v221_v32  ;;  %v688_v36 = vpop.eup %687  ;;  %v230_v37 = vadd.f32 1.0, %v686_v35 }
  0xc0   :  { %689 = vtanh.f32 %v224_v33  ;;  %v231_v38 = vadd.f32 1.0, %v688_v36 }
  0xc1   :  { %691 = vtanh.f32 %v225_v34  ;;  %v234_v42 = vmul.f32 0.5, %v230_v37  ;;  %v469_v34 = vld [vmem:[%s863_s5] sm:$0x1]  ;;  %s784_s5 = smov [#allocation8]  }
  0xc2   :  { %v235_v44 = vmul.f32 0.5, %v231_v38  ;;  %693 = vrcp.f32 %v783_v5  ;;  %v470_v36 = vunpack.c.l.bf16 %v469_v34  ;;  %s487_s22 = sshll.u32 %s784_s5, 4  ;;  %s488_s22 = int_to_ptr.vmem [resolvable:$true] %s487_s22 }
  0xc3   :  { %v238_v47 = vmul.f32 %v234_v42, %v188_v8 }
  0xc4   :  { %v239_v49 = vmul.f32 %v235_v44, %v202_v10  ;;  %v471_v42 = vperm.slane %v470_v36, 0 }
  0xc6   :  { %v690_v39 = vpop.eup %689 }
  0xc7   :  { %v692_v40 = vpop.eup %691  ;;  %v232_v41 = vadd.f32 1.0, %v690_v39  ;;  %v474_v39 = vld [vmem:[%s864_s6] sm:$0x1] }
  0xc8   :  { %v233_v43 = vadd.f32 1.0, %v692_v40  ;;  %v694_v6 = vpop.eup %693 }
  0xc9   :  { %v236_v45 = vmul.f32 0.5, %v232_v41  ;;  %v427_v7 = vmul.f32 128.0, %v694_v6  ;;  %vm431_vm0 = vweird.f32 %v694_v6 }
  0xca   :  { %v237_v46 = vmul.f32 0.5, %v233_v43  ;;  %v475_v43 = vunpack.c.l.bf16 %v474_v39 }
  0xcb   :  { %v240_v48 = vmul.f32 %v236_v45, %v190_v19  ;;  %v428_v8 = vsub.f32 1.0, %v427_v7 }
  0xcc   :  { %v241_v50 = vmul.f32 %v237_v46, %v204_v22 }
  0xcd   :  { %v244_v51 = vpack.c.bf16 %v240_v48, %v238_v47  ;;  %v429_v9 = vmul.f32 %v694_v6, %v428_v8  ;;  %v476_v48 = vperm.slane %v475_v43, 0 }
  0xce   :  { %v245_v52 = vpack.c.bf16 %v241_v50, %v239_v49 }
  0xcf   :  { %382 = vmatmul.bf16.vlgmr.msra.gmra.mxu2 %v244_v51  ;;  %v430_v10 = vadd.f32 %v694_v6, %v429_v9 }
  0xd0   :  { %396 = vmatmul.bf16.vlgmr.msra.gmra.mxu3 %v245_v52 }
  0xd1   :  { %v432_v11 = vsel %vm431_vm0, %v694_v6, %v430_v10 }
 0x152   :  { %v383_v56 = vpop.f32.mrf.mxu2 }
 0x153   :  { %v397_v58 = vpop.f32.mrf.mxu3 }
 0x154   :  { %v398_v59 = vadd.f32 %v397_v58, %v383_v56 }
 0x156   :  { %v414_v61 = vadd.f32 %v413_v57, %v398_v59 }
 0x158   :  { %v420_v62 = vadd.f32 %v670_v60, %v414_v61 }
 0x15a   :  { %422 = vadd.xlane.f32.xlu0 %v420_v62  ;;  %v385_v63 = vpop.f32.mrf.mxu2 }
 0x15b   :  { %v399_v0 = vpop.f32.mrf.mxu3 }
 0x15c   :  { %v400_v1 = vadd.f32 %v399_v0, %v385_v63 }
 0x15e   :  { %v415_v3 = vadd.f32 %v413_v57, %v400_v1 }
 0x160   :  { %v421_v4 = vadd.f32 %v671_v2, %v415_v3 }
 0x162   :  { %424 = vadd.xlane.f32.xlu0 %v421_v4 }
 0x1cd   :  { %v423_v12 = vpop.xlane.xlu0 %422 }
 0x1ce   :  { %v433_v13 = vmul.f32 %v432_v11, %v423_v12 }
 0x1d0   :  { %v435_v14 = vsub.f32 %v420_v62, %v433_v13 }
 0x1d2   :  { %v437_v15 = vmul.f32 %v435_v14, %v435_v14 }
 0x1d4   :  { %439 = vadd.xlane.f32.xlu1 %v437_v15 }
 0x1d5   :  { %v425_v16 = vpop.xlane.xlu0 %424 }
 0x1d6   :  { %v434_v17 = vmul.f32 %v432_v11, %v425_v16 }
 0x1d8   :  { %v436_v18 = vsub.f32 %v421_v4, %v434_v17 }
 0x1da   :  { %v438_v19 = vmul.f32 %v436_v18, %v436_v18 }
 0x1dc   :  { %441 = vadd.xlane.f32.xlu1 %v438_v19 }
 0x247   :  { %v440_v20 = vpop.xlane.xlu1 %439 }
 0x248   :  { %v443_v21 = vmul.f32 %v440_v20, %v432_v11 }
 0x24a   :  { %v445_v22 = vadd.f32 1e-12, %v443_v21 }
 0x24c   :  { %695 = vrsqrt.f32 %v445_v22  ;;  %vm453_vm2 = vweird.f32 %v445_v22 }
 0x24f   :  { %v442_v23 = vpop.xlane.xlu1 %441 }
 0x250   :  { %v444_v24 = vmul.f32 %v442_v23, %v432_v11 }
 0x252   :  { %v696_v25 = vpop.eup %695  ;;  %v446_v26 = vadd.f32 1e-12, %v444_v24 }
 0x253   :  { %v448_v27 = vmul.f32 %v696_v25, %v445_v22  ;;  %vm454_vm1 = vweird.f32 %v696_v25 }
 0x254   :  { %697 = vrsqrt.f32 %v446_v26  ;;  %vm455_vm3 = vmor %vm453_vm2, %vm454_vm1  ;;  %vm463_vm5 = vweird.f32 %v446_v26 }
 0x255   :  { %v449_v28 = vmul.f32 %v696_v25, %v448_v27 }
 0x257   :  { %v450_v29 = vmul.f32 0.5, %v449_v28 }
 0x259   :  { %v451_v30 = vsub.f32 1.5, %v450_v29 }
 0x25a   :  { %v698_v31 = vpop.eup %697 }
 0x25b   :  { %v452_v32 = vmul.f32 %v696_v25, %v451_v30  ;;  %v458_v33 = vmul.f32 %v698_v31, %v446_v26  ;;  %vm464_vm4 = vweird.f32 %v698_v31 }
 0x25c   :  { %vm465_vm6 = vmor %vm463_vm5, %vm464_vm4 }
 0x25d   :  { %v459_v35 = vmul.f32 %v698_v31, %v458_v33  ;;  %v456_v37 = vsel %vm455_vm3, %v696_v25, %v452_v32 }
 0x25e   :  { %v467_v41 = vmul.f32 %v456_v37, %v435_v14 }
 0x25f   :  { %v460_v38 = vmul.f32 0.5, %v459_v35 }
 0x260   :  { %v472_v47 = vmul.f32 %v471_v42, %v467_v41 }
 0x261   :  { %v461_v40 = vsub.f32 1.5, %v460_v38 }
 0x262   :  { %v477_v50 = vadd.f32 %v476_v48, %v472_v47 }
 0x263   :  { %v462_v44 = vmul.f32 %v698_v31, %v461_v40 }
 0x265   :  { %v466_v45 = vsel %vm465_vm6, %v698_v31, %v462_v44 }
 0x266   :  { %v468_v46 = vmul.f32 %v466_v45, %v436_v18 }
 0x268   :  { %v473_v49 = vmul.f32 %v471_v42, %v468_v46 }
 0x26a   :  { %v478_v51 = vadd.f32 %v476_v48, %v473_v49 }
 0x26c   :  { %v675_v52 = vpack.c.bf16 %v478_v51, %v477_v50 }
 0x26e   :  { %676 = vst [vmem:[#allocation8] sm:$0xff] %v675_v52  }
 0x26f   :  { %495 = dma.vmem_to_hbm [thread:$0]  %s488_s22, 128, %s490_s25, [#allocation5], %s781_s13, %s781_s13, %s782_s14  }
 0x270   :  { %775 = dma.done.wait [#allocation5], 128  }
 0x271   :  { %776 = vsyncadd [#allocation5], 4294967168 }
 0x272   :  { %500 = vsyncpa [#allocation4], 1 }
 0x273   :  { %501 = vsyncpa [#allocation7], 1 }
 0x274   :  { %502 = vsyncpa [#allocation5], 1 }

</bundles_post_ra>
